<compile_context>
chip_gen: v6e
topology: v6e:2x2x1
jax: 0.10.0
libtpu: 0.0.40
codegen_flags: <defaults>
</compile_context>

<pallas_src>
import functools

import jax
import jax.numpy as jnp
from jax.experimental import pallas as pl
from jax.experimental.pallas import tpu as pltpu

TQ = 128  # VQ row tile


def _round_up(x, m):
    return ((x + m - 1) // m) * m


# ----------------------------------------------------------------------------
# Pallas kernels
# ----------------------------------------------------------------------------
def gemm_bias_act_kernel(a_ref, w_ref, bias_ref, o_ref, *, act):
    """One (bm, K) x (K, Np) tile: bf16 MXU matmul + f32 bias + activation."""
    acc = jnp.dot(a_ref[0], w_ref[0], preferred_element_type=jnp.float32)
    acc = acc + bias_ref[...]               # (1, Np) broadcast over rows, f32
    if act == "relu":
        acc = jnp.maximum(acc, 0.0)
    elif act == "tanh":
        acc = jnp.tanh(acc)
    o_ref[0] = acc


def grouped_gemm_bias_act(a, w, bias, act):
    """a: (G, M, K) f32, w: (G, K, N) f32, bias: (N,) f32 -> (G, M, N) f32.

    Operands are cast to bf16 for the MXU (accumulation stays f32). N is
    zero-padded to a multiple of 128 so the output store is lane-dense; M is
    padded to the tile size (up to 512 rows per grid step).
    """
    g, m, k = a.shape
    n = w.shape[2]
    npad = _round_up(n, 128)
    bm = min(512, _round_up(m, 128))
    mp = _round_up(m, bm)

    a_p = jnp.pad(a, ((0, 0), (0, mp - m), (0, 0))).astype(jnp.bfloat16)
    w_p = jnp.pad(w, ((0, 0), (0, 0), (0, npad - n))).astype(jnp.bfloat16)
    bias_p = jnp.pad(bias.astype(jnp.float32), (0, npad - n)).reshape(1, npad)

    out = pl.pallas_call(
        functools.partial(gemm_bias_act_kernel, act=act),
        out_shape=jax.ShapeDtypeStruct((g, mp, npad), jnp.float32),
        grid=(g, mp // bm),
        in_specs=[
            pl.BlockSpec((1, bm, k), lambda gi, mi: (gi, mi, 0)),
            pl.BlockSpec((1, k, npad), lambda gi, mi: (gi, 0, 0)),
            pl.BlockSpec((1, npad), lambda gi, mi: (0, 0)),
        ],
        out_specs=pl.BlockSpec((1, bm, npad), lambda gi, mi: (gi, mi, 0)),
        compiler_params=pltpu.CompilerParams(
            dimension_semantics=("parallel", "parallel")),
    )(a_p, w_p, bias_p)
    return out[:, :m, :n]


def vq_kernel(z_ref, e_ref, esq_ref, q_ref, idx_ref, lsum_ref, *, n_valid, tq):
    """Vector quantization on a (TQ, D) row tile with the codebook resident."""
    i = pl.program_id(0)

    @pl.when(i == 0)
    def _():
        lsum_ref[...] = jnp.zeros_like(lsum_ref)

    z = z_ref[...]                 # (TQ, D)   f32
    e = e_ref[...]                 # (Kc, D)   f32 (resident)
    kc = e.shape[0]

    z_sq = jnp.sum(z * z, axis=-1, keepdims=True)                  # (TQ, 1)
    cross = jax.lax.dot_general(z, e, (((1,), (1,)), ((), ())),
                                preferred_element_type=jnp.float32)  # (TQ, Kc)
    d2 = z_sq + esq_ref[...] - 2.0 * cross                          # (TQ, Kc)

    min_d = jnp.min(d2, axis=-1, keepdims=True)
    lane = jax.lax.broadcasted_iota(jnp.int32, d2.shape, 1)
    # first index attaining the minimum (matches torch.argmin tie-breaking)
    idx = jnp.min(jnp.where(d2 <= min_d, lane, kc), axis=-1, keepdims=True)

    onehot = (lane == idx).astype(jnp.float32)                      # (TQ, Kc)
    q = jnp.dot(onehot, e, preferred_element_type=jnp.float32)      # (TQ, D)

    q_ref[...] = q
    idx_ref[...] = idx.astype(jnp.int32)

    # masked commitment-loss accumulation (padded rows excluded)
    row = i * tq + jax.lax.broadcasted_iota(jnp.int32, (tq, 1), 0)
    mask = (row < n_valid).astype(jnp.float32)
    diff = (q - z) * mask
    lsum_ref[...] += jnp.sum(diff * diff)


# ----------------------------------------------------------------------------
# Conv / conv-transpose wrappers (NHWC; patch extraction stays a view-friendly
# channel-concat, GEMM + bias + activation run in the Pallas kernel)
# ----------------------------------------------------------------------------
def conv2d(x, w, bias, stride, pad, act):
    """x: (B, H, W, Cin) NHWC; w: (Cout, Cin, k, k) (PyTorch Conv2d layout)."""
    b, h, wd, cin = x.shape
    cout, k = w.shape[0], w.shape[2]
    xp = jnp.pad(x, ((0, 0), (pad, pad), (pad, pad), (0, 0)))
    ho = (h + 2 * pad - k) // stride + 1
    wo = (wd + 2 * pad - k) // stride + 1
    # im2col in NHWC: patch channel layout is (ky, kx, cin); the final reshape
    # to (M, K) is a view (no transpose).
    cols = [xp[:, ky:ky + stride * ho:stride, kx:kx + stride * wo:stride, :]
            for ky in range(k) for kx in range(k)]
    patches = jnp.concatenate(cols, axis=-1).reshape(b * ho * wo, k * k * cin)
    wmat = jnp.transpose(w, (2, 3, 1, 0)).reshape(k * k * cin, cout)
    y = grouped_gemm_bias_act(patches[None], wmat[None], bias, act)[0]
    return y.reshape(b, ho, wo, cout)


def conv_transpose2d(x, w, bias, act):
    """x: (B, H, W, Cin) NHWC; w: (Cin, Cout, 4, 4) (PyTorch ConvTranspose2d).

    Polyphase decomposition of the 4x4 / stride-2 / pad-1 transposed conv into
    4 stride-1 2x2 GEMMs on the un-dilated input, run as one grouped GEMM.
      even output coord:  y[2t]   = x[t]*w[.,.,1] + x[t-1]*w[.,.,3]
      odd  output coord:  y[2t+1] = x[t]*w[.,.,2] + x[t+1]*w[.,.,0]
    """
    b, h, wd, cin = x.shape
    cout = w.shape[1]
    xp = jnp.pad(x, ((0, 0), (1, 1), (1, 1), (0, 0)))

    sel = {0: (3, 1), 1: (2, 0)}   # output parity -> kernel taps for offsets (0, 1)
    a_list, w_list = [], []
    for py in range(2):
        for px in range(2):
            cols = [xp[:, py + ry:py + ry + h, px + rx:px + rx + wd, :]
                    for ry in range(2) for rx in range(2)]
            a_list.append(
                jnp.concatenate(cols, axis=-1).reshape(b * h * wd, 4 * cin))
            sub = w[:, :, list(sel[py]), :][:, :, :, list(sel[px])]  # (Cin,Cout,2,2)
            w_list.append(
                jnp.transpose(sub, (2, 3, 0, 1)).reshape(4 * cin, cout))
    a_all = jnp.stack(a_list, axis=0)          # (4, B*H*W, 4*Cin)
    w_all = jnp.stack(w_list, axis=0)          # (4, 4*Cin, Cout)

    y = grouped_gemm_bias_act(a_all, w_all, bias, act)   # (4, B*H*W, Cout)
    y = y.reshape(2, 2, b, h, wd, cout)                   # (py, px, B, H, W, C)
    y = jnp.transpose(y, (2, 3, 0, 4, 1, 5))              # (B, H, py, W, px, C)
    return y.reshape(b, 2 * h, 2 * wd, cout)


def vector_quantize(z, emb):
    """z: (B, h, w, D) NHWC; emb: (Kc, D)."""
    b, h, w, d = z.shape
    z_flat = z.reshape(-1, d)          # view; same row order as torch permute(0,2,3,1)
    n = z_flat.shape[0]
    kc = emb.shape[0]
    nq = _round_up(n, TQ)
    z_pad = jnp.pad(z_flat, ((0, nq - n), (0, 0)))
    e_sq = jnp.sum(emb * emb, axis=1).reshape(1, kc)

    q, idx, lsum = pl.pallas_call(
        functools.partial(vq_kernel, n_valid=n, tq=TQ),
        out_shape=(
            jax.ShapeDtypeStruct((nq, d), jnp.float32),
            jax.ShapeDtypeStruct((nq, 1), jnp.int32),
            jax.ShapeDtypeStruct((1, 1), jnp.float32),
        ),
        grid=(nq // TQ,),
        in_specs=[
            pl.BlockSpec((TQ, d), lambda i: (i, 0)),
            pl.BlockSpec((kc, d), lambda i: (0, 0)),
            pl.BlockSpec((1, kc), lambda i: (0, 0)),
        ],
        out_specs=(
            pl.BlockSpec((TQ, d), lambda i: (i, 0)),
            pl.BlockSpec((TQ, 1), lambda i: (i, 0)),
            pl.BlockSpec((1, 1), lambda i: (0, 0)),
        ),
        compiler_params=pltpu.CompilerParams(
            dimension_semantics=("arbitrary",)),  # loss reduction across tiles
    )(z_pad, emb, e_sq)

    quant = q[:n].reshape(b, h, w, d)     # straight-through forward value == q
    # q_latent_loss + 0.25 * e_latent_loss == 1.25 * mse(q, z) in the forward pass
    loss = 1.25 * lsum[0, 0] / (n * d)
    indices = idx[:n, 0].reshape(b, h, w)
    return quant, loss, indices


# ----------------------------------------------------------------------------
# Model
# ----------------------------------------------------------------------------
def init_params(key, codebook_num=512, codebook_dim=32):
    ks = jax.random.split(key, 16)
    s = 0.05

    def nrm(k, shape):
        return s * jax.random.normal(k, shape, jnp.float32)

    p = {
        # encoder convs: (Cout, Cin, 4, 4)
        "e1w": nrm(ks[0], (32, 1, 4, 4)),   "e1b": jnp.zeros((32,), jnp.float32),
        "e2w": nrm(ks[1], (64, 32, 4, 4)),  "e2b": jnp.zeros((64,), jnp.float32),
        "e3w": nrm(ks[2], (128, 64, 4, 4)), "e3b": jnp.zeros((128,), jnp.float32),
        "e4w": nrm(ks[3], (codebook_dim, 128, 4, 4)),
        "e4b": jnp.zeros((codebook_dim,), jnp.float32),
        # codebook
        "emb": jax.random.uniform(ks[4], (codebook_num, codebook_dim),
                                  jnp.float32, -1.0 / codebook_num,
                                  1.0 / codebook_num),
        # decoder conv-transposes: (Cin, Cout, 4, 4)
        "d1w": nrm(ks[5], (codebook_dim, 128, 4, 4)),
        "d1b": jnp.zeros((128,), jnp.float32),
        "d2w": nrm(ks[6], (128, 64, 4, 4)), "d2b": jnp.zeros((64,), jnp.float32),
        "d3w": nrm(ks[7], (64, 32, 4, 4)),  "d3b": jnp.zeros((32,), jnp.float32),
        "d4w": nrm(ks[8], (32, 1, 4, 4)),   "d4b": jnp.zeros((1,), jnp.float32),
    }
    return p


def vq_vae_forward(x, p):
    # torch: x.unsqueeze(1) -> NCHW.  Here channels-last (NHWC) end-to-end.
    x = x[..., None].astype(jnp.float32)                    # (B, H, W, 1)

    # encoder
    h = conv2d(x, p["e1w"], p["e1b"], 2, 1, "relu")
    h = conv2d(h, p["e2w"], p["e2b"], 2, 1, "relu")
    h = conv2d(h, p["e3w"], p["e3b"], 2, 1, "relu")
    z = conv2d(h, p["e4w"], p["e4b"], 2, 1, "none")          # (B, h, w, D)

    # vector quantization
    # TODO(synk): could be fused into the e4 GEMM epilogue to skip one z round-trip.
    q, qloss, indices = vector_quantize(z, p["emb"])

    # decoder (polyphase transposed convs)
    y = conv_transpose2d(q, p["d1w"], p["d1b"], "relu")
    y = conv_transpose2d(y, p["d2w"], p["d2b"], "relu")
    y = conv_transpose2d(y, p["d3w"], p["d3b"], "relu")
    y = conv_transpose2d(y, p["d4w"], p["d4b"], "tanh")      # (B, H, W, 1)

    # back to torch layout: decoder out (B,1,H,W); out.unsqueeze(1) -> (B,1,1,H,W)
    out = jnp.transpose(y, (0, 3, 1, 2))[:, None]
    return out, qloss, indices


if __name__ == "__main__":
    key = jax.random.PRNGKey(0)
    kx, kp = jax.random.split(key)

    # input consistent with 4 stride-2 downsamples: 32 -> 2x2 latent grid
    x = jax.random.normal(kx, (2, 32, 32), jnp.float32)
    params = init_params(kp)

    fwd = jax.jit(lambda inp: vq_vae_forward(inp, params))
    out, qloss, indices = fwd(x)
    jax.block_until_ready((out, qloss, indices))

    assert out.shape == (2, 1, 1, 32, 32)
    assert indices.shape == (2, 2, 2)
    assert qloss.shape == ()
    assert bool(jnp.all(jnp.isfinite(out)))
    print("KERNEL_OK")
</pallas_src>

<mosaic_0001>
module attributes {stable_mosaic.version = 11 : i64} {
  func.func @gemm_bias_act_kernel(%arg0: i32, %arg1: i32, %arg2: memref<1x512x16xbf16, #tpu.memory_space<vmem>>, %arg3: memref<1x16x128xbf16, #tpu.memory_space<vmem>>, %arg4: memref<1x128xf32, #tpu.memory_space<vmem>>, %arg5: memref<1x512x128xf32, #tpu.memory_space<vmem>>) attributes {dimension_semantics = [#tpu.dimension_semantics<parallel>, #tpu.dimension_semantics<parallel>], iteration_bounds = array<i64: 1, 1>, scalar_prefetch = 0 : i64, scratch_operands = 0 : i64, tpu.core_type = #tpu.core_type<tc>, window_params = [{transform_indices = @transform_0, window_bounds = array<i64: 1, 512, 16>}, {transform_indices = @transform_1, window_bounds = array<i64: 1, 16, 128>}, {pipeline_mode = #tpu.pipeline_mode<synchronous>, transform_indices = @transform_2, window_bounds = array<i64: 1, 128>}, {transform_indices = @transform_3, window_bounds = array<i64: 1, 512, 128>}]} {
    %c0 = arith.constant 0 : index
    %c0_0 = arith.constant 0 : index
    %c0_1 = arith.constant 0 : index
    %0 = vector.load %arg2[%c0, %c0_0, %c0_1] : memref<1x512x16xbf16, #tpu.memory_space<vmem>>, vector<1x512x16xbf16>
    %1 = vector.shape_cast %0 : vector<1x512x16xbf16> to vector<512x16xbf16>
    %c0_2 = arith.constant 0 : index
    %c0_3 = arith.constant 0 : index
    %c0_4 = arith.constant 0 : index
    %2 = vector.load %arg3[%c0_2, %c0_3, %c0_4] : memref<1x16x128xbf16, #tpu.memory_space<vmem>>, vector<1x16x128xbf16>
    %3 = vector.shape_cast %2 : vector<1x16x128xbf16> to vector<16x128xbf16>
    %cst = arith.constant dense<0.000000e+00> : vector<512x128xf32>
    %4 = tpu.matmul %1, %3, %cst {dimension_numbers = #tpu.dot_dimension_numbers<[1], [0], [0], [1], [0, 0, 1, 1], [], []>} : vector<512x16xbf16>, vector<16x128xbf16>, vector<512x128xf32> -> vector<512x128xf32>
    %c0_5 = arith.constant 0 : index
    %c0_6 = arith.constant 0 : index
    %5 = vector.load %arg4[%c0_5, %c0_6] : memref<1x128xf32, #tpu.memory_space<vmem>>, vector<1x128xf32>
    %6 = vector.broadcast %5 : vector<1x128xf32> to vector<512x128xf32>
    %7 = arith.addf %4, %6 : vector<512x128xf32>
    %cst_7 = arith.constant 0.000000e+00 : f32
    %8 = vector.broadcast %cst_7 : f32 to vector<512x128xf32>
    %9 = arith.maximumf %7, %8 : vector<512x128xf32>
    %c0_8 = arith.constant 0 : index
    %c0_9 = arith.constant 0 : index
    %c0_10 = arith.constant 0 : index
    %10 = vector.load %arg5[%c0_8, %c0_9, %c0_10] : memref<1x512x128xf32, #tpu.memory_space<vmem>>, vector<1x512x128xf32>
    %11 = vector.shape_cast %10 : vector<1x512x128xf32> to vector<512x128xf32>
    %12 = vector.shape_cast %9 : vector<512x128xf32> to vector<1x512x128xf32>
    tpu.vector_store %arg5[%c0_8, %c0_9, %c0_10], %12 {strides = array<i32>} : memref<1x512x128xf32, #tpu.memory_space<vmem>>, vector<1x512x128xf32>,
    return
  }
  func.func @transform_0(%arg0: i32, %arg1: i32) -> (i32, i32, i32) {
    %c0_i32 = arith.constant 0 : i32
    %c0_i32_0 = arith.constant 0 : i32
    return %arg0, %arg1, %c0_i32 : i32, i32, i32
  }
  func.func @transform_1(%arg0: i32, %arg1: i32) -> (i32, i32, i32) {
    %c0_i32 = arith.constant 0 : i32
    %c0_i32_0 = arith.constant 0 : i32
    %c0_i32_1 = arith.constant 0 : i32
    return %arg0, %c0_i32, %c0_i32_0 : i32, i32, i32
  }
  func.func @transform_2(%arg0: i32, %arg1: i32) -> (i32, i32) {
    %c0_i32 = arith.constant 0 : i32
    %c0_i32_0 = arith.constant 0 : i32
    %c0_i32_1 = arith.constant 0 : i32
    return %c0_i32, %c0_i32_0 : i32, i32
  }
  func.func @transform_3(%arg0: i32, %arg1: i32) -> (i32, i32, i32) {
    %c0_i32 = arith.constant 0 : i32
    %c0_i32_0 = arith.constant 0 : i32
    return %arg0, %arg1, %c0_i32 : i32, i32, i32
  }
}

module attributes {stable_mosaic.version = 11 : i64} {
  func.func @gemm_bias_act_kernel(%arg0: i32, %arg1: i32, %arg2: memref<1x128x512xbf16, #tpu.memory_space<vmem>>, %arg3: memref<1x512x128xbf16, #tpu.memory_space<vmem>>, %arg4: memref<1x128xf32, #tpu.memory_space<vmem>>, %arg5: memref<1x128x128xf32, #tpu.memory_space<vmem>>) attributes {dimension_semantics = [#tpu.dimension_semantics<parallel>, #tpu.dimension_semantics<parallel>], iteration_bounds = array<i64: 1, 1>, scalar_prefetch = 0 : i64, scratch_operands = 0 : i64, tpu.core_type = #tpu.core_type<tc>, window_params = [{transform_indices = @transform_0, window_bounds = array<i64: 1, 128, 512>}, {transform_indices = @transform_1, window_bounds = array<i64: 1, 512, 128>}, {pipeline_mode = #tpu.pipeline_mode<synchronous>, transform_indices = @transform_2, window_bounds = array<i64: 1, 128>}, {transform_indices = @transform_3, window_bounds = array<i64: 1, 128, 128>}]} {
    %c0 = arith.constant 0 : index
    %c0_0 = arith.constant 0 : index
    %c0_1 = arith.constant 0 : index
    %0 = vector.load %arg2[%c0, %c0_0, %c0_1] : memref<1x128x512xbf16, #tpu.memory_space<vmem>>, vector<1x128x512xbf16>
    %1 = vector.shape_cast %0 : vector<1x128x512xbf16> to vector<128x512xbf16>
    %c0_2 = arith.constant 0 : index
    %c0_3 = arith.constant 0 : index
    %c0_4 = arith.constant 0 : index
    %2 = vector.load %arg3[%c0_2, %c0_3, %c0_4] : memref<1x512x128xbf16, #tpu.memory_space<vmem>>, vector<1x512x128xbf16>
    %3 = vector.shape_cast %2 : vector<1x512x128xbf16> to vector<512x128xbf16>
    %cst = arith.constant dense<0.000000e+00> : vector<128x128xf32>
    %4 = tpu.matmul %1, %3, %cst {dimension_numbers = #tpu.dot_dimension_numbers<[1], [0], [0], [1], [0, 0, 1, 1], [], []>} : vector<128x512xbf16>, vector<512x128xbf16>, vector<128x128xf32> -> vector<128x128xf32>
    %c0_5 = arith.constant 0 : index
    %c0_6 = arith.constant 0 : index
    %5 = vector.load %arg4[%c0_5, %c0_6] : memref<1x128xf32, #tpu.memory_space<vmem>>, vector<1x128xf32>
    %6 = vector.broadcast %5 : vector<1x128xf32> to vector<128x128xf32>
    %7 = arith.addf %4, %6 : vector<128x128xf32>
    %cst_7 = arith.constant 0.000000e+00 : f32
    %8 = vector.broadcast %cst_7 : f32 to vector<128x128xf32>
    %9 = arith.maximumf %7, %8 : vector<128x128xf32>
    %c0_8 = arith.constant 0 : index
    %c0_9 = arith.constant 0 : index
    %c0_10 = arith.constant 0 : index
    %10 = vector.load %arg5[%c0_8, %c0_9, %c0_10] : memref<1x128x128xf32, #tpu.memory_space<vmem>>, vector<1x128x128xf32>
    %11 = vector.shape_cast %10 : vector<1x128x128xf32> to vector<128x128xf32>
    %12 = vector.shape_cast %9 : vector<128x128xf32> to vector<1x128x128xf32>
    tpu.vector_store %arg5[%c0_8, %c0_9, %c0_10], %12 {strides = array<i32>} : memref<1x128x128xf32, #tpu.memory_space<vmem>>, vector<1x128x128xf32>,
    return
  }
  func.func @transform_0(%arg0: i32, %arg1: i32) -> (i32, i32, i32) {
    %c0_i32 = arith.constant 0 : i32
    %c0_i32_0 = arith.constant 0 : i32
    return %arg0, %arg1, %c0_i32 : i32, i32, i32
  }
  func.func @transform_1(%arg0: i32, %arg1: i32) -> (i32, i32, i32) {
    %c0_i32 = arith.constant 0 : i32
    %c0_i32_0 = arith.constant 0 : i32
    %c0_i32_1 = arith.constant 0 : i32
    return %arg0, %c0_i32, %c0_i32_0 : i32, i32, i32
  }
  func.func @transform_2(%arg0: i32, %arg1: i32) -> (i32, i32) {
    %c0_i32 = arith.constant 0 : i32
    %c0_i32_0 = arith.constant 0 : i32
    %c0_i32_1 = arith.constant 0 : i32
    return %c0_i32, %c0_i32_0 : i32, i32
  }
  func.func @transform_3(%arg0: i32, %arg1: i32) -> (i32, i32, i32) {
    %c0_i32 = arith.constant 0 : i32
    %c0_i32_0 = arith.constant 0 : i32
    return %arg0, %arg1, %c0_i32 : i32, i32, i32
  }
}

module attributes {stable_mosaic.version = 11 : i64} {
  func.func @gemm_bias_act_kernel(%arg0: i32, %arg1: i32, %arg2: memref<1x128x1024xbf16, #tpu.memory_space<vmem>>, %arg3: memref<1x1024x128xbf16, #tpu.memory_space<vmem>>, %arg4: memref<1x128xf32, #tpu.memory_space<vmem>>, %arg5: memref<1x128x128xf32, #tpu.memory_space<vmem>>) attributes {dimension_semantics = [#tpu.dimension_semantics<parallel>, #tpu.dimension_semantics<parallel>], iteration_bounds = array<i64: 1, 1>, scalar_prefetch = 0 : i64, scratch_operands = 0 : i64, tpu.core_type = #tpu.core_type<tc>, window_params = [{transform_indices = @transform_0, window_bounds = array<i64: 1, 128, 1024>}, {transform_indices = @transform_1, window_bounds = array<i64: 1, 1024, 128>}, {pipeline_mode = #tpu.pipeline_mode<synchronous>, transform_indices = @transform_2, window_bounds = array<i64: 1, 128>}, {transform_indices = @transform_3, window_bounds = array<i64: 1, 128, 128>}]} {
    %c0 = arith.constant 0 : index
    %c0_0 = arith.constant 0 : index
    %c0_1 = arith.constant 0 : index
    %0 = vector.load %arg2[%c0, %c0_0, %c0_1] : memref<1x128x1024xbf16, #tpu.memory_space<vmem>>, vector<1x128x1024xbf16>
    %1 = vector.shape_cast %0 : vector<1x128x1024xbf16> to vector<128x1024xbf16>
    %c0_2 = arith.constant 0 : index
    %c0_3 = arith.constant 0 : index
    %c0_4 = arith.constant 0 : index
    %2 = vector.load %arg3[%c0_2, %c0_3, %c0_4] : memref<1x1024x128xbf16, #tpu.memory_space<vmem>>, vector<1x1024x128xbf16>
    %3 = vector.shape_cast %2 : vector<1x1024x128xbf16> to vector<1024x128xbf16>
    %cst = arith.constant dense<0.000000e+00> : vector<128x128xf32>
    %4 = tpu.matmul %1, %3, %cst {dimension_numbers = #tpu.dot_dimension_numbers<[1], [0], [0], [1], [0, 0, 1, 1], [], []>} : vector<128x1024xbf16>, vector<1024x128xbf16>, vector<128x128xf32> -> vector<128x128xf32>
    %c0_5 = arith.constant 0 : index
    %c0_6 = arith.constant 0 : index
    %5 = vector.load %arg4[%c0_5, %c0_6] : memref<1x128xf32, #tpu.memory_space<vmem>>, vector<1x128xf32>
    %6 = vector.broadcast %5 : vector<1x128xf32> to vector<128x128xf32>
    %7 = arith.addf %4, %6 : vector<128x128xf32>
    %cst_7 = arith.constant 0.000000e+00 : f32
    %8 = vector.broadcast %cst_7 : f32 to vector<128x128xf32>
    %9 = arith.maximumf %7, %8 : vector<128x128xf32>
    %c0_8 = arith.constant 0 : index
    %c0_9 = arith.constant 0 : index
    %c0_10 = arith.constant 0 : index
    %10 = vector.load %arg5[%c0_8, %c0_9, %c0_10] : memref<1x128x128xf32, #tpu.memory_space<vmem>>, vector<1x128x128xf32>
    %11 = vector.shape_cast %10 : vector<1x128x128xf32> to vector<128x128xf32>
    %12 = vector.shape_cast %9 : vector<128x128xf32> to vector<1x128x128xf32>
    tpu.vector_store %arg5[%c0_8, %c0_9, %c0_10], %12 {strides = array<i32>} : memref<1x128x128xf32, #tpu.memory_space<vmem>>, vector<1x128x128xf32>,
    return
  }
  func.func @transform_0(%arg0: i32, %arg1: i32) -> (i32, i32, i32) {
    %c0_i32 = arith.constant 0 : i32
    %c0_i32_0 = arith.constant 0 : i32
    return %arg0, %arg1, %c0_i32 : i32, i32, i32
  }
  func.func @transform_1(%arg0: i32, %arg1: i32) -> (i32, i32, i32) {
    %c0_i32 = arith.constant 0 : i32
    %c0_i32_0 = arith.constant 0 : i32
    %c0_i32_1 = arith.constant 0 : i32
    return %arg0, %c0_i32, %c0_i32_0 : i32, i32, i32
  }
  func.func @transform_2(%arg0: i32, %arg1: i32) -> (i32, i32) {
    %c0_i32 = arith.constant 0 : i32
    %c0_i32_0 = arith.constant 0 : i32
    %c0_i32_1 = arith.constant 0 : i32
    return %c0_i32, %c0_i32_0 : i32, i32
  }
  func.func @transform_3(%arg0: i32, %arg1: i32) -> (i32, i32, i32) {
    %c0_i32 = arith.constant 0 : i32
    %c0_i32_0 = arith.constant 0 : i32
    return %arg0, %arg1, %c0_i32 : i32, i32, i32
  }
}

module attributes {stable_mosaic.version = 11 : i64} {
  func.func @gemm_bias_act_kernel(%arg0: i32, %arg1: i32, %arg2: memref<1x128x2048xbf16, #tpu.memory_space<vmem>>, %arg3: memref<1x2048x128xbf16, #tpu.memory_space<vmem>>, %arg4: memref<1x128xf32, #tpu.memory_space<vmem>>, %arg5: memref<1x128x128xf32, #tpu.memory_space<vmem>>) attributes {dimension_semantics = [#tpu.dimension_semantics<parallel>, #tpu.dimension_semantics<parallel>], iteration_bounds = array<i64: 1, 1>, scalar_prefetch = 0 : i64, scratch_operands = 0 : i64, tpu.core_type = #tpu.core_type<tc>, window_params = [{transform_indices = @transform_0, window_bounds = array<i64: 1, 128, 2048>}, {transform_indices = @transform_1, window_bounds = array<i64: 1, 2048, 128>}, {pipeline_mode = #tpu.pipeline_mode<synchronous>, transform_indices = @transform_2, window_bounds = array<i64: 1, 128>}, {transform_indices = @transform_3, window_bounds = array<i64: 1, 128, 128>}]} {
    %c0 = arith.constant 0 : index
    %c0_0 = arith.constant 0 : index
    %c0_1 = arith.constant 0 : index
    %0 = vector.load %arg2[%c0, %c0_0, %c0_1] : memref<1x128x2048xbf16, #tpu.memory_space<vmem>>, vector<1x128x2048xbf16>
    %1 = vector.shape_cast %0 : vector<1x128x2048xbf16> to vector<128x2048xbf16>
    %c0_2 = arith.constant 0 : index
    %c0_3 = arith.constant 0 : index
    %c0_4 = arith.constant 0 : index
    %2 = vector.load %arg3[%c0_2, %c0_3, %c0_4] : memref<1x2048x128xbf16, #tpu.memory_space<vmem>>, vector<1x2048x128xbf16>
    %3 = vector.shape_cast %2 : vector<1x2048x128xbf16> to vector<2048x128xbf16>
    %cst = arith.constant dense<0.000000e+00> : vector<128x128xf32>
    %4 = tpu.matmul %1, %3, %cst {dimension_numbers = #tpu.dot_dimension_numbers<[1], [0], [0], [1], [0, 0, 1, 1], [], []>} : vector<128x2048xbf16>, vector<2048x128xbf16>, vector<128x128xf32> -> vector<128x128xf32>
    %c0_5 = arith.constant 0 : index
    %c0_6 = arith.constant 0 : index
    %5 = vector.load %arg4[%c0_5, %c0_6] : memref<1x128xf32, #tpu.memory_space<vmem>>, vector<1x128xf32>
    %6 = vector.broadcast %5 : vector<1x128xf32> to vector<128x128xf32>
    %7 = arith.addf %4, %6 : vector<128x128xf32>
    %c0_7 = arith.constant 0 : index
    %c0_8 = arith.constant 0 : index
    %c0_9 = arith.constant 0 : index
    %8 = vector.load %arg5[%c0_7, %c0_8, %c0_9] : memref<1x128x128xf32, #tpu.memory_space<vmem>>, vector<1x128x128xf32>
    %9 = vector.shape_cast %8 : vector<1x128x128xf32> to vector<128x128xf32>
    %10 = vector.shape_cast %7 : vector<128x128xf32> to vector<1x128x128xf32>
    tpu.vector_store %arg5[%c0_7, %c0_8, %c0_9], %10 {strides = array<i32>} : memref<1x128x128xf32, #tpu.memory_space<vmem>>, vector<1x128x128xf32>,
    return
  }
  func.func @transform_0(%arg0: i32, %arg1: i32) -> (i32, i32, i32) {
    %c0_i32 = arith.constant 0 : i32
    %c0_i32_0 = arith.constant 0 : i32
    return %arg0, %arg1, %c0_i32 : i32, i32, i32
  }
  func.func @transform_1(%arg0: i32, %arg1: i32) -> (i32, i32, i32) {
    %c0_i32 = arith.constant 0 : i32
    %c0_i32_0 = arith.constant 0 : i32
    %c0_i32_1 = arith.constant 0 : i32
    return %arg0, %c0_i32, %c0_i32_0 : i32, i32, i32
  }
  func.func @transform_2(%arg0: i32, %arg1: i32) -> (i32, i32) {
    %c0_i32 = arith.constant 0 : i32
    %c0_i32_0 = arith.constant 0 : i32
    %c0_i32_1 = arith.constant 0 : i32
    return %c0_i32, %c0_i32_0 : i32, i32
  }
  func.func @transform_3(%arg0: i32, %arg1: i32) -> (i32, i32, i32) {
    %c0_i32 = arith.constant 0 : i32
    %c0_i32_0 = arith.constant 0 : i32
    return %arg0, %arg1, %c0_i32 : i32, i32, i32
  }
}

module attributes {stable_mosaic.version = 11 : i64} {
  func.func @vq_kernel(%arg0: i32, %arg1: memref<128x32xf32, #tpu.memory_space<vmem>>, %arg2: memref<512x32xf32, #tpu.memory_space<vmem>>, %arg3: memref<1x512xf32, #tpu.memory_space<vmem>>, %arg4: memref<128x32xf32, #tpu.memory_space<vmem>>, %arg5: memref<128x1xi32, #tpu.memory_space<vmem>>, %arg6: memref<1x1xf32, #tpu.memory_space<vmem>>) attributes {dimension_semantics = [#tpu.dimension_semantics<arbitrary>], iteration_bounds = array<i64: 1>, scalar_prefetch = 0 : i64, scratch_operands = 0 : i64, tpu.core_type = #tpu.core_type<tc>, window_params = [{transform_indices = @transform_0, window_bounds = array<i64: 128, 32>}, {pipeline_mode = #tpu.pipeline_mode<synchronous>, transform_indices = @transform_1, window_bounds = array<i64: 512, 32>}, {pipeline_mode = #tpu.pipeline_mode<synchronous>, transform_indices = @transform_2, window_bounds = array<i64: 1, 512>}, {transform_indices = @transform_3, window_bounds = array<i64: 128, 32>}, {transform_indices = @transform_4, window_bounds = array<i64: 128, 1>}, {pipeline_mode = #tpu.pipeline_mode<synchronous>, transform_indices = @transform_5, window_bounds = array<i64: 1, 1>}]} {
    %c0_i32 = arith.constant 0 : i32
    %0 = arith.cmpi eq, %arg0, %c0_i32 : i32
    %1 = arith.extui %0 : i1 to i32
    %c0_i32_0 = arith.constant 0 : i32
    %2 = arith.cmpi ne, %1, %c0_i32_0 : i32
    scf.if %2 {
      %cst_20 = arith.constant 0.000000e+00 : f32
      %52 = vector.broadcast %cst_20 : f32 to vector<1x1xf32>
      %c0_21 = arith.constant 0 : index
      %c0_22 = arith.constant 0 : index
      %53 = vector.load %arg6[%c0_21, %c0_22] : memref<1x1xf32, #tpu.memory_space<vmem>>, vector<1x1xf32>
      tpu.vector_store %arg6[%c0_21, %c0_22], %52 {strides = array<i32>} : memref<1x1xf32, #tpu.memory_space<vmem>>, vector<1x1xf32>,
    } else {
    }
    %c0 = arith.constant 0 : index
    %c0_1 = arith.constant 0 : index
    %3 = vector.load %arg1[%c0, %c0_1] : memref<128x32xf32, #tpu.memory_space<vmem>>, vector<128x32xf32>
    %c0_2 = arith.constant 0 : index
    %c0_3 = arith.constant 0 : index
    %4 = vector.load %arg2[%c0_2, %c0_3] : memref<512x32xf32, #tpu.memory_space<vmem>>, vector<512x32xf32>
    %5 = arith.mulf %3, %3 : vector<128x32xf32>
    %cst = arith.constant dense<0.000000e+00> : vector<128xf32>
    %6 = vector.multi_reduction <add>, %5, %cst [1] : vector<128x32xf32> to vector<128xf32>
    %7 = vector.shape_cast %6 : vector<128xf32> to vector<128x1xf32>
    %cst_4 = arith.constant dense<0.000000e+00> : vector<128x512xf32>
    %8 = tpu.matmul %3, %4, %cst_4 {dimension_numbers = #tpu.dot_dimension_numbers<[1], [1], [0], [0], [0, 0, 1, 0], [], []>} : vector<128x32xf32>, vector<512x32xf32>, vector<128x512xf32> -> vector<128x512xf32>
    %c0_5 = arith.constant 0 : index
    %c0_6 = arith.constant 0 : index
    %9 = vector.load %arg3[%c0_5, %c0_6] : memref<1x512xf32, #tpu.memory_space<vmem>>, vector<1x512xf32>
    %10 = vector.broadcast %7 : vector<128x1xf32> to vector<128x512xf32>
    %11 = vector.broadcast %9 : vector<1x512xf32> to vector<128x512xf32>
    %12 = arith.addf %10, %11 : vector<128x512xf32>
    %cst_7 = arith.constant 2.000000e+00 : f32
    %13 = vector.broadcast %cst_7 : f32 to vector<128x512xf32>
    %14 = arith.mulf %13, %8 : vector<128x512xf32>
    %15 = arith.subf %12, %14 : vector<128x512xf32>
    %cst_8 = arith.constant dense<0x7F800000> : vector<128xf32>
    %16 = vector.multi_reduction <minimumf>, %15, %cst_8 [1] : vector<128x512xf32> to vector<128xf32>
    %17 = vector.shape_cast %16 : vector<128xf32> to vector<128x1xf32>
    %18 = tpu.iota {dimensions = array<i32: 1>} : vector<128x512xi32>
    %19 = vector.broadcast %17 : vector<128x1xf32> to vector<128x512xf32>
    %20 = arith.cmpf ole, %15, %19 : vector<128x512xf32>
    %c512_i32 = arith.constant 512 : i32
    %21 = vector.broadcast %c512_i32 : i32 to vector<128x512xi32>
    %22 = arith.select %20, %18, %21 : vector<128x512xi1>, vector<128x512xi32>
    %cst_9 = arith.constant dense<2147483647> : vector<128xi32>
    %23 = vector.multi_reduction <minsi>, %22, %cst_9 [1] : vector<128x512xi32> to vector<128xi32>
    %24 = vector.shape_cast %23 : vector<128xi32> to vector<128x1xi32>
    %25 = vector.broadcast %24 : vector<128x1xi32> to vector<128x512xi32>
    %26 = arith.cmpi eq, %18, %25 : vector<128x512xi32>
    %27 = arith.extui %26 : vector<128x512xi1> to vector<128x512xi32>
    %28 = arith.sitofp %27 : vector<128x512xi32> to vector<128x512xf32>
    %cst_10 = arith.constant dense<0.000000e+00> : vector<128x32xf32>
    %29 = tpu.matmul %28, %4, %cst_10 {dimension_numbers = #tpu.dot_dimension_numbers<[1], [0], [0], [1], [0, 0, 1, 1], [], []>} : vector<128x512xf32>, vector<512x32xf32>, vector<128x32xf32> -> vector<128x32xf32>
    %c0_11 = arith.constant 0 : index
    %c0_12 = arith.constant 0 : index
    %30 = vector.load %arg4[%c0_11, %c0_12] : memref<128x32xf32, #tpu.memory_space<vmem>>, vector<128x32xf32>
    tpu.vector_store %arg4[%c0_11, %c0_12], %29 {strides = array<i32>} : memref<128x32xf32, #tpu.memory_space<vmem>>, vector<128x32xf32>,
    %c0_13 = arith.constant 0 : index
    %c0_14 = arith.constant 0 : index
    %31 = vector.load %arg5[%c0_13, %c0_14] : memref<128x1xi32, #tpu.memory_space<vmem>>, vector<128x1xi32>
    tpu.vector_store %arg5[%c0_13, %c0_14], %24 {strides = array<i32>} : memref<128x1xi32, #tpu.memory_space<vmem>>, vector<128x1xi32>,
    %c128_i32 = arith.constant 128 : i32
    %32 = arith.muli %arg0, %c128_i32 : i32
    %33 = tpu.iota {dimensions = array<i32: 0>} : vector<128x1xi32>
    %34 = vector.broadcast %32 : i32 to vector<128x1xi32>
    %35 = arith.addi %34, %33 : vector<128x1xi32>
    %c8_i32 = arith.constant 8 : i32
    %36 = vector.broadcast %c8_i32 : i32 to vector<128x1xi32>
    %37 = arith.cmpi slt, %35, %36 : vector<128x1xi32>
    %38 = arith.extui %37 : vector<128x1xi1> to vector<128x1xi32>
    %39 = arith.sitofp %38 : vector<128x1xi32> to vector<128x1xf32>
    %40 = arith.subf %29, %3 : vector<128x32xf32>
    %41 = vector.broadcast %39 : vector<128x1xf32> to vector<128x32xf32>
    %42 = arith.mulf %40, %41 : vector<128x32xf32>
    %c0_15 = arith.constant 0 : index
    %c0_16 = arith.constant 0 : index
    %43 = vector.load %arg6[%c0_15, %c0_16] : memref<1x1xf32, #tpu.memory_space<vmem>>, vector<1x1xf32>
    %44 = arith.mulf %42, %42 : vector<128x32xf32>
    %45 = vector.shape_cast %44 : vector<128x32xf32> to vector<1x128x32xf32>
    %cst_17 = arith.constant dense<0.000000e+00> : vector<1xf32>
    %46 = vector.multi_reduction <add>, %45, %cst_17 [1, 2] : vector<1x128x32xf32> to vector<1xf32>
    %47 = vector.shape_cast %46 : vector<1xf32> to vector<1x1x1xf32>
    %48 = vector.extract %47[0, 0, 0] : f32 from vector<1x1x1xf32>
    %49 = vector.broadcast %48 : f32 to vector<1x1xf32>
    %50 = arith.addf %43, %49 : vector<1x1xf32>
    %c0_18 = arith.constant 0 : index
    %c0_19 = arith.constant 0 : index
    %51 = vector.load %arg6[%c0_18, %c0_19] : memref<1x1xf32, #tpu.memory_space<vmem>>, vector<1x1xf32>
    tpu.vector_store %arg6[%c0_18, %c0_19], %50 {strides = array<i32>} : memref<1x1xf32, #tpu.memory_space<vmem>>, vector<1x1xf32>,
    return
  }
  func.func @transform_0(%arg0: i32) -> (i32, i32) {
    %c0_i32 = arith.constant 0 : i32
    %c0_i32_0 = arith.constant 0 : i32
    return %arg0, %c0_i32 : i32, i32
  }
  func.func @transform_1(%arg0: i32) -> (i32, i32) {
    %c0_i32 = arith.constant 0 : i32
    %c0_i32_0 = arith.constant 0 : i32
    %c0_i32_1 = arith.constant 0 : i32
    return %c0_i32, %c0_i32_0 : i32, i32
  }
  func.func @transform_2(%arg0: i32) -> (i32, i32) {
    %c0_i32 = arith.constant 0 : i32
    %c0_i32_0 = arith.constant 0 : i32
    %c0_i32_1 = arith.constant 0 : i32
    return %c0_i32, %c0_i32_0 : i32, i32
  }
  func.func @transform_3(%arg0: i32) -> (i32, i32) {
    %c0_i32 = arith.constant 0 : i32
    %c0_i32_0 = arith.constant 0 : i32
    return %arg0, %c0_i32 : i32, i32
  }
  func.func @transform_4(%arg0: i32) -> (i32, i32) {
    %c0_i32 = arith.constant 0 : i32
    %c0_i32_0 = arith.constant 0 : i32
    return %arg0, %c0_i32 : i32, i32
  }
  func.func @transform_5(%arg0: i32) -> (i32, i32) {
    %c0_i32 = arith.constant 0 : i32
    %c0_i32_0 = arith.constant 0 : i32
    %c0_i32_1 = arith.constant 0 : i32
    return %c0_i32, %c0_i32_0 : i32, i32
  }
}

module attributes {stable_mosaic.version = 11 : i64} {
  func.func @gemm_bias_act_kernel(%arg0: i32, %arg1: i32, %arg2: memref<1x128x128xbf16, #tpu.memory_space<vmem>>, %arg3: memref<1x128x128xbf16, #tpu.memory_space<vmem>>, %arg4: memref<1x128xf32, #tpu.memory_space<vmem>>, %arg5: memref<1x128x128xf32, #tpu.memory_space<vmem>>) attributes {dimension_semantics = [#tpu.dimension_semantics<parallel>, #tpu.dimension_semantics<parallel>], iteration_bounds = array<i64: 4, 1>, scalar_prefetch = 0 : i64, scratch_operands = 0 : i64, tpu.core_type = #tpu.core_type<tc>, window_params = [{transform_indices = @transform_0, window_bounds = array<i64: 1, 128, 128>}, {transform_indices = @transform_1, window_bounds = array<i64: 1, 128, 128>}, {pipeline_mode = #tpu.pipeline_mode<synchronous>, transform_indices = @transform_2, window_bounds = array<i64: 1, 128>}, {transform_indices = @transform_3, window_bounds = array<i64: 1, 128, 128>}]} {
    %c0 = arith.constant 0 : index
    %c0_0 = arith.constant 0 : index
    %c0_1 = arith.constant 0 : index
    %0 = vector.load %arg2[%c0, %c0_0, %c0_1] : memref<1x128x128xbf16, #tpu.memory_space<vmem>>, vector<1x128x128xbf16>
    %1 = vector.shape_cast %0 : vector<1x128x128xbf16> to vector<128x128xbf16>
    %c0_2 = arith.constant 0 : index
    %c0_3 = arith.constant 0 : index
    %c0_4 = arith.constant 0 : index
    %2 = vector.load %arg3[%c0_2, %c0_3, %c0_4] : memref<1x128x128xbf16, #tpu.memory_space<vmem>>, vector<1x128x128xbf16>
    %3 = vector.shape_cast %2 : vector<1x128x128xbf16> to vector<128x128xbf16>
    %cst = arith.constant dense<0.000000e+00> : vector<128x128xf32>
    %4 = tpu.matmul %1, %3, %cst {dimension_numbers = #tpu.dot_dimension_numbers<[1], [0], [0], [1], [0, 0, 1, 1], [], []>} : vector<128x128xbf16>, vector<128x128xbf16>, vector<128x128xf32> -> vector<128x128xf32>
    %c0_5 = arith.constant 0 : index
    %c0_6 = arith.constant 0 : index
    %5 = vector.load %arg4[%c0_5, %c0_6] : memref<1x128xf32, #tpu.memory_space<vmem>>, vector<1x128xf32>
    %6 = vector.broadcast %5 : vector<1x128xf32> to vector<128x128xf32>
    %7 = arith.addf %4, %6 : vector<128x128xf32>
    %cst_7 = arith.constant 0.000000e+00 : f32
    %8 = vector.broadcast %cst_7 : f32 to vector<128x128xf32>
    %9 = arith.maximumf %7, %8 : vector<128x128xf32>
    %c0_8 = arith.constant 0 : index
    %c0_9 = arith.constant 0 : index
    %c0_10 = arith.constant 0 : index
    %10 = vector.load %arg5[%c0_8, %c0_9, %c0_10] : memref<1x128x128xf32, #tpu.memory_space<vmem>>, vector<1x128x128xf32>
    %11 = vector.shape_cast %10 : vector<1x128x128xf32> to vector<128x128xf32>
    %12 = vector.shape_cast %9 : vector<128x128xf32> to vector<1x128x128xf32>
    tpu.vector_store %arg5[%c0_8, %c0_9, %c0_10], %12 {strides = array<i32>} : memref<1x128x128xf32, #tpu.memory_space<vmem>>, vector<1x128x128xf32>,
    return
  }
  func.func @transform_0(%arg0: i32, %arg1: i32) -> (i32, i32, i32) {
    %c0_i32 = arith.constant 0 : i32
    %c0_i32_0 = arith.constant 0 : i32
    return %arg0, %arg1, %c0_i32 : i32, i32, i32
  }
  func.func @transform_1(%arg0: i32, %arg1: i32) -> (i32, i32, i32) {
    %c0_i32 = arith.constant 0 : i32
    %c0_i32_0 = arith.constant 0 : i32
    %c0_i32_1 = arith.constant 0 : i32
    return %arg0, %c0_i32, %c0_i32_0 : i32, i32, i32
  }
  func.func @transform_2(%arg0: i32, %arg1: i32) -> (i32, i32) {
    %c0_i32 = arith.constant 0 : i32
    %c0_i32_0 = arith.constant 0 : i32
    %c0_i32_1 = arith.constant 0 : i32
    return %c0_i32, %c0_i32_0 : i32, i32
  }
  func.func @transform_3(%arg0: i32, %arg1: i32) -> (i32, i32, i32) {
    %c0_i32 = arith.constant 0 : i32
    %c0_i32_0 = arith.constant 0 : i32
    return %arg0, %arg1, %c0_i32 : i32, i32, i32
  }
}

module attributes {stable_mosaic.version = 11 : i64} {
  func.func @gemm_bias_act_kernel(%arg0: i32, %arg1: i32, %arg2: memref<1x128x512xbf16, #tpu.memory_space<vmem>>, %arg3: memref<1x512x128xbf16, #tpu.memory_space<vmem>>, %arg4: memref<1x128xf32, #tpu.memory_space<vmem>>, %arg5: memref<1x128x128xf32, #tpu.memory_space<vmem>>) attributes {dimension_semantics = [#tpu.dimension_semantics<parallel>, #tpu.dimension_semantics<parallel>], iteration_bounds = array<i64: 4, 1>, scalar_prefetch = 0 : i64, scratch_operands = 0 : i64, tpu.core_type = #tpu.core_type<tc>, window_params = [{transform_indices = @transform_0, window_bounds = array<i64: 1, 128, 512>}, {transform_indices = @transform_1, window_bounds = array<i64: 1, 512, 128>}, {pipeline_mode = #tpu.pipeline_mode<synchronous>, transform_indices = @transform_2, window_bounds = array<i64: 1, 128>}, {transform_indices = @transform_3, window_bounds = array<i64: 1, 128, 128>}]} {
    %c0 = arith.constant 0 : index
    %c0_0 = arith.constant 0 : index
    %c0_1 = arith.constant 0 : index
    %0 = vector.load %arg2[%c0, %c0_0, %c0_1] : memref<1x128x512xbf16, #tpu.memory_space<vmem>>, vector<1x128x512xbf16>
    %1 = vector.shape_cast %0 : vector<1x128x512xbf16> to vector<128x512xbf16>
    %c0_2 = arith.constant 0 : index
    %c0_3 = arith.constant 0 : index
    %c0_4 = arith.constant 0 : index
    %2 = vector.load %arg3[%c0_2, %c0_3, %c0_4] : memref<1x512x128xbf16, #tpu.memory_space<vmem>>, vector<1x512x128xbf16>
    %3 = vector.shape_cast %2 : vector<1x512x128xbf16> to vector<512x128xbf16>
    %cst = arith.constant dense<0.000000e+00> : vector<128x128xf32>
    %4 = tpu.matmul %1, %3, %cst {dimension_numbers = #tpu.dot_dimension_numbers<[1], [0], [0], [1], [0, 0, 1, 1], [], []>} : vector<128x512xbf16>, vector<512x128xbf16>, vector<128x128xf32> -> vector<128x128xf32>
    %c0_5 = arith.constant 0 : index
    %c0_6 = arith.constant 0 : index
    %5 = vector.load %arg4[%c0_5, %c0_6] : memref<1x128xf32, #tpu.memory_space<vmem>>, vector<1x128xf32>
    %6 = vector.broadcast %5 : vector<1x128xf32> to vector<128x128xf32>
    %7 = arith.addf %4, %6 : vector<128x128xf32>
    %cst_7 = arith.constant 0.000000e+00 : f32
    %8 = vector.broadcast %cst_7 : f32 to vector<128x128xf32>
    %9 = arith.maximumf %7, %8 : vector<128x128xf32>
    %c0_8 = arith.constant 0 : index
    %c0_9 = arith.constant 0 : index
    %c0_10 = arith.constant 0 : index
    %10 = vector.load %arg5[%c0_8, %c0_9, %c0_10] : memref<1x128x128xf32, #tpu.memory_space<vmem>>, vector<1x128x128xf32>
    %11 = vector.shape_cast %10 : vector<1x128x128xf32> to vector<128x128xf32>
    %12 = vector.shape_cast %9 : vector<128x128xf32> to vector<1x128x128xf32>
    tpu.vector_store %arg5[%c0_8, %c0_9, %c0_10], %12 {strides = array<i32>} : memref<1x128x128xf32, #tpu.memory_space<vmem>>, vector<1x128x128xf32>,
    return
  }
  func.func @transform_0(%arg0: i32, %arg1: i32) -> (i32, i32, i32) {
    %c0_i32 = arith.constant 0 : i32
    %c0_i32_0 = arith.constant 0 : i32
    return %arg0, %arg1, %c0_i32 : i32, i32, i32
  }
  func.func @transform_1(%arg0: i32, %arg1: i32) -> (i32, i32, i32) {
    %c0_i32 = arith.constant 0 : i32
    %c0_i32_0 = arith.constant 0 : i32
    %c0_i32_1 = arith.constant 0 : i32
    return %arg0, %c0_i32, %c0_i32_0 : i32, i32, i32
  }
  func.func @transform_2(%arg0: i32, %arg1: i32) -> (i32, i32) {
    %c0_i32 = arith.constant 0 : i32
    %c0_i32_0 = arith.constant 0 : i32
    %c0_i32_1 = arith.constant 0 : i32
    return %c0_i32, %c0_i32_0 : i32, i32
  }
  func.func @transform_3(%arg0: i32, %arg1: i32) -> (i32, i32, i32) {
    %c0_i32 = arith.constant 0 : i32
    %c0_i32_0 = arith.constant 0 : i32
    return %arg0, %arg1, %c0_i32 : i32, i32, i32
  }
}

module attributes {stable_mosaic.version = 11 : i64} {
  func.func @gemm_bias_act_kernel(%arg0: i32, %arg1: i32, %arg2: memref<1x128x256xbf16, #tpu.memory_space<vmem>>, %arg3: memref<1x256x128xbf16, #tpu.memory_space<vmem>>, %arg4: memref<1x128xf32, #tpu.memory_space<vmem>>, %arg5: memref<1x128x128xf32, #tpu.memory_space<vmem>>) attributes {dimension_semantics = [#tpu.dimension_semantics<parallel>, #tpu.dimension_semantics<parallel>], iteration_bounds = array<i64: 4, 1>, scalar_prefetch = 0 : i64, scratch_operands = 0 : i64, tpu.core_type = #tpu.core_type<tc>, window_params = [{transform_indices = @transform_0, window_bounds = array<i64: 1, 128, 256>}, {transform_indices = @transform_1, window_bounds = array<i64: 1, 256, 128>}, {pipeline_mode = #tpu.pipeline_mode<synchronous>, transform_indices = @transform_2, window_bounds = array<i64: 1, 128>}, {transform_indices = @transform_3, window_bounds = array<i64: 1, 128, 128>}]} {
    %c0 = arith.constant 0 : index
    %c0_0 = arith.constant 0 : index
    %c0_1 = arith.constant 0 : index
    %0 = vector.load %arg2[%c0, %c0_0, %c0_1] : memref<1x128x256xbf16, #tpu.memory_space<vmem>>, vector<1x128x256xbf16>
    %1 = vector.shape_cast %0 : vector<1x128x256xbf16> to vector<128x256xbf16>
    %c0_2 = arith.constant 0 : index
    %c0_3 = arith.constant 0 : index
    %c0_4 = arith.constant 0 : index
    %2 = vector.load %arg3[%c0_2, %c0_3, %c0_4] : memref<1x256x128xbf16, #tpu.memory_space<vmem>>, vector<1x256x128xbf16>
    %3 = vector.shape_cast %2 : vector<1x256x128xbf16> to vector<256x128xbf16>
    %cst = arith.constant dense<0.000000e+00> : vector<128x128xf32>
    %4 = tpu.matmul %1, %3, %cst {dimension_numbers = #tpu.dot_dimension_numbers<[1], [0], [0], [1], [0, 0, 1, 1], [], []>} : vector<128x256xbf16>, vector<256x128xbf16>, vector<128x128xf32> -> vector<128x128xf32>
    %c0_5 = arith.constant 0 : index
    %c0_6 = arith.constant 0 : index
    %5 = vector.load %arg4[%c0_5, %c0_6] : memref<1x128xf32, #tpu.memory_space<vmem>>, vector<1x128xf32>
    %6 = vector.broadcast %5 : vector<1x128xf32> to vector<128x128xf32>
    %7 = arith.addf %4, %6 : vector<128x128xf32>
    %cst_7 = arith.constant 0.000000e+00 : f32
    %8 = vector.broadcast %cst_7 : f32 to vector<128x128xf32>
    %9 = arith.maximumf %7, %8 : vector<128x128xf32>
    %c0_8 = arith.constant 0 : index
    %c0_9 = arith.constant 0 : index
    %c0_10 = arith.constant 0 : index
    %10 = vector.load %arg5[%c0_8, %c0_9, %c0_10] : memref<1x128x128xf32, #tpu.memory_space<vmem>>, vector<1x128x128xf32>
    %11 = vector.shape_cast %10 : vector<1x128x128xf32> to vector<128x128xf32>
    %12 = vector.shape_cast %9 : vector<128x128xf32> to vector<1x128x128xf32>
    tpu.vector_store %arg5[%c0_8, %c0_9, %c0_10], %12 {strides = array<i32>} : memref<1x128x128xf32, #tpu.memory_space<vmem>>, vector<1x128x128xf32>,
    return
  }
  func.func @transform_0(%arg0: i32, %arg1: i32) -> (i32, i32, i32) {
    %c0_i32 = arith.constant 0 : i32
    %c0_i32_0 = arith.constant 0 : i32
    return %arg0, %arg1, %c0_i32 : i32, i32, i32
  }
  func.func @transform_1(%arg0: i32, %arg1: i32) -> (i32, i32, i32) {
    %c0_i32 = arith.constant 0 : i32
    %c0_i32_0 = arith.constant 0 : i32
    %c0_i32_1 = arith.constant 0 : i32
    return %arg0, %c0_i32, %c0_i32_0 : i32, i32, i32
  }
  func.func @transform_2(%arg0: i32, %arg1: i32) -> (i32, i32) {
    %c0_i32 = arith.constant 0 : i32
    %c0_i32_0 = arith.constant 0 : i32
    %c0_i32_1 = arith.constant 0 : i32
    return %c0_i32, %c0_i32_0 : i32, i32
  }
  func.func @transform_3(%arg0: i32, %arg1: i32) -> (i32, i32, i32) {
    %c0_i32 = arith.constant 0 : i32
    %c0_i32_0 = arith.constant 0 : i32
    return %arg0, %arg1, %c0_i32 : i32, i32, i32
  }
}

module attributes {stable_mosaic.version = 11 : i64} {
  func.func @gemm_bias_act_kernel(%arg0: i32, %arg1: i32, %arg2: memref<1x512x128xbf16, #tpu.memory_space<vmem>>, %arg3: memref<1x128x128xbf16, #tpu.memory_space<vmem>>, %arg4: memref<1x128xf32, #tpu.memory_space<vmem>>, %arg5: memref<1x512x128xf32, #tpu.memory_space<vmem>>) attributes {dimension_semantics = [#tpu.dimension_semantics<parallel>, #tpu.dimension_semantics<parallel>], iteration_bounds = array<i64: 4, 1>, scalar_prefetch = 0 : i64, scratch_operands = 0 : i64, tpu.core_type = #tpu.core_type<tc>, window_params = [{transform_indices = @transform_0, window_bounds = array<i64: 1, 512, 128>}, {transform_indices = @transform_1, window_bounds = array<i64: 1, 128, 128>}, {pipeline_mode = #tpu.pipeline_mode<synchronous>, transform_indices = @transform_2, window_bounds = array<i64: 1, 128>}, {transform_indices = @transform_3, window_bounds = array<i64: 1, 512, 128>}]} {
    %c0 = arith.constant 0 : index
    %c0_0 = arith.constant 0 : index
    %c0_1 = arith.constant 0 : index
    %0 = vector.load %arg2[%c0, %c0_0, %c0_1] : memref<1x512x128xbf16, #tpu.memory_space<vmem>>, vector<1x512x128xbf16>
    %1 = vector.shape_cast %0 : vector<1x512x128xbf16> to vector<512x128xbf16>
    %c0_2 = arith.constant 0 : index
    %c0_3 = arith.constant 0 : index
    %c0_4 = arith.constant 0 : index
    %2 = vector.load %arg3[%c0_2, %c0_3, %c0_4] : memref<1x128x128xbf16, #tpu.memory_space<vmem>>, vector<1x128x128xbf16>
    %3 = vector.shape_cast %2 : vector<1x128x128xbf16> to vector<128x128xbf16>
    %cst = arith.constant dense<0.000000e+00> : vector<512x128xf32>
    %4 = tpu.matmul %1, %3, %cst {dimension_numbers = #tpu.dot_dimension_numbers<[1], [0], [0], [1], [0, 0, 1, 1], [], []>} : vector<512x128xbf16>, vector<128x128xbf16>, vector<512x128xf32> -> vector<512x128xf32>
    %c0_5 = arith.constant 0 : index
    %c0_6 = arith.constant 0 : index
    %5 = vector.load %arg4[%c0_5, %c0_6] : memref<1x128xf32, #tpu.memory_space<vmem>>, vector<1x128xf32>
    %6 = vector.broadcast %5 : vector<1x128xf32> to vector<512x128xf32>
    %7 = arith.addf %4, %6 : vector<512x128xf32>
    %8 = math.tanh %7 : vector<512x128xf32>
    %c0_7 = arith.constant 0 : index
    %c0_8 = arith.constant 0 : index
    %c0_9 = arith.constant 0 : index
    %9 = vector.load %arg5[%c0_7, %c0_8, %c0_9] : memref<1x512x128xf32, #tpu.memory_space<vmem>>, vector<1x512x128xf32>
    %10 = vector.shape_cast %9 : vector<1x512x128xf32> to vector<512x128xf32>
    %11 = vector.shape_cast %8 : vector<512x128xf32> to vector<1x512x128xf32>
    tpu.vector_store %arg5[%c0_7, %c0_8, %c0_9], %11 {strides = array<i32>} : memref<1x512x128xf32, #tpu.memory_space<vmem>>, vector<1x512x128xf32>,
    return
  }
  func.func @transform_0(%arg0: i32, %arg1: i32) -> (i32, i32, i32) {
    %c0_i32 = arith.constant 0 : i32
    %c0_i32_0 = arith.constant 0 : i32
    return %arg0, %arg1, %c0_i32 : i32, i32, i32
  }
  func.func @transform_1(%arg0: i32, %arg1: i32) -> (i32, i32, i32) {
    %c0_i32 = arith.constant 0 : i32
    %c0_i32_0 = arith.constant 0 : i32
    %c0_i32_1 = arith.constant 0 : i32
    return %arg0, %c0_i32, %c0_i32_0 : i32, i32, i32
  }
  func.func @transform_2(%arg0: i32, %arg1: i32) -> (i32, i32) {
    %c0_i32 = arith.constant 0 : i32
    %c0_i32_0 = arith.constant 0 : i32
    %c0_i32_1 = arith.constant 0 : i32
    return %c0_i32, %c0_i32_0 : i32, i32
  }
  func.func @transform_3(%arg0: i32, %arg1: i32) -> (i32, i32, i32) {
    %c0_i32 = arith.constant 0 : i32
    %c0_i32_0 = arith.constant 0 : i32
    return %arg0, %arg1, %c0_i32 : i32, i32, i32
  }
}

</mosaic_0001>

<bundles_post_ra>
// kernel: _lambda_.9
= control target key start
LH: loop header
LB: loop body
LE: loop exit
PB: predicated region body
PF: predicated region fallthrough
CT: control target
= control target key end

     0   :  { %vm254_vm0 = vcmask 130048   ;;  %s1384_s1 = inlined_call_operand.vmem [shape: bf16[1,16,128], index: 1, kind: input, shape index: {}]   ;;  %s1385_s0 = inlined_call_operand.vmem [shape: bf16[1,512,16], index: 0, kind: input, shape index: {}]   ;;  %s1386_s2 = inlined_call_operand.vmem [shape: f32[1,128], index: 2, kind: input, shape index: {}]   ;;  %s1387_s3 = inlined_call_operand.vmem [shape: f32[1,512,128], index: 3, kind: output, shape index: {}]  }
   0x1   :  { %v939_v0 = vld [vmem:[%s1384_s1] sm:$0xff]   ;;  %v942_v3 = vld [vmem:[%s1385_s0 + $0x8] sm:$0xff]   ;;  %v944_v5 = vld [vmem:[%s1385_s0 + $0x10] sm:$0xff]  }
   0x2   :  { %v940_v1 = vld [vmem:[%s1385_s0] sm:$0xff]   ;;  %871 = vmatprep.subr.bf16.mxu0 %v939_v0  ;;  %937 = vmatprep.subr.bf16.mxu1 %v939_v0  ;;  %v943_v4 = vld [vmem:[%s1385_s0 + $0x88] sm:$0xff]   ;;  %v945_v6 = vld [vmem:[%s1385_s0 + $0x90] sm:$0xff]  }
   0x3   :  { %v941_v2 = vld [vmem:[%s1385_s0 + $0x80] sm:$0xff]   ;;  %872 = vmatpush3.bf16.msra.mxu0 %v939_v0  ;;  %938 = vmatpush3.bf16.msra.mxu1 %v939_v0  ;;  %v946_v7 = vld [vmem:[%s1385_s0 + $0x18] sm:$0xff]   ;;  %v950_v11 = vld [vmem:[%s1385_s0 + $0x28] sm:$0xff]  }
   0x4   :  { %873 = vmatprep.mubr.msk.bf16.mxu0 %vm254_vm0, %v940_v1  ;;  %905 = vmatprep.mubr.msk.bf16.mxu1 %vm254_vm0, %v941_v2  ;;  %v947_v8 = vld [vmem:[%s1385_s0 + $0x98] sm:$0xff]   ;;  %v948_v9 = vld [vmem:[%s1385_s0 + $0x20] sm:$0xff]   ;;  %v951_v12 = vld [vmem:[%s1385_s0 + $0xa8] sm:$0xff]  }
   0x5   :  { %v949_v10 = vld [vmem:[%s1385_s0 + $0xa0] sm:$0xff]   ;;  %v952_v13 = vld [vmem:[%s1385_s0 + $0x30] sm:$0xff]   ;;  %v954_v15 = vld [vmem:[%s1385_s0 + $0x38] sm:$0xff]  }
   0x6   :  { %874 = vmatmul.mubr.msk.bf16.vlgmr.msra.gmra.mxu0 %vm254_vm0, %v942_v3  ;;  %906 = vmatmul.mubr.msk.bf16.vlgmr.msra.gmra.mxu1 %vm254_vm0, %v943_v4  ;;  %v953_v14 = vld [vmem:[%s1385_s0 + $0xb0] sm:$0xff]   ;;  %v955_v16 = vld [vmem:[%s1385_s0 + $0xb8] sm:$0xff]   ;;  %v956_v17 = vld [vmem:[%s1385_s0 + $0x40] sm:$0xff]  }
   0x7   :  { %877 = vmatprep.mubr.msk.bf16.mxu0 %vm254_vm0, %v944_v5  ;;  %909 = vmatprep.mubr.msk.bf16.mxu1 %vm254_vm0, %v945_v6  ;;  %v957_v18 = vld [vmem:[%s1385_s0 + $0xc0] sm:$0xff]   ;;  %v958_v19 = vld [vmem:[%s1385_s0 + $0x48] sm:$0xff]   ;;  %v960_v21 = vld [vmem:[%s1385_s0 + $0x50] sm:$0xff]  }
   0x8   :  { %v959_v20 = vld [vmem:[%s1385_s0 + $0xc8] sm:$0xff]   ;;  %v961_v22 = vld [vmem:[%s1385_s0 + $0xd0] sm:$0xff]   ;;  %v962_v23 = vld [vmem:[%s1385_s0 + $0x58] sm:$0xff]  }
   0x9   :  { %v963_v24 = vld [vmem:[%s1385_s0 + $0xd8] sm:$0xff]   ;;  %v964_v25 = vld [vmem:[%s1385_s0 + $0x60] sm:$0xff]   ;;  %v966_v27 = vld [vmem:[%s1385_s0 + $0x68] sm:$0xff]  }
   0xa   :  { %v965_v26 = vld [vmem:[%s1385_s0 + $0xe0] sm:$0xff]   ;;  %v967_v28 = vld [vmem:[%s1385_s0 + $0xe8] sm:$0xff]   ;;  %v968_v29 = vld [vmem:[%s1385_s0 + $0x70] sm:$0xff]  }
   0xb   :  { %v969_v30 = vld [vmem:[%s1385_s0 + $0xf0] sm:$0xff]   ;;  %v970_v31 = vld [vmem:[%s1385_s0 + $0x78] sm:$0xff]   ;;  %v1126_v33 = vld [vmem:[%s1386_s2] ss:$0 sm:$0xff] }
   0xc   :  { %v971_v32 = vld [vmem:[%s1385_s0 + $0xf8] sm:$0xff]  }
   0xe   :  { %878 = vmatmul.mubr.msk.bf16.gmra.mxu0 %vm254_vm0, %v946_v7  ;;  %910 = vmatmul.mubr.msk.bf16.gmra.mxu1 %vm254_vm0, %v947_v8 }
   0xf   :  { %881 = vmatprep.mubr.msk.bf16.mxu0 %vm254_vm0, %v948_v9  ;;  %913 = vmatprep.mubr.msk.bf16.mxu1 %vm254_vm0, %v949_v10 }
  0x16   :  { %882 = vmatmul.mubr.msk.bf16.gmra.mxu0 %vm254_vm0, %v950_v11  ;;  %914 = vmatmul.mubr.msk.bf16.gmra.mxu1 %vm254_vm0, %v951_v12 }
  0x17   :  { %885 = vmatprep.mubr.msk.bf16.mxu0 %vm254_vm0, %v952_v13  ;;  %917 = vmatprep.mubr.msk.bf16.mxu1 %vm254_vm0, %v953_v14 }
  0x1e   :  { %886 = vmatmul.mubr.msk.bf16.gmra.mxu0 %vm254_vm0, %v954_v15  ;;  %918 = vmatmul.mubr.msk.bf16.gmra.mxu1 %vm254_vm0, %v955_v16 }
  0x1f   :  { %889 = vmatprep.mubr.msk.bf16.mxu0 %vm254_vm0, %v956_v17  ;;  %921 = vmatprep.mubr.msk.bf16.mxu1 %vm254_vm0, %v957_v18 }
  0x26   :  { %890 = vmatmul.mubr.msk.bf16.gmra.mxu0 %vm254_vm0, %v958_v19  ;;  %922 = vmatmul.mubr.msk.bf16.gmra.mxu1 %vm254_vm0, %v959_v20 }
  0x27   :  { %893 = vmatprep.mubr.msk.bf16.mxu0 %vm254_vm0, %v960_v21  ;;  %925 = vmatprep.mubr.msk.bf16.mxu1 %vm254_vm0, %v961_v22 }
  0x2e   :  { %894 = vmatmul.mubr.msk.bf16.gmra.mxu0 %vm254_vm0, %v962_v23  ;;  %926 = vmatmul.mubr.msk.bf16.gmra.mxu1 %vm254_vm0, %v963_v24 }
  0x2f   :  { %897 = vmatprep.mubr.msk.bf16.mxu0 %vm254_vm0, %v964_v25  ;;  %929 = vmatprep.mubr.msk.bf16.mxu1 %vm254_vm0, %v965_v26 }
  0x36   :  { %898 = vmatmul.mubr.msk.bf16.gmra.mxu0 %vm254_vm0, %v966_v27  ;;  %930 = vmatmul.mubr.msk.bf16.gmra.mxu1 %vm254_vm0, %v967_v28 }
  0x37   :  { %901 = vmatprep.mubr.msk.bf16.mxu0 %vm254_vm0, %v968_v29  ;;  %933 = vmatprep.mubr.msk.bf16.mxu1 %vm254_vm0, %v969_v30 }
  0x3e   :  { %902 = vmatmul.mubr.msk.bf16.gmra.mxu0 %vm254_vm0, %v970_v31  ;;  %934 = vmatmul.mubr.msk.bf16.gmra.mxu1 %vm254_vm0, %v971_v32 }
  0xc6   :  { %v875_v34 = vpop.f32.mrf.mxu0  ;;  %v907_v35 = vpop.f32.mrf.mxu1 }
  0xc7   :  { %v394_v36 = vadd.f32 %v875_v34, %v1126_v33  ;;  %v522_v37 = vadd.f32 %v907_v35, %v1126_v33 }
  0xc8   :  { %v385_v38 = vpop.f32.mrf.mxu0  ;;  %v513_v39 = vpop.f32.mrf.mxu1 }
  0xc9   :  { %v642_v40 = vmax.f32 %v394_v36, 0.0  ;;  %v674_v41 = vmax.f32 %v522_v37, 0.0  ;;  %v386_v42 = vadd.f32 %v1126_v33, %v385_v38  ;;  %v514_v43 = vadd.f32 %v1126_v33, %v513_v39 }
  0xca   :  { %v876_v44 = vpop.f32.mrf.mxu0  ;;  %v908_v45 = vpop.f32.mrf.mxu1 }
  0xcb   :  { %706 = vst [vmem:[%s1387_s3 + $0x10] sm:$0xff] %v642_v40  ;;  %738 = vst [vmem:[%s1387_s3 + $0x110] sm:$0xff] %v674_v41  ;;  %v640_v46 = vmax.f32 %v386_v42, 0.0  ;;  %v672_v47 = vmax.f32 %v514_v43, 0.0  ;;  %v397_v48 = vadd.f32 %v876_v44, %v1126_v33  ;;  %v525_v49 = vadd.f32 %v908_v45, %v1126_v33 }
  0xcc   :  { %v388_v50 = vpop.f32.mrf.mxu0  ;;  %v516_v51 = vpop.f32.mrf.mxu1 }
  0xcd   :  { %704 = vst [vmem:[%s1387_s3] sm:$0xff] %v640_v46  ;;  %736 = vst [vmem:[%s1387_s3 + $0x100] sm:$0xff] %v672_v47  ;;  %v643_v52 = vmax.f32 %v397_v48, 0.0  ;;  %v675_v53 = vmax.f32 %v525_v49, 0.0  ;;  %v389_v54 = vadd.f32 %v1126_v33, %v388_v50  ;;  %v517_v55 = vadd.f32 %v1126_v33, %v516_v51 }
  0xce   :  { %v879_v56 = vpop.f32.mrf.mxu0  ;;  %v911_v57 = vpop.f32.mrf.mxu1 }
  0xcf   :  { %707 = vst [vmem:[%s1387_s3 + $0x18] sm:$0xff] %v643_v52  ;;  %739 = vst [vmem:[%s1387_s3 + $0x118] sm:$0xff] %v675_v53  ;;  %v641_v58 = vmax.f32 %v389_v54, 0.0  ;;  %v673_v59 = vmax.f32 %v517_v55, 0.0  ;;  %v410_v60 = vadd.f32 %v879_v56, %v1126_v33  ;;  %v538_v61 = vadd.f32 %v911_v57, %v1126_v33 }
  0xd0   :  { %v401_v62 = vpop.f32.mrf.mxu0  ;;  %v529_v63 = vpop.f32.mrf.mxu1 }
  0xd1   :  { %705 = vst [vmem:[%s1387_s3 + $0x8] sm:$0xff] %v641_v58  ;;  %737 = vst [vmem:[%s1387_s3 + $0x108] sm:$0xff] %v673_v59  ;;  %v646_v0 = vmax.f32 %v410_v60, 0.0  ;;  %v678_v1 = vmax.f32 %v538_v61, 0.0  ;;  %v402_v2 = vadd.f32 %v1126_v33, %v401_v62  ;;  %v530_v3 = vadd.f32 %v1126_v33, %v529_v63 }
  0xd2   :  { %v880_v4 = vpop.f32.mrf.mxu0  ;;  %v912_v5 = vpop.f32.mrf.mxu1 }
  0xd3   :  { %710 = vst [vmem:[%s1387_s3 + $0x30] sm:$0xff] %v646_v0  ;;  %742 = vst [vmem:[%s1387_s3 + $0x130] sm:$0xff] %v678_v1  ;;  %v644_v6 = vmax.f32 %v402_v2, 0.0  ;;  %v676_v7 = vmax.f32 %v530_v3, 0.0  ;;  %v413_v8 = vadd.f32 %v880_v4, %v1126_v33  ;;  %v541_v9 = vadd.f32 %v912_v5, %v1126_v33 }
  0xd4   :  { %v404_v10 = vpop.f32.mrf.mxu0  ;;  %v532_v11 = vpop.f32.mrf.mxu1 }
  0xd5   :  { %708 = vst [vmem:[%s1387_s3 + $0x20] sm:$0xff] %v644_v6  ;;  %740 = vst [vmem:[%s1387_s3 + $0x120] sm:$0xff] %v676_v7  ;;  %v647_v12 = vmax.f32 %v413_v8, 0.0  ;;  %v679_v13 = vmax.f32 %v541_v9, 0.0  ;;  %v405_v14 = vadd.f32 %v1126_v33, %v404_v10  ;;  %v533_v15 = vadd.f32 %v1126_v33, %v532_v11 }
  0xd6   :  { %v883_v16 = vpop.f32.mrf.mxu0  ;;  %v915_v17 = vpop.f32.mrf.mxu1 }
  0xd7   :  { %711 = vst [vmem:[%s1387_s3 + $0x38] sm:$0xff] %v647_v12  ;;  %743 = vst [vmem:[%s1387_s3 + $0x138] sm:$0xff] %v679_v13  ;;  %v645_v18 = vmax.f32 %v405_v14, 0.0  ;;  %v677_v19 = vmax.f32 %v533_v15, 0.0  ;;  %v426_v20 = vadd.f32 %v883_v16, %v1126_v33  ;;  %v554_v21 = vadd.f32 %v915_v17, %v1126_v33 }
  0xd8   :  { %v417_v22 = vpop.f32.mrf.mxu0  ;;  %v545_v23 = vpop.f32.mrf.mxu1 }
  0xd9   :  { %709 = vst [vmem:[%s1387_s3 + $0x28] sm:$0xff] %v645_v18  ;;  %741 = vst [vmem:[%s1387_s3 + $0x128] sm:$0xff] %v677_v19  ;;  %v650_v24 = vmax.f32 %v426_v20, 0.0  ;;  %v682_v25 = vmax.f32 %v554_v21, 0.0  ;;  %v418_v26 = vadd.f32 %v1126_v33, %v417_v22  ;;  %v546_v27 = vadd.f32 %v1126_v33, %v545_v23 }
  0xda   :  { %v884_v28 = vpop.f32.mrf.mxu0  ;;  %v916_v29 = vpop.f32.mrf.mxu1 }
  0xdb   :  { %714 = vst [vmem:[%s1387_s3 + $0x50] sm:$0xff] %v650_v24  ;;  %746 = vst [vmem:[%s1387_s3 + $0x150] sm:$0xff] %v682_v25  ;;  %v648_v30 = vmax.f32 %v418_v26, 0.0  ;;  %v680_v31 = vmax.f32 %v546_v27, 0.0  ;;  %v429_v32 = vadd.f32 %v884_v28, %v1126_v33  ;;  %v557_v34 = vadd.f32 %v916_v29, %v1126_v33 }
  0xdc   :  { %v420_v35 = vpop.f32.mrf.mxu0  ;;  %v548_v36 = vpop.f32.mrf.mxu1 }
  0xdd   :  { %712 = vst [vmem:[%s1387_s3 + $0x40] sm:$0xff] %v648_v30  ;;  %744 = vst [vmem:[%s1387_s3 + $0x140] sm:$0xff] %v680_v31  ;;  %v651_v37 = vmax.f32 %v429_v32, 0.0  ;;  %v683_v38 = vmax.f32 %v557_v34, 0.0  ;;  %v421_v39 = vadd.f32 %v1126_v33, %v420_v35  ;;  %v549_v40 = vadd.f32 %v1126_v33, %v548_v36 }
  0xde   :  { %v887_v41 = vpop.f32.mrf.mxu0  ;;  %v919_v42 = vpop.f32.mrf.mxu1 }
  0xdf   :  { %715 = vst [vmem:[%s1387_s3 + $0x58] sm:$0xff] %v651_v37  ;;  %747 = vst [vmem:[%s1387_s3 + $0x158] sm:$0xff] %v683_v38  ;;  %v649_v43 = vmax.f32 %v421_v39, 0.0  ;;  %v681_v44 = vmax.f32 %v549_v40, 0.0  ;;  %v442_v45 = vadd.f32 %v887_v41, %v1126_v33  ;;  %v570_v46 = vadd.f32 %v919_v42, %v1126_v33 }
  0xe0   :  { %v433_v47 = vpop.f32.mrf.mxu0  ;;  %v561_v48 = vpop.f32.mrf.mxu1 }
  0xe1   :  { %713 = vst [vmem:[%s1387_s3 + $0x48] sm:$0xff] %v649_v43  ;;  %745 = vst [vmem:[%s1387_s3 + $0x148] sm:$0xff] %v681_v44  ;;  %v654_v49 = vmax.f32 %v442_v45, 0.0  ;;  %v686_v50 = vmax.f32 %v570_v46, 0.0  ;;  %v434_v51 = vadd.f32 %v1126_v33, %v433_v47  ;;  %v562_v52 = vadd.f32 %v1126_v33, %v561_v48 }
  0xe2   :  { %v888_v53 = vpop.f32.mrf.mxu0  ;;  %v920_v54 = vpop.f32.mrf.mxu1 }
  0xe3   :  { %718 = vst [vmem:[%s1387_s3 + $0x70] sm:$0xff] %v654_v49  ;;  %750 = vst [vmem:[%s1387_s3 + $0x170] sm:$0xff] %v686_v50  ;;  %v652_v55 = vmax.f32 %v434_v51, 0.0  ;;  %v684_v56 = vmax.f32 %v562_v52, 0.0  ;;  %v445_v57 = vadd.f32 %v888_v53, %v1126_v33  ;;  %v573_v58 = vadd.f32 %v920_v54, %v1126_v33 }
  0xe4   :  { %v436_v59 = vpop.f32.mrf.mxu0  ;;  %v564_v60 = vpop.f32.mrf.mxu1 }
  0xe5   :  { %716 = vst [vmem:[%s1387_s3 + $0x60] sm:$0xff] %v652_v55  ;;  %748 = vst [vmem:[%s1387_s3 + $0x160] sm:$0xff] %v684_v56  ;;  %v655_v61 = vmax.f32 %v445_v57, 0.0  ;;  %v687_v62 = vmax.f32 %v573_v58, 0.0  ;;  %v437_v63 = vadd.f32 %v1126_v33, %v436_v59  ;;  %v565_v0 = vadd.f32 %v1126_v33, %v564_v60 }
  0xe6   :  { %v891_v1 = vpop.f32.mrf.mxu0  ;;  %v923_v2 = vpop.f32.mrf.mxu1 }
  0xe7   :  { %719 = vst [vmem:[%s1387_s3 + $0x78] sm:$0xff] %v655_v61  ;;  %751 = vst [vmem:[%s1387_s3 + $0x178] sm:$0xff] %v687_v62  ;;  %v653_v3 = vmax.f32 %v437_v63, 0.0  ;;  %v685_v4 = vmax.f32 %v565_v0, 0.0  ;;  %v458_v5 = vadd.f32 %v891_v1, %v1126_v33  ;;  %v586_v6 = vadd.f32 %v923_v2, %v1126_v33 }
  0xe8   :  { %v449_v7 = vpop.f32.mrf.mxu0  ;;  %v577_v8 = vpop.f32.mrf.mxu1 }
  0xe9   :  { %717 = vst [vmem:[%s1387_s3 + $0x68] sm:$0xff] %v653_v3  ;;  %749 = vst [vmem:[%s1387_s3 + $0x168] sm:$0xff] %v685_v4  ;;  %v658_v9 = vmax.f32 %v458_v5, 0.0  ;;  %v690_v10 = vmax.f32 %v586_v6, 0.0  ;;  %v450_v11 = vadd.f32 %v1126_v33, %v449_v7  ;;  %v578_v12 = vadd.f32 %v1126_v33, %v577_v8 }
  0xea   :  { %v892_v13 = vpop.f32.mrf.mxu0  ;;  %v924_v14 = vpop.f32.mrf.mxu1 }
  0xeb   :  { %722 = vst [vmem:[%s1387_s3 + $0x90] sm:$0xff] %v658_v9  ;;  %754 = vst [vmem:[%s1387_s3 + $0x190] sm:$0xff] %v690_v10  ;;  %v656_v15 = vmax.f32 %v450_v11, 0.0  ;;  %v688_v16 = vmax.f32 %v578_v12, 0.0  ;;  %v461_v17 = vadd.f32 %v892_v13, %v1126_v33  ;;  %v589_v18 = vadd.f32 %v924_v14, %v1126_v33 }
  0xec   :  { %v452_v19 = vpop.f32.mrf.mxu0  ;;  %v580_v20 = vpop.f32.mrf.mxu1 }
  0xed   :  { %720 = vst [vmem:[%s1387_s3 + $0x80] sm:$0xff] %v656_v15  ;;  %752 = vst [vmem:[%s1387_s3 + $0x180] sm:$0xff] %v688_v16  ;;  %v659_v21 = vmax.f32 %v461_v17, 0.0  ;;  %v691_v22 = vmax.f32 %v589_v18, 0.0  ;;  %v453_v23 = vadd.f32 %v1126_v33, %v452_v19  ;;  %v581_v24 = vadd.f32 %v1126_v33, %v580_v20 }
  0xee   :  { %v895_v25 = vpop.f32.mrf.mxu0  ;;  %v927_v26 = vpop.f32.mrf.mxu1 }
  0xef   :  { %723 = vst [vmem:[%s1387_s3 + $0x98] sm:$0xff] %v659_v21  ;;  %755 = vst [vmem:[%s1387_s3 + $0x198] sm:$0xff] %v691_v22  ;;  %v657_v27 = vmax.f32 %v453_v23, 0.0  ;;  %v689_v28 = vmax.f32 %v581_v24, 0.0  ;;  %v474_v29 = vadd.f32 %v895_v25, %v1126_v33  ;;  %v602_v30 = vadd.f32 %v927_v26, %v1126_v33 }
  0xf0   :  { %v465_v31 = vpop.f32.mrf.mxu0  ;;  %v593_v32 = vpop.f32.mrf.mxu1 }
  0xf1   :  { %721 = vst [vmem:[%s1387_s3 + $0x88] sm:$0xff] %v657_v27  ;;  %753 = vst [vmem:[%s1387_s3 + $0x188] sm:$0xff] %v689_v28  ;;  %v662_v34 = vmax.f32 %v474_v29, 0.0  ;;  %v694_v35 = vmax.f32 %v602_v30, 0.0  ;;  %v466_v36 = vadd.f32 %v1126_v33, %v465_v31  ;;  %v594_v37 = vadd.f32 %v1126_v33, %v593_v32 }
  0xf2   :  { %v896_v38 = vpop.f32.mrf.mxu0  ;;  %v928_v39 = vpop.f32.mrf.mxu1 }
  0xf3   :  { %726 = vst [vmem:[%s1387_s3 + $0xb0] sm:$0xff] %v662_v34  ;;  %758 = vst [vmem:[%s1387_s3 + $0x1b0] sm:$0xff] %v694_v35  ;;  %v660_v40 = vmax.f32 %v466_v36, 0.0  ;;  %v692_v41 = vmax.f32 %v594_v37, 0.0  ;;  %v477_v42 = vadd.f32 %v896_v38, %v1126_v33  ;;  %v605_v43 = vadd.f32 %v928_v39, %v1126_v33 }
  0xf4   :  { %v468_v44 = vpop.f32.mrf.mxu0  ;;  %v596_v45 = vpop.f32.mrf.mxu1 }
  0xf5   :  { %724 = vst [vmem:[%s1387_s3 + $0xa0] sm:$0xff] %v660_v40  ;;  %756 = vst [vmem:[%s1387_s3 + $0x1a0] sm:$0xff] %v692_v41  ;;  %v663_v46 = vmax.f32 %v477_v42, 0.0  ;;  %v695_v47 = vmax.f32 %v605_v43, 0.0  ;;  %v469_v48 = vadd.f32 %v1126_v33, %v468_v44  ;;  %v597_v49 = vadd.f32 %v1126_v33, %v596_v45 }
  0xf6   :  { %v899_v50 = vpop.f32.mrf.mxu0  ;;  %v931_v51 = vpop.f32.mrf.mxu1 }
  0xf7   :  { %727 = vst [vmem:[%s1387_s3 + $0xb8] sm:$0xff] %v663_v46  ;;  %759 = vst [vmem:[%s1387_s3 + $0x1b8] sm:$0xff] %v695_v47  ;;  %v661_v52 = vmax.f32 %v469_v48, 0.0  ;;  %v693_v53 = vmax.f32 %v597_v49, 0.0  ;;  %v490_v54 = vadd.f32 %v899_v50, %v1126_v33  ;;  %v618_v55 = vadd.f32 %v931_v51, %v1126_v33 }
  0xf8   :  { %v481_v56 = vpop.f32.mrf.mxu0  ;;  %v609_v57 = vpop.f32.mrf.mxu1 }
  0xf9   :  { %725 = vst [vmem:[%s1387_s3 + $0xa8] sm:$0xff] %v661_v52  ;;  %757 = vst [vmem:[%s1387_s3 + $0x1a8] sm:$0xff] %v693_v53  ;;  %v666_v58 = vmax.f32 %v490_v54, 0.0  ;;  %v698_v59 = vmax.f32 %v618_v55, 0.0  ;;  %v482_v60 = vadd.f32 %v1126_v33, %v481_v56  ;;  %v610_v61 = vadd.f32 %v1126_v33, %v609_v57 }
  0xfa   :  { %v900_v62 = vpop.f32.mrf.mxu0  ;;  %v932_v63 = vpop.f32.mrf.mxu1 }
  0xfb   :  { %730 = vst [vmem:[%s1387_s3 + $0xd0] sm:$0xff] %v666_v58  ;;  %762 = vst [vmem:[%s1387_s3 + $0x1d0] sm:$0xff] %v698_v59  ;;  %v664_v0 = vmax.f32 %v482_v60, 0.0  ;;  %v696_v1 = vmax.f32 %v610_v61, 0.0  ;;  %v493_v2 = vadd.f32 %v900_v62, %v1126_v33  ;;  %v621_v3 = vadd.f32 %v932_v63, %v1126_v33 }
  0xfc   :  { %v484_v4 = vpop.f32.mrf.mxu0  ;;  %v612_v5 = vpop.f32.mrf.mxu1 }
  0xfd   :  { %728 = vst [vmem:[%s1387_s3 + $0xc0] sm:$0xff] %v664_v0  ;;  %760 = vst [vmem:[%s1387_s3 + $0x1c0] sm:$0xff] %v696_v1  ;;  %v667_v6 = vmax.f32 %v493_v2, 0.0  ;;  %v699_v7 = vmax.f32 %v621_v3, 0.0  ;;  %v485_v8 = vadd.f32 %v1126_v33, %v484_v4  ;;  %v613_v9 = vadd.f32 %v1126_v33, %v612_v5 }
  0xfe   :  { %v903_v10 = vpop.f32.mrf.mxu0  ;;  %v935_v11 = vpop.f32.mrf.mxu1 }
  0xff   :  { %731 = vst [vmem:[%s1387_s3 + $0xd8] sm:$0xff] %v667_v6  ;;  %763 = vst [vmem:[%s1387_s3 + $0x1d8] sm:$0xff] %v699_v7  ;;  %v665_v12 = vmax.f32 %v485_v8, 0.0  ;;  %v697_v13 = vmax.f32 %v613_v9, 0.0  ;;  %v506_v14 = vadd.f32 %v903_v10, %v1126_v33  ;;  %v634_v15 = vadd.f32 %v935_v11, %v1126_v33 }
 0x100   :  { %v497_v16 = vpop.f32.mrf.mxu0  ;;  %v625_v17 = vpop.f32.mrf.mxu1 }
 0x101   :  { %729 = vst [vmem:[%s1387_s3 + $0xc8] sm:$0xff] %v665_v12  ;;  %761 = vst [vmem:[%s1387_s3 + $0x1c8] sm:$0xff] %v697_v13  ;;  %v670_v18 = vmax.f32 %v506_v14, 0.0  ;;  %v702_v19 = vmax.f32 %v634_v15, 0.0  ;;  %v498_v20 = vadd.f32 %v1126_v33, %v497_v16  ;;  %v626_v21 = vadd.f32 %v1126_v33, %v625_v17 }
 0x102   :  { %v904_v22 = vpop.f32.mrf.mxu0  ;;  %v936_v23 = vpop.f32.mrf.mxu1 }
 0x103   :  { %734 = vst [vmem:[%s1387_s3 + $0xf0] sm:$0xff] %v670_v18  ;;  %766 = vst [vmem:[%s1387_s3 + $0x1f0] sm:$0xff] %v702_v19  ;;  %v668_v24 = vmax.f32 %v498_v20, 0.0  ;;  %v700_v25 = vmax.f32 %v626_v21, 0.0  ;;  %v509_v26 = vadd.f32 %v904_v22, %v1126_v33  ;;  %v637_v27 = vadd.f32 %v936_v23, %v1126_v33 }
 0x104   :  { %v500_v28 = vpop.f32.mrf.mxu0  ;;  %v628_v29 = vpop.f32.mrf.mxu1 }
 0x105   :  { %732 = vst [vmem:[%s1387_s3 + $0xe0] sm:$0xff] %v668_v24  ;;  %764 = vst [vmem:[%s1387_s3 + $0x1e0] sm:$0xff] %v700_v25  ;;  %v671_v30 = vmax.f32 %v509_v26, 0.0  ;;  %v703_v31 = vmax.f32 %v637_v27, 0.0  ;;  %v501_v32 = vadd.f32 %v1126_v33, %v500_v28  ;;  %v629_v34 = vadd.f32 %v1126_v33, %v628_v29 }
 0x107   :  { %735 = vst [vmem:[%s1387_s3 + $0xf8] sm:$0xff] %v671_v30  ;;  %767 = vst [vmem:[%s1387_s3 + $0x1f8] sm:$0xff] %v703_v31  ;;  %v669_v35 = vmax.f32 %v501_v32, 0.0  ;;  %v701_v36 = vmax.f32 %v629_v34, 0.0 }
 0x109   :  { %733 = vst [vmem:[%s1387_s3 + $0xe8] sm:$0xff] %v669_v35  ;;  %765 = vst [vmem:[%s1387_s3 + $0x1e8] sm:$0xff] %v701_v36 }

// kernel: _lambda_.10
= control target key start
LH: loop header
LB: loop body
LE: loop exit
PB: predicated region body
PF: predicated region fallthrough
CT: control target
= control target key end

     0   :  { %s1254_s1 = inlined_call_operand.vmem [shape: bf16[1,512,128], index: 1, kind: input, shape index: {}]   ;;  %s1255_s0 = inlined_call_operand.vmem [shape: bf16[1,128,512], index: 0, kind: input, shape index: {}]   ;;  %s1256_s2 = inlined_call_operand.vmem [shape: f32[1,128], index: 2, kind: input, shape index: {}]   ;;  %s1257_s3 = inlined_call_operand.vmem [shape: f32[1,128,128], index: 3, kind: output, shape index: {}]  }
   0x1   :  { %v893_v0 = vld [vmem:[%s1254_s1 + $0x78] sm:$0xff]   ;;  %v897_v4 = vld [vmem:[%s1254_s1 + $0x70] sm:$0xff]   ;;  %v901_v8 = vld [vmem:[%s1254_s1 + $0x68] sm:$0xff]  }
   0x2   :  { %v894_v1 = vld [vmem:[%s1254_s1 + $0xf8] sm:$0xff]   ;;  %765 = vmatprep.subr.bf16.mxu0 %v893_v0  ;;  %v898_v5 = vld [vmem:[%s1254_s1 + $0xf0] sm:$0xff]   ;;  %v902_v9 = vld [vmem:[%s1254_s1 + $0xe8] sm:$0xff]  }
   0x3   :  { %v895_v2 = vld [vmem:[%s1254_s1 + $0x38] sm:$0xff]   ;;  %829 = vmatprep.subr.bf16.mxu1 %v894_v1  ;;  %v899_v6 = vld [vmem:[%s1254_s1 + $0x30] sm:$0xff]   ;;  %v903_v10 = vld [vmem:[%s1254_s1 + $0x28] sm:$0xff]  }
   0x4   :  { %v896_v3 = vld [vmem:[%s1254_s1 + $0xb8] sm:$0xff]   ;;  %766 = vmatpush3.bf16.msra.mxu0 %v895_v2  ;;  %v900_v7 = vld [vmem:[%s1254_s1 + $0xb0] sm:$0xff]   ;;  %v904_v11 = vld [vmem:[%s1254_s1 + $0xa8] sm:$0xff]  }
   0x5   :  { %830 = vmatpush3.bf16.msra.mxu1 %v896_v3  ;;  %767 = vmatprep.subr.bf16.mxu0 %v897_v4  ;;  %v905_v12 = vld [vmem:[%s1254_s1 + $0x60] sm:$0xff]   ;;  %v909_v16 = vld [vmem:[%s1254_s1 + $0x58] sm:$0xff]   ;;  %v913_v20 = vld [vmem:[%s1254_s1 + $0x50] sm:$0xff]  }
   0x6   :  { %831 = vmatprep.subr.bf16.mxu1 %v898_v5  ;;  %v906_v13 = vld [vmem:[%s1254_s1 + $0xe0] sm:$0xff]   ;;  %v910_v17 = vld [vmem:[%s1254_s1 + $0xd8] sm:$0xff]   ;;  %v914_v21 = vld [vmem:[%s1254_s1 + $0xd0] sm:$0xff]  }
   0x7   :  { %v907_v14 = vld [vmem:[%s1254_s1 + $0x20] sm:$0xff]   ;;  %v911_v18 = vld [vmem:[%s1254_s1 + $0x18] sm:$0xff]   ;;  %v915_v22 = vld [vmem:[%s1254_s1 + $0x10] sm:$0xff]  }
   0x8   :  { %768 = vmatpush3.bf16.msra.mxu0 %v899_v6  ;;  %v908_v15 = vld [vmem:[%s1254_s1 + $0xa0] sm:$0xff]   ;;  %v912_v19 = vld [vmem:[%s1254_s1 + $0x98] sm:$0xff]   ;;  %v916_v23 = vld [vmem:[%s1254_s1 + $0x90] sm:$0xff]  }
   0x9   :  { %832 = vmatpush3.bf16.msra.mxu1 %v900_v7  ;;  %769 = vmatprep.subr.bf16.mxu0 %v901_v8  ;;  %v917_v24 = vld [vmem:[%s1254_s1 + $0x48] sm:$0xff]   ;;  %v921_v28 = vld [vmem:[%s1254_s1 + $0x40] sm:$0xff]  }
   0xa   :  { %833 = vmatprep.subr.bf16.mxu1 %v902_v9  ;;  %v918_v25 = vld [vmem:[%s1254_s1 + $0xc8] sm:$0xff]   ;;  %v922_v29 = vld [vmem:[%s1254_s1 + $0xc0] sm:$0xff]  }
   0xb   :  { %v919_v26 = vld [vmem:[%s1254_s1 + $0x8] sm:$0xff]   ;;  %v923_v30 = vld [vmem:[%s1254_s1] sm:$0xff]  }
   0xc   :  { %770 = vmatpush3.bf16.msra.mxu0 %v903_v10  ;;  %v920_v27 = vld [vmem:[%s1254_s1 + $0x88] sm:$0xff]   ;;  %v924_v31 = vld [vmem:[%s1254_s1 + $0x80] sm:$0xff]  }
   0xd   :  { %834 = vmatpush3.bf16.msra.mxu1 %v904_v11  ;;  %771 = vmatprep.subr.bf16.mxu0 %v905_v12  ;;  %v925_v32 = vld [vmem:[%s1255_s0] ss:$16 sps:$4 sm:$0xff]   ;;  %v927_v33 = vld [vmem:[%s1255_s0 + $0x4] ss:$16 sps:$4 sm:$0xff]   ;;  %v928_v34 = vld [vmem:[%s1255_s0 + $0x8] ss:$16 sps:$4 sm:$0xff]  }
   0xe   :  { %835 = vmatprep.subr.bf16.mxu1 %v906_v13  ;;  %v930_v35 = vld [vmem:[%s1255_s0 + $0xc] ss:$16 sps:$4 sm:$0xff]   ;;  %502 = vmatprep.mubr.bf16.mxu0 %v927_v33  ;;  %v931_v36 = vld [vmem:[%s1255_s0 + $0x24] ss:$16 sps:$4 sm:$0xff]   ;;  %v935_v38 = vld [vmem:[%s1255_s0 + $0x20] ss:$16 sps:$4 sm:$0xff]  }
   0xf   :  { %599 = vmatprep.mubr.bf16.mxu1 %v930_v35  ;;  %v933_v37 = vld [vmem:[%s1255_s0 + $0x2c] ss:$16 sps:$4 sm:$0xff]   ;;  %v936_v39 = vld [vmem:[%s1255_s0 + $0x28] ss:$16 sps:$4 sm:$0xff]   ;;  %v937_v40 = vld [vmem:[%s1255_s0 + $0x44] ss:$16 sps:$4 sm:$0xff]  }
  0x10   :  { %772 = vmatpush3.bf16.msra.mxu0 %v907_v14  ;;  %v939_v41 = vld [vmem:[%s1255_s0 + $0x4c] ss:$16 sps:$4 sm:$0xff]   ;;  %v941_v42 = vld [vmem:[%s1255_s0 + $0x40] ss:$16 sps:$4 sm:$0xff]   ;;  %v942_v43 = vld [vmem:[%s1255_s0 + $0x48] ss:$16 sps:$4 sm:$0xff]  }
  0x11   :  { %836 = vmatpush3.bf16.msra.mxu1 %v908_v15  ;;  %773 = vmatprep.subr.bf16.mxu0 %v909_v16  ;;  %v943_v44 = vld [vmem:[%s1255_s0 + $0x64] ss:$16 sps:$4 sm:$0xff]   ;;  %v945_v45 = vld [vmem:[%s1255_s0 + $0x6c] ss:$16 sps:$4 sm:$0xff]   ;;  %v947_v46 = vld [vmem:[%s1255_s0 + $0x60] ss:$16 sps:$4 sm:$0xff]  }
  0x12   :  { %837 = vmatprep.subr.bf16.mxu1 %v910_v17  ;;  %v948_v47 = vld [vmem:[%s1255_s0 + $0x68] ss:$16 sps:$4 sm:$0xff]   ;;  %v949_v48 = vld [vmem:[%s1255_s0 + $0x84] ss:$16 sps:$4 sm:$0xff]   ;;  %v951_v49 = vld [vmem:[%s1255_s0 + $0x8c] ss:$16 sps:$4 sm:$0xff]  }
  0x13   :  { %v953_v50 = vld [vmem:[%s1255_s0 + $0x80] ss:$16 sps:$4 sm:$0xff]   ;;  %v954_v51 = vld [vmem:[%s1255_s0 + $0x88] ss:$16 sps:$4 sm:$0xff]   ;;  %v955_v52 = vld [vmem:[%s1255_s0 + $0xa4] ss:$16 sps:$4 sm:$0xff]  }
  0x14   :  { %774 = vmatpush3.bf16.msra.mxu0 %v911_v18  ;;  %v957_v53 = vld [vmem:[%s1255_s0 + $0xac] ss:$16 sps:$4 sm:$0xff]   ;;  %v959_v54 = vld [vmem:[%s1255_s0 + $0xa0] ss:$16 sps:$4 sm:$0xff]   ;;  %v960_v55 = vld [vmem:[%s1255_s0 + $0xa8] ss:$16 sps:$4 sm:$0xff]  }
  0x15   :  { %838 = vmatpush3.bf16.msra.mxu1 %v912_v19  ;;  %775 = vmatprep.subr.bf16.mxu0 %v913_v20  ;;  %v961_v56 = vld [vmem:[%s1255_s0 + $0xc4] ss:$16 sps:$4 sm:$0xff]   ;;  %v963_v57 = vld [vmem:[%s1255_s0 + $0xcc] ss:$16 sps:$4 sm:$0xff]   ;;  %v965_v58 = vld [vmem:[%s1255_s0 + $0xc0] ss:$16 sps:$4 sm:$0xff]  }
  0x16   :  { %839 = vmatprep.subr.bf16.mxu1 %v914_v21  ;;  %v966_v59 = vld [vmem:[%s1255_s0 + $0xc8] ss:$16 sps:$4 sm:$0xff]   ;;  %v967_v60 = vld [vmem:[%s1255_s0 + $0xe4] ss:$16 sps:$4 sm:$0xff]   ;;  %v969_v61 = vld [vmem:[%s1255_s0 + $0xec] ss:$16 sps:$4 sm:$0xff]  }
  0x17   :  { %v971_v62 = vld [vmem:[%s1255_s0 + $0xe0] ss:$16 sps:$4 sm:$0xff]   ;;  %v972_v63 = vld [vmem:[%s1255_s0 + $0xe8] ss:$16 sps:$4 sm:$0xff]  }
  0x18   :  { %776 = vmatpush3.bf16.msra.mxu0 %v915_v22  ;;  %v1188_v2 = vld [vmem:[%s1256_s2] ss:$0 sm:$0xff] }
  0x19   :  { %840 = vmatpush3.bf16.msra.mxu1 %v916_v23  ;;  %777 = vmatprep.subr.bf16.mxu0 %v917_v24 }
  0x1a   :  { %841 = vmatprep.subr.bf16.mxu1 %v918_v25 }
  0x1c   :  { %778 = vmatpush3.bf16.msra.mxu0 %v919_v26 }
  0x1d   :  { %842 = vmatpush3.bf16.msra.mxu1 %v920_v27  ;;  %779 = vmatprep.subr.bf16.mxu0 %v921_v28 }
  0x1e   :  { %843 = vmatprep.subr.bf16.mxu1 %v922_v29 }
  0x20   :  { %780 = vmatpush3.bf16.msra.mxu0 %v923_v30 }
  0x21   :  { %844 = vmatpush3.bf16.msra.mxu1 %v924_v31 }
  0x23   :  { %503 = vmatmul.mubr.bf16.vlgmr.msra.gmra.mxu0 %v925_v32 }
  0x24   :  { %600 = vmatmul.mubr.bf16.vlgmr.msra.gmra.mxu1 %v928_v34  ;;  %510 = vmatprep.mubr.bf16.mxu0 %v931_v36 }
  0x25   :  { %607 = vmatprep.mubr.bf16.mxu1 %v933_v37 }
  0x2b   :  { %511 = vmatmul.mubr.bf16.gmra.mxu0 %v935_v38 }
  0x2c   :  { %608 = vmatmul.mubr.bf16.gmra.mxu1 %v936_v39  ;;  %518 = vmatprep.mubr.bf16.mxu0 %v937_v40 }
  0x2d   :  { %615 = vmatprep.mubr.bf16.mxu1 %v939_v41 }
  0x33   :  { %519 = vmatmul.mubr.bf16.gmra.mxu0 %v941_v42 }
  0x34   :  { %616 = vmatmul.mubr.bf16.gmra.mxu1 %v942_v43  ;;  %526 = vmatprep.mubr.bf16.mxu0 %v943_v44 }
  0x35   :  { %623 = vmatprep.mubr.bf16.mxu1 %v945_v45 }
  0x3b   :  { %527 = vmatmul.mubr.bf16.gmra.mxu0 %v947_v46 }
  0x3c   :  { %624 = vmatmul.mubr.bf16.gmra.mxu1 %v948_v47  ;;  %534 = vmatprep.mubr.bf16.mxu0 %v949_v48 }
  0x3d   :  { %631 = vmatprep.mubr.bf16.mxu1 %v951_v49 }
  0x43   :  { %535 = vmatmul.mubr.bf16.gmra.mxu0 %v953_v50 }
  0x44   :  { %632 = vmatmul.mubr.bf16.gmra.mxu1 %v954_v51  ;;  %542 = vmatprep.mubr.bf16.mxu0 %v955_v52 }
  0x45   :  { %639 = vmatprep.mubr.bf16.mxu1 %v957_v53 }
  0x4b   :  { %543 = vmatmul.mubr.bf16.gmra.mxu0 %v959_v54 }
  0x4c   :  { %640 = vmatmul.mubr.bf16.gmra.mxu1 %v960_v55  ;;  %550 = vmatprep.mubr.bf16.mxu0 %v961_v56 }
  0x4d   :  { %647 = vmatprep.mubr.bf16.mxu1 %v963_v57 }
  0x53   :  { %551 = vmatmul.mubr.bf16.gmra.mxu0 %v965_v58 }
  0x54   :  { %648 = vmatmul.mubr.bf16.gmra.mxu1 %v966_v59  ;;  %558 = vmatprep.mubr.bf16.mxu0 %v967_v60 }
  0x55   :  { %655 = vmatprep.mubr.bf16.mxu1 %v969_v61 }
  0x5b   :  { %559 = vmatmul.mubr.bf16.gmra.mxu0 %v971_v62 }
  0x5c   :  { %656 = vmatmul.mubr.bf16.gmra.mxu1 %v972_v63 }
  0xe3   :  { %v781_v0 = vpop.f32.mrf.mxu0 }
  0xe4   :  { %v845_v1 = vpop.f32.mrf.mxu1 }
  0xe5   :  { %v782_v3 = vpop.f32.mrf.mxu0 }
  0xe6   :  { %v783_v4 = vadd.f32 %v782_v3, %v781_v0  ;;  %v846_v5 = vpop.f32.mrf.mxu1 }
  0xe7   :  { %v784_v6 = vpop.f32.mrf.mxu0  ;;  %v847_v8 = vadd.f32 %v846_v5, %v845_v1 }
  0xe8   :  { %v505_v7 = vadd.f32 %v783_v4, %v1188_v2  ;;  %v848_v9 = vpop.f32.mrf.mxu1 }
  0xe9   :  { %v785_v10 = vpop.f32.mrf.mxu0 }
  0xea   :  { %v602_v11 = vadd.f32 %v847_v8, %v505_v7  ;;  %v786_v12 = vadd.f32 %v785_v10, %v784_v6  ;;  %v849_v13 = vpop.f32.mrf.mxu1 }
  0xeb   :  { %v787_v14 = vpop.f32.mrf.mxu0  ;;  %v850_v17 = vadd.f32 %v849_v13, %v848_v9 }
  0xec   :  { %v664_v15 = vmax.f32 %v602_v11, 0.0  ;;  %v508_v16 = vadd.f32 %v786_v12, %v1188_v2  ;;  %v851_v18 = vpop.f32.mrf.mxu1 }
  0xed   :  { %v788_v19 = vpop.f32.mrf.mxu0 }
  0xee   :  { %680 = vst [vmem:[%s1257_s3] sm:$0xff] %v664_v15  ;;  %v605_v20 = vadd.f32 %v850_v17, %v508_v16  ;;  %v789_v21 = vadd.f32 %v788_v19, %v787_v14  ;;  %v852_v22 = vpop.f32.mrf.mxu1 }
  0xef   :  { %v790_v23 = vpop.f32.mrf.mxu0  ;;  %v853_v26 = vadd.f32 %v852_v22, %v851_v18 }
  0xf0   :  { %v665_v24 = vmax.f32 %v605_v20, 0.0  ;;  %v513_v25 = vadd.f32 %v789_v21, %v1188_v2  ;;  %v854_v27 = vpop.f32.mrf.mxu1 }
  0xf1   :  { %v791_v28 = vpop.f32.mrf.mxu0 }
  0xf2   :  { %681 = vst [vmem:[%s1257_s3 + $0x8] sm:$0xff] %v665_v24  ;;  %v610_v29 = vadd.f32 %v853_v26, %v513_v25  ;;  %v792_v30 = vadd.f32 %v791_v28, %v790_v23  ;;  %v855_v31 = vpop.f32.mrf.mxu1 }
  0xf3   :  { %v793_v32 = vpop.f32.mrf.mxu0  ;;  %v856_v35 = vadd.f32 %v855_v31, %v854_v27 }
  0xf4   :  { %v666_v33 = vmax.f32 %v610_v29, 0.0  ;;  %v516_v34 = vadd.f32 %v792_v30, %v1188_v2  ;;  %v857_v36 = vpop.f32.mrf.mxu1 }
  0xf5   :  { %v794_v37 = vpop.f32.mrf.mxu0 }
  0xf6   :  { %682 = vst [vmem:[%s1257_s3 + $0x10] sm:$0xff] %v666_v33  ;;  %v613_v38 = vadd.f32 %v856_v35, %v516_v34  ;;  %v795_v39 = vadd.f32 %v794_v37, %v793_v32  ;;  %v858_v40 = vpop.f32.mrf.mxu1 }
  0xf7   :  { %v796_v41 = vpop.f32.mrf.mxu0  ;;  %v859_v44 = vadd.f32 %v858_v40, %v857_v36 }
  0xf8   :  { %v667_v42 = vmax.f32 %v613_v38, 0.0  ;;  %v521_v43 = vadd.f32 %v795_v39, %v1188_v2  ;;  %v860_v45 = vpop.f32.mrf.mxu1 }
  0xf9   :  { %v797_v46 = vpop.f32.mrf.mxu0 }
  0xfa   :  { %683 = vst [vmem:[%s1257_s3 + $0x18] sm:$0xff] %v667_v42  ;;  %v618_v47 = vadd.f32 %v859_v44, %v521_v43  ;;  %v798_v48 = vadd.f32 %v797_v46, %v796_v41  ;;  %v861_v49 = vpop.f32.mrf.mxu1 }
  0xfb   :  { %v799_v50 = vpop.f32.mrf.mxu0  ;;  %v862_v53 = vadd.f32 %v861_v49, %v860_v45 }
  0xfc   :  { %v668_v51 = vmax.f32 %v618_v47, 0.0  ;;  %v524_v52 = vadd.f32 %v798_v48, %v1188_v2  ;;  %v863_v54 = vpop.f32.mrf.mxu1 }
  0xfd   :  { %v800_v55 = vpop.f32.mrf.mxu0 }
  0xfe   :  { %684 = vst [vmem:[%s1257_s3 + $0x20] sm:$0xff] %v668_v51  ;;  %v621_v56 = vadd.f32 %v862_v53, %v524_v52  ;;  %v801_v57 = vadd.f32 %v800_v55, %v799_v50  ;;  %v864_v58 = vpop.f32.mrf.mxu1 }
  0xff   :  { %v802_v59 = vpop.f32.mrf.mxu0  ;;  %v865_v62 = vadd.f32 %v864_v58, %v863_v54 }
 0x100   :  { %v669_v60 = vmax.f32 %v621_v56, 0.0  ;;  %v529_v61 = vadd.f32 %v801_v57, %v1188_v2  ;;  %v866_v63 = vpop.f32.mrf.mxu1 }
 0x101   :  { %v803_v0 = vpop.f32.mrf.mxu0 }
 0x102   :  { %685 = vst [vmem:[%s1257_s3 + $0x28] sm:$0xff] %v669_v60  ;;  %v626_v1 = vadd.f32 %v865_v62, %v529_v61  ;;  %v804_v3 = vadd.f32 %v803_v0, %v802_v59  ;;  %v867_v4 = vpop.f32.mrf.mxu1 }
 0x103   :  { %v805_v5 = vpop.f32.mrf.mxu0  ;;  %v868_v8 = vadd.f32 %v867_v4, %v866_v63 }
 0x104   :  { %v670_v6 = vmax.f32 %v626_v1, 0.0  ;;  %v532_v7 = vadd.f32 %v804_v3, %v1188_v2  ;;  %v869_v9 = vpop.f32.mrf.mxu1 }
 0x105   :  { %v806_v10 = vpop.f32.mrf.mxu0 }
 0x106   :  { %686 = vst [vmem:[%s1257_s3 + $0x30] sm:$0xff] %v670_v6  ;;  %v629_v11 = vadd.f32 %v868_v8, %v532_v7  ;;  %v807_v12 = vadd.f32 %v806_v10, %v805_v5  ;;  %v870_v13 = vpop.f32.mrf.mxu1 }
 0x107   :  { %v808_v14 = vpop.f32.mrf.mxu0  ;;  %v871_v17 = vadd.f32 %v870_v13, %v869_v9 }
 0x108   :  { %v671_v15 = vmax.f32 %v629_v11, 0.0  ;;  %v537_v16 = vadd.f32 %v807_v12, %v1188_v2  ;;  %v872_v18 = vpop.f32.mrf.mxu1 }
 0x109   :  { %v809_v19 = vpop.f32.mrf.mxu0 }
 0x10a   :  { %687 = vst [vmem:[%s1257_s3 + $0x38] sm:$0xff] %v671_v15  ;;  %v634_v20 = vadd.f32 %v871_v17, %v537_v16  ;;  %v810_v21 = vadd.f32 %v809_v19, %v808_v14  ;;  %v873_v22 = vpop.f32.mrf.mxu1 }
 0x10b   :  { %v811_v23 = vpop.f32.mrf.mxu0  ;;  %v874_v26 = vadd.f32 %v873_v22, %v872_v18 }
 0x10c   :  { %v672_v24 = vmax.f32 %v634_v20, 0.0  ;;  %v540_v25 = vadd.f32 %v810_v21, %v1188_v2  ;;  %v875_v27 = vpop.f32.mrf.mxu1 }
 0x10d   :  { %v812_v28 = vpop.f32.mrf.mxu0 }
 0x10e   :  { %688 = vst [vmem:[%s1257_s3 + $0x40] sm:$0xff] %v672_v24  ;;  %v637_v29 = vadd.f32 %v874_v26, %v540_v25  ;;  %v813_v30 = vadd.f32 %v812_v28, %v811_v23  ;;  %v876_v31 = vpop.f32.mrf.mxu1 }
 0x10f   :  { %v814_v32 = vpop.f32.mrf.mxu0  ;;  %v877_v35 = vadd.f32 %v876_v31, %v875_v27 }
 0x110   :  { %v673_v33 = vmax.f32 %v637_v29, 0.0  ;;  %v545_v34 = vadd.f32 %v813_v30, %v1188_v2  ;;  %v878_v36 = vpop.f32.mrf.mxu1 }
 0x111   :  { %v815_v37 = vpop.f32.mrf.mxu0 }
 0x112   :  { %689 = vst [vmem:[%s1257_s3 + $0x48] sm:$0xff] %v673_v33  ;;  %v642_v38 = vadd.f32 %v877_v35, %v545_v34  ;;  %v816_v39 = vadd.f32 %v815_v37, %v814_v32  ;;  %v879_v40 = vpop.f32.mrf.mxu1 }
 0x113   :  { %v817_v41 = vpop.f32.mrf.mxu0  ;;  %v880_v44 = vadd.f32 %v879_v40, %v878_v36 }
 0x114   :  { %v674_v42 = vmax.f32 %v642_v38, 0.0  ;;  %v548_v43 = vadd.f32 %v816_v39, %v1188_v2  ;;  %v881_v45 = vpop.f32.mrf.mxu1 }
 0x115   :  { %v818_v46 = vpop.f32.mrf.mxu0 }
 0x116   :  { %690 = vst [vmem:[%s1257_s3 + $0x50] sm:$0xff] %v674_v42  ;;  %v645_v47 = vadd.f32 %v880_v44, %v548_v43  ;;  %v819_v48 = vadd.f32 %v818_v46, %v817_v41  ;;  %v882_v49 = vpop.f32.mrf.mxu1 }
 0x117   :  { %v820_v50 = vpop.f32.mrf.mxu0  ;;  %v883_v53 = vadd.f32 %v882_v49, %v881_v45 }
 0x118   :  { %v675_v51 = vmax.f32 %v645_v47, 0.0  ;;  %v553_v52 = vadd.f32 %v819_v48, %v1188_v2  ;;  %v884_v54 = vpop.f32.mrf.mxu1 }
 0x119   :  { %v821_v55 = vpop.f32.mrf.mxu0 }
 0x11a   :  { %691 = vst [vmem:[%s1257_s3 + $0x58] sm:$0xff] %v675_v51  ;;  %v650_v56 = vadd.f32 %v883_v53, %v553_v52  ;;  %v822_v57 = vadd.f32 %v821_v55, %v820_v50  ;;  %v885_v58 = vpop.f32.mrf.mxu1 }
 0x11b   :  { %v823_v59 = vpop.f32.mrf.mxu0  ;;  %v886_v62 = vadd.f32 %v885_v58, %v884_v54 }
 0x11c   :  { %v676_v60 = vmax.f32 %v650_v56, 0.0  ;;  %v556_v61 = vadd.f32 %v822_v57, %v1188_v2  ;;  %v887_v63 = vpop.f32.mrf.mxu1 }
 0x11d   :  { %v824_v0 = vpop.f32.mrf.mxu0 }
 0x11e   :  { %692 = vst [vmem:[%s1257_s3 + $0x60] sm:$0xff] %v676_v60  ;;  %v653_v1 = vadd.f32 %v886_v62, %v556_v61  ;;  %v825_v3 = vadd.f32 %v824_v0, %v823_v59  ;;  %v888_v4 = vpop.f32.mrf.mxu1 }
 0x11f   :  { %v826_v5 = vpop.f32.mrf.mxu0  ;;  %v889_v8 = vadd.f32 %v888_v4, %v887_v63 }
 0x120   :  { %v677_v6 = vmax.f32 %v653_v1, 0.0  ;;  %v561_v7 = vadd.f32 %v825_v3, %v1188_v2  ;;  %v890_v9 = vpop.f32.mrf.mxu1 }
 0x121   :  { %v827_v10 = vpop.f32.mrf.mxu0 }
 0x122   :  { %693 = vst [vmem:[%s1257_s3 + $0x68] sm:$0xff] %v677_v6  ;;  %v658_v11 = vadd.f32 %v889_v8, %v561_v7  ;;  %v828_v12 = vadd.f32 %v827_v10, %v826_v5  ;;  %v891_v13 = vpop.f32.mrf.mxu1 }
 0x123   :  { %v892_v16 = vadd.f32 %v891_v13, %v890_v9 }
 0x124   :  { %v678_v14 = vmax.f32 %v658_v11, 0.0  ;;  %v564_v15 = vadd.f32 %v828_v12, %v1188_v2 }
 0x126   :  { %694 = vst [vmem:[%s1257_s3 + $0x70] sm:$0xff] %v678_v14  ;;  %v661_v17 = vadd.f32 %v892_v16, %v564_v15 }
 0x128   :  { %v679_v18 = vmax.f32 %v661_v17, 0.0 }
 0x12a   :  { %695 = vst [vmem:[%s1257_s3 + $0x78] sm:$0xff] %v679_v18 }

// kernel: _lambda_.11
= control target key start
LH: loop header
LB: loop body
LE: loop exit
PB: predicated region body
PF: predicated region fallthrough
CT: control target
= control target key end

     0   :  { %s2444_s1 = inlined_call_operand.vmem [shape: bf16[1,1024,128], index: 1, kind: input, shape index: {}]   ;;  %s2445_s0 = inlined_call_operand.vmem [shape: bf16[1,128,1024], index: 0, kind: input, shape index: {}]   ;;  %s2446_s2 = inlined_call_operand.vmem [shape: f32[1,128], index: 2, kind: input, shape index: {}]   ;;  %s2447_s3 = inlined_call_operand.vmem [shape: f32[1,128,128], index: 3, kind: output, shape index: {}]  }
   0x1   :  { %v1727_v0 = vld [vmem:[%s2444_s1 + $0x78] sm:$0xff]   ;;  %v1731_v4 = vld [vmem:[%s2444_s1 + $0x70] sm:$0xff]   ;;  %v1735_v8 = vld [vmem:[%s2444_s1 + $0x68] sm:$0xff]  }
   0x2   :  { %v1728_v1 = vld [vmem:[%s2444_s1 + $0xf8] sm:$0xff]   ;;  %1471 = vmatprep.subr.bf16.mxu0 %v1727_v0  ;;  %v1732_v5 = vld [vmem:[%s2444_s1 + $0xf0] sm:$0xff]   ;;  %v1736_v9 = vld [vmem:[%s2444_s1 + $0xe8] sm:$0xff]  }
   0x3   :  { %v1729_v2 = vld [vmem:[%s2444_s1 + $0x38] sm:$0xff]   ;;  %1535 = vmatprep.subr.bf16.mxu1 %v1728_v1  ;;  %v1733_v6 = vld [vmem:[%s2444_s1 + $0x30] sm:$0xff]   ;;  %v1737_v10 = vld [vmem:[%s2444_s1 + $0x28] sm:$0xff]  }
   0x4   :  { %v1730_v3 = vld [vmem:[%s2444_s1 + $0xb8] sm:$0xff]   ;;  %1472 = vmatpush3.bf16.msra.mxu0 %v1729_v2  ;;  %v1734_v7 = vld [vmem:[%s2444_s1 + $0xb0] sm:$0xff]   ;;  %v1738_v11 = vld [vmem:[%s2444_s1 + $0xa8] sm:$0xff]  }
   0x5   :  { %1536 = vmatpush3.bf16.msra.mxu1 %v1730_v3  ;;  %1473 = vmatprep.subr.bf16.mxu0 %v1731_v4  ;;  %v1739_v12 = vld [vmem:[%s2444_s1 + $0x60] sm:$0xff]   ;;  %v1743_v16 = vld [vmem:[%s2444_s1 + $0x58] sm:$0xff]   ;;  %v1747_v20 = vld [vmem:[%s2444_s1 + $0x50] sm:$0xff]  }
   0x6   :  { %1537 = vmatprep.subr.bf16.mxu1 %v1732_v5  ;;  %v1740_v13 = vld [vmem:[%s2444_s1 + $0xe0] sm:$0xff]   ;;  %v1744_v17 = vld [vmem:[%s2444_s1 + $0xd8] sm:$0xff]   ;;  %v1748_v21 = vld [vmem:[%s2444_s1 + $0xd0] sm:$0xff]  }
   0x7   :  { %v1741_v14 = vld [vmem:[%s2444_s1 + $0x20] sm:$0xff]   ;;  %v1745_v18 = vld [vmem:[%s2444_s1 + $0x18] sm:$0xff]   ;;  %v1749_v22 = vld [vmem:[%s2444_s1 + $0x10] sm:$0xff]  }
   0x8   :  { %1474 = vmatpush3.bf16.msra.mxu0 %v1733_v6  ;;  %v1742_v15 = vld [vmem:[%s2444_s1 + $0xa0] sm:$0xff]   ;;  %v1746_v19 = vld [vmem:[%s2444_s1 + $0x98] sm:$0xff]   ;;  %v1750_v23 = vld [vmem:[%s2444_s1 + $0x90] sm:$0xff]  }
   0x9   :  { %1538 = vmatpush3.bf16.msra.mxu1 %v1734_v7  ;;  %1475 = vmatprep.subr.bf16.mxu0 %v1735_v8  ;;  %v1751_v24 = vld [vmem:[%s2444_s1 + $0x48] sm:$0xff]   ;;  %v1755_v28 = vld [vmem:[%s2444_s1 + $0x40] sm:$0xff]   ;;  %v1759_v40 = vld [vmem:[%s2444_s1 + $0x178] sm:$0xff]  }
   0xa   :  { %1539 = vmatprep.subr.bf16.mxu1 %v1736_v9  ;;  %v1752_v25 = vld [vmem:[%s2444_s1 + $0xc8] sm:$0xff]   ;;  %v1756_v29 = vld [vmem:[%s2444_s1 + $0xc0] sm:$0xff]   ;;  %v1760_v41 = vld [vmem:[%s2444_s1 + $0x138] sm:$0xff]  }
   0xb   :  { %v1753_v26 = vld [vmem:[%s2444_s1 + $0x8] sm:$0xff]   ;;  %v1757_v30 = vld [vmem:[%s2444_s1] sm:$0xff]   ;;  %v1761_v42 = vld [vmem:[%s2444_s1 + $0x1f8] sm:$0xff]  }
   0xc   :  { %1476 = vmatpush3.bf16.msra.mxu0 %v1737_v10  ;;  %v1754_v27 = vld [vmem:[%s2444_s1 + $0x88] sm:$0xff]   ;;  %v1758_v31 = vld [vmem:[%s2444_s1 + $0x80] sm:$0xff]   ;;  %v1762_v43 = vld [vmem:[%s2444_s1 + $0x1b8] sm:$0xff]  }
   0xd   :  { %1540 = vmatpush3.bf16.msra.mxu1 %v1738_v11  ;;  %1477 = vmatprep.subr.bf16.mxu0 %v1739_v12  ;;  %v15_v32 = vld [vmem:[%s2445_s0] sm:$0xff]  ;;  %v16_v34 = vld [vmem:[%s2445_s0 + $0x8] sm:$0xff]  ;;  %v1763_v50 = vld [vmem:[%s2444_s1 + $0x170] sm:$0xff]  }
   0xe   :  { %1541 = vmatprep.subr.bf16.mxu1 %v1740_v13  ;;  %v19_v33 = vld [vmem:[%s2445_s0 + $0x20] sm:$0xff]  ;;  %v20_v37 = vld [vmem:[%s2445_s0 + $0x28] sm:$0xff]  ;;  %v1764_v52 = vld [vmem:[%s2444_s1 + $0x130] sm:$0xff]  }
   0xf   :  { %v1343_v35 = vcombine.low %v15_v32, %v19_v33  ;;  %v1344_v36 = vcombine.high %v15_v32, %v19_v33  ;;  %v1345_v38 = vcombine.low %v16_v34, %v20_v37  ;;  %v1346_v39 = vcombine.high %v16_v34, %v20_v37  ;;  %v23_v44 = vld [vmem:[%s2445_s0 + $0x40] sm:$0xff]  ;;  %v24_v47 = vld [vmem:[%s2445_s0 + $0x48] sm:$0xff]  ;;  %v1765_v54 = vld [vmem:[%s2444_s1 + $0x1f0] sm:$0xff]  }
  0x10   :  { %1478 = vmatpush3.bf16.msra.mxu0 %v1741_v14  ;;  %v27_v45 = vld [vmem:[%s2445_s0 + $0x60] sm:$0xff]  ;;  %v28_v48 = vld [vmem:[%s2445_s0 + $0x68] sm:$0xff]  ;;  %v1766_v55 = vld [vmem:[%s2444_s1 + $0x1b0] sm:$0xff]  }
  0x11   :  { %1542 = vmatpush3.bf16.msra.mxu1 %v1742_v15  ;;  %1479 = vmatprep.subr.bf16.mxu0 %v1743_v16  ;;  %v1352_v46 = vcombine.high %v23_v44, %v27_v45  ;;  %v1354_v49 = vcombine.high %v24_v47, %v28_v48  ;;  %v1351_v51 = vcombine.low %v23_v44, %v27_v45  ;;  %v31_v56 = vld [vmem:[%s2445_s0 + $0x80] sm:$0xff]  ;;  %v32_v58 = vld [vmem:[%s2445_s0 + $0x88] sm:$0xff]  ;;  %v1781_v32 = vld [vmem:[%s2444_s1 + $0x1d0] sm:$0xff]  }
  0x12   :  { %1543 = vmatprep.subr.bf16.mxu1 %v1744_v17  ;;  %950 = vmatprep.mubr.bf16.mxu0 %v1344_v36  ;;  %v1353_v53 = vcombine.low %v24_v47, %v28_v48  ;;  %v35_v57 = vld [vmem:[%s2445_s0 + $0xa0] sm:$0xff]  ;;  %v36_v59 = vld [vmem:[%s2445_s0 + $0xa8] sm:$0xff]  ;;  %v1782_v33 = vld [vmem:[%s2444_s1 + $0x190] sm:$0xff]  }
  0x13   :  { %1047 = vmatprep.mubr.bf16.mxu1 %v1346_v39  ;;  %v1360_v60 = vcombine.high %v31_v56, %v35_v57  ;;  %v1362_v61 = vcombine.high %v32_v58, %v36_v59  ;;  %v1767_v62 = vld [vmem:[%s2444_s1 + $0x168] sm:$0xff]   ;;  %v1359_v2 = vcombine.low %v31_v56, %v35_v57  ;;  %v39_v3 = vld [vmem:[%s2445_s0 + $0xc0] sm:$0xff]  ;;  %v1361_v6 = vcombine.low %v32_v58, %v36_v59 }
  0x14   :  { %1480 = vmatpush3.bf16.msra.mxu0 %v1745_v18  ;;  %v1768_v63 = vld [vmem:[%s2444_s1 + $0x128] sm:$0xff]   ;;  %v43_v4 = vld [vmem:[%s2445_s0 + $0xe0] sm:$0xff]  ;;  %v1775_v18 = vld [vmem:[%s2444_s1 + $0x158] sm:$0xff]  }
  0x15   :  { %1544 = vmatpush3.bf16.msra.mxu1 %v1746_v19  ;;  %1481 = vmatprep.subr.bf16.mxu0 %v1747_v20  ;;  %v1769_v0 = vld [vmem:[%s2444_s1 + $0x1e8] sm:$0xff]   ;;  %v1368_v7 = vcombine.high %v39_v3, %v43_v4  ;;  %v1771_v10 = vld [vmem:[%s2444_s1 + $0x160] sm:$0xff]   ;;  %v1367_v19 = vcombine.low %v39_v3, %v43_v4  ;;  %v1776_v20 = vld [vmem:[%s2444_s1 + $0x118] sm:$0xff]  }
  0x16   :  { %1545 = vmatprep.subr.bf16.mxu1 %v1748_v21  ;;  %v1770_v1 = vld [vmem:[%s2444_s1 + $0x1a8] sm:$0xff]   ;;  %v1772_v11 = vld [vmem:[%s2444_s1 + $0x120] sm:$0xff]  }
  0x17   :  { %v40_v5 = vld [vmem:[%s2445_s0 + $0xc8] sm:$0xff]  ;;  %v1773_v12 = vld [vmem:[%s2444_s1 + $0x1e0] sm:$0xff]  }
  0x18   :  { %1482 = vmatpush3.bf16.msra.mxu0 %v1749_v22  ;;  %v44_v8 = vld [vmem:[%s2445_s0 + $0xe8] sm:$0xff]  ;;  %v1774_v13 = vld [vmem:[%s2444_s1 + $0x1a0] sm:$0xff]  }
  0x19   :  { %1546 = vmatpush3.bf16.msra.mxu1 %v1750_v23  ;;  %1483 = vmatprep.subr.bf16.mxu0 %v1751_v24  ;;  %v1370_v9 = vcombine.high %v40_v5, %v44_v8  ;;  %v47_v14 = vld [vmem:[%s2445_s0 + $0x100] sm:$0xff]  ;;  %v48_v16 = vld [vmem:[%s2445_s0 + $0x108] sm:$0xff]  ;;  %v1369_v21 = vcombine.low %v40_v5, %v44_v8  ;;  %v1777_v23 = vld [vmem:[%s2444_s1 + $0x1d8] sm:$0xff]  }
  0x1a   :  { %1547 = vmatprep.subr.bf16.mxu1 %v1752_v25  ;;  %v51_v15 = vld [vmem:[%s2445_s0 + $0x120] sm:$0xff]  ;;  %v52_v17 = vld [vmem:[%s2445_s0 + $0x128] sm:$0xff]  ;;  %v1778_v25 = vld [vmem:[%s2444_s1 + $0x198] sm:$0xff]  }
  0x1b   :  { %v1376_v22 = vcombine.high %v47_v14, %v51_v15  ;;  %v1378_v24 = vcombine.high %v48_v16, %v52_v17  ;;  %v1375_v34 = vcombine.low %v47_v14, %v51_v15  ;;  %v1784_v39 = vld [vmem:[%s2444_s1 + $0x108] sm:$0xff]   ;;  %v1788_v48 = vld [vmem:[%s2444_s1 + $0x100] sm:$0xff]   ;;  %v26_v8 = vld [vmem:[%s2445_s0 + $0x58] sm:$0xff] }
  0x1c   :  { %1484 = vmatpush3.bf16.msra.mxu0 %v1753_v26  ;;  %v55_v26 = vld [vmem:[%s2445_s0 + $0x140] sm:$0xff]  ;;  %v64_v44 = vld [vmem:[%s2445_s0 + $0x188] sm:$0xff]  ;;  %v33_v14 = vld [vmem:[%s2445_s0 + $0x90] sm:$0xff] }
  0x1d   :  { %1548 = vmatpush3.bf16.msra.mxu1 %v1754_v27  ;;  %1485 = vmatprep.subr.bf16.mxu0 %v1755_v28  ;;  %v59_v27 = vld [vmem:[%s2445_s0 + $0x160] sm:$0xff]  ;;  %v1779_v28 = vld [vmem:[%s2444_s1 + $0x150] sm:$0xff]   ;;  %v68_v45 = vld [vmem:[%s2445_s0 + $0x1a8] sm:$0xff] }
  0x1e   :  { %1549 = vmatprep.subr.bf16.mxu1 %v1756_v29  ;;  %v56_v29 = vld [vmem:[%s2445_s0 + $0x148] sm:$0xff]  ;;  %v1384_v36 = vcombine.high %v55_v26, %v59_v27  ;;  %v1383_v47 = vcombine.low %v55_v26, %v59_v27  ;;  %v1393_v59 = vcombine.low %v64_v44, %v68_v45  ;;  %v37_v15 = vld [vmem:[%s2445_s0 + $0xb0] sm:$0xff] }
  0x1f   :  { %v72_v56 = vld [vmem:[%s2445_s0 + $0x1c8] sm:$0xff]  ;;  %v1363_v26 = vcombine.low %v33_v14, %v37_v15 }
  0x20   :  { %1486 = vmatpush3.bf16.msra.mxu0 %v1757_v30  ;;  %v60_v30 = vld [vmem:[%s2445_s0 + $0x168] sm:$0xff] }
  0x21   :  { %1550 = vmatpush3.bf16.msra.mxu1 %v1758_v31  ;;  %1599 = vmatprep.subr.bf16.mxu0 %v1759_v40  ;;  %v1780_v31 = vld [vmem:[%s2444_s1 + $0x110] sm:$0xff]   ;;  %v1386_v37 = vcombine.high %v56_v29, %v60_v30  ;;  %v1785_v40 = vld [vmem:[%s2444_s1 + $0x1c8] sm:$0xff]  }
  0x22   :  { %1663 = vmatprep.subr.bf16.mxu1 %v1761_v42  ;;  %v67_v42 = vld [vmem:[%s2445_s0 + $0x1a0] sm:$0xff]  ;;  %v76_v57 = vld [vmem:[%s2445_s0 + $0x1e8] sm:$0xff] }
  0x23   :  { %951 = vmatmul.mubr.bf16.vlgmr.msra.gmra.mxu0 %v1343_v35  ;;  %v1377_v35 = vcombine.low %v48_v16, %v52_v17  ;;  %v1401_v3 = vcombine.low %v72_v56, %v76_v57  ;;  %v34_v16 = vld [vmem:[%s2445_s0 + $0x98] sm:$0xff] }
  0x24   :  { %1048 = vmatmul.mubr.bf16.vlgmr.msra.gmra.mxu1 %v1345_v38  ;;  %1600 = vmatpush3.bf16.msra.mxu0 %v1760_v41  ;;  %v1783_v38 = vld [vmem:[%s2444_s1 + $0x148] sm:$0xff]   ;;  %v63_v41 = vld [vmem:[%s2445_s0 + $0x180] sm:$0xff]  ;;  %v38_v17 = vld [vmem:[%s2445_s0 + $0xb8] sm:$0xff] }
  0x25   :  { %1664 = vmatpush3.bf16.msra.mxu1 %v1762_v43  ;;  %958 = vmatprep.mubr.bf16.mxu0 %v1352_v46  ;;  %v1786_v43 = vld [vmem:[%s2444_s1 + $0x188] sm:$0xff]   ;;  %v1787_v46 = vld [vmem:[%s2444_s1 + $0x140] sm:$0xff]   ;;  %v1391_v58 = vcombine.low %v63_v41, %v67_v42  ;;  %v1365_v27 = vcombine.low %v34_v16, %v38_v17 }
  0x26   :  { %1055 = vmatprep.mubr.bf16.mxu1 %v1354_v49  ;;  %1601 = vmatprep.subr.bf16.mxu0 %v1763_v50  ;;  %v1385_v49 = vcombine.low %v56_v29, %v60_v30  ;;  %v1392_v50 = vcombine.high %v63_v41, %v67_v42  ;;  %v49_v30 = vld [vmem:[%s2445_s0 + $0x110] sm:$0xff]  ;;  %v62_v41 = vld [vmem:[%s2445_s0 + $0x178] sm:$0xff] }
  0x27   :  { %1665 = vmatprep.subr.bf16.mxu1 %v1765_v54  ;;  %v71_v54 = vld [vmem:[%s2445_s0 + $0x1c0] sm:$0xff] }
  0x28   :  { %1602 = vmatpush3.bf16.msra.mxu0 %v1764_v52  ;;  %v1394_v52 = vcombine.high %v64_v44, %v68_v45 }
  0x29   :  { %1666 = vmatpush3.bf16.msra.mxu1 %v1766_v55  ;;  %1603 = vmatprep.subr.bf16.mxu0 %v1767_v62  ;;  %v75_v55 = vld [vmem:[%s2445_s0 + $0x1e0] sm:$0xff]  ;;  %v17_v62 = vld [vmem:[%s2445_s0 + $0x10] sm:$0xff] }
  0x2a   :  { %1667 = vmatprep.subr.bf16.mxu1 %v1769_v0  ;;  %v18_v0 = vld [vmem:[%s2445_s0 + $0x18] sm:$0xff] }
  0x2b   :  { %959 = vmatmul.mubr.bf16.gmra.mxu0 %v1351_v51  ;;  %v1789_v51 = vld [vmem:[%s2444_s1 + $0x1c0] sm:$0xff]  }
  0x2c   :  { %1056 = vmatmul.mubr.bf16.gmra.mxu1 %v1353_v53  ;;  %966 = vmatprep.mubr.bf16.mxu0 %v1360_v60  ;;  %v1790_v53 = vld [vmem:[%s2444_s1 + $0x180] sm:$0xff]   ;;  %v1400_v60 = vcombine.high %v71_v54, %v75_v55 }
  0x2d   :  { %1063 = vmatprep.mubr.bf16.mxu1 %v1362_v61  ;;  %1604 = vmatpush3.bf16.msra.mxu0 %v1768_v63  ;;  %v1402_v61 = vcombine.high %v72_v56, %v76_v57  ;;  %v21_v63 = vld [vmem:[%s2445_s0 + $0x30] sm:$0xff]  ;;  %v74_v56 = vld [vmem:[%s2445_s0 + $0x1d8] sm:$0xff] }
  0x2e   :  { %1668 = vmatpush3.bf16.msra.mxu1 %v1770_v1  ;;  %1605 = vmatprep.subr.bf16.mxu0 %v1771_v10  ;;  %v22_v1 = vld [vmem:[%s2445_s0 + $0x38] sm:$0xff]  ;;  %v1348_v4 = vcombine.high %v17_v62, %v21_v63  ;;  %v1347_v10 = vcombine.low %v17_v62, %v21_v63 }
  0x2f   :  { %1669 = vmatprep.subr.bf16.mxu1 %v1773_v12  ;;  %v1350_v5 = vcombine.high %v18_v0, %v22_v1  ;;  %v78_v57 = vld [vmem:[%s2445_s0 + $0x1f8] sm:$0xff] }
  0x30   :  { %v1405_v63 = vcombine.low %v74_v56, %v78_v57 }
  0x31   :  { %1606 = vmatpush3.bf16.msra.mxu0 %v1772_v11  ;;  %v1349_v11 = vcombine.low %v18_v0, %v22_v1 }
  0x32   :  { %1670 = vmatpush3.bf16.msra.mxu1 %v1774_v13  ;;  %1607 = vmatprep.subr.bf16.mxu0 %v1775_v18 }
  0x33   :  { %967 = vmatmul.mubr.bf16.gmra.mxu0 %v1359_v2  ;;  %1671 = vmatprep.subr.bf16.mxu1 %v1777_v23  ;;  %v1399_v2 = vcombine.low %v71_v54, %v75_v55  ;;  %v45_v23 = vld [vmem:[%s2445_s0 + $0xf0] sm:$0xff] }
  0x34   :  { %1064 = vmatmul.mubr.bf16.gmra.mxu1 %v1361_v6  ;;  %974 = vmatprep.mubr.bf16.mxu0 %v1368_v7  ;;  %v25_v6 = vld [vmem:[%s2445_s0 + $0x50] sm:$0xff] }
  0x35   :  { %1071 = vmatprep.mubr.bf16.mxu1 %v1370_v9  ;;  %1608 = vmatpush3.bf16.msra.mxu0 %v1776_v20  ;;  %v29_v7 = vld [vmem:[%s2445_s0 + $0x70] sm:$0xff]  ;;  %v30_v9 = vld [vmem:[%s2445_s0 + $0x78] sm:$0xff]  ;;  %v1364_v20 = vcombine.high %v33_v14, %v37_v15 }
  0x36   :  { %1672 = vmatpush3.bf16.msra.mxu1 %v1778_v25  ;;  %1609 = vmatprep.subr.bf16.mxu0 %v1779_v28  ;;  %v1356_v12 = vcombine.high %v25_v6, %v29_v7  ;;  %v1358_v13 = vcombine.high %v26_v8, %v30_v9  ;;  %v1355_v18 = vcombine.low %v25_v6, %v29_v7  ;;  %v46_v25 = vld [vmem:[%s2445_s0 + $0xf8] sm:$0xff]  ;;  %v73_v54 = vld [vmem:[%s2445_s0 + $0x1d0] sm:$0xff] }
  0x37   :  { %1673 = vmatprep.subr.bf16.mxu1 %v1781_v32  ;;  %v50_v32 = vld [vmem:[%s2445_s0 + $0x118] sm:$0xff]  ;;  %v77_v55 = vld [vmem:[%s2445_s0 + $0x1f0] sm:$0xff] }
  0x38   :  { %v1403_v62 = vcombine.low %v73_v54, %v77_v55 }
  0x39   :  { %1610 = vmatpush3.bf16.msra.mxu0 %v1780_v31  ;;  %v53_v31 = vld [vmem:[%s2445_s0 + $0x130] sm:$0xff] }
  0x3a   :  { %1674 = vmatpush3.bf16.msra.mxu1 %v1782_v33  ;;  %1611 = vmatprep.subr.bf16.mxu0 %v1783_v38  ;;  %v54_v33 = vld [vmem:[%s2445_s0 + $0x138] sm:$0xff]  ;;  %v57_v38 = vld [vmem:[%s2445_s0 + $0x150] sm:$0xff]  ;;  %v1379_v42 = vcombine.low %v49_v30, %v53_v31 }
  0x3b   :  { %975 = vmatmul.mubr.bf16.gmra.mxu0 %v1367_v19  ;;  %1675 = vmatprep.subr.bf16.mxu1 %v1785_v40  ;;  %v1357_v19 = vcombine.low %v26_v8, %v30_v9  ;;  %v58_v40 = vld [vmem:[%s2445_s0 + $0x158] sm:$0xff] }
  0x3c   :  { %1072 = vmatmul.mubr.bf16.gmra.mxu1 %v1369_v21  ;;  %982 = vmatprep.mubr.bf16.mxu0 %v1376_v22  ;;  %v1366_v21 = vcombine.high %v34_v16, %v38_v17  ;;  %v41_v22 = vld [vmem:[%s2445_s0 + $0xd0] sm:$0xff]  ;;  %v1390_v45 = vcombine.high %v58_v40, %v62_v41 }
  0x3d   :  { %1079 = vmatprep.mubr.bf16.mxu1 %v1378_v24  ;;  %1612 = vmatpush3.bf16.msra.mxu0 %v1784_v39  ;;  %v42_v24 = vld [vmem:[%s2445_s0 + $0xd8] sm:$0xff]  ;;  %v1372_v28 = vcombine.high %v41_v22, %v45_v23  ;;  %v61_v39 = vld [vmem:[%s2445_s0 + $0x170] sm:$0xff] }
  0x3e   :  { %1676 = vmatpush3.bf16.msra.mxu1 %v1786_v43  ;;  %1613 = vmatprep.subr.bf16.mxu0 %v1787_v46  ;;  %v1374_v29 = vcombine.high %v42_v24, %v46_v25  ;;  %v1381_v43 = vcombine.low %v50_v32, %v54_v33  ;;  %v1388_v44 = vcombine.high %v57_v38, %v61_v39  ;;  %v65_v46 = vld [vmem:[%s2445_s0 + $0x190] sm:$0xff] }
  0x3f   :  { %1677 = vmatprep.subr.bf16.mxu1 %v1789_v51  ;;  %v1389_v51 = vcombine.low %v58_v40, %v62_v41 }
  0x41   :  { %1614 = vmatpush3.bf16.msra.mxu0 %v1788_v48  ;;  %v66_v48 = vld [vmem:[%s2445_s0 + $0x198] sm:$0xff] }
  0x42   :  { %1678 = vmatpush3.bf16.msra.mxu1 %v1790_v53 }
  0x43   :  { %983 = vmatmul.mubr.bf16.gmra.mxu0 %v1375_v34  ;;  %v1371_v34 = vcombine.low %v41_v22, %v45_v23 }
  0x44   :  { %1080 = vmatmul.mubr.bf16.gmra.mxu1 %v1377_v35  ;;  %990 = vmatprep.mubr.bf16.mxu0 %v1384_v36  ;;  %v1373_v35 = vcombine.low %v42_v24, %v46_v25  ;;  %v1380_v36 = vcombine.high %v49_v30, %v53_v31 }
  0x45   :  { %1087 = vmatprep.mubr.bf16.mxu1 %v1386_v37  ;;  %v1382_v37 = vcombine.high %v50_v32, %v54_v33 }
  0x4b   :  { %991 = vmatmul.mubr.bf16.gmra.mxu0 %v1383_v47  ;;  %v69_v47 = vld [vmem:[%s2445_s0 + $0x1b0] sm:$0xff] }
  0x4c   :  { %1088 = vmatmul.mubr.bf16.gmra.mxu1 %v1385_v49  ;;  %998 = vmatprep.mubr.bf16.mxu0 %v1392_v50  ;;  %v70_v49 = vld [vmem:[%s2445_s0 + $0x1b8] sm:$0xff]  ;;  %v1387_v50 = vcombine.low %v57_v38, %v61_v39 }
  0x4d   :  { %1095 = vmatprep.mubr.bf16.mxu1 %v1394_v52  ;;  %v1396_v52 = vcombine.high %v65_v46, %v69_v47  ;;  %v1398_v53 = vcombine.high %v66_v48, %v70_v49 }
  0x53   :  { %999 = vmatmul.mubr.bf16.gmra.mxu0 %v1391_v58  ;;  %v1395_v58 = vcombine.low %v65_v46, %v69_v47 }
  0x54   :  { %1096 = vmatmul.mubr.bf16.gmra.mxu1 %v1393_v59  ;;  %1006 = vmatprep.mubr.bf16.mxu0 %v1400_v60  ;;  %v1397_v59 = vcombine.low %v66_v48, %v70_v49  ;;  %v1404_v60 = vcombine.high %v73_v54, %v77_v55 }
  0x55   :  { %1103 = vmatprep.mubr.bf16.mxu1 %v1402_v61  ;;  %v1406_v61 = vcombine.high %v74_v56, %v78_v57 }
  0x5b   :  { %1007 = vmatmul.mubr.bf16.gmra.mxu0 %v1399_v2 }
  0x5c   :  { %1104 = vmatmul.mubr.bf16.gmra.mxu1 %v1401_v3  ;;  %1144 = vmatprep.mubr.bf16.mxu0 %v1348_v4 }
  0x5d   :  { %1241 = vmatprep.mubr.bf16.mxu1 %v1350_v5 }
  0x63   :  { %1145 = vmatmul.mubr.bf16.vlgmr.msra.gmra.mxu0 %v1347_v10 }
  0x64   :  { %1242 = vmatmul.mubr.bf16.vlgmr.msra.gmra.mxu1 %v1349_v11  ;;  %1152 = vmatprep.mubr.bf16.mxu0 %v1356_v12 }
  0x65   :  { %1249 = vmatprep.mubr.bf16.mxu1 %v1358_v13 }
  0x6b   :  { %1153 = vmatmul.mubr.bf16.gmra.mxu0 %v1355_v18 }
  0x6c   :  { %1250 = vmatmul.mubr.bf16.gmra.mxu1 %v1357_v19  ;;  %1160 = vmatprep.mubr.bf16.mxu0 %v1364_v20 }
  0x6d   :  { %1257 = vmatprep.mubr.bf16.mxu1 %v1366_v21 }
  0x73   :  { %1161 = vmatmul.mubr.bf16.gmra.mxu0 %v1363_v26 }
  0x74   :  { %1258 = vmatmul.mubr.bf16.gmra.mxu1 %v1365_v27  ;;  %1168 = vmatprep.mubr.bf16.mxu0 %v1372_v28 }
  0x75   :  { %1265 = vmatprep.mubr.bf16.mxu1 %v1374_v29 }
  0x7b   :  { %1169 = vmatmul.mubr.bf16.gmra.mxu0 %v1371_v34 }
  0x7c   :  { %1266 = vmatmul.mubr.bf16.gmra.mxu1 %v1373_v35  ;;  %1176 = vmatprep.mubr.bf16.mxu0 %v1380_v36 }
  0x7d   :  { %1273 = vmatprep.mubr.bf16.mxu1 %v1382_v37 }
  0x83   :  { %1177 = vmatmul.mubr.bf16.gmra.mxu0 %v1379_v42 }
  0x84   :  { %1274 = vmatmul.mubr.bf16.gmra.mxu1 %v1381_v43  ;;  %1184 = vmatprep.mubr.bf16.mxu0 %v1388_v44 }
  0x85   :  { %1281 = vmatprep.mubr.bf16.mxu1 %v1390_v45 }
  0x8b   :  { %1185 = vmatmul.mubr.bf16.gmra.mxu0 %v1387_v50 }
  0x8c   :  { %1282 = vmatmul.mubr.bf16.gmra.mxu1 %v1389_v51  ;;  %1192 = vmatprep.mubr.bf16.mxu0 %v1396_v52 }
  0x8d   :  { %1289 = vmatprep.mubr.bf16.mxu1 %v1398_v53 }
  0x93   :  { %1193 = vmatmul.mubr.bf16.gmra.mxu0 %v1395_v58 }
  0x94   :  { %1290 = vmatmul.mubr.bf16.gmra.mxu1 %v1397_v59  ;;  %1200 = vmatprep.mubr.bf16.mxu0 %v1404_v60 }
  0x95   :  { %1297 = vmatprep.mubr.bf16.mxu1 %v1406_v61  ;;  %v2310_v61 = vld [vmem:[%s2446_s2] ss:$0 sm:$0xff] }
  0x9b   :  { %1201 = vmatmul.mubr.bf16.gmra.mxu0 %v1403_v62 }
  0x9c   :  { %1298 = vmatmul.mubr.bf16.gmra.mxu1 %v1405_v63 }
  0xe3   :  { %v1487_v0 = vpop.f32.mrf.mxu0 }
  0xe4   :  { %v2195_v1 = vpop.f32.mrf.mxu1 }
  0xe5   :  { %v1488_v2 = vpop.f32.mrf.mxu0 }
  0xe6   :  { %v2197_v3 = vpop.f32.mrf.mxu1  ;;  %v1489_v59 = vadd.f32 %v1488_v2, %v1487_v0 }
  0xe7   :  { %v1490_v4 = vpop.f32.mrf.mxu0  ;;  %v1553_v0 = vadd.f32 %v2197_v3, %v2195_v1 }
  0xe8   :  { %v2199_v5 = vpop.f32.mrf.mxu1 }
  0xe9   :  { %v1491_v6 = vpop.f32.mrf.mxu0 }
  0xea   :  { %v2201_v7 = vpop.f32.mrf.mxu1 }
  0xeb   :  { %v2203_v8 = vpop.f32.mrf.mxu0 }
  0xec   :  { %v2205_v9 = vpop.f32.mrf.mxu1 }
  0xed   :  { %v2207_v10 = vpop.f32.mrf.mxu0 }
  0xee   :  { %v2209_v11 = vpop.f32.mrf.mxu1 }
  0xef   :  { %v2211_v12 = vpop.f32.mrf.mxu0 }
  0xf0   :  { %v2213_v13 = vpop.f32.mrf.mxu1 }
  0xf1   :  { %v2215_v14 = vpop.f32.mrf.mxu0 }
  0xf2   :  { %v2217_v15 = vpop.f32.mrf.mxu1  ;;  %v1498_v3 = vadd.f32 %v2215_v14, %v2211_v12 }
  0xf3   :  { %v2219_v16 = vpop.f32.mrf.mxu0 }
  0xf4   :  { %v2221_v17 = vpop.f32.mrf.mxu1 }
  0xf5   :  { %v2223_v18 = vpop.f32.mrf.mxu0 }
  0xf6   :  { %v2225_v19 = vpop.f32.mrf.mxu1 }
  0xf7   :  { %v2227_v20 = vpop.f32.mrf.mxu0 }
  0xf8   :  { %v2229_v21 = vpop.f32.mrf.mxu1 }
  0xf9   :  { %v2231_v22 = vpop.f32.mrf.mxu0 }
  0xfa   :  { %v2233_v23 = vpop.f32.mrf.mxu1 }
  0xfb   :  { %v2235_v24 = vpop.f32.mrf.mxu0 }
  0xfc   :  { %v2237_v25 = vpop.f32.mrf.mxu1 }
  0xfd   :  { %v2239_v26 = vpop.f32.mrf.mxu0 }
  0xfe   :  { %v2241_v27 = vpop.f32.mrf.mxu1 }
  0xff   :  { %v2243_v28 = vpop.f32.mrf.mxu0 }
 0x100   :  { %v2245_v29 = vpop.f32.mrf.mxu1 }
 0x101   :  { %v2247_v30 = vpop.f32.mrf.mxu0 }
 0x102   :  { %v2249_v31 = vpop.f32.mrf.mxu1 }
 0x103   :  { %v2251_v32 = vpop.f32.mrf.mxu0 }
 0x104   :  { %v2253_v33 = vpop.f32.mrf.mxu1 }
 0x105   :  { %v2255_v34 = vpop.f32.mrf.mxu0 }
 0x106   :  { %v2257_v35 = vpop.f32.mrf.mxu1 }
 0x107   :  { %v2259_v36 = vpop.f32.mrf.mxu0 }
 0x108   :  { %v2261_v37 = vpop.f32.mrf.mxu1 }
 0x109   :  { %v2263_v38 = vpop.f32.mrf.mxu0 }
 0x10a   :  { %v2265_v39 = vpop.f32.mrf.mxu1 }
 0x10b   :  { %v2267_v40 = vpop.f32.mrf.mxu0 }
 0x10c   :  { %v2269_v41 = vpop.f32.mrf.mxu1 }
 0x10d   :  { %v2271_v42 = vpop.f32.mrf.mxu0 }
 0x10e   :  { %v2273_v43 = vpop.f32.mrf.mxu1 }
 0x10f   :  { %v2275_v44 = vpop.f32.mrf.mxu0 }
 0x110   :  { %v2277_v45 = vpop.f32.mrf.mxu1 }
 0x111   :  { %v2279_v46 = vpop.f32.mrf.mxu0 }
 0x112   :  { %v2281_v47 = vpop.f32.mrf.mxu1 }
 0x113   :  { %2448 = vst [vmem:[#allocation2_spill] sm:$0xff] %v2281_v47  ;;  %v2283_v48 = vpop.f32.mrf.mxu0 }
 0x114   :  { %v2285_v49 = vpop.f32.mrf.mxu1 }
 0x115   :  { %2449 = vst [vmem:[#allocation3_spill] sm:$0xff] %v2285_v49  ;;  %v2287_v50 = vpop.f32.mrf.mxu0 }
 0x116   :  { %v2289_v51 = vpop.f32.mrf.mxu1 }
 0x117   :  { %2450 = vst [vmem:[#allocation4_spill] sm:$0xff] %v2289_v51  ;;  %v2291_v52 = vpop.f32.mrf.mxu0 }
 0x118   :  { %2451 = vst [vmem:[#allocation5_spill] sm:$0xff] %v2291_v52  ;;  %v2293_v53 = vpop.f32.mrf.mxu1 }
 0x119   :  { %2452 = vst [vmem:[#allocation6_spill] sm:$0xff] %v2293_v53  ;;  %v2295_v54 = vpop.f32.mrf.mxu0  ;;  %v1492_v53 = vadd.f32 %v1491_v6, %v1490_v4  ;;  %v1556_v6 = vadd.f32 %v2201_v7, %v2199_v5 }
 0x11a   :  { %2453 = vst [vmem:[#allocation7_spill] sm:$0xff] %v2295_v54  ;;  %v2297_v55 = vpop.f32.mrf.mxu1 }
 0x11b   :  { %2454 = vst [vmem:[#allocation8_spill] sm:$0xff] %v2297_v55  ;;  %v2299_v56 = vpop.f32.mrf.mxu0 }
 0x11c   :  { %2455 = vst [vmem:[#allocation9_spill] sm:$0xff] %v2299_v56  ;;  %v2301_v57 = vpop.f32.mrf.mxu1  ;;  %v953_v56 = vadd.f32 %v1489_v59, %v2310_v61 }
 0x11d   :  { %2456 = vst [vmem:[#allocation10_spill] sm:$0xff] %v2301_v57  ;;  %v2303_v58 = vpop.f32.mrf.mxu0 }
 0x11e   :  { %2457 = vst [vmem:[#allocation11_spill] sm:$0xff] %v2303_v58  ;;  %v2305_v60 = vpop.f32.mrf.mxu1  ;;  %v1050_v49 = vadd.f32 %v1553_v0, %v953_v56 }
 0x11f   :  { %2458 = vst [vmem:[#allocation12_spill] sm:$0xff] %v2305_v60  ;;  %v2312_v62 = vpop.f32.mrf.mxu0  ;;  %v956_v60 = vadd.f32 %v1492_v53, %v2310_v61 }
 0x120   :  { %2459 = vst [vmem:[#allocation13_spill] sm:$0xff] %v2312_v62  ;;  %v2314_v63 = vpop.f32.mrf.mxu1  ;;  %v1495_v62 = vadd.f32 %v2207_v10, %v2203_v8  ;;  %v1559_v10 = vadd.f32 %v2209_v11, %v2205_v9  ;;  %v1562_v9 = vadd.f32 %v2217_v15, %v2213_v13  ;;  %v1565_v13 = vadd.f32 %v2225_v19, %v2221_v17 }
 0x121   :  { %2460 = vst [vmem:[#allocation14_spill] sm:$0xff] %v2314_v63  ;;  %v2316_v55 = vpop.f32.mrf.mxu0  ;;  %v1053_v52 = vadd.f32 %v1556_v6, %v956_v60  ;;  %v1568_v19 = vadd.f32 %v2233_v23, %v2229_v21  ;;  %v1571_v21 = vadd.f32 %v2241_v27, %v2237_v25  ;;  %v1574_v25 = vadd.f32 %v2249_v31, %v2245_v29 }
 0x122   :  { %2461 = vst [vmem:[#allocation15_spill] sm:$0xff] %v2316_v55  ;;  %v2319_v57 = vpop.f32.mrf.mxu1  ;;  %v961_v1 = vadd.f32 %v1495_v62, %v2310_v61  ;;  %v964_v62 = vadd.f32 %v1498_v3, %v2310_v61  ;;  %v1577_v31 = vadd.f32 %v2257_v35, %v2253_v33  ;;  %v1580_v33 = vadd.f32 %v2265_v39, %v2261_v37 }
 0x123   :  { %2462 = vst [vmem:[#allocation16_spill] sm:$0xff] %v2319_v57  ;;  %v1615_v58 = vpop.f32.mrf.mxu0  ;;  %v1583_v37 = vadd.f32 %v2273_v43, %v2269_v41  ;;  %v2463_v43 = vld [vmem:[#allocation2_spill] sm:$0xff] }
 0x124   :  { %v1679_v2 = vpop.f32.mrf.mxu1 }
 0x125   :  { %v1616_v51 = vpop.f32.mrf.mxu0 }
 0x126   :  { %v1617_v63 = vadd.f32 %v1616_v51, %v1615_v58  ;;  %v1680_v4 = vpop.f32.mrf.mxu1  ;;  %v1501_v58 = vadd.f32 %v2223_v18, %v2219_v16 }
 0x127   :  { %v1618_v59 = vpop.f32.mrf.mxu0  ;;  %v1681_v57 = vadd.f32 %v1680_v4, %v1679_v2  ;;  %v1061_v2 = vadd.f32 %v1562_v9, %v964_v62  ;;  %v1504_v4 = vadd.f32 %v2231_v22, %v2227_v20  ;;  %v1507_v20 = vadd.f32 %v2239_v26, %v2235_v24 }
 0x128   :  { %v1147_v55 = vadd.f32 %v1617_v63, %v1050_v49  ;;  %v1682_v54 = vpop.f32.mrf.mxu1  ;;  %v1058_v63 = vadd.f32 %v1559_v10, %v961_v1  ;;  %v969_v16 = vadd.f32 %v1501_v58, %v2310_v61  ;;  %v1510_v62 = vadd.f32 %v2247_v30, %v2243_v28 }
 0x129   :  { %v1619_v47 = vpop.f32.mrf.mxu0  ;;  %v977_v26 = vadd.f32 %v1507_v20, %v2310_v61 }
 0x12a   :  { %v1244_v53 = vadd.f32 %v1681_v57, %v1147_v55  ;;  %v1620_v56 = vadd.f32 %v1619_v47, %v1618_v59  ;;  %v1683_v0 = vpop.f32.mrf.mxu1  ;;  %v980_v28 = vadd.f32 %v1510_v62, %v2310_v61 }
 0x12b   :  { %v1621_v8 = vpop.f32.mrf.mxu0  ;;  %v1684_v7 = vadd.f32 %v1683_v0, %v1682_v54 }
 0x12c   :  { %v1306_v51 = vmax.f32 %v1244_v53, 0.0  ;;  %v1150_v5 = vadd.f32 %v1620_v56, %v1053_v52  ;;  %v1685_v49 = vpop.f32.mrf.mxu1 }
 0x12d   :  { %v1622_v60 = vpop.f32.mrf.mxu0 }
 0x12e   :  { %1322 = vst [vmem:[%s2447_s3] sm:$0xff] %v1306_v51  ;;  %v1247_v12 = vadd.f32 %v1684_v7, %v1150_v5  ;;  %v1623_v14 = vadd.f32 %v1622_v60, %v1621_v8  ;;  %v1686_v47 = vpop.f32.mrf.mxu1  ;;  %v1066_v8 = vadd.f32 %v1565_v13, %v969_v16  ;;  %v972_v51 = vadd.f32 %v1504_v4, %v2310_v61 }
 0x12f   :  { %v1624_v55 = vpop.f32.mrf.mxu0  ;;  %v1687_v54 = vadd.f32 %v1686_v47, %v1685_v49  ;;  %v1513_v16 = vadd.f32 %v2255_v34, %v2251_v32  ;;  %v1516_v32 = vadd.f32 %v2263_v38, %v2259_v36 }
 0x130   :  { %v1307_v11 = vmax.f32 %v1247_v12, 0.0  ;;  %v1155_v52 = vadd.f32 %v1623_v14, %v1058_v63  ;;  %v1688_v57 = vpop.f32.mrf.mxu1  ;;  %v1069_v24 = vadd.f32 %v1568_v19, %v972_v51 }
 0x131   :  { %v1625_v18 = vpop.f32.mrf.mxu0  ;;  %v988_v38 = vadd.f32 %v1516_v32, %v2310_v61 }
 0x132   :  { %1323 = vst [vmem:[%s2447_s3 + $0x8] sm:$0xff] %v1307_v11  ;;  %v1252_v6 = vadd.f32 %v1687_v54, %v1155_v52  ;;  %v1626_v59 = vadd.f32 %v1625_v18, %v1624_v55  ;;  %v1689_v1 = vpop.f32.mrf.mxu1 }
 0x133   :  { %v1627_v15 = vpop.f32.mrf.mxu0  ;;  %v1690_v56 = vadd.f32 %v1689_v1, %v1688_v57  ;;  %v1074_v57 = vadd.f32 %v1571_v21, %v977_v26  ;;  %v1085_v62 = vadd.f32 %v1580_v33, %v988_v38  ;;  %v2470_v38 = vld [vmem:[#allocation6_spill] sm:$0xff] }
 0x134   :  { %v1308_v3 = vmax.f32 %v1252_v6, 0.0  ;;  %v1158_v53 = vadd.f32 %v1626_v59, %v1061_v2  ;;  %v1691_v0 = vpop.f32.mrf.mxu1 }
 0x135   :  { %v1628_v10 = vpop.f32.mrf.mxu0 }
 0x136   :  { %1324 = vst [vmem:[%s2447_s3 + $0x10] sm:$0xff] %v1308_v3  ;;  %v1255_v22 = vadd.f32 %v1690_v56, %v1158_v53  ;;  %v1629_v5 = vadd.f32 %v1628_v10, %v1627_v15  ;;  %v1692_v7 = vpop.f32.mrf.mxu1  ;;  %v1077_v15 = vadd.f32 %v1574_v25, %v980_v28  ;;  %v985_v53 = vadd.f32 %v1513_v16, %v2310_v61  ;;  %v2465_v25 = vld [vmem:[#allocation7_spill] sm:$0xff] }
 0x137   :  { %v1630_v17 = vpop.f32.mrf.mxu0  ;;  %v1693_v60 = vadd.f32 %v1692_v7, %v1691_v0 }
 0x138   :  { %v1309_v49 = vmax.f32 %v1255_v22, 0.0  ;;  %v1163_v58 = vadd.f32 %v1629_v5, %v1066_v8  ;;  %v1694_v63 = vpop.f32.mrf.mxu1  ;;  %v1519_v22 = vadd.f32 %v2271_v42, %v2267_v40  ;;  %v1082_v36 = vadd.f32 %v1577_v31, %v985_v53 }
 0x139   :  { %v1631_v12 = vpop.f32.mrf.mxu0 }
 0x13a   :  { %1325 = vst [vmem:[%s2447_s3 + $0x18] sm:$0xff] %v1309_v49  ;;  %v1260_v14 = vadd.f32 %v1693_v60, %v1163_v58  ;;  %v1632_v47 = vadd.f32 %v1631_v12, %v1630_v17  ;;  %v1695_v55 = vpop.f32.mrf.mxu1  ;;  %v993_v40 = vadd.f32 %v1519_v22, %v2310_v61  ;;  %v1522_v12 = vadd.f32 %v2279_v46, %v2275_v44 }
 0x13b   :  { %v1633_v9 = vpop.f32.mrf.mxu0  ;;  %v1696_v52 = vadd.f32 %v1695_v55, %v1694_v63  ;;  %v1525_v44 = vadd.f32 %v2287_v50, %v2283_v48 }
 0x13c   :  { %v1310_v23 = vmax.f32 %v1260_v14, 0.0  ;;  %v1166_v11 = vadd.f32 %v1632_v47, %v1069_v24  ;;  %v1697_v54 = vpop.f32.mrf.mxu1 }
 0x13d   :  { %v1634_v30 = vpop.f32.mrf.mxu0  ;;  %v1001_v50 = vadd.f32 %v1525_v44, %v2310_v61 }
 0x13e   :  { %1326 = vst [vmem:[%s2447_s3 + $0x20] sm:$0xff] %v1310_v23  ;;  %v1263_v18 = vadd.f32 %v1696_v52, %v1166_v11  ;;  %v1635_v2 = vadd.f32 %v1634_v30, %v1633_v9  ;;  %v1698_v4 = vpop.f32.mrf.mxu1  ;;  %v1090_v23 = vadd.f32 %v1583_v37, %v993_v40  ;;  %v996_v52 = vadd.f32 %v1522_v12, %v2310_v61 }
 0x13f   :  { %v1636_v27 = vpop.f32.mrf.mxu0  ;;  %v1699_v1 = vadd.f32 %v1698_v4, %v1697_v54  ;;  %v1586_v30 = vadd.f32 %v2463_v43, %v2277_v45  ;;  %v2464_v4 = vld [vmem:[#allocation5_spill] sm:$0xff]  ;;  %v2466_v45 = vld [vmem:[#allocation3_spill] sm:$0xff] }
 0x140   :  { %v1311_v6 = vmax.f32 %v1263_v18, 0.0  ;;  %v1171_v59 = vadd.f32 %v1635_v2, %v1074_v57  ;;  %v1700_v13 = vpop.f32.mrf.mxu1 }
 0x141   :  { %v1637_v3 = vpop.f32.mrf.mxu0  ;;  %v1093_v48 = vadd.f32 %v1586_v30, %v996_v52  ;;  %v2476_v30 = vld [vmem:[#allocation14_spill] sm:$0xff] }
 0x142   :  { %1327 = vst [vmem:[%s2447_s3 + $0x28] sm:$0xff] %v1311_v6  ;;  %v1268_v34 = vadd.f32 %v1699_v1, %v1171_v59  ;;  %v1638_v56 = vadd.f32 %v1637_v3, %v1636_v27  ;;  %v1701_v0 = vpop.f32.mrf.mxu1  ;;  %v1528_v27 = vadd.f32 %v2465_v25, %v2464_v4  ;;  %v2467_v3 = vld [vmem:[#allocation4_spill] sm:$0xff] }
 0x143   :  { %v1639_v29 = vpop.f32.mrf.mxu0  ;;  %v1702_v51 = vadd.f32 %v1701_v0, %v1700_v13  ;;  %v1589_v53 = vadd.f32 %v2467_v3, %v2466_v45 }
 0x144   :  { %v1312_v8 = vmax.f32 %v1268_v34, 0.0  ;;  %v1174_v10 = vadd.f32 %v1638_v56, %v1077_v15  ;;  %v1703_v20 = vpop.f32.mrf.mxu1 }
 0x145   :  { %v1640_v5 = vpop.f32.mrf.mxu0 }
 0x146   :  { %1328 = vst [vmem:[%s2447_s3 + $0x30] sm:$0xff] %v1312_v8  ;;  %v1271_v7 = vadd.f32 %v1702_v51, %v1174_v10  ;;  %v1641_v17 = vadd.f32 %v1640_v5, %v1639_v29  ;;  %v1704_v19 = vpop.f32.mrf.mxu1  ;;  %v1004_v29 = vadd.f32 %v1528_v27, %v2310_v61  ;;  %v1098_v8 = vadd.f32 %v1589_v53, %v1001_v50  ;;  %v2468_v10 = vld [vmem:[#allocation9_spill] sm:$0xff]  ;;  %v2469_v51 = vld [vmem:[#allocation11_spill] sm:$0xff] }
 0x147   :  { %v1642_v49 = vpop.f32.mrf.mxu0  ;;  %v1705_v60 = vadd.f32 %v1704_v19, %v1703_v20  ;;  %v1531_v20 = vadd.f32 %v2469_v51, %v2468_v10 }
 0x148   :  { %v1313_v35 = vmax.f32 %v1271_v7, 0.0  ;;  %v1179_v58 = vadd.f32 %v1641_v17, %v1082_v36  ;;  %v1706_v63 = vpop.f32.mrf.mxu1  ;;  %v2471_v7 = vld [vmem:[#allocation8_spill] sm:$0xff] }
 0x149   :  { %v1643_v42 = vpop.f32.mrf.mxu0  ;;  %v1592_v17 = vadd.f32 %v2471_v7, %v2470_v38  ;;  %v1009_v40 = vadd.f32 %v1531_v20, %v2310_v61 }
 0x14a   :  { %1329 = vst [vmem:[%s2447_s3 + $0x38] sm:$0xff] %v1313_v35  ;;  %v1276_v24 = vadd.f32 %v1705_v60, %v1179_v58  ;;  %v1644_v26 = vadd.f32 %v1643_v42, %v1642_v49  ;;  %v1707_v14 = vpop.f32.mrf.mxu1  ;;  %v2472_v42 = vld [vmem:[#allocation13_spill] sm:$0xff] }
 0x14b   :  { %v1645_v39 = vpop.f32.mrf.mxu0  ;;  %v1708_v9 = vadd.f32 %v1707_v14, %v1706_v63  ;;  %v1101_v60 = vadd.f32 %v1592_v17, %v1004_v29 }
 0x14c   :  { %v1314_v47 = vmax.f32 %v1276_v24, 0.0  ;;  %v1182_v55 = vadd.f32 %v1644_v26, %v1085_v62  ;;  %v1709_v21 = vpop.f32.mrf.mxu1  ;;  %v2473_v62 = vld [vmem:[#allocation15_spill] sm:$0xff] }
 0x14d   :  { %v1646_v11 = vpop.f32.mrf.mxu0  ;;  %v1534_v12 = vadd.f32 %v2473_v62, %v2472_v42 }
 0x14e   :  { %1330 = vst [vmem:[%s2447_s3 + $0x40] sm:$0xff] %v1314_v47  ;;  %v1279_v46 = vadd.f32 %v1708_v9, %v1182_v55  ;;  %v1647_v54 = vadd.f32 %v1646_v11, %v1645_v39  ;;  %v1710_v28 = vpop.f32.mrf.mxu1  ;;  %v2474_v39 = vld [vmem:[#allocation10_spill] sm:$0xff]  ;;  %v2475_v47 = vld [vmem:[#allocation12_spill] sm:$0xff] }
 0x14f   :  { %v1648_v41 = vpop.f32.mrf.mxu0  ;;  %v1711_v18 = vadd.f32 %v1710_v28, %v1709_v21  ;;  %v1595_v55 = vadd.f32 %v2475_v47, %v2474_v39 }
 0x150   :  { %v1315_v57 = vmax.f32 %v1279_v46, 0.0  ;;  %v1187_v16 = vadd.f32 %v1647_v54, %v1090_v23  ;;  %v1712_v2 = vpop.f32.mrf.mxu1  ;;  %v1012_v46 = vadd.f32 %v1534_v12, %v2310_v61 }
 0x151   :  { %v1649_v6 = vpop.f32.mrf.mxu0  ;;  %v1106_v44 = vadd.f32 %v1595_v55, %v1009_v40 }
 0x152   :  { %1331 = vst [vmem:[%s2447_s3 + $0x48] sm:$0xff] %v1315_v57  ;;  %v1284_v59 = vadd.f32 %v1711_v18, %v1187_v16  ;;  %v1650_v1 = vadd.f32 %v1649_v6, %v1648_v41  ;;  %v1713_v13 = vpop.f32.mrf.mxu1  ;;  %v2477_v57 = vld [vmem:[#allocation16_spill] sm:$0xff] }
 0x153   :  { %v1651_v15 = vpop.f32.mrf.mxu0  ;;  %v1714_v56 = vadd.f32 %v1713_v13, %v1712_v2  ;;  %v1598_v16 = vadd.f32 %v2477_v57, %v2476_v30 }
 0x154   :  { %v1316_v32 = vmax.f32 %v1284_v59, 0.0  ;;  %v1190_v34 = vadd.f32 %v1650_v1, %v1093_v48  ;;  %v1715_v0 = vpop.f32.mrf.mxu1 }
 0x155   :  { %v1652_v31 = vpop.f32.mrf.mxu0  ;;  %v1109_v6 = vadd.f32 %v1598_v16, %v1012_v46 }
 0x156   :  { %1332 = vst [vmem:[%s2447_s3 + $0x50] sm:$0xff] %v1316_v32  ;;  %v1287_v22 = vadd.f32 %v1714_v56, %v1190_v34  ;;  %v1653_v5 = vadd.f32 %v1652_v31, %v1651_v15  ;;  %v1716_v36 = vpop.f32.mrf.mxu1 }
 0x157   :  { %v1654_v19 = vpop.f32.mrf.mxu0  ;;  %v1717_v35 = vadd.f32 %v1716_v36, %v1715_v0 }
 0x158   :  { %v1317_v49 = vmax.f32 %v1287_v22, 0.0  ;;  %v1195_v33 = vadd.f32 %v1653_v5, %v1098_v8  ;;  %v1718_v58 = vpop.f32.mrf.mxu1 }
 0x159   :  { %v1655_v63 = vpop.f32.mrf.mxu0 }
 0x15a   :  { %1333 = vst [vmem:[%s2447_s3 + $0x58] sm:$0xff] %v1317_v49  ;;  %v1292_v24 = vadd.f32 %v1717_v35, %v1195_v33  ;;  %v1656_v26 = vadd.f32 %v1655_v63, %v1654_v19  ;;  %v1719_v14 = vpop.f32.mrf.mxu1 }
 0x15b   :  { %v1657_v37 = vpop.f32.mrf.mxu0  ;;  %v1720_v23 = vadd.f32 %v1719_v14, %v1718_v58 }
 0x15c   :  { %v1318_v9 = vmax.f32 %v1292_v24, 0.0  ;;  %v1198_v21 = vadd.f32 %v1656_v26, %v1101_v60  ;;  %v1721_v11 = vpop.f32.mrf.mxu1 }
 0x15d   :  { %v1658_v52 = vpop.f32.mrf.mxu0 }
 0x15e   :  { %1334 = vst [vmem:[%s2447_s3 + $0x60] sm:$0xff] %v1318_v9  ;;  %v1295_v54 = vadd.f32 %v1720_v23, %v1198_v21  ;;  %v1659_v28 = vadd.f32 %v1658_v52, %v1657_v37  ;;  %v1722_v41 = vpop.f32.mrf.mxu1 }
 0x15f   :  { %v1660_v43 = vpop.f32.mrf.mxu0  ;;  %v1723_v4 = vadd.f32 %v1722_v41, %v1721_v11 }
 0x160   :  { %v1319_v18 = vmax.f32 %v1295_v54, 0.0  ;;  %v1203_v2 = vadd.f32 %v1659_v28, %v1106_v44  ;;  %v1724_v25 = vpop.f32.mrf.mxu1 }
 0x161   :  { %v1661_v27 = vpop.f32.mrf.mxu0 }
 0x162   :  { %1335 = vst [vmem:[%s2447_s3 + $0x68] sm:$0xff] %v1319_v18  ;;  %v1300_v61 = vadd.f32 %v1723_v4, %v1203_v2  ;;  %v1662_v48 = vadd.f32 %v1661_v27, %v1660_v43  ;;  %v1725_v50 = vpop.f32.mrf.mxu1 }
 0x163   :  { %v1726_v13 = vadd.f32 %v1725_v50, %v1724_v25 }
 0x164   :  { %v1320_v59 = vmax.f32 %v1300_v61, 0.0  ;;  %v1206_v1 = vadd.f32 %v1662_v48, %v1109_v6 }
 0x166   :  { %1336 = vst [vmem:[%s2447_s3 + $0x70] sm:$0xff] %v1320_v59  ;;  %v1303_v15 = vadd.f32 %v1726_v13, %v1206_v1 }
 0x168   :  { %v1321_v45 = vmax.f32 %v1303_v15, 0.0 }
 0x16a   :  { %1337 = vst [vmem:[%s2447_s3 + $0x78] sm:$0xff] %v1321_v45 }

// kernel: squeeze.11
= control target key start
LH: loop header
LB: loop body
LE: loop exit
PB: predicated region body
PF: predicated region fallthrough
CT: control target
= control target key end

     0   :  { %s103_s0 = inlined_call_operand.vmem [shape: s32[8], index: 0, kind: input, shape index: {}]   ;;  %s104_s1 = inlined_call_operand.hbm [shape: s32[2,2,2], index: 1, kind: output, shape index: {}]  }
   0x1   :  { %v6_v0 = vld [vmem:[%s103_s0] sm:$0x1] }
   0x2   :  { %7 = vst [vmem:[#allocation3] sm:$0x1] %v6_v0 }
   0x3   :  { %2 = vsyncpa [#allocation1], 0  ;;  %vm9_vm0 = vcmask 15360   ;;  %s79_s0 = smov 126   ;;  %s80_s8 = smov 122  }
   0x4   :  { %s81_s9 = smov 124   ;;  %s82_s10 = smov [#allocation0]  }
   0x5   :  { %s47_s11 = sshll.u32 %s82_s10, 4  ;;  %s48_s11 = int_to_ptr.vmem [resolvable:$true] %s47_s11 }
   0x6   :  { %s57_s12 = scalar_lea.vmem %s48_s11, 64  ;;  %p62_p1 = scmp.lt.s32.totalorder %s48_s11, %s48_s11 }
   0x7   :  { %p58_p0 = scmp.ne.s32.totalorder %s48_s11, %s57_s12  ;;  %p63_p2 = scmp.lt.s32.totalorder %s57_s12, %s57_s12 }
   0x9   :  { %v11_v1 = vld [vmem:[#allocation3] sm:$0x1]   ;;  %p64_p3 = por %p63_p2, %p62_p1 }
   0xa   :  { %v23_v2 = vld [vmem:[#allocation3] sm:$0x1]   ;;  %12 = vrot.lane.b32.xlu0 %v11_v1, %s79_s0 }
   0xb   :  { %24 = vrot.lane.b32.xlu1 %v23_v2, %s80_s8  ;;  %v8_v3 = vld [vmem:[#allocation3] sm:$0x1]   ;;  %p65_p4 = pnand %p64_p3, %p58_p0 }
   0xc   :  { %v17_v4 = vld [vmem:[#allocation3] sm:$0x1]   ;;  %10 = vst.msk [vmem:[#allocation2] sm:$0x1] %vm9_vm0, %v8_v3  }
   0xe   :  { %18 = vrot.lane.b32.xlu0 %v17_v4, %s81_s9 }
  0x7c   :  { %v13_v5 = vpop.permute.xlu0 %12  }
  0x7d   :  { %v25_v6 = vpop.permute.xlu1 %24   ;;  %16 = vst.msk [vmem:[#allocation2 + $0x1] sm:$0x1] %vm9_vm0, %v13_v5  }
  0x7e   :  { %28 = vst.msk [vmem:[#allocation2 + $0x9] sm:$0x1] %vm9_vm0, %v25_v6  }
  0x80   :  { %v19_v7 = vpop.permute.xlu0 %18  }
  0x81   :  { %22 = vst.msk [vmem:[#allocation2 + $0x8] sm:$0x1] %vm9_vm0, %v19_v7  }
  0x84   :  { %v33_v8 = vld [vmem:[#allocation2] sm:$0x3] }
  0x85   :  { %36 = vst [vmem:[#allocation0] sm:$0x3] %v33_v8 }
  0x88   :  { %v38_v9 = vld [vmem:[#allocation2 + $0x8] sm:$0x3] }
  0x89   :  { %42 = vst [vmem:[#allocation0 + $0x2] sm:$0x3] %v38_v9 }
  0x8a   :  { %68 = shalt.err (!%p65_p4)
}
  0x8b   :  { %50 = dma.vmem_to_hbm [thread:$0]  %s48_s11, 64, %s104_s1, [#allocation1]  }
  0x8c   :  { %77 = dma.done.wait [#allocation1], 64  }
  0x8d   :  { %78 = vsyncadd [#allocation1], 4294967232 }
  0x8e   :  { %52 = vsyncpa [#allocation1], 1 }

// kernel: _lambda_.14
= control target key start
LH: loop header
LB: loop body
LE: loop exit
PB: predicated region body
PF: predicated region fallthrough
CT: control target
= control target key end

     0   :  { %s775_s12 = smov 0   ;;  %s777_s13 = smov 0   ;;  %s856_s0 = inlined_call_operand.vmem [shape: bf16[4,128,128], index: 0, kind: input, shape index: {}]   ;;  %s857_s1 = inlined_call_operand.vmem [shape: bf16[4,128,128], index: 1, kind: input, shape index: {}]   ;;  %s858_s2 = inlined_call_operand.vmem [shape: f32[1,128], index: 2, kind: input, shape index: {}]   ;;  %s859_s3 = inlined_call_operand.vmem [shape: f32[4,128,128], index: 3, kind: output, shape index: {}]  }
   0x1   :  { %s779_s14 = smov 0  }
   0x2 LB: > { %s25_s15 = sadd.s32 1, %s749_s13  ;;  %p598_p0 = scmp.ge.s32.totalorder %s753_s14, 1  ;;  %s753_s14 = sphi %s779_s14, %s13_s14   ;;  %s749_s13 = sphi %s777_s13, %s861_s13   ;;  %s745_s12 = sphi %s775_s12, %s860_s12  }
   0x3   : > { %p27_p1 = scmp.ge.s32.totalorder %s25_s15, 4  ;;  %p168_p2 = scmp.lt.s32.totalorder %s753_s14, 5 }
   0x5   : > { %s863_s15 = smov (%p27_p1, %s25_s15), 0  ;;  %p169_p3 = pnand %p598_p0, %p168_p2 }
   0x6   : > { %p206_p4 = scmp.lt.s32.totalorder (!%p169_p3), %s745_s12, 3 }
   0x7   : > { %172 = sbr.rel (%p169_p3) target bundleno = 260 (0x104), region = 32 }
   0xc   : > { %s865_s12 = smov (!%p206_p4, %s745_s12), 3  ;;  %v605_v16 = vld [vmem:[%s858_s2] ss:$0 sm:$0xff] }
   0xd   : > { %s624_s16 = sshll.u32 %s865_s12, 6  ;;  %s626_s25 = sshll.u32 %s865_s12, 7 }
   0xe   : > { %s799_s19 = scalar_lea.vmem %s857_s1, %s624_s16  ;;  %s807_s22 = scalar_lea.vmem %s856_s0, %s624_s16 }
   0xf   : > { %v715_v0 = vld [vmem:[%s799_s19 + $0x38] sm:$0xff]   ;;  %v716_v1 = vld [vmem:[%s799_s19 + $0x30] sm:$0xff]   ;;  %v717_v2 = vld [vmem:[%s799_s19 + $0x28] sm:$0xff]   ;;  %s829_s28 = scalar_lea.vmem %s859_s3, %s626_s25 }
  0x10   : > { %643 = vmatprep.subr.bf16.mxu0 %v715_v0  ;;  %675 = vmatprep.subr.bf16.mxu1 %v715_v0  ;;  %v718_v3 = vld [vmem:[%s799_s19 + $0x20] sm:$0xff]   ;;  %v719_v6 = vld [vmem:[%s799_s19 + $0x18] sm:$0xff]   ;;  %v720_v7 = vld [vmem:[%s799_s19 + $0x10] sm:$0xff]  }
  0x11   : > { %644 = vmatpush3.bf16.msra.mxu0 %v715_v0  ;;  %683 = vmatpush3.bf16.msra.mxu1 %v715_v0  ;;  %v723_v4 = vld [vmem:[%s807_s22] sm:$0xff]   ;;  %v721_v8 = vld [vmem:[%s799_s19 + $0x8] sm:$0xff]   ;;  %v727_v12 = vld [vmem:[%s807_s22 + $0x10] sm:$0xff]  }
  0x12   : > { %645 = vmatprep.subr.bf16.mxu0 %v716_v1  ;;  %676 = vmatprep.subr.bf16.mxu1 %v716_v1  ;;  %v724_v5 = vld [vmem:[%s807_s22 + $0x20] sm:$0xff]   ;;  %v725_v10 = vld [vmem:[%s807_s22 + $0x8] sm:$0xff]   ;;  %v728_v13 = vld [vmem:[%s807_s22 + $0x30] sm:$0xff]  }
  0x13   : > { %659 = vmatprep.mubr.bf16.mxu0 %v723_v4  ;;  %667 = vmatprep.mubr.bf16.mxu1 %v724_v5  ;;  %v722_v9 = vld [vmem:[%s799_s19] sm:$0xff]   ;;  %v726_v11 = vld [vmem:[%s807_s22 + $0x28] sm:$0xff]   ;;  %v729_v14 = vld [vmem:[%s807_s22 + $0x18] sm:$0xff]  }
  0x14   : > { %v730_v15 = vld [vmem:[%s807_s22 + $0x38] sm:$0xff]  }
  0x15   : > { %646 = vmatpush3.bf16.msra.mxu0 %v716_v1  ;;  %684 = vmatpush3.bf16.msra.mxu1 %v716_v1 }
  0x16   : > { %647 = vmatprep.subr.bf16.mxu0 %v717_v2  ;;  %677 = vmatprep.subr.bf16.mxu1 %v717_v2 }
  0x19   : > { %648 = vmatpush3.bf16.msra.mxu0 %v717_v2  ;;  %685 = vmatpush3.bf16.msra.mxu1 %v717_v2 }
  0x1a   : > { %649 = vmatprep.subr.bf16.mxu0 %v718_v3  ;;  %678 = vmatprep.subr.bf16.mxu1 %v718_v3 }
  0x1d   : > { %650 = vmatpush3.bf16.msra.mxu0 %v718_v3  ;;  %686 = vmatpush3.bf16.msra.mxu1 %v718_v3 }
  0x1e   : > { %651 = vmatprep.subr.bf16.mxu0 %v719_v6  ;;  %679 = vmatprep.subr.bf16.mxu1 %v719_v6 }
  0x21   : > { %652 = vmatpush3.bf16.msra.mxu0 %v719_v6  ;;  %687 = vmatpush3.bf16.msra.mxu1 %v719_v6 }
  0x22   : > { %653 = vmatprep.subr.bf16.mxu0 %v720_v7  ;;  %680 = vmatprep.subr.bf16.mxu1 %v720_v7 }
  0x25   : > { %654 = vmatpush3.bf16.msra.mxu0 %v720_v7  ;;  %688 = vmatpush3.bf16.msra.mxu1 %v720_v7 }
  0x26   : > { %655 = vmatprep.subr.bf16.mxu0 %v721_v8  ;;  %681 = vmatprep.subr.bf16.mxu1 %v721_v8 }
  0x29   : > { %656 = vmatpush3.bf16.msra.mxu0 %v721_v8  ;;  %689 = vmatpush3.bf16.msra.mxu1 %v721_v8 }
  0x2a   : > { %657 = vmatprep.subr.bf16.mxu0 %v722_v9  ;;  %682 = vmatprep.subr.bf16.mxu1 %v722_v9 }
  0x2d   : > { %658 = vmatpush3.bf16.msra.mxu0 %v722_v9  ;;  %690 = vmatpush3.bf16.msra.mxu1 %v722_v9 }
  0x30   : > { %660 = vmatmul.mubr.bf16.vlgmr.msra.gmra.mxu0 %v725_v10  ;;  %668 = vmatmul.mubr.bf16.vlgmr.msra.gmra.mxu1 %v726_v11 }
  0x31   : > { %663 = vmatprep.mubr.bf16.mxu0 %v727_v12  ;;  %671 = vmatprep.mubr.bf16.mxu1 %v728_v13 }
  0x38   : > { %664 = vmatmul.mubr.bf16.gmra.mxu0 %v729_v14  ;;  %672 = vmatmul.mubr.bf16.gmra.mxu1 %v730_v15 }
  0xf0   : > { %v661_v17 = vpop.f32.mrf.mxu0  ;;  %v669_v18 = vpop.f32.mrf.mxu1 }
  0xf1   : > { %v409_v19 = vadd.f32 %v661_v17, %v605_v16  ;;  %v441_v20 = vadd.f32 %v669_v18, %v605_v16 }
  0xf2   : > { %v400_v21 = vpop.f32.mrf.mxu0  ;;  %v432_v22 = vpop.f32.mrf.mxu1 }
  0xf3   : > { %v465_v23 = vmax.f32 %v409_v19, 0.0  ;;  %v473_v24 = vmax.f32 %v441_v20, 0.0  ;;  %v401_v25 = vadd.f32 %v605_v16, %v400_v21  ;;  %v433_v26 = vadd.f32 %v605_v16, %v432_v22 }
  0xf4   : > { %v662_v27 = vpop.f32.mrf.mxu0  ;;  %v670_v28 = vpop.f32.mrf.mxu1 }
  0xf5   : > { %481 = vst [vmem:[%s829_s28 + $0x10] sm:$0xff] %v465_v23  ;;  %489 = vst [vmem:[%s829_s28 + $0x50] sm:$0xff] %v473_v24  ;;  %v463_v29 = vmax.f32 %v401_v25, 0.0  ;;  %v471_v30 = vmax.f32 %v433_v26, 0.0  ;;  %v412_v31 = vadd.f32 %v662_v27, %v605_v16  ;;  %v444_v32 = vadd.f32 %v670_v28, %v605_v16 }
  0xf6   : > { %v403_v33 = vpop.f32.mrf.mxu0  ;;  %v435_v34 = vpop.f32.mrf.mxu1 }
  0xf7   : > { %479 = vst [vmem:[%s829_s28] sm:$0xff] %v463_v29  ;;  %487 = vst [vmem:[%s829_s28 + $0x40] sm:$0xff] %v471_v30  ;;  %v466_v35 = vmax.f32 %v412_v31, 0.0  ;;  %v474_v36 = vmax.f32 %v444_v32, 0.0  ;;  %v404_v37 = vadd.f32 %v605_v16, %v403_v33  ;;  %v436_v38 = vadd.f32 %v605_v16, %v435_v34 }
  0xf8   : > { %v665_v39 = vpop.f32.mrf.mxu0  ;;  %v673_v40 = vpop.f32.mrf.mxu1 }
  0xf9   : > { %482 = vst [vmem:[%s829_s28 + $0x18] sm:$0xff] %v466_v35  ;;  %490 = vst [vmem:[%s829_s28 + $0x58] sm:$0xff] %v474_v36  ;;  %v464_v41 = vmax.f32 %v404_v37, 0.0  ;;  %v472_v42 = vmax.f32 %v436_v38, 0.0  ;;  %v425_v43 = vadd.f32 %v665_v39, %v605_v16  ;;  %v457_v44 = vadd.f32 %v673_v40, %v605_v16 }
  0xfa   : > { %v416_v45 = vpop.f32.mrf.mxu0  ;;  %v448_v46 = vpop.f32.mrf.mxu1 }
  0xfb   : > { %480 = vst [vmem:[%s829_s28 + $0x8] sm:$0xff] %v464_v41  ;;  %488 = vst [vmem:[%s829_s28 + $0x48] sm:$0xff] %v472_v42  ;;  %v469_v47 = vmax.f32 %v425_v43, 0.0  ;;  %v477_v48 = vmax.f32 %v457_v44, 0.0  ;;  %v417_v49 = vadd.f32 %v605_v16, %v416_v45  ;;  %v449_v50 = vadd.f32 %v605_v16, %v448_v46 }
  0xfc   : > { %v666_v51 = vpop.f32.mrf.mxu0  ;;  %v674_v52 = vpop.f32.mrf.mxu1 }
  0xfd   : > { %485 = vst [vmem:[%s829_s28 + $0x30] sm:$0xff] %v469_v47  ;;  %493 = vst [vmem:[%s829_s28 + $0x70] sm:$0xff] %v477_v48  ;;  %v467_v53 = vmax.f32 %v417_v49, 0.0  ;;  %v475_v54 = vmax.f32 %v449_v50, 0.0  ;;  %v428_v55 = vadd.f32 %v666_v51, %v605_v16  ;;  %v460_v56 = vadd.f32 %v674_v52, %v605_v16 }
  0xfe   : > { %v419_v57 = vpop.f32.mrf.mxu0  ;;  %v451_v58 = vpop.f32.mrf.mxu1 }
  0xff   : > { %483 = vst [vmem:[%s829_s28 + $0x20] sm:$0xff] %v467_v53  ;;  %491 = vst [vmem:[%s829_s28 + $0x60] sm:$0xff] %v475_v54  ;;  %v470_v59 = vmax.f32 %v428_v55, 0.0  ;;  %v478_v60 = vmax.f32 %v460_v56, 0.0  ;;  %v420_v61 = vadd.f32 %v605_v16, %v419_v57  ;;  %v452_v62 = vadd.f32 %v605_v16, %v451_v58 }
 0x101   : > { %486 = vst [vmem:[%s829_s28 + $0x38] sm:$0xff] %v470_v59  ;;  %494 = vst [vmem:[%s829_s28 + $0x78] sm:$0xff] %v478_v60  ;;  %v468_v63 = vmax.f32 %v420_v61, 0.0  ;;  %v476_v0 = vmax.f32 %v452_v62, 0.0 }
 0x103   : > { %484 = vst [vmem:[%s829_s28 + $0x28] sm:$0xff] %v468_v63  ;;  %492 = vst [vmem:[%s829_s28 + $0x68] sm:$0xff] %v476_v0 }
 0x104 PF: > { %s13_s14 = sadd.s32 1, %s753_s14   ;;  %s860_s12 = smov %s749_s13 }
 0x105   : > { %p10_p5 = scmp.ge.s32.totalorder %s13_s14, 6   ;;  %s861_s13 = smov %s863_s15 }
 0x107   :  { %12 = sbr.rel (!%p10_p5) target bundleno = 2 (0x2), region = 65 }

// kernel: _lambda_.13
= control target key start
LH: loop header
LB: loop body
LE: loop exit
PB: predicated region body
PF: predicated region fallthrough
CT: control target
= control target key end

     0   :  { %vm120_vm0 = vcmask 261120   ;;  %s4504_s0 = inlined_call_operand.vmem [shape: f32[128,32], index: 0, kind: input, shape index: {}]   ;;  %s4505_s1 = inlined_call_operand.vmem [shape: f32[512,32], index: 1, kind: input, shape index: {}]   ;;  %s4506_s2 = inlined_call_operand.vmem [shape: f32[1,512], index: 2, kind: input, shape index: {}]   ;;  %s4507_s3 = inlined_call_operand.vmem [shape: f32[128,32], index: 3, kind: output, shape index: {0}]   ;;  %s4508_s4 = inlined_call_operand.vmem [shape: s32[128,1], index: 4, kind: output, shape index: {1}]   ;;  %s4509_s5 = inlined_call_operand.hbm [shape: f32[1,1], index: 5, kind: output, shape index: {2}]  }
   0x1   :  { %v2782_v0 = vld [vmem:[%s4505_s1 + $0xf8] sm:$0xff]  ;;  %v2806_v4 = vld [vmem:[%s4505_s1 + $0xf0] sm:$0xff]  ;;  %v2834_v8 = vld [vmem:[%s4505_s1 + $0xe8] sm:$0xff] }
   0x2   :  { %v2787_v1 = vld [vmem:[%s4505_s1 + $0x1f8] sm:$0xff]  ;;  %2415 = vmatprep.subr.msk.mxu0 %vm120_vm0, %v2782_v0  ;;  %v2811_v5 = vld [vmem:[%s4505_s1 + $0x1f0] sm:$0xff]  ;;  %v2839_v9 = vld [vmem:[%s4505_s1 + $0x1e8] sm:$0xff] }
   0x3   :  { %v2792_v2 = vld [vmem:[%s4505_s1 + $0x78] sm:$0xff]  ;;  %2479 = vmatprep.subr.msk.mxu1 %vm120_vm0, %v2787_v1  ;;  %v2824_v6 = vld [vmem:[%s4505_s1 + $0x70] sm:$0xff]  ;;  %v2852_v10 = vld [vmem:[%s4505_s1 + $0x68] sm:$0xff] }
   0x4   :  { %v2801_v3 = vld [vmem:[%s4505_s1 + $0x178] sm:$0xff]  ;;  %2416 = vmatpush3.xpose.msk.msra.mxu0 %vm120_vm0, %v2792_v2  ;;  %v2829_v7 = vld [vmem:[%s4505_s1 + $0x170] sm:$0xff]  ;;  %v2857_v11 = vld [vmem:[%s4505_s1 + $0x168] sm:$0xff] }
   0x5   :  { %2480 = vmatpush3.xpose.msk.msra.mxu1 %vm120_vm0, %v2801_v3  ;;  %2417 = vmatprep.subr.msk.mxu0 %vm120_vm0, %v2806_v4  ;;  %v2862_v12 = vld [vmem:[%s4505_s1 + $0xe0] sm:$0xff]  ;;  %v2890_v16 = vld [vmem:[%s4505_s1 + $0xd8] sm:$0xff]  ;;  %v2918_v20 = vld [vmem:[%s4505_s1 + $0xd0] sm:$0xff] }
   0x6   :  { %2481 = vmatprep.subr.msk.mxu1 %vm120_vm0, %v2811_v5  ;;  %v2867_v13 = vld [vmem:[%s4505_s1 + $0x1e0] sm:$0xff]  ;;  %v2895_v17 = vld [vmem:[%s4505_s1 + $0x1d8] sm:$0xff]  ;;  %v2923_v21 = vld [vmem:[%s4505_s1 + $0x1d0] sm:$0xff] }
   0x7   :  { %v2880_v14 = vld [vmem:[%s4505_s1 + $0x60] sm:$0xff]  ;;  %v2908_v18 = vld [vmem:[%s4505_s1 + $0x58] sm:$0xff]  ;;  %v2936_v22 = vld [vmem:[%s4505_s1 + $0x50] sm:$0xff] }
   0x8   :  { %2418 = vmatpush3.xpose.msk.msra.mxu0 %vm120_vm0, %v2824_v6  ;;  %v2885_v15 = vld [vmem:[%s4505_s1 + $0x160] sm:$0xff]  ;;  %v2913_v19 = vld [vmem:[%s4505_s1 + $0x158] sm:$0xff]  ;;  %v2941_v23 = vld [vmem:[%s4505_s1 + $0x150] sm:$0xff] }
   0x9   :  { %2482 = vmatpush3.xpose.msk.msra.mxu1 %vm120_vm0, %v2829_v7  ;;  %2419 = vmatprep.subr.msk.mxu0 %vm120_vm0, %v2834_v8  ;;  %v2946_v24 = vld [vmem:[%s4505_s1 + $0xc8] sm:$0xff]  ;;  %v2956_v26 = vld [vmem:[%s4504_s0] sm:$0xff]  ;;  %v2970_v28 = vld [vmem:[%s4504_s0 + $0x10] sm:$0xff] }
   0xa   :  { %2483 = vmatprep.subr.msk.mxu1 %vm120_vm0, %v2839_v9  ;;  %v2951_v25 = vld [vmem:[%s4505_s1 + $0x1c8] sm:$0xff]  ;;  %v104_v29 = vmul.f32 %v2956_v26, %v2956_v26  ;;  %v106_v33 = vmul.f32 %v2970_v28, %v2970_v28  ;;  %v2995_v34 = vld [vmem:[%s4505_s1 + $0xc0] sm:$0xff]  ;;  %2447 = vmatprep.mubr.msk.f32.mxu0 %vm120_vm0, %v2956_v26  ;;  %v3009_v36 = vld [vmem:[%s4504_s0 + $0x18] sm:$0xff] }
   0xb   :  { %v2961_v27 = vld [vmem:[%s4504_s0 + $0x8] sm:$0xff]  ;;  %v3000_v35 = vld [vmem:[%s4505_s1 + $0x1c0] sm:$0xff]  ;;  %2511 = vmatprep.mubr.msk.f32.mxu1 %vm120_vm0, %v2956_v26  ;;  %v107_v40 = vmul.f32 %v3009_v36, %v3009_v36 }
   0xc   :  { %2420 = vmatpush3.xpose.msk.msra.mxu0 %vm120_vm0, %v2852_v10  ;;  %v105_v30 = vmul.f32 %v2961_v27, %v2961_v27  ;;  %v2983_v31 = vld [vmem:[%s4505_s1 + $0x48] sm:$0xff]  ;;  %v121_v37 = vsel %vm120_vm0, %v104_v29, 0.0  ;;  %v3015_v38 = vld [vmem:[%s4504_s0 + $0x20] sm:$0xff]  ;;  %v127_v39 = vsel %vm120_vm0, %v106_v33, 0.0 }
   0xd   :  { %2484 = vmatpush3.xpose.msk.msra.mxu1 %vm120_vm0, %v2857_v11  ;;  %2421 = vmatprep.subr.msk.mxu0 %vm120_vm0, %v2862_v12  ;;  %v2988_v32 = vld [vmem:[%s4505_s1 + $0x148] sm:$0xff]  ;;  %v108_v42 = vmul.f32 %v3015_v38, %v3015_v38 }
   0xe   :  { %2485 = vmatprep.subr.msk.mxu1 %vm120_vm0, %v2867_v13  ;;  %122 = vadd.xlane.f32.xlu0 %v121_v37  ;;  %v124_v41 = vsel %vm120_vm0, %v105_v30, 0.0 }
  0x10   :  { %2422 = vmatpush3.xpose.msk.msra.mxu0 %vm120_vm0, %v2880_v14 }
  0x11   :  { %2486 = vmatpush3.xpose.msk.msra.mxu1 %vm120_vm0, %v2885_v15  ;;  %2423 = vmatprep.subr.msk.mxu0 %vm120_vm0, %v2890_v16 }
  0x12   :  { %2487 = vmatprep.subr.msk.mxu1 %vm120_vm0, %v2895_v17 }
  0x14   :  { %2424 = vmatpush3.xpose.msk.msra.mxu0 %vm120_vm0, %v2908_v18 }
  0x15   :  { %2488 = vmatpush3.xpose.msk.msra.mxu1 %vm120_vm0, %v2913_v19  ;;  %2425 = vmatprep.subr.msk.mxu0 %vm120_vm0, %v2918_v20 }
  0x16   :  { %2489 = vmatprep.subr.msk.mxu1 %vm120_vm0, %v2923_v21 }
  0x18   :  { %2426 = vmatpush3.xpose.msk.msra.mxu0 %vm120_vm0, %v2936_v22 }
  0x19   :  { %2490 = vmatpush3.xpose.msk.msra.mxu1 %vm120_vm0, %v2941_v23  ;;  %2427 = vmatprep.subr.msk.mxu0 %vm120_vm0, %v2946_v24 }
  0x1a   :  { %2491 = vmatprep.subr.msk.mxu1 %vm120_vm0, %v2951_v25 }
  0x1c   :  { %2428 = vmatpush3.xpose.msk.msra.mxu0 %vm120_vm0, %v2983_v31 }
  0x1d   :  { %2492 = vmatpush3.xpose.msk.msra.mxu1 %vm120_vm0, %v2988_v32 }
  0x1e   :  { %11 = vsyncpa [#allocation3], 0  ;;  %2429 = vmatprep.subr.msk.mxu0 %vm120_vm0, %v2995_v34  ;;  %2493 = vmatprep.subr.msk.mxu1 %vm120_vm0, %v3000_v35  ;;  %v3034_v43 = vld [vmem:[%s4505_s1 + $0x40] sm:$0xff]  ;;  %v3044_v45 = vld [vmem:[%s4505_s1 + $0xb8] sm:$0xff]  ;;  %v130_v49 = vsel %vm120_vm0, %v107_v40, 0.0  ;;  %v133_v51 = vsel %vm120_vm0, %v108_v42, 0.0 }
  0x1f   :  { %v3039_v44 = vld [vmem:[%s4505_s1 + $0x140] sm:$0xff]  ;;  %v3049_v46 = vld [vmem:[%s4505_s1 + $0x1b8] sm:$0xff]  ;;  %v3054_v47 = vld [vmem:[%s4504_s0 + $0x28] sm:$0xff]  ;;  %128 = vadd.xlane.f32.xlu1 %v127_v39  ;;  %125 = vadd.xlane.f32.xlu0 %v124_v41 }
  0x20   :  { %v3059_v48 = vld [vmem:[%s4504_s0 + $0x30] sm:$0xff]  ;;  %v109_v50 = vmul.f32 %v3054_v47, %v3054_v47  ;;  %2430 = vmatpush3.xpose.msk.msra.mxu0 %vm120_vm0, %v3034_v43  ;;  %v3078_v53 = vld [vmem:[%s4505_s1 + $0x38] sm:$0xff]  ;;  %v3103_v58 = vld [vmem:[%s4504_s0 + $0x40] sm:$0xff] }
  0x21   :  { %2494 = vmatpush3.xpose.msk.msra.mxu1 %vm120_vm0, %v3039_v44  ;;  %v110_v52 = vmul.f32 %v3059_v48, %v3059_v48  ;;  %2431 = vmatprep.subr.msk.mxu0 %vm120_vm0, %v3044_v45  ;;  %v3083_v54 = vld [vmem:[%s4505_s1 + $0x138] sm:$0xff]  ;;  %v3088_v55 = vld [vmem:[%s4505_s1 + $0xb0] sm:$0xff]  ;;  %v112_v62 = vmul.f32 %v3103_v58, %v3103_v58  ;;  %v3132_v30 = vld [vmem:[%s4505_s1 + $0xa8] sm:$0xff] }
  0x22   :  { %2495 = vmatprep.subr.msk.mxu1 %vm120_vm0, %v3049_v46  ;;  %v3093_v56 = vld [vmem:[%s4505_s1 + $0x1b0] sm:$0xff]  ;;  %v3098_v57 = vld [vmem:[%s4504_s0 + $0x38] sm:$0xff]  ;;  %v136_v59 = vsel %vm120_vm0, %v109_v50, 0.0  ;;  %4559 = vst [vmem:[#allocation5_spill] sm:$0xff] %v3132_v30  ;;  %v3137_v33 = vld [vmem:[%s4505_s1 + $0x1a8] sm:$0xff] }
  0x23   :  { %131 = vadd.xlane.f32.xlu1 %v130_v49  ;;  %134 = vadd.xlane.f32.xlu0 %v133_v51  ;;  %v111_v60 = vmul.f32 %v3098_v57, %v3098_v57  ;;  %v139_v61 = vsel %vm120_vm0, %v110_v52, 0.0  ;;  %v3122_v63 = vld [vmem:[%s4505_s1 + $0x30] sm:$0xff]  ;;  %4560 = vst [vmem:[#allocation6_spill] sm:$0xff] %v3137_v33  ;;  %v3142_v37 = vld [vmem:[%s4504_s0 + $0x48] sm:$0xff]  ;;  %v145_v42 = vsel %vm120_vm0, %v112_v62, 0.0  ;;  %v3176_v52 = vld [vmem:[%s4505_s1 + $0xa0] sm:$0xff] }
  0x24   :  { %2432 = vmatpush3.xpose.msk.msra.mxu0 %vm120_vm0, %v3078_v53  ;;  %v3127_v29 = vld [vmem:[%s4505_s1 + $0x130] sm:$0xff]  ;;  %v113_v41 = vmul.f32 %v3142_v37, %v3142_v37  ;;  %v3166_v50 = vld [vmem:[%s4505_s1 + $0x28] sm:$0xff]  ;;  %4563 = vst [vmem:[#allocation9_spill] sm:$0xff] %v3176_v52 }
  0x25   :  { %2496 = vmatpush3.xpose.msk.msra.mxu1 %vm120_vm0, %v3083_v54  ;;  %2433 = vmatprep.subr.msk.mxu0 %vm120_vm0, %v3088_v55  ;;  %v3147_v39 = vld [vmem:[%s4504_s0 + $0x50] sm:$0xff]  ;;  %v142_v40 = vsel %vm120_vm0, %v111_v60, 0.0  ;;  %4561 = vst [vmem:[#allocation7_spill] sm:$0xff] %v3166_v50  ;;  %v3171_v51 = vld [vmem:[%s4505_s1 + $0x128] sm:$0xff]  ;;  %v3186_v60 = vld [vmem:[%s4504_s0 + $0x58] sm:$0xff] }
  0x26   :  { %2497 = vmatprep.subr.msk.mxu1 %vm120_vm0, %v3093_v56  ;;  %v114_v49 = vmul.f32 %v3147_v39, %v3147_v39  ;;  %4562 = vst [vmem:[#allocation8_spill] sm:$0xff] %v3171_v51  ;;  %4565 = vst [vmem:[#allocation11_spill] sm:$0xff] %v3186_v60  ;;  %v148_v62 = vsel %vm120_vm0, %v113_v41, 0.0  ;;  %v3210_v41 = vld [vmem:[%s4505_s1 + $0x20] sm:$0xff] }
  0x27   :  { %137 = vadd.xlane.f32.xlu1 %v136_v59  ;;  %140 = vadd.xlane.f32.xlu0 %v139_v61  ;;  %v3181_v59 = vld [vmem:[%s4505_s1 + $0x1a0] sm:$0xff] }
  0x28   :  { %2434 = vmatpush3.xpose.msk.msra.mxu0 %vm120_vm0, %v3122_v63  ;;  %4564 = vst [vmem:[#allocation10_spill] sm:$0xff] %v3181_v59  ;;  %v3191_v61 = vld [vmem:[%s4504_s0 + $0x60] sm:$0xff] }
  0x29   :  { %2498 = vmatpush3.xpose.msk.msra.mxu1 %vm120_vm0, %v3127_v29  ;;  %2435 = vmatprep.subr.msk.mxu0 %vm120_vm0, %v3132_v30  ;;  %4566 = vst [vmem:[#allocation12_spill] sm:$0xff] %v3191_v61  ;;  %v151_v30 = vsel %vm120_vm0, %v114_v49, 0.0  ;;  %v3220_v49 = vld [vmem:[%s4505_s1 + $0x98] sm:$0xff] }
  0x2a   :  { %2499 = vmatprep.subr.msk.mxu1 %vm120_vm0, %v3137_v33  ;;  %v115_v33 = vmul.f32 %v3186_v60, %v3186_v60  ;;  %4568 = vst [vmem:[#allocation14_spill] sm:$0xff] %v3220_v49 }
  0x2b   :  { %143 = vadd.xlane.f32.xlu1 %v142_v40  ;;  %146 = vadd.xlane.f32.xlu0 %v145_v42  ;;  %v116_v40 = vmul.f32 %v3191_v61, %v3191_v61  ;;  %v3215_v42 = vld [vmem:[%s4505_s1 + $0x120] sm:$0xff]  ;;  %v3225_v61 = vld [vmem:[%s4505_s1 + $0x198] sm:$0xff] }
  0x2c   :  { %2436 = vmatpush3.xpose.msk.msra.mxu0 %vm120_vm0, %v3166_v50  ;;  %4567 = vst [vmem:[#allocation13_spill] sm:$0xff] %v3215_v42  ;;  %4569 = vst [vmem:[#allocation15_spill] sm:$0xff] %v3225_v61 }
  0x2d   :  { %2500 = vmatpush3.xpose.msk.msra.mxu1 %vm120_vm0, %v3171_v51  ;;  %2437 = vmatprep.subr.msk.mxu0 %vm120_vm0, %v3176_v52  ;;  %v3235_v52 = vld [vmem:[%s4504_s0 + $0x70] sm:$0xff]  ;;  %v154_v51 = vsel %vm120_vm0, %v115_v33, 0.0  ;;  %v157_v60 = vsel %vm120_vm0, %v116_v40, 0.0  ;;  %v3259_v33 = vld [vmem:[%s4505_s1 + $0x118] sm:$0xff] }
  0x2e   :  { %2501 = vmatprep.subr.msk.mxu1 %vm120_vm0, %v3181_v59  ;;  %v3230_v59 = vld [vmem:[%s4504_s0 + $0x68] sm:$0xff]  ;;  %4571 = vst [vmem:[#allocation17_spill] sm:$0xff] %v3235_v52  ;;  %v3264_v40 = vld [vmem:[%s4505_s1 + $0x90] sm:$0xff] }
  0x2f   :  { %4570 = vst [vmem:[#allocation16_spill] sm:$0xff] %v3230_v59  ;;  %149 = vadd.xlane.f32.xlu1 %v148_v62  ;;  %152 = vadd.xlane.f32.xlu0 %v151_v30  ;;  %v117_v50 = vmul.f32 %v3230_v59, %v3230_v59  ;;  %v118_v62 = vmul.f32 %v3235_v52, %v3235_v52  ;;  %v3254_v30 = vld [vmem:[%s4505_s1 + $0x18] sm:$0xff]  ;;  %v3269_v52 = vld [vmem:[%s4505_s1 + $0x190] sm:$0xff] }
  0x30   :  { %2438 = vmatpush3.xpose.msk.msra.mxu0 %vm120_vm0, %v3210_v41  ;;  %4572 = vst [vmem:[#allocation18_spill] sm:$0xff] %v3269_v52  ;;  %v3274_v59 = vld [vmem:[%s4504_s0 + $0x78] sm:$0xff] }
  0x31   :  { %2502 = vmatpush3.xpose.msk.msra.mxu1 %vm120_vm0, %v3215_v42  ;;  %2439 = vmatprep.subr.msk.mxu0 %vm120_vm0, %v3220_v49  ;;  %4573 = vst [vmem:[#allocation19_spill] sm:$0xff] %v3274_v59  ;;  %v119_v49 = vmul.f32 %v3274_v59, %v3274_v59  ;;  %v163_v42 = vsel %vm120_vm0, %v118_v62, 0.0  ;;  %v3306_v62 = vld [vmem:[%s4505_s1 + $0x188] sm:$0xff] }
  0x32   :  { %2503 = vmatprep.subr.msk.mxu1 %vm120_vm0, %v3225_v61  ;;  %v160_v61 = vsel %vm120_vm0, %v117_v50, 0.0  ;;  %v3291_v50 = vld [vmem:[%s4505_s1 + $0x10] sm:$0xff]  ;;  %4574 = vst [vmem:[#allocation20_spill] sm:$0xff] %v3306_v62 }
  0x33   :  { %155 = vadd.xlane.f32.xlu1 %v154_v51  ;;  %158 = vadd.xlane.f32.xlu0 %v157_v60  ;;  %v3296_v51 = vld [vmem:[%s4505_s1 + $0x110] sm:$0xff]  ;;  %v3301_v60 = vld [vmem:[%s4505_s1 + $0x88] sm:$0xff]  ;;  %v166_v59 = vsel %vm120_vm0, %v119_v49, 0.0  ;;  %v3335_v49 = vld [vmem:[%s4505_s1 + $0x180] sm:$0xff] }
  0x34   :  { %2440 = vmatpush3.xpose.msk.msra.mxu0 %vm120_vm0, %v3254_v30 }
  0x35   :  { %2504 = vmatpush3.xpose.msk.msra.mxu1 %vm120_vm0, %v3259_v33  ;;  %2441 = vmatprep.subr.msk.mxu0 %vm120_vm0, %v3264_v40 }
  0x36   :  { %2505 = vmatprep.subr.msk.mxu1 %vm120_vm0, %v3269_v52  ;;  %v3320_v52 = vld [vmem:[%s4505_s1 + $0x8] sm:$0xff] }
  0x37   :  { %161 = vadd.xlane.f32.xlu1 %v160_v61  ;;  %164 = vadd.xlane.f32.xlu0 %v163_v42  ;;  %v3325_v61 = vld [vmem:[%s4505_s1 + $0x108] sm:$0xff]  ;;  %v3330_v42 = vld [vmem:[%s4505_s1 + $0x80] sm:$0xff] }
  0x38   :  { %2442 = vmatpush3.xpose.msk.msra.mxu0 %vm120_vm0, %v3291_v50 }
  0x39   :  { %2506 = vmatpush3.xpose.msk.msra.mxu1 %vm120_vm0, %v3296_v51  ;;  %2443 = vmatprep.subr.msk.mxu0 %vm120_vm0, %v3301_v60 }
  0x3a   :  { %2507 = vmatprep.subr.msk.mxu1 %vm120_vm0, %v3306_v62  ;;  %v3348_v62 = vld [vmem:[%s4505_s1] sm:$0xff] }
  0x3b   :  { %167 = vadd.xlane.f32.xlu1 %v166_v59  ;;  %v3353_v59 = vld [vmem:[%s4505_s1 + $0x100] sm:$0xff] }
  0x3c   :  { %2444 = vmatpush3.xpose.msk.msra.mxu0 %vm120_vm0, %v3320_v52 }
  0x3d   :  { %2508 = vmatpush3.xpose.msk.msra.mxu1 %vm120_vm0, %v3325_v61  ;;  %2445 = vmatprep.subr.msk.mxu0 %vm120_vm0, %v3330_v42 }
  0x3e   :  { %2509 = vmatprep.subr.msk.mxu1 %vm120_vm0, %v3335_v49 }
  0x40   :  { %2446 = vmatpush3.xpose.msk.msra.mxu0 %vm120_vm0, %v3348_v62 }
  0x41   :  { %2510 = vmatpush3.xpose.msk.msra.mxu1 %vm120_vm0, %v3353_v59  ;;  %2543 = vmatprep.subr.mxu0 %v2782_v0  ;;  %v4575_v0 = vld [vmem:[#allocation5_spill] sm:$0xff] }
  0x42   :  { %2623 = vmatprep.subr.mxu1 %v2787_v1  ;;  %v4576_v1 = vld [vmem:[#allocation6_spill] sm:$0xff] }
  0x43   :  { %2448 = vmatmul.mubr.msk.f32.vlgmr.msra.gmra.mxu0 %vm120_vm0, %v2956_v26 }
  0x44   :  { %2512 = vmatmul.mubr.msk.f32.vlgmr.msra.gmra.mxu1 %vm120_vm0, %v2956_v26  ;;  %2449 = vmatprep.mubr.msk.f32.mxu0 %vm120_vm0, %v2961_v27 }
  0x45   :  { %2513 = vmatprep.mubr.msk.f32.mxu1 %vm120_vm0, %v2961_v27  ;;  %2544 = vmatpush3.msra.mxu0 %v2792_v2  ;;  %v4577_v2 = vld [vmem:[#allocation11_spill] sm:$0xff] }
  0x46   :  { %2624 = vmatpush3.msra.mxu1 %v2801_v3  ;;  %2545 = vmatprep.subr.mxu0 %v2806_v4  ;;  %v4578_v3 = vld [vmem:[#allocation7_spill] sm:$0xff]  ;;  %v4579_v4 = vld [vmem:[#allocation8_spill] sm:$0xff] }
  0x47   :  { %2625 = vmatprep.subr.mxu1 %v2811_v5  ;;  %2450 = vmatmul.mubr.msk.f32.gmra.mxu0 %vm120_vm0, %v2961_v27  ;;  %v4580_v5 = vld [vmem:[#allocation9_spill] sm:$0xff] }
  0x48   :  { %2514 = vmatmul.mubr.msk.f32.gmra.mxu1 %vm120_vm0, %v2961_v27  ;;  %2451 = vmatprep.mubr.msk.f32.mxu0 %vm120_vm0, %v2970_v28 }
  0x49   :  { %2515 = vmatprep.mubr.msk.f32.mxu1 %vm120_vm0, %v2970_v28  ;;  %2546 = vmatpush3.msra.mxu0 %v2824_v6  ;;  %v4581_v6 = vld [vmem:[#allocation10_spill] sm:$0xff] }
  0x4a   :  { %2626 = vmatpush3.msra.mxu1 %v2829_v7  ;;  %2547 = vmatprep.subr.mxu0 %v2834_v8  ;;  %v4582_v7 = vld [vmem:[#allocation12_spill] sm:$0xff]  ;;  %v4583_v8 = vld [vmem:[#allocation13_spill] sm:$0xff] }
  0x4b   :  { %2627 = vmatprep.subr.mxu1 %v2839_v9  ;;  %2452 = vmatmul.mubr.msk.f32.gmra.mxu0 %vm120_vm0, %v2970_v28  ;;  %v4584_v9 = vld [vmem:[#allocation14_spill] sm:$0xff] }
  0x4c   :  { %2516 = vmatmul.mubr.msk.f32.gmra.mxu1 %vm120_vm0, %v2970_v28  ;;  %2453 = vmatprep.mubr.msk.f32.mxu0 %vm120_vm0, %v3009_v36 }
  0x4d   :  { %2517 = vmatprep.mubr.msk.f32.mxu1 %vm120_vm0, %v3009_v36  ;;  %2548 = vmatpush3.msra.mxu0 %v2852_v10  ;;  %v4585_v10 = vld [vmem:[#allocation15_spill] sm:$0xff] }
  0x4e   :  { %2628 = vmatpush3.msra.mxu1 %v2857_v11  ;;  %2549 = vmatprep.subr.mxu0 %v2862_v12  ;;  %v4586_v11 = vld [vmem:[#allocation16_spill] sm:$0xff]  ;;  %v4587_v12 = vld [vmem:[#allocation18_spill] sm:$0xff] }
  0x4f   :  { %2629 = vmatprep.subr.mxu1 %v2867_v13  ;;  %2454 = vmatmul.mubr.msk.f32.gmra.mxu0 %vm120_vm0, %v3009_v36  ;;  %v4588_v13 = vld [vmem:[#allocation17_spill] sm:$0xff] }
  0x50   :  { %2518 = vmatmul.mubr.msk.f32.gmra.mxu1 %vm120_vm0, %v3009_v36  ;;  %2455 = vmatprep.mubr.msk.f32.mxu0 %vm120_vm0, %v3015_v38 }
  0x51   :  { %2519 = vmatprep.mubr.msk.f32.mxu1 %vm120_vm0, %v3015_v38  ;;  %2550 = vmatpush3.msra.mxu0 %v2880_v14  ;;  %v4589_v14 = vld [vmem:[#allocation20_spill] sm:$0xff] }
  0x52   :  { %2630 = vmatpush3.msra.mxu1 %v2885_v15  ;;  %2551 = vmatprep.subr.mxu0 %v2890_v16  ;;  %v4590_v15 = vld [vmem:[#allocation19_spill] sm:$0xff]  ;;  %v4531_v16 = vlaneseq }
  0x53   :  { %2631 = vmatprep.subr.mxu1 %v2895_v17  ;;  %2456 = vmatmul.mubr.msk.f32.gmra.mxu0 %vm120_vm0, %v3015_v38 }
  0x54   :  { %2520 = vmatmul.mubr.msk.f32.gmra.mxu1 %vm120_vm0, %v3015_v38  ;;  %2457 = vmatprep.mubr.msk.f32.mxu0 %vm120_vm0, %v3054_v47  ;;  %v734_v17 = vshrl.u32 %v4531_v16, 7 }
  0x55   :  { %2521 = vmatprep.mubr.msk.f32.mxu1 %vm120_vm0, %v3054_v47  ;;  %2552 = vmatpush3.msra.mxu0 %v2908_v18 }
  0x56   :  { %2632 = vmatpush3.msra.mxu1 %v2913_v19  ;;  %2553 = vmatprep.subr.mxu0 %v2918_v20  ;;  %v735_v18 = vsub.s32 0, %v734_v17  ;;  %v739_v19 = vsub.s32 1, %v734_v17  ;;  %v731_v20 = vld [vmem:[%s4506_s2] sm:$0xf] }
  0x57   :  { %2633 = vmatprep.subr.mxu1 %v2923_v21  ;;  %2458 = vmatmul.mubr.msk.f32.gmra.mxu0 %vm120_vm0, %v3054_v47 }
  0x58   :  { %2522 = vmatmul.mubr.msk.f32.gmra.mxu1 %vm120_vm0, %v3054_v47  ;;  %2459 = vmatprep.mubr.msk.f32.mxu0 %vm120_vm0, %v3059_v48 }
  0x59   :  { %2523 = vmatprep.mubr.msk.f32.mxu1 %vm120_vm0, %v3059_v48  ;;  %2554 = vmatpush3.msra.mxu0 %v2936_v22  ;;  %v743_v22 = vsub.s32 2, %v734_v17 }
  0x5a   :  { %2634 = vmatpush3.msra.mxu1 %v2941_v23  ;;  %2555 = vmatprep.subr.mxu0 %v2946_v24  ;;  %v3551_v23 = vrot.slane %v731_v20, %v735_v18  ;;  %v3553_v24 = vrot.slane %v731_v20, %v739_v19 }
  0x5b   :  { %2635 = vmatprep.subr.mxu1 %v2951_v25  ;;  %2460 = vmatmul.mubr.msk.f32.gmra.mxu0 %vm120_vm0, %v3059_v48  ;;  %v747_v25 = vsub.s32 3, %v734_v17  ;;  %v3555_v28 = vrot.slane %v731_v20, %v743_v22 }
  0x5c   :  { %2524 = vmatmul.mubr.msk.f32.gmra.mxu1 %vm120_vm0, %v3059_v48  ;;  %2461 = vmatprep.mubr.msk.f32.mxu0 %vm120_vm0, %v3098_v57 }
  0x5d   :  { %2525 = vmatprep.mubr.msk.f32.mxu1 %vm120_vm0, %v3098_v57  ;;  %2556 = vmatpush3.msra.mxu0 %v2983_v31 }
  0x5e   :  { %2636 = vmatpush3.msra.mxu1 %v2988_v32  ;;  %2557 = vmatprep.subr.mxu0 %v2995_v34 }
  0x5f   :  { %2637 = vmatprep.subr.mxu1 %v3000_v35  ;;  %2462 = vmatmul.mubr.msk.f32.gmra.mxu0 %vm120_vm0, %v3098_v57 }
  0x60   :  { %2526 = vmatmul.mubr.msk.f32.gmra.mxu1 %vm120_vm0, %v3098_v57  ;;  %2463 = vmatprep.mubr.msk.f32.mxu0 %vm120_vm0, %v3103_v58 }
  0x61   :  { %2527 = vmatprep.mubr.msk.f32.mxu1 %vm120_vm0, %v3103_v58  ;;  %2558 = vmatpush3.msra.mxu0 %v3034_v43  ;;  %v3559_v43 = vrot.slane %v731_v20, %v747_v25 }
  0x62   :  { %2638 = vmatpush3.msra.mxu1 %v3039_v44  ;;  %2559 = vmatprep.subr.mxu0 %v3044_v45 }
  0x63   :  { %2639 = vmatprep.subr.mxu1 %v3049_v46  ;;  %2464 = vmatmul.mubr.msk.f32.gmra.mxu0 %vm120_vm0, %v3103_v58 }
  0x64   :  { %2528 = vmatmul.mubr.msk.f32.gmra.mxu1 %vm120_vm0, %v3103_v58  ;;  %2465 = vmatprep.mubr.msk.f32.mxu0 %vm120_vm0, %v3142_v37 }
  0x65   :  { %2529 = vmatprep.mubr.msk.f32.mxu1 %vm120_vm0, %v3142_v37  ;;  %2560 = vmatpush3.msra.mxu0 %v3078_v53 }
  0x66   :  { %2640 = vmatpush3.msra.mxu1 %v3083_v54  ;;  %2561 = vmatprep.subr.mxu0 %v3088_v55 }
  0x67   :  { %2641 = vmatprep.subr.mxu1 %v3093_v56  ;;  %2466 = vmatmul.mubr.msk.f32.gmra.mxu0 %vm120_vm0, %v3142_v37 }
  0x68   :  { %2530 = vmatmul.mubr.msk.f32.gmra.mxu1 %vm120_vm0, %v3142_v37  ;;  %2467 = vmatprep.mubr.msk.f32.mxu0 %vm120_vm0, %v3147_v39 }
  0x69   :  { %2531 = vmatprep.mubr.msk.f32.mxu1 %vm120_vm0, %v3147_v39  ;;  %2562 = vmatpush3.msra.mxu0 %v3122_v63 }
  0x6a   :  { %2642 = vmatpush3.msra.mxu1 %v3127_v29  ;;  %2563 = vmatprep.subr.mxu0 %v4575_v0 }
  0x6b   :  { %2643 = vmatprep.subr.mxu1 %v4576_v1  ;;  %2468 = vmatmul.mubr.msk.f32.gmra.mxu0 %vm120_vm0, %v3147_v39 }
  0x6c   :  { %2532 = vmatmul.mubr.msk.f32.gmra.mxu1 %vm120_vm0, %v3147_v39  ;;  %2469 = vmatprep.mubr.msk.f32.mxu0 %vm120_vm0, %v4577_v2 }
  0x6d   :  { %2533 = vmatprep.mubr.msk.f32.mxu1 %vm120_vm0, %v4577_v2  ;;  %2564 = vmatpush3.msra.mxu0 %v4578_v3 }
  0x6e   :  { %2644 = vmatpush3.msra.mxu1 %v4579_v4  ;;  %2565 = vmatprep.subr.mxu0 %v4580_v5 }
  0x6f   :  { %2645 = vmatprep.subr.mxu1 %v4581_v6  ;;  %2470 = vmatmul.mubr.msk.f32.gmra.mxu0 %vm120_vm0, %v4577_v2 }
  0x70   :  { %2534 = vmatmul.mubr.msk.f32.gmra.mxu1 %vm120_vm0, %v4577_v2  ;;  %2471 = vmatprep.mubr.msk.f32.mxu0 %vm120_vm0, %v4582_v7 }
  0x71   :  { %2535 = vmatprep.mubr.msk.f32.mxu1 %vm120_vm0, %v4582_v7  ;;  %2566 = vmatpush3.msra.mxu0 %v3210_v41 }
  0x72   :  { %2646 = vmatpush3.msra.mxu1 %v4583_v8  ;;  %2567 = vmatprep.subr.mxu0 %v4584_v9 }
  0x73   :  { %2647 = vmatprep.subr.mxu1 %v4585_v10  ;;  %2472 = vmatmul.mubr.msk.f32.gmra.mxu0 %vm120_vm0, %v4582_v7 }
  0x74   :  { %2536 = vmatmul.mubr.msk.f32.gmra.mxu1 %vm120_vm0, %v4582_v7  ;;  %2473 = vmatprep.mubr.msk.f32.mxu0 %vm120_vm0, %v4586_v11 }
  0x75   :  { %2537 = vmatprep.mubr.msk.f32.mxu1 %vm120_vm0, %v4586_v11  ;;  %2568 = vmatpush3.msra.mxu0 %v3254_v30 }
  0x76   :  { %2648 = vmatpush3.msra.mxu1 %v3259_v33  ;;  %2569 = vmatprep.subr.mxu0 %v3264_v40 }
  0x77   :  { %2649 = vmatprep.subr.mxu1 %v4587_v12  ;;  %2474 = vmatmul.mubr.msk.f32.gmra.mxu0 %vm120_vm0, %v4586_v11 }
  0x78   :  { %2538 = vmatmul.mubr.msk.f32.gmra.mxu1 %vm120_vm0, %v4586_v11  ;;  %2475 = vmatprep.mubr.msk.f32.mxu0 %vm120_vm0, %v4588_v13 }
  0x79   :  { %2539 = vmatprep.mubr.msk.f32.mxu1 %vm120_vm0, %v4588_v13  ;;  %2570 = vmatpush3.msra.mxu0 %v3291_v50 }
  0x7a   :  { %2650 = vmatpush3.msra.mxu1 %v3296_v51  ;;  %2571 = vmatprep.subr.mxu0 %v3301_v60 }
  0x7b   :  { %2651 = vmatprep.subr.mxu1 %v4589_v14  ;;  %2476 = vmatmul.mubr.msk.f32.gmra.mxu0 %vm120_vm0, %v4588_v13 }
  0x7c   :  { %2540 = vmatmul.mubr.msk.f32.gmra.mxu1 %vm120_vm0, %v4588_v13  ;;  %2477 = vmatprep.mubr.msk.f32.mxu0 %vm120_vm0, %v4590_v15 }
  0x7d   :  { %2541 = vmatprep.mubr.msk.f32.mxu1 %vm120_vm0, %v4590_v15  ;;  %2572 = vmatpush3.msra.mxu0 %v3320_v52 }
  0x7e   :  { %2652 = vmatpush3.msra.mxu1 %v3325_v61  ;;  %2573 = vmatprep.subr.mxu0 %v3330_v42 }
  0x7f   :  { %2653 = vmatprep.subr.mxu1 %v3335_v49  ;;  %2478 = vmatmul.mubr.msk.f32.gmra.mxu0 %vm120_vm0, %v4590_v15 }
  0x80   :  { %2542 = vmatmul.mubr.msk.f32.gmra.mxu1 %vm120_vm0, %v4590_v15  ;;  %2574 = vmatpush3.msra.mxu0 %v3348_v62 }
  0x81   :  { %2654 = vmatpush3.msra.mxu1 %v3353_v59 }
  0x97   :  { %v123_v21 = vpop.xlane.xlu0 %122 }
  0x98   :  { %v753_v32 = vadd.f32 %v3551_v23, %v123_v21  ;;  %v754_v34 = vadd.f32 %v3553_v24, %v123_v21  ;;  %v755_v47 = vadd.f32 %v3555_v28, %v123_v21  ;;  %v756_v63 = vadd.f32 %v3559_v43, %v123_v21 }
  0xa8   :  { %v126_v35 = vpop.xlane.xlu0 %125  ;;  %v129_v45 = vpop.xlane.xlu1 %128 }
  0xa9   :  { %v757_v54 = vadd.f32 %v3551_v23, %v126_v35  ;;  %v758_v58 = vadd.f32 %v3553_v24, %v126_v35  ;;  %v759_v30 = vadd.f32 %v3555_v28, %v126_v35  ;;  %v761_v50 = vadd.f32 %v3551_v23, %v129_v45 }
  0xaa   :  { %v763_v60 = vadd.f32 %v3555_v28, %v129_v45  ;;  %v762_v59 = vadd.f32 %v3553_v24, %v129_v45  ;;  %v760_v2 = vadd.f32 %v3559_v43, %v126_v35  ;;  %v764_v25 = vadd.f32 %v3559_v43, %v129_v45 }
  0xac   :  { %v132_v0 = vpop.xlane.xlu1 %131  ;;  %v135_v20 = vpop.xlane.xlu0 %134 }
  0xad   :  { %v765_v12 = vadd.f32 %v3551_v23, %v132_v0  ;;  %v766_v15 = vadd.f32 %v3553_v24, %v132_v0  ;;  %v767_v35 = vadd.f32 %v3555_v28, %v132_v0  ;;  %v770_v45 = vadd.f32 %v3553_v24, %v135_v20 }
 0x103   :  { %v475_v26 = vpop.f32.mrf.mxu0 }
 0x104   :  { %v636_v27 = vpop.f32.mrf.mxu1  ;;  %v817_v31 = vmul.f32 2.0, %v475_v26 }
 0x105   :  { %v477_v36 = vpop.f32.mrf.mxu0  ;;  %v819_v46 = vmul.f32 2.0, %v636_v27 }
 0x106   :  { %v638_v38 = vpop.f32.mrf.mxu1  ;;  %v818_v44 = vmul.f32 2.0, %v477_v36  ;;  %v3563_v55 = vsub.f32 %v753_v32, %v817_v31 }
 0x107   :  { %v481_v48 = vpop.f32.mrf.mxu0  ;;  %v820_v29 = vmul.f32 2.0, %v638_v38  ;;  %v3574_v62 = vsub.f32 %v755_v47, %v819_v46  ;;  %v769_v47 = vadd.f32 %v3551_v23, %v135_v20 }
 0x108   :  { %v642_v53 = vpop.f32.mrf.mxu1  ;;  %v3565_v56 = vsub.f32 %v754_v34, %v818_v44  ;;  %v821_v57 = vmul.f32 2.0, %v481_v48 }
 0x109   :  { %v483_v37 = vpop.f32.mrf.mxu0  ;;  %v823_v41 = vmul.f32 2.0, %v642_v53  ;;  %v3581_v1 = vsub.f32 %v756_v63, %v820_v29 }
 0x10a   :  { %v644_v39 = vpop.f32.mrf.mxu1  ;;  %v945_v52 = vmin.f32 %v3563_v55, %v3565_v56  ;;  %v822_v33 = vmul.f32 2.0, %v483_v37  ;;  %v3576_v61 = vsub.f32 %v757_v54, %v821_v57  ;;  %v768_v37 = vadd.f32 %v3559_v43, %v132_v0 }
 0x10b   :  { %v487_v40 = vpop.f32.mrf.mxu0  ;;  %v824_v3 = vmul.f32 2.0, %v644_v39  ;;  %v3587_v10 = vsub.f32 %v759_v30, %v823_v41 }
 0x10c   :  { %v648_v51 = vpop.f32.mrf.mxu1  ;;  %v3578_v42 = vsub.f32 %v758_v58, %v822_v33  ;;  %v825_v49 = vmul.f32 2.0, %v487_v40  ;;  %v946_v6 = vmin.f32 %v945_v52, %v3574_v62  ;;  %v138_v58 = vpop.xlane.xlu1 %137  ;;  %v771_v40 = vadd.f32 %v3555_v28, %v135_v20 }
 0x10d   :  { %v489_v4 = vpop.f32.mrf.mxu0  ;;  %v827_v8 = vmul.f32 2.0, %v648_v51  ;;  %v3597_v22 = vsub.f32 %v760_v2, %v824_v3 }
 0x10e   :  { %v650_v5 = vpop.f32.mrf.mxu1  ;;  %v950_v7 = vmin.f32 %v3576_v61, %v3578_v42  ;;  %v826_v9 = vmul.f32 2.0, %v489_v4  ;;  %v947_v14 = vmin.f32 %v946_v6, %v3581_v1  ;;  %v3592_v17 = vsub.f32 %v761_v50, %v825_v49  ;;  %v141_v6 = vpop.xlane.xlu0 %140 }
 0x10f   :  { %v493_v11 = vpop.f32.mrf.mxu0  ;;  %v828_v26 = vmul.f32 2.0, %v650_v5  ;;  %v3600_v32 = vsub.f32 %v763_v60, %v827_v8  ;;  %v773_v49 = vadd.f32 %v3551_v23, %v138_v58  ;;  %v774_v5 = vadd.f32 %v3553_v24, %v138_v58 }
 0x110   :  { %v654_v13 = vpop.f32.mrf.mxu1  ;;  %v3594_v18 = vsub.f32 %v762_v59, %v826_v9  ;;  %v829_v19 = vmul.f32 2.0, %v493_v11  ;;  %v951_v21 = vmin.f32 %v950_v7, %v3587_v10  ;;  %948 = vmin.xlane.f32.xlu0 %v947_v14  ;;  %v772_v8 = vadd.f32 %v3559_v43, %v135_v20 }
 0x111   :  { %v495_v27 = vpop.f32.mrf.mxu0  ;;  %v831_v38 = vmul.f32 2.0, %v654_v13  ;;  %v3613_v29 = vsub.f32 %v764_v25, %v828_v26 }
 0x112   :  { %v656_v31 = vpop.f32.mrf.mxu1  ;;  %v955_v34 = vmin.f32 %v3592_v17, %v3594_v18  ;;  %v830_v36 = vmul.f32 2.0, %v495_v27  ;;  %v952_v48 = vmin.f32 %v951_v21, %v3597_v22  ;;  %v3608_v53 = vsub.f32 %v765_v12, %v829_v19 }
 0x113   :  { %v499_v44 = vpop.f32.mrf.mxu0  ;;  %v832_v39 = vmul.f32 2.0, %v656_v31  ;;  %v3619_v51 = vsub.f32 %v767_v35, %v831_v38  ;;  %v777_v31 = vadd.f32 %v3551_v23, %v141_v6 }
 0x114   :  { %v660_v46 = vpop.f32.mrf.mxu1  ;;  %v3610_v54 = vsub.f32 %v766_v15, %v830_v36  ;;  %v833_v57 = vmul.f32 2.0, %v499_v44  ;;  %v956_v63 = vmin.f32 %v955_v34, %v3600_v32  ;;  %953 = vmin.xlane.f32.xlu1 %v952_v48  ;;  %v775_v15 = vadd.f32 %v3555_v28, %v138_v58  ;;  %v144_v44 = vpop.xlane.xlu1 %143 }
 0x115   :  { %v501_v52 = vpop.f32.mrf.mxu0  ;;  %v835_v33 = vmul.f32 2.0, %v660_v46  ;;  %v3628_v7 = vsub.f32 %v768_v37, %v832_v39  ;;  %v778_v34 = vadd.f32 %v3553_v24, %v141_v6  ;;  %v776_v48 = vadd.f32 %v3559_v43, %v138_v58 }
 0x116   :  { %v662_v41 = vpop.f32.mrf.mxu1  ;;  %v960_v30 = vmin.f32 %v3608_v53, %v3610_v54  ;;  %v834_v50 = vmul.f32 2.0, %v501_v52  ;;  %v957_v2 = vmin.f32 %v956_v63, %v3613_v29  ;;  %v3623_v0 = vsub.f32 %v769_v47, %v833_v57 }
 0x117   :  { %v505_v60 = vpop.f32.mrf.mxu0  ;;  %v836_v9 = vmul.f32 2.0, %v662_v41  ;;  %v3635_v21 = vsub.f32 %v771_v40, %v835_v33  ;;  %v779_v52 = vadd.f32 %v3555_v28, %v141_v6  ;;  %v781_v40 = vadd.f32 %v3551_v23, %v144_v44 }
 0x118   :  { %v666_v59 = vpop.f32.mrf.mxu1  ;;  %v3625_v3 = vsub.f32 %v770_v45, %v834_v50  ;;  %v837_v4 = vmul.f32 2.0, %v505_v60  ;;  %958 = vmin.xlane.f32.xlu0 %v957_v2  ;;  %v961_v13 = vmin.f32 %v960_v30, %v3619_v51  ;;  %v782_v2 = vadd.f32 %v3553_v24, %v144_v44 }
 0x119   :  { %v507_v11 = vpop.f32.mrf.mxu0  ;;  %v839_v25 = vmul.f32 2.0, %v666_v59  ;;  %v3645_v47 = vsub.f32 %v772_v8, %v836_v9  ;;  %v780_v8 = vadd.f32 %v3559_v43, %v141_v6 }
 0x11a   :  { %v668_v12 = vpop.f32.mrf.mxu1  ;;  %v965_v14 = vmin.f32 %v3623_v0, %v3625_v3  ;;  %v838_v19 = vmul.f32 2.0, %v507_v11  ;;  %v962_v20 = vmin.f32 %v961_v13, %v3628_v7  ;;  %v3640_v35 = vsub.f32 %v773_v49, %v837_v4  ;;  %v147_v4 = vpop.xlane.xlu0 %146 }
 0x11b   :  { %v511_v26 = vpop.f32.mrf.mxu0  ;;  %v840_v45 = vmul.f32 2.0, %v668_v12  ;;  %v3651_v30 = vsub.f32 %v775_v15, %v839_v25  ;;  %v783_v15 = vadd.f32 %v3555_v28, %v144_v44 }
 0x11c   :  { %v672_v27 = vpop.f32.mrf.mxu1  ;;  %v3642_v36 = vsub.f32 %v774_v5, %v838_v19  ;;  %v841_v38 = vmul.f32 2.0, %v511_v26  ;;  %v966_v46 = vmin.f32 %v965_v14, %v3635_v21  ;;  %963 = vmin.xlane.f32.xlu1 %v962_v20  ;;  %v785_v20 = vadd.f32 %v3551_v23, %v147_v4 }
 0x11d   :  { %v513_v57 = vpop.f32.mrf.mxu0  ;;  %v843_v39 = vmul.f32 2.0, %v672_v27  ;;  %v3660_v5 = vsub.f32 %v776_v48, %v840_v45  ;;  %v150_v45 = vpop.xlane.xlu1 %149 }
 0x11e   :  { %v674_v63 = vpop.f32.mrf.mxu1  ;;  %v970_v37 = vmin.f32 %v3640_v35, %v3642_v36  ;;  %v842_v41 = vmul.f32 2.0, %v513_v57  ;;  %v967_v60 = vmin.f32 %v966_v46, %v3645_v47  ;;  %v3655_v58 = vsub.f32 %v777_v31, %v841_v38 }
 0x11f   :  { %v517_v33 = vpop.f32.mrf.mxu0  ;;  %v844_v9 = vmul.f32 2.0, %v674_v63  ;;  %v3667_v25 = vsub.f32 %v779_v52, %v843_v39 }
 0x120   :  { %v678_v50 = vpop.f32.mrf.mxu1  ;;  %v3657_v49 = vsub.f32 %v778_v34, %v842_v41  ;;  %v845_v59 = vmul.f32 2.0, %v517_v33  ;;  %968 = vmin.xlane.f32.xlu0 %v967_v60  ;;  %v971_v13 = vmin.f32 %v970_v37, %v3651_v30  ;;  %v786_v34 = vadd.f32 %v3553_v24, %v147_v4 }
 0x121   :  { %v519_v11 = vpop.f32.mrf.mxu0  ;;  %v847_v26 = vmul.f32 2.0, %v678_v50  ;;  %v3677_v63 = vsub.f32 %v780_v8, %v844_v9  ;;  %v784_v37 = vadd.f32 %v3559_v43, %v144_v44 }
 0x122   :  { %v680_v12 = vpop.f32.mrf.mxu1  ;;  %v975_v14 = vmin.f32 %v3655_v58, %v3657_v49  ;;  %v846_v19 = vmul.f32 2.0, %v519_v11  ;;  %v972_v6 = vmin.f32 %v971_v13, %v3660_v5  ;;  %v3672_v38 = vsub.f32 %v781_v40, %v845_v59 }
 0x123   :  { %v523_v27 = vpop.f32.mrf.mxu0  ;;  %v848_v39 = vmul.f32 2.0, %v680_v12  ;;  %v787_v40 = vadd.f32 %v3555_v28, %v147_v4  ;;  %v3683_v59 = vsub.f32 %v783_v15, %v847_v26  ;;  %v789_v11 = vadd.f32 %v3551_v23, %v150_v45 }
 0x124   :  { %v684_v31 = vpop.f32.mrf.mxu1  ;;  %v3674_v46 = vsub.f32 %v782_v2, %v846_v19  ;;  %v849_v48 = vmul.f32 2.0, %v523_v27  ;;  %v976_v57 = vmin.f32 %v975_v14, %v3667_v25  ;;  %973 = vmin.xlane.f32.xlu1 %v972_v6  ;;  %v790_v14 = vadd.f32 %v3553_v24, %v150_v45  ;;  %v153_v19 = vpop.xlane.xlu0 %152 }
 0x125   :  { %v525_v52 = vpop.f32.mrf.mxu0  ;;  %v851_v50 = vmul.f32 2.0, %v684_v31  ;;  %4591 = vst [vmem:[#allocation5_spill] sm:$0xff] %v3683_v59  ;;  %v3692_v27 = vsub.f32 %v784_v37, %v848_v39  ;;  %v788_v31 = vadd.f32 %v3559_v43, %v147_v4  ;;  %v793_v39 = vadd.f32 %v3551_v23, %v153_v19 }
 0x126   :  { %v686_v41 = vpop.f32.mrf.mxu1  ;;  %v980_v33 = vmin.f32 %v3672_v38, %v3674_v46  ;;  %v850_v60 = vmul.f32 2.0, %v525_v52  ;;  %v977_v9 = vmin.f32 %v976_v57, %v3677_v63  ;;  %v3687_v44 = vsub.f32 %v785_v20, %v849_v48 }
 0x127   :  { %v529_v2 = vpop.f32.mrf.mxu0  ;;  %4594 = vst [vmem:[#allocation7_spill] sm:$0xff] %v3692_v27  ;;  %v852_v15 = vmul.f32 2.0, %v686_v41  ;;  %v3699_v57 = vsub.f32 %v787_v40, %v851_v50  ;;  %v794_v41 = vadd.f32 %v3553_v24, %v153_v19  ;;  %v792_v50 = vadd.f32 %v3559_v43, %v150_v45 }
 0x128   :  { %v690_v8 = vpop.f32.mrf.mxu1  ;;  %4592 = vst [vmem:[#allocation6_spill] sm:$0xff] %v3687_v44  ;;  %v3689_v12 = vsub.f32 %v786_v34, %v850_v60  ;;  %v853_v13 = vmul.f32 2.0, %v529_v2  ;;  %978 = vmin.xlane.f32.xlu0 %v977_v9  ;;  %v981_v52 = vmin.f32 %v980_v33, %v3683_v59  ;;  %v791_v34 = vadd.f32 %v3555_v28, %v150_v45 }
 0x129   :  { %v531_v26 = vpop.f32.mrf.mxu0  ;;  %4595 = vst [vmem:[#allocation8_spill] sm:$0xff] %v3699_v57  ;;  %v855_v60 = vmul.f32 2.0, %v690_v8 }
 0x12a   :  { %4593 = vst [vmem:[#allocation11_spill] sm:$0xff] %v3689_v12  ;;  %v692_v6 = vpop.f32.mrf.mxu1  ;;  %v985_v20 = vmin.f32 %v3687_v44, %v3689_v12  ;;  %v854_v48 = vmul.f32 2.0, %v531_v26  ;;  %v982_v4 = vmin.f32 %v981_v52, %v3692_v27  ;;  %v3704_v9 = vsub.f32 %v789_v11, %v853_v13  ;;  %v156_v12 = vpop.xlane.xlu1 %155 }
 0x12b   :  { %v535_v2 = vpop.f32.mrf.mxu0  ;;  %v3709_v26 = vsub.f32 %v788_v31, %v852_v15  ;;  %v856_v40 = vmul.f32 2.0, %v692_v6  ;;  %v795_v11 = vadd.f32 %v3555_v28, %v153_v19 }
 0x12c   :  { %v696_v37 = vpop.f32.mrf.mxu1  ;;  %4596 = vst [vmem:[#allocation9_spill] sm:$0xff] %v3704_v9  ;;  %v3706_v33 = vsub.f32 %v790_v14, %v854_v48  ;;  %v857_v16 = vmul.f32 2.0, %v535_v2  ;;  %v986_v44 = vmin.f32 %v985_v20, %v3699_v57  ;;  %983 = vmin.xlane.f32.xlu1 %v982_v4  ;;  %v3715_v14 = vsub.f32 %v791_v34, %v855_v60 }
 0x12d   :  { %4598 = vst [vmem:[#allocation12_spill] sm:$0xff] %v3709_v26  ;;  %v537_v8 = vpop.f32.mrf.mxu0  ;;  %v859_v27 = vmul.f32 2.0, %v696_v37  ;;  %v797_v20 = vadd.f32 %v3551_v23, %v156_v12  ;;  %v798_v4 = vadd.f32 %v3553_v24, %v156_v12  ;;  %v3724_v37 = vsub.f32 %v792_v50, %v856_v40 }
 0x12e   :  { %4597 = vst [vmem:[#allocation10_spill] sm:$0xff] %v3706_v33  ;;  %v698_v59 = vpop.f32.mrf.mxu1  ;;  %v990_v52 = vmin.f32 %v3704_v9, %v3706_v33  ;;  %v858_v13 = vmul.f32 2.0, %v537_v8  ;;  %4599 = vst [vmem:[#allocation13_spill] sm:$0xff] %v3715_v14  ;;  %v987_v15 = vmin.f32 %v986_v44, %v3709_v26  ;;  %v3719_v45 = vsub.f32 %v793_v39, %v857_v16  ;;  %v159_v33 = vpop.xlane.xlu0 %158 }
 0x12f   :  { %v541_v48 = vpop.f32.mrf.mxu0  ;;  %4602 = vst [vmem:[#allocation16_spill] sm:$0xff] %v3724_v37  ;;  %v796_v8 = vadd.f32 %v3559_v43, %v153_v19  ;;  %v860_v34 = vmul.f32 2.0, %v698_v59  ;;  %v799_v44 = vadd.f32 %v3555_v28, %v156_v12  ;;  %v801_v40 = vadd.f32 %v3551_v23, %v159_v33 }
 0x130   :  { %v702_v31 = vpop.f32.mrf.mxu1  ;;  %4600 = vst [vmem:[#allocation14_spill] sm:$0xff] %v3719_v45  ;;  %v3721_v6 = vsub.f32 %v794_v41, %v858_v13  ;;  %v861_v2 = vmul.f32 2.0, %v541_v48  ;;  %988 = vmin.xlane.f32.xlu0 %v987_v15  ;;  %v991_v57 = vmin.f32 %v990_v52, %v3715_v14  ;;  %v3731_v41 = vsub.f32 %v795_v11, %v859_v27 }
 0x131   :  { %v543_v60 = vpop.f32.mrf.mxu0  ;;  %v863_v13 = vmul.f32 2.0, %v702_v31  ;;  %v802_v19 = vadd.f32 %v3553_v24, %v159_v33  ;;  %v800_v27 = vadd.f32 %v3559_v43, %v156_v12 }
 0x132   :  { %4601 = vst [vmem:[#allocation15_spill] sm:$0xff] %v3721_v6  ;;  %v704_v9 = vpop.f32.mrf.mxu1  ;;  %v995_v16 = vmin.f32 %v3719_v45, %v3721_v6  ;;  %v862_v39 = vmul.f32 2.0, %v543_v60  ;;  %4603 = vst [vmem:[#allocation18_spill] sm:$0xff] %v3731_v41  ;;  %v992_v59 = vmin.f32 %v991_v57, %v3724_v37  ;;  %v3736_v15 = vsub.f32 %v797_v20, %v861_v2  ;;  %v162_v6 = vpop.xlane.xlu1 %161 }
 0x133   :  { %v547_v48 = vpop.f32.mrf.mxu0  ;;  %v3741_v60 = vsub.f32 %v796_v8, %v860_v34  ;;  %v864_v11 = vmul.f32 2.0, %v704_v9  ;;  %v803_v20 = vadd.f32 %v3555_v28, %v159_v33 }
 0x134   :  { %v708_v50 = vpop.f32.mrf.mxu1  ;;  %4604 = vst [vmem:[#allocation17_spill] sm:$0xff] %v3736_v15  ;;  %v3738_v52 = vsub.f32 %v798_v4, %v862_v39  ;;  %v865_v14 = vmul.f32 2.0, %v547_v48  ;;  %v996_v45 = vmin.f32 %v995_v16, %v3731_v41  ;;  %993 = vmin.xlane.f32.xlu1 %v992_v59  ;;  %v3747_v4 = vsub.f32 %v799_v44, %v863_v13 }
 0x135   :  { %4606 = vst [vmem:[#allocation19_spill] sm:$0xff] %v3741_v60  ;;  %v549_v31 = vpop.f32.mrf.mxu0  ;;  %v867_v37 = vmul.f32 2.0, %v708_v50  ;;  %v805_v16 = vadd.f32 %v3551_v23, %v162_v6  ;;  %v806_v59 = vadd.f32 %v3553_v24, %v162_v6  ;;  %v3756_v50 = vsub.f32 %v800_v27, %v864_v11 }
 0x136   :  { %4605 = vst [vmem:[#allocation20_spill] sm:$0xff] %v3738_v52  ;;  %v710_v26 = vpop.f32.mrf.mxu1  ;;  %v1000_v57 = vmin.f32 %v3736_v15, %v3738_v52  ;;  %v866_v2 = vmul.f32 2.0, %v549_v31  ;;  %4607 = vst [vmem:[#allocation21_spill] sm:$0xff] %v3747_v4  ;;  %v997_v34 = vmin.f32 %v996_v45, %v3741_v60  ;;  %v3751_v12 = vsub.f32 %v801_v40, %v865_v14  ;;  %v165_v52 = vpop.xlane.xlu0 %164 }
 0x137   :  { %v553_v39 = vpop.f32.mrf.mxu0  ;;  %4610 = vst [vmem:[#allocation24_spill] sm:$0xff] %v3756_v50  ;;  %v804_v31 = vadd.f32 %v3559_v43, %v159_v33  ;;  %v868_v44 = vmul.f32 2.0, %v710_v26  ;;  %v807_v45 = vadd.f32 %v3555_v28, %v162_v6  ;;  %v809_v11 = vadd.f32 %v3551_v23, %v165_v52 }
 0x138   :  { %v714_v8 = vpop.f32.mrf.mxu1  ;;  %4608 = vst [vmem:[#allocation22_spill] sm:$0xff] %v3751_v12  ;;  %v3753_v9 = vsub.f32 %v802_v19, %v866_v2  ;;  %v869_v48 = vmul.f32 2.0, %v553_v39  ;;  %998 = vmin.xlane.f32.xlu0 %v997_v34  ;;  %v1001_v41 = vmin.f32 %v1000_v57, %v3747_v4  ;;  %v3763_v19 = vsub.f32 %v803_v20, %v867_v37 }
 0x139   :  { %v555_v13 = vpop.f32.mrf.mxu0  ;;  %v871_v2 = vmul.f32 2.0, %v714_v8  ;;  %v810_v26 = vadd.f32 %v3553_v24, %v165_v52  ;;  %v808_v37 = vadd.f32 %v3559_v43, %v162_v6  ;;  %v811_v8 = vadd.f32 %v3555_v28, %v165_v52 }
 0x13a   :  { %4609 = vst [vmem:[#allocation23_spill] sm:$0xff] %v3753_v9  ;;  %v716_v15 = vpop.f32.mrf.mxu1  ;;  %v1005_v14 = vmin.f32 %v3751_v12, %v3753_v9  ;;  %v870_v40 = vmul.f32 2.0, %v555_v13  ;;  %4611 = vst [vmem:[#allocation25_spill] sm:$0xff] %v3763_v19  ;;  %v1002_v33 = vmin.f32 %v1001_v41, %v3756_v50  ;;  %v3768_v34 = vsub.f32 %v805_v16, %v869_v48  ;;  %v168_v9 = vpop.xlane.xlu1 %167 }
 0x13b   :  { %v559_v39 = vpop.f32.mrf.mxu0  ;;  %v3773_v13 = vsub.f32 %v804_v31, %v868_v44  ;;  %v872_v20 = vmul.f32 2.0, %v716_v15  ;;  %v813_v44 = vadd.f32 %v3551_v23, %v168_v9 }
 0x13c   :  { %v720_v27 = vpop.f32.mrf.mxu1  ;;  %v3770_v57 = vsub.f32 %v806_v59, %v870_v40  ;;  %v873_v4 = vmul.f32 2.0, %v559_v39  ;;  %v1006_v12 = vmin.f32 %v1005_v14, %v3763_v19  ;;  %1003 = vmin.xlane.f32.xlu1 %v1002_v33  ;;  %v812_v40 = vadd.f32 %v3559_v43, %v165_v52 }
 0x13d   :  { %v561_v60 = vpop.f32.mrf.mxu0  ;;  %v875_v48 = vmul.f32 2.0, %v720_v27  ;;  %v3780_v39 = vsub.f32 %v807_v45, %v871_v2  ;;  %v3789_v27 = vsub.f32 %v808_v37, %v872_v20  ;;  %v815_v52 = vadd.f32 %v3555_v28, %v168_v9 }
 0x13e   :  { %4612 = vst [vmem:[#allocation26_spill] sm:$0xff] %v3770_v57  ;;  %v722_v41 = vpop.f32.mrf.mxu1  ;;  %v1010_v16 = vmin.f32 %v3768_v34, %v3770_v57  ;;  %v874_v59 = vmul.f32 2.0, %v561_v60  ;;  %v1007_v15 = vmin.f32 %v1006_v12, %v3773_v13  ;;  %v3784_v19 = vsub.f32 %v809_v11, %v873_v4 }
 0x13f   :  { %v876_v14 = vmul.f32 2.0, %v722_v41  ;;  %v565_v31 = vpop.f32.mrf.mxu0  ;;  %v814_v57 = vadd.f32 %v3553_v24, %v168_v9  ;;  %v3795_v11 = vsub.f32 %v811_v8, %v875_v48  ;;  %v816_v24 = vadd.f32 %v3559_v43, %v168_v9 }
 0x140   :  { %v726_v6 = vpop.f32.mrf.mxu1  ;;  %v3786_v33 = vsub.f32 %v810_v26, %v874_v59  ;;  %v877_v50 = vmul.f32 2.0, %v565_v31  ;;  %1008 = vmin.xlane.f32.xlu0 %v1007_v15  ;;  %v1011_v2 = vmin.f32 %v1010_v16, %v3780_v39 }
 0x141   :  { %v567_v60 = vpop.f32.mrf.mxu0  ;;  %v879_v12 = vmul.f32 2.0, %v726_v6  ;;  %v3797_v26 = vsub.f32 %v812_v40, %v876_v14 }
 0x142   :  { %v728_v45 = vpop.f32.mrf.mxu1  ;;  %v1015_v23 = vmin.f32 %v3784_v19, %v3786_v33  ;;  %v878_v4 = vmul.f32 2.0, %v567_v60  ;;  %v1012_v37 = vmin.f32 %v1011_v2, %v3789_v27  ;;  %v3801_v20 = vsub.f32 %v813_v44, %v877_v50 }
 0x143   :  { %v880_v41 = vmul.f32 2.0, %v728_v45  ;;  %v3806_v59 = vsub.f32 %v815_v52, %v879_v12  ;;  %v4613_v50 = vlaneseq }
 0x144   :  { %v3803_v28 = vsub.f32 %v814_v57, %v878_v4  ;;  %v1016_v16 = vmin.f32 %v1015_v23, %v3795_v11  ;;  %1013 = vmin.xlane.f32.xlu1 %v1012_v37 }
 0x145   :  { %v3811_v40 = vsub.f32 %v816_v24, %v880_v41  ;;  %v3816_v57 = vand.u32 127, %v4613_v50 }
 0x146   :  { %v1020_v8 = vmin.f32 %v3801_v20, %v3803_v28  ;;  %v1017_v48 = vmin.f32 %v1016_v16, %v3797_v26 }
 0x147   :  { %v3819_v14 = vadd.s32 128, %v3816_v57  ;;  %v3822_v44 = vadd.s32 256, %v3816_v57  ;;  %v3830_v52 = vadd.s32 384, %v3816_v57 }
 0x148   :  { %1018 = vmin.xlane.f32.xlu0 %v1017_v48  ;;  %v1021_v43 = vmin.f32 %v1020_v8, %v3806_v59 }
 0x14a   :  { %v1022_v9 = vmin.f32 %v1021_v43, %v3811_v40 }
 0x14c   :  { %1023 = vmin.xlane.f32.xlu1 %v1022_v9 }
 0x199   :  { %v949_v31 = vpop.xlane.xlu0 %948 }
 0x19a   :  { %vm1030_vm1 = vcmp.le.f32.partialorder %v3563_v55, %v949_v31  ;;  %vm1031_vm2 = vcmp.le.f32.partialorder %v3565_v56, %v949_v31  ;;  %vm1032_vm3 = vcmp.le.f32.partialorder %v3574_v62, %v949_v31  ;;  %vm1033_vm5 = vcmp.le.f32.partialorder %v3581_v1, %v949_v31 }
 0x19b   :  { %v1094_v6 = vsel %vm1030_vm1, %v3816_v57, 512  ;;  %v1095_v15 = vsel %vm1031_vm2, %v3819_v14, 512  ;;  %v1096_v2 = vsel %vm1032_vm3, %v3822_v44, 512  ;;  %v1097_v62 = vsel %vm1033_vm5, %v3830_v52, 512 }
 0x19c   :  { %vm1158_vm4 = vcmp.lt.s32.totalorder %v1094_v6, %v1095_v15 }
 0x19d   :  { %v954_v60 = vpop.xlane.xlu1 %953  ;;  %v1159_v45 = vsel %vm1158_vm4, %v1094_v6, %v1095_v15 }
 0x19e   :  { %vm1034_vm6 = vcmp.le.f32.partialorder %v3576_v61, %v954_v60  ;;  %vm1035_vm7 = vcmp.le.f32.partialorder %v3578_v42, %v954_v60  ;;  %vm1036_vm8 = vcmp.le.f32.partialorder %v3587_v10, %v954_v60  ;;  %vm1160_vm9 = vcmp.lt.s32.totalorder %v1159_v45, %v1096_v2 }
 0x19f   :  { %v1098_v55 = vsel %vm1034_vm6, %v3816_v57, 512  ;;  %v1099_v56 = vsel %vm1035_vm7, %v3819_v14, 512  ;;  %v1161_v23 = vsel %vm1160_vm9, %v1159_v45, %v1096_v2  ;;  %vm1037_vm12 = vcmp.le.f32.partialorder %v3597_v22, %v954_v60 }
 0x1a0   :  { %vm1178_vm10 = vcmp.lt.s32.totalorder %v1098_v55, %v1099_v56  ;;  %vm1162_vm11 = vcmp.lt.s32.totalorder %v1161_v23, %v1097_v62  ;;  %v1100_v61 = vsel %vm1036_vm8, %v3822_v44, 512  ;;  %v1101_v37 = vsel %vm1037_vm12, %v3830_v52, 512 }
 0x1a1   :  { %v959_v1 = vpop.xlane.xlu0 %958  ;;  %v1179_v12 = vsel %vm1178_vm10, %v1098_v55, %v1099_v56  ;;  %v3847_v4 = vsel %vm1162_vm11, %v1161_v23, %v1097_v62 }
 0x1a2   :  { %vm1038_vm13 = vcmp.le.f32.partialorder %v3592_v17, %v959_v1  ;;  %vm1039_vm14 = vcmp.le.f32.partialorder %v3594_v18, %v959_v1  ;;  %vm1040_vm15 = vcmp.le.f32.partialorder %v3600_v32, %v959_v1  ;;  %v1165_v24 = vshra.s32 %v3847_v4, 16 }
 0x1a3   :  { %v1102_v42 = vsel %vm1038_vm13, %v3816_v57, 512  ;;  %v1103_v10 = vsel %vm1039_vm14, %v3819_v14, 512  ;;  %vm1180_vm2 = vcmp.lt.s32.totalorder %v1179_v12, %v1100_v61  ;;  %vm1041_vm3 = vcmp.le.f32.partialorder %v3613_v29, %v959_v1 }
 0x1a4   :  { %vm1198_vm1 = vcmp.lt.s32.totalorder %v1102_v42, %v1103_v10  ;;  %v1181_v17 = vsel %vm1180_vm2, %v1179_v12, %v1100_v61  ;;  %v1104_v18 = vsel %vm1040_vm15, %v3822_v44, 512  ;;  %v3859_v8 = vcvt.s32.f32 %v1165_v24 }
 0x1a5   :  { %v964_v22 = vpop.xlane.xlu1 %963  ;;  %v1199_v41 = vsel %vm1198_vm1, %v1102_v42, %v1103_v10  ;;  %vm1182_vm9 = vcmp.lt.s32.totalorder %v1181_v17, %v1101_v37 }
 0x1a6   :  { %vm1042_vm4 = vcmp.le.f32.partialorder %v3608_v53, %v964_v22  ;;  %vm1043_vm5 = vcmp.le.f32.partialorder %v3610_v54, %v964_v22  ;;  %vm1044_vm6 = vcmp.le.f32.partialorder %v3619_v51, %v964_v22  ;;  %vm1045_vm7 = vcmp.le.f32.partialorder %v3628_v7, %v964_v22  ;;  %1168 = vmin.xlane.f32.xlu0 %v3859_v8  ;;  %v4614_v22 = vld [vmem:[#allocation5_spill] sm:$0xff] }
 0x1a7   :  { %v1106_v32 = vsel %vm1042_vm4, %v3816_v57, 512  ;;  %v1107_v16 = vsel %vm1043_vm5, %v3819_v14, 512  ;;  %vm1200_vm10 = vcmp.lt.s32.totalorder %v1199_v41, %v1104_v18  ;;  %v3862_v43 = vsel %vm1182_vm9, %v1181_v17, %v1101_v37  ;;  %v4615_v37 = vld [vmem:[#allocation7_spill] sm:$0xff] }
 0x1a8   :  { %vm1218_vm8 = vcmp.lt.s32.totalorder %v1106_v32, %v1107_v16  ;;  %v1105_v53 = vsel %vm1041_vm3, %v3830_v52, 512  ;;  %v1201_v54 = vsel %vm1200_vm10, %v1199_v41, %v1104_v18  ;;  %v1108_v9 = vsel %vm1044_vm6, %v3822_v44, 512 }
 0x1a9   :  { %v969_v48 = vpop.xlane.xlu0 %968  ;;  %v1219_v51 = vsel %vm1218_vm8, %v1106_v32, %v1107_v16  ;;  %v1109_v50 = vsel %vm1045_vm7, %v3830_v52, 512  ;;  %v1185_v29 = vshra.s32 %v3862_v43, 16  ;;  %vm1202_vm1 = vcmp.lt.s32.totalorder %v1201_v54, %v1105_v53 }
 0x1aa   :  { %vm1046_vm11 = vcmp.le.f32.partialorder %v3623_v0, %v969_v48  ;;  %vm1047_vm12 = vcmp.le.f32.partialorder %v3625_v3, %v969_v48  ;;  %vm1048_vm13 = vcmp.le.f32.partialorder %v3635_v21, %v969_v48  ;;  %vm1049_vm14 = vcmp.le.f32.partialorder %v3645_v47, %v969_v48 }
 0x1ab   :  { %v1110_v31 = vsel %vm1046_vm11, %v3816_v57, 512  ;;  %v1111_v6 = vsel %vm1047_vm12, %v3819_v14, 512  ;;  %vm1220_vm2 = vcmp.lt.s32.totalorder %v1219_v51, %v1108_v9  ;;  %v3878_v0 = vcvt.s32.f32 %v1185_v29 }
 0x1ac   :  { %vm1238_vm15 = vcmp.lt.s32.totalorder %v1110_v31, %v1111_v6  ;;  %v3880_v15 = vsel %vm1202_vm1, %v1201_v54, %v1105_v53  ;;  %v1221_v7 = vsel %vm1220_vm2, %v1219_v51, %v1108_v9  ;;  %v1112_v21 = vsel %vm1048_vm13, %v3822_v44, 512  ;;  %v4616_v51 = vld [vmem:[#allocation6_spill] sm:$0xff]  ;;  %v4617_v9 = vld [vmem:[#allocation11_spill] sm:$0xff] }
 0x1ad   :  { %v974_v3 = vpop.xlane.xlu1 %973  ;;  %v1239_v60 = vsel %vm1238_vm15, %v1110_v31, %v1111_v6  ;;  %1188 = vmin.xlane.f32.xlu1 %v3878_v0  ;;  %v1205_v55 = vshra.s32 %v3880_v15, 16  ;;  %vm1222_vm8 = vcmp.lt.s32.totalorder %v1221_v7, %v1109_v50 }
 0x1ae   :  { %vm1050_vm3 = vcmp.le.f32.partialorder %v3640_v35, %v974_v3  ;;  %vm1051_vm4 = vcmp.le.f32.partialorder %v3642_v36, %v974_v3  ;;  %vm1052_vm5 = vcmp.le.f32.partialorder %v3651_v30, %v974_v3  ;;  %vm1053_vm6 = vcmp.le.f32.partialorder %v3660_v5, %v974_v3  ;;  %v4619_v3 = vld [vmem:[#allocation12_spill] sm:$0xff] }
 0x1af   :  { %v1114_v45 = vsel %vm1050_vm3, %v3816_v57, 512  ;;  %v1115_v2 = vsel %vm1051_vm4, %v3819_v14, 512  ;;  %v1113_v35 = vsel %vm1049_vm14, %v3830_v52, 512  ;;  %vm1240_vm9 = vcmp.lt.s32.totalorder %v1239_v60, %v1112_v21 }
 0x1b0   :  { %vm1258_vm7 = vcmp.lt.s32.totalorder %v1114_v45, %v1115_v2  ;;  %v3894_v36 = vcvt.s32.f32 %v1205_v55  ;;  %v3896_v56 = vsel %vm1222_vm8, %v1221_v7, %v1109_v50  ;;  %v1241_v62 = vsel %vm1240_vm9, %v1239_v60, %v1112_v21 }
 0x1b1   :  { %v979_v30 = vpop.xlane.xlu0 %978  ;;  %v1259_v23 = vsel %vm1258_vm7, %v1114_v45, %v1115_v2  ;;  %v1116_v1 = vsel %vm1052_vm5, %v3822_v44, 512  ;;  %v1117_v12 = vsel %vm1053_vm6, %v3830_v52, 512  ;;  %v1225_v42 = vshra.s32 %v3896_v56, 16 }
 0x1b2   :  { %vm1054_vm10 = vcmp.le.f32.partialorder %v3655_v58, %v979_v30  ;;  %vm1055_vm11 = vcmp.le.f32.partialorder %v3657_v49, %v979_v30  ;;  %1208 = vmin.xlane.f32.xlu0 %v3894_v36  ;;  %vm1056_vm12 = vcmp.le.f32.partialorder %v3667_v25, %v979_v30  ;;  %vm1057_vm13 = vcmp.le.f32.partialorder %v3677_v63, %v979_v30  ;;  %v4618_v63 = vld [vmem:[#allocation8_spill] sm:$0xff]  ;;  %v4621_v30 = vld [vmem:[#allocation10_spill] sm:$0xff] }
 0x1b3   :  { %v1118_v47 = vsel %vm1054_vm10, %v3816_v57, 512  ;;  %v1119_v61 = vsel %vm1055_vm11, %v3819_v14, 512  ;;  %vm1242_vm15 = vcmp.lt.s32.totalorder %v1241_v62, %v1113_v35  ;;  %vm1260_vm1 = vcmp.lt.s32.totalorder %v1259_v23, %v1116_v1 }
 0x1b4   :  { %vm1278_vm14 = vcmp.lt.s32.totalorder %v1118_v47, %v1119_v61  ;;  %v3910_v58 = vcvt.s32.f32 %v1225_v42  ;;  %v3912_v5 = vsel %vm1242_vm15, %v1241_v62, %v1113_v35  ;;  %v1261_v10 = vsel %vm1260_vm1, %v1259_v23, %v1116_v1  ;;  %v4620_v35 = vld [vmem:[#allocation9_spill] sm:$0xff]  ;;  %v4623_v23 = vld [vmem:[#allocation16_spill] sm:$0xff] }
 0x1b5   :  { %v984_v49 = vpop.xlane.xlu1 %983  ;;  %v1279_v24 = vsel %vm1278_vm14, %v1118_v47, %v1119_v61  ;;  %v1120_v25 = vsel %vm1056_vm12, %v3822_v44, 512  ;;  %v1245_v18 = vshra.s32 %v3912_v5, 16  ;;  %vm1262_vm7 = vcmp.lt.s32.totalorder %v1261_v10, %v1117_v12  ;;  %v4622_v62 = vld [vmem:[#allocation13_spill] sm:$0xff] }
 0x1b6   :  { %vm1058_vm2 = vcmp.le.f32.partialorder %v3672_v38, %v984_v49  ;;  %vm1059_vm3 = vcmp.le.f32.partialorder %v3674_v46, %v984_v49  ;;  %vm1060_vm4 = vcmp.le.f32.partialorder %v4614_v22, %v984_v49  ;;  %1228 = vmin.xlane.f32.xlu1 %v3910_v58  ;;  %vm1061_vm5 = vcmp.le.f32.partialorder %v4615_v37, %v984_v49  ;;  %v4624_v37 = vld [vmem:[#allocation14_spill] sm:$0xff] }
 0x1b7   :  { %v1122_v17 = vsel %vm1058_vm2, %v3816_v57, 512  ;;  %v1123_v41 = vsel %vm1059_vm3, %v3819_v14, 512  ;;  %v1121_v38 = vsel %vm1057_vm13, %v3830_v52, 512  ;;  %vm1280_vm8 = vcmp.lt.s32.totalorder %v1279_v24, %v1120_v25 }
 0x1b8   :  { %vm1298_vm6 = vcmp.lt.s32.totalorder %v1122_v17, %v1123_v41  ;;  %v3926_v46 = vcvt.s32.f32 %v1245_v18  ;;  %v3928_v16 = vsel %vm1262_vm7, %v1261_v10, %v1117_v12  ;;  %v1281_v48 = vsel %vm1280_vm8, %v1279_v24, %v1120_v25  ;;  %v4626_v18 = vld [vmem:[#allocation18_spill] sm:$0xff] }
 0x1b9   :  { %v989_v32 = vpop.xlane.xlu0 %988  ;;  %v1299_v53 = vsel %vm1298_vm6, %v1122_v17, %v1123_v41  ;;  %v1124_v54 = vsel %vm1060_vm4, %v3822_v44, 512  ;;  %v1125_v50 = vsel %vm1061_vm5, %v3830_v52, 512  ;;  %v1265_v29 = vshra.s32 %v3928_v16, 16  ;;  %v4625_v17 = vld [vmem:[#allocation15_spill] sm:$0xff] }
 0x1ba   :  { %vm1062_vm9 = vcmp.le.f32.partialorder %v4616_v51, %v989_v32  ;;  %vm1063_vm10 = vcmp.le.f32.partialorder %v4617_v9, %v989_v32  ;;  %1248 = vmin.xlane.f32.xlu0 %v3926_v46  ;;  %vm1064_vm11 = vcmp.le.f32.partialorder %v4618_v63, %v989_v32  ;;  %vm1065_vm12 = vcmp.le.f32.partialorder %v4619_v3, %v989_v32  ;;  %v4630_v3 = vld [vmem:[#allocation21_spill] sm:$0xff] }
 0x1bb   :  { %v1126_v31 = vsel %vm1062_vm9, %v3816_v57, 512  ;;  %v1127_v6 = vsel %vm1063_vm10, %v3819_v14, 512  ;;  %vm1282_vm14 = vcmp.lt.s32.totalorder %v1281_v48, %v1121_v38  ;;  %vm1300_vm15 = vcmp.lt.s32.totalorder %v1299_v53, %v1124_v54 }
 0x1bc   :  { %vm1318_vm13 = vcmp.lt.s32.totalorder %v1126_v31, %v1127_v6  ;;  %v3942_v7 = vcvt.s32.f32 %v1265_v29  ;;  %v3944_v21 = vsel %vm1282_vm14, %v1281_v48, %v1121_v38  ;;  %v1301_v45 = vsel %vm1300_vm15, %v1299_v53, %v1124_v54  ;;  %v4627_v53 = vld [vmem:[#allocation19_spill] sm:$0xff]  ;;  %v4629_v29 = vld [vmem:[#allocation20_spill] sm:$0xff] }
 0x1bd   :  { %v994_v60 = vpop.xlane.xlu1 %993  ;;  %v1319_v2 = vsel %vm1318_vm13, %v1126_v31, %v1127_v6  ;;  %v1128_v55 = vsel %vm1064_vm11, %v3822_v44, 512  ;;  %v1285_v47 = vshra.s32 %v3944_v21, 16  ;;  %vm1302_vm6 = vcmp.lt.s32.totalorder %v1301_v45, %v1125_v50  ;;  %v4628_v6 = vld [vmem:[#allocation17_spill] sm:$0xff] }
 0x1be   :  { %vm1066_vm1 = vcmp.le.f32.partialorder %v4620_v35, %v994_v60  ;;  %vm1067_vm2 = vcmp.le.f32.partialorder %v4621_v30, %v994_v60  ;;  %vm1068_vm3 = vcmp.le.f32.partialorder %v4622_v62, %v994_v60  ;;  %1268 = vmin.xlane.f32.xlu1 %v3942_v7  ;;  %vm1069_vm4 = vcmp.le.f32.partialorder %v4623_v23, %v994_v60  ;;  %v4631_v60 = vld [vmem:[#allocation24_spill] sm:$0xff] }
 0x1bf   :  { %v1130_v1 = vsel %vm1066_vm1, %v3816_v57, 512  ;;  %v1131_v12 = vsel %vm1067_vm2, %v3819_v14, 512  ;;  %v1129_v61 = vsel %vm1065_vm12, %v3830_v52, 512  ;;  %vm1320_vm7 = vcmp.lt.s32.totalorder %v1319_v2, %v1128_v55 }
 0x1c0   :  { %vm1338_vm5 = vcmp.lt.s32.totalorder %v1130_v1, %v1131_v12  ;;  %v3958_v42 = vcvt.s32.f32 %v1285_v47  ;;  %v3960_v10 = vsel %vm1302_vm6, %v1301_v45, %v1125_v50  ;;  %v1321_v24 = vsel %vm1320_vm7, %v1319_v2, %v1128_v55 }
 0x1c1   :  { %v999_v49 = vpop.xlane.xlu0 %998  ;;  %v1339_v25 = vsel %vm1338_vm5, %v1130_v1, %v1131_v12  ;;  %v1132_v22 = vsel %vm1068_vm3, %v3822_v44, 512  ;;  %v1133_v41 = vsel %vm1069_vm4, %v3830_v52, 512  ;;  %v1305_v48 = vshra.s32 %v3960_v10, 16 }
 0x1c2   :  { %vm1070_vm8 = vcmp.le.f32.partialorder %v4624_v37, %v999_v49  ;;  %vm1071_vm9 = vcmp.le.f32.partialorder %v4625_v17, %v999_v49  ;;  %1288 = vmin.xlane.f32.xlu0 %v3958_v42  ;;  %vm1072_vm10 = vcmp.le.f32.partialorder %v4626_v18, %v999_v49  ;;  %vm1073_vm11 = vcmp.le.f32.partialorder %v4627_v53, %v999_v49  ;;  %v4634_v49 = vld [vmem:[#allocation25_spill] sm:$0xff] }
 0x1c3   :  { %v1134_v38 = vsel %vm1070_vm8, %v3816_v57, 512  ;;  %v1135_v32 = vsel %vm1071_vm9, %v3819_v14, 512  ;;  %vm1322_vm13 = vcmp.lt.s32.totalorder %v1321_v24, %v1129_v61  ;;  %vm1340_vm14 = vcmp.lt.s32.totalorder %v1339_v25, %v1132_v22 }
 0x1c4   :  { %vm1358_vm12 = vcmp.lt.s32.totalorder %v1134_v38, %v1135_v32  ;;  %v3974_v54 = vcvt.s32.f32 %v1305_v48  ;;  %v3976_v9 = vsel %vm1322_vm13, %v1321_v24, %v1129_v61  ;;  %v1341_v50 = vsel %vm1340_vm14, %v1339_v25, %v1132_v22  ;;  %v4632_v61 = vld [vmem:[#allocation22_spill] sm:$0xff]  ;;  %v4633_v24 = vld [vmem:[#allocation23_spill] sm:$0xff] }
 0x1c5   :  { %v1004_v51 = vpop.xlane.xlu1 %1003  ;;  %v1359_v63 = vsel %vm1358_vm12, %v1134_v38, %v1135_v32  ;;  %v1136_v31 = vsel %vm1072_vm10, %v3822_v44, 512  ;;  %v1325_v55 = vshra.s32 %v3976_v9, 16  ;;  %vm1342_vm5 = vcmp.lt.s32.totalorder %v1341_v50, %v1133_v41 }
 0x1c6   :  { %vm1074_vm15 = vcmp.le.f32.partialorder %v4628_v6, %v1004_v51  ;;  %vm1075_vm1 = vcmp.le.f32.partialorder %v4629_v29, %v1004_v51  ;;  %vm1076_vm2 = vcmp.le.f32.partialorder %v4630_v3, %v1004_v51  ;;  %1308 = vmin.xlane.f32.xlu1 %v3974_v54  ;;  %vm1077_vm3 = vcmp.le.f32.partialorder %v4631_v60, %v1004_v51  ;;  %v4635_v51 = vld [vmem:[#allocation26_spill] sm:$0xff] }
 0x1c7   :  { %v1138_v45 = vsel %vm1074_vm15, %v3816_v57, 512  ;;  %v1139_v2 = vsel %vm1075_vm1, %v3819_v14, 512  ;;  %v1137_v35 = vsel %vm1073_vm11, %v3830_v52, 512  ;;  %vm1360_vm6 = vcmp.lt.s32.totalorder %v1359_v63, %v1136_v31 }
 0x1c8   :  { %vm1378_vm4 = vcmp.lt.s32.totalorder %v1138_v45, %v1139_v2  ;;  %v3990_v30 = vcvt.s32.f32 %v1325_v55  ;;  %v3992_v23 = vsel %vm1342_vm5, %v1341_v50, %v1133_v41  ;;  %v1361_v1 = vsel %vm1360_vm6, %v1359_v63, %v1136_v31 }
 0x1c9   :  { %v1009_v62 = vpop.xlane.xlu0 %1008  ;;  %v1379_v12 = vsel %vm1378_vm4, %v1138_v45, %v1139_v2  ;;  %v1140_v47 = vsel %vm1076_vm2, %v3822_v44, 512  ;;  %v1141_v25 = vsel %vm1077_vm3, %v3830_v52, 512  ;;  %v1345_v17 = vshra.s32 %v3992_v23, 16 }
 0x1ca   :  { %vm1078_vm7 = vcmp.le.f32.partialorder %v4632_v61, %v1009_v62  ;;  %vm1079_vm8 = vcmp.le.f32.partialorder %v4633_v24, %v1009_v62  ;;  %1328 = vmin.xlane.f32.xlu0 %v3990_v30  ;;  %vm1080_vm9 = vcmp.le.f32.partialorder %v4634_v49, %v1009_v62  ;;  %vm1081_vm10 = vcmp.le.f32.partialorder %v3773_v13, %v1009_v62 }
 0x1cb   :  { %v1142_v22 = vsel %vm1078_vm7, %v3816_v57, 512  ;;  %v1143_v37 = vsel %vm1079_vm8, %v3819_v14, 512  ;;  %vm1362_vm12 = vcmp.lt.s32.totalorder %v1361_v1, %v1137_v35  ;;  %vm1380_vm13 = vcmp.lt.s32.totalorder %v1379_v12, %v1140_v47 }
 0x1cc   :  { %vm1398_vm11 = vcmp.lt.s32.totalorder %v1142_v22, %v1143_v37  ;;  %v4006_v41 = vcvt.s32.f32 %v1345_v17  ;;  %v4008_v38 = vsel %vm1362_vm12, %v1361_v1, %v1137_v35  ;;  %v1381_v32 = vsel %vm1380_vm13, %v1379_v12, %v1140_v47 }
 0x1cd   :  { %v1014_v18 = vpop.xlane.xlu1 %1013  ;;  %v1399_v48 = vsel %vm1398_vm11, %v1142_v22, %v1143_v37  ;;  %v1144_v53 = vsel %vm1080_vm9, %v3822_v44, 512  ;;  %v1365_v31 = vshra.s32 %v4008_v38, 16  ;;  %v1145_v6 = vsel %vm1081_vm10, %v3830_v52, 512 }
 0x1ce   :  { %vm1082_vm14 = vcmp.le.f32.partialorder %v3768_v34, %v1014_v18  ;;  %vm1083_vm15 = vcmp.le.f32.partialorder %v4635_v51, %v1014_v18  ;;  %vm1084_vm1 = vcmp.le.f32.partialorder %v3780_v39, %v1014_v18  ;;  %1348 = vmin.xlane.f32.xlu1 %v4006_v41  ;;  %vm1085_vm2 = vcmp.le.f32.partialorder %v3789_v27, %v1014_v18 }
 0x1cf   :  { %v1146_v50 = vsel %vm1082_vm14, %v3816_v57, 512  ;;  %v1147_v63 = vsel %vm1083_vm15, %v3819_v14, 512  ;;  %vm1382_vm4 = vcmp.lt.s32.totalorder %v1381_v32, %v1141_v25  ;;  %vm1400_vm5 = vcmp.lt.s32.totalorder %v1399_v48, %v1144_v53 }
 0x1d0   :  { %vm1418_vm3 = vcmp.lt.s32.totalorder %v1146_v50, %v1147_v63  ;;  %v1148_v39 = vsel %vm1084_vm1, %v3822_v44, 512  ;;  %v4023_v29 = vcvt.s32.f32 %v1365_v31  ;;  %v4032_v60 = vsel %vm1382_vm4, %v1381_v32, %v1141_v25 }
 0x1d1   :  { %v1019_v34 = vpop.xlane.xlu0 %1018  ;;  %v1401_v45 = vsel %vm1400_vm5, %v1399_v48, %v1144_v53  ;;  %v1149_v2 = vsel %vm1085_vm2, %v3830_v52, 512 }
 0x1d2   :  { %vm1086_vm6 = vcmp.le.f32.partialorder %v3784_v19, %v1019_v34  ;;  %vm1087_vm7 = vcmp.le.f32.partialorder %v3786_v33, %v1019_v34  ;;  %vm1088_vm8 = vcmp.le.f32.partialorder %v3795_v11, %v1019_v34  ;;  %vm1089_vm9 = vcmp.le.f32.partialorder %v3797_v26, %v1019_v34  ;;  %1368 = vmin.xlane.f32.xlu0 %v4023_v29 }
 0x1d3   :  { %v1150_v13 = vsel %vm1086_vm6, %v3816_v57, 512  ;;  %v1151_v3 = vsel %vm1087_vm7, %v3819_v14, 512  ;;  %v1419_v19 = vsel %vm1418_vm3, %v1146_v50, %v1147_v63  ;;  %v1385_v33 = vshra.s32 %v4032_v60, 16 }
 0x1d4   :  { %vm1438_vm10 = vcmp.lt.s32.totalorder %v1150_v13, %v1151_v3  ;;  %vm1402_vm11 = vcmp.lt.s32.totalorder %v1401_v45, %v1145_v6  ;;  %vm1420_vm12 = vcmp.lt.s32.totalorder %v1419_v19, %v1148_v39  ;;  %v1152_v55 = vsel %vm1088_vm8, %v3822_v44, 512 }
 0x1d5   :  { %v1024_v11 = vpop.xlane.xlu1 %1023  ;;  %v1153_v35 = vsel %vm1089_vm9, %v3830_v52, 512  ;;  %v4045_v27 = vcvt.s32.f32 %v1385_v33  ;;  %v4050_v12 = vsel %vm1402_vm11, %v1401_v45, %v1145_v6  ;;  %v1421_v47 = vsel %vm1420_vm12, %v1419_v19, %v1148_v39 }
 0x1d6   :  { %vm1090_vm13 = vcmp.le.f32.partialorder %v3801_v20, %v1024_v11  ;;  %vm1091_vm14 = vcmp.le.f32.partialorder %v3803_v28, %v1024_v11  ;;  %vm1092_vm15 = vcmp.le.f32.partialorder %v3806_v59, %v1024_v11  ;;  %v1439_v20 = vsel %vm1438_vm10, %v1150_v13, %v1151_v3 }
 0x1d7   :  { %v1154_v62 = vsel %vm1090_vm13, %v3816_v57, 512  ;;  %v1155_v1 = vsel %vm1091_vm14, %v3819_v14, 512  ;;  %1388 = vmin.xlane.f32.xlu1 %v4045_v27  ;;  %vm1093_vm2 = vcmp.le.f32.partialorder %v3811_v40, %v1024_v11  ;;  %v1405_v26 = vshra.s32 %v4050_v12, 16 }
 0x1d8   :  { %vm1458_vm1 = vcmp.lt.s32.totalorder %v1154_v62, %v1155_v1  ;;  %vm1422_vm3 = vcmp.lt.s32.totalorder %v1421_v47, %v1149_v2  ;;  %vm1440_vm4 = vcmp.lt.s32.totalorder %v1439_v20, %v1152_v55  ;;  %v1156_v28 = vsel %vm1092_vm15, %v3822_v44, 512 }
 0x1d9   :  { %v4057_v59 = vsel %vm1422_vm3, %v1421_v47, %v1149_v2  ;;  %v1441_v61 = vsel %vm1440_vm4, %v1439_v20, %v1152_v55  ;;  %v1459_v24 = vsel %vm1458_vm1, %v1154_v62, %v1155_v1  ;;  %v4059_v25 = vcvt.s32.f32 %v1405_v26 }
 0x1da   :  { %v1425_v49 = vshra.s32 %v4057_v59, 16  ;;  %vm1442_vm5 = vcmp.lt.s32.totalorder %v1441_v61, %v1153_v35  ;;  %vm1460_vm6 = vcmp.lt.s32.totalorder %v1459_v24, %v1156_v28  ;;  %v1157_v40 = vsel %vm1093_vm2, %v3830_v52, 512 }
 0x1db   :  { %v4062_v22 = vsel %vm1442_vm5, %v1441_v61, %v1153_v35  ;;  %v1461_v37 = vsel %vm1460_vm6, %v1459_v24, %v1156_v28  ;;  %1408 = vmin.xlane.f32.xlu0 %v4059_v25  ;;  %v1164_v50 = vand.u32 65535, %v3847_v4  ;;  %v1184_v34 = vand.u32 65535, %v3862_v43 }
 0x1dc   :  { %v4066_v17 = vcvt.s32.f32 %v1425_v49  ;;  %v1445_v18 = vshra.s32 %v4062_v22, 16  ;;  %vm1462_vm7 = vcmp.lt.s32.totalorder %v1461_v37, %v1157_v40  ;;  %v1204_v3 = vand.u32 65535, %v3880_v15 }
 0x1dd   :  { %v4069_v32 = vsel %vm1462_vm7, %v1461_v37, %v1157_v40  ;;  %v1166_v31 = vcvt.s32.f32 %v1164_v50  ;;  %v1186_v13 = vcvt.s32.f32 %v1184_v34  ;;  %v1224_v19 = vand.u32 65535, %v3896_v56 }
 0x1de   :  { %1428 = vmin.xlane.f32.xlu1 %v4066_v17  ;;  %v4072_v48 = vcvt.s32.f32 %v1445_v18  ;;  %v1465_v53 = vshra.s32 %v4069_v32, 16  ;;  %v1206_v2 = vcvt.s32.f32 %v1204_v3  ;;  %v1244_v15 = vand.u32 65535, %v3912_v5 }
 0x1df   :  { %v1226_v33 = vcvt.s32.f32 %v1224_v19  ;;  %v1264_v56 = vand.u32 65535, %v3928_v16  ;;  %v1284_v5 = vand.u32 65535, %v3944_v21  ;;  %v1304_v16 = vand.u32 65535, %v3960_v10 }
 0x1e0   :  { %1448 = vmin.xlane.f32.xlu0 %v4072_v48  ;;  %v4076_v51 = vcvt.s32.f32 %v1465_v53  ;;  %v1246_v55 = vcvt.s32.f32 %v1244_v15  ;;  %v1324_v21 = vand.u32 65535, %v3976_v9  ;;  %v1344_v10 = vand.u32 65535, %v3992_v23 }
 0x1e1   :  { %v1266_v62 = vcvt.s32.f32 %v1264_v56  ;;  %v1286_v47 = vcvt.s32.f32 %v1284_v5  ;;  %v1306_v26 = vcvt.s32.f32 %v1304_v16  ;;  %v1364_v9 = vand.u32 65535, %v4008_v38 }
 0x1e2   :  { %1468 = vmin.xlane.f32.xlu1 %v4076_v51  ;;  %v1326_v61 = vcvt.s32.f32 %v1324_v21  ;;  %v1346_v49 = vcvt.s32.f32 %v1344_v10  ;;  %v1404_v38 = vand.u32 65535, %v4050_v12  ;;  %v1424_v50 = vand.u32 65535, %v4057_v59 }
 0x1e3   :  { %v1366_v37 = vcvt.s32.f32 %v1364_v9  ;;  %v1464_v12 = vand.u32 65535, %v4069_v32 }
 0x22f   :  { %v4080_v63 = vpop.xlane.xlu0 %1168 }
 0x230   :  { %vm1170_vm8 = vcmp.eq.f32.partialorder %v3859_v8, %v4080_v63 }
 0x231   :  { %v1171_v6 = vsel %vm1170_vm8, %v1166_v31, inf }
 0x232   :  { %1172 = vmin.xlane.f32.xlu0 %v1171_v6  ;;  %v1406_v6 = vcvt.s32.f32 %v1404_v38 }
 0x236   :  { %v4085_v39 = vpop.xlane.xlu1 %1188 }
 0x237   :  { %vm1190_vm9 = vcmp.eq.f32.partialorder %v3878_v0, %v4085_v39 }
 0x238   :  { %v1191_v45 = vsel %vm1190_vm9, %v1186_v13, inf  ;;  %v1426_v13 = vcvt.s32.f32 %v1424_v50  ;;  %vm1976_vm9 = vcmask 7168  }
 0x239   :  { %1192 = vmin.xlane.f32.xlu1 %v1191_v45  ;;  %v1466_v45 = vcvt.s32.f32 %v1464_v12 }
 0x23b   :  { %v4090_v4 = vpop.xlane.xlu0 %1208 }
 0x23c   :  { %vm1210_vm10 = vcmp.eq.f32.partialorder %v3894_v36, %v4090_v4 }
 0x23d   :  { %v1211_v8 = vsel %vm1210_vm10, %v1206_v2, inf }
 0x23e   :  { %1212 = vmin.xlane.f32.xlu0 %v1211_v8 }
 0x23f   :  { %v4095_v43 = vpop.xlane.xlu1 %1228 }
 0x240   :  { %vm1230_vm11 = vcmp.eq.f32.partialorder %v3910_v58, %v4095_v43 }
 0x241   :  { %v1231_v0 = vsel %vm1230_vm11, %v1226_v33, inf  ;;  %v1195_v33 = vcvt.f32.s32 %v4085_v39 }
 0x242   :  { %1232 = vmin.xlane.f32.xlu1 %v1231_v0 }
 0x243   :  { %v4100_v11 = vpop.xlane.xlu0 %1248  ;;  %v1196_v39 = vshll.u32 %v1195_v33, 16 }
 0x244   :  { %vm1250_vm12 = vcmp.eq.f32.partialorder %v3926_v46, %v4100_v11 }
 0x245   :  { %v1251_v36 = vsel %vm1250_vm12, %v1246_v55, inf }
 0x246   :  { %1252 = vmin.xlane.f32.xlu0 %v1251_v36  ;;  %v1235_v36 = vcvt.f32.s32 %v4095_v43 }
 0x247   :  { %v4105_v35 = vpop.xlane.xlu1 %1268 }
 0x248   :  { %vm1270_vm13 = vcmp.eq.f32.partialorder %v3942_v7, %v4105_v35  ;;  %v1236_v5 = vshll.u32 %v1235_v36, 16 }
 0x249   :  { %v1271_v58 = vsel %vm1270_vm13, %v1266_v62, inf }
 0x24a   :  { %1272 = vmin.xlane.f32.xlu1 %v1271_v58  ;;  %v1255_v58 = vcvt.f32.s32 %v4100_v11 }
 0x24b   :  { %v4110_v1 = vpop.xlane.xlu0 %1288 }
 0x24c   :  { %vm1290_vm14 = vcmp.eq.f32.partialorder %v3958_v42, %v4110_v1  ;;  %v1295_v10 = vcvt.f32.s32 %v4110_v1 }
 0x24d   :  { %v1291_v46 = vsel %vm1290_vm14, %v1286_v47, inf }
 0x24e   :  { %1292 = vmin.xlane.f32.xlu0 %v1291_v46  ;;  %v1256_v46 = vshll.u32 %v1255_v58, 16  ;;  %v1296_v9 = vshll.u32 %v1295_v10, 16 }
 0x24f   :  { %v4115_v20 = vpop.xlane.xlu1 %1308 }
 0x250   :  { %vm1310_vm15 = vcmp.eq.f32.partialorder %v3974_v54, %v4115_v20 }
 0x251   :  { %v1311_v7 = vsel %vm1310_vm15, %v1306_v26, inf  ;;  %v1275_v26 = vcvt.f32.s32 %v4105_v35 }
 0x252   :  { %1312 = vmin.xlane.f32.xlu1 %v1311_v7 }
 0x253   :  { %v4120_v28 = vpop.xlane.xlu0 %1328 }
 0x254   :  { %vm1330_vm1 = vcmp.eq.f32.partialorder %v3990_v30, %v4120_v28  ;;  %v1384_v30 = vand.u32 65535, %v4032_v60 }
 0x255   :  { %v1331_v42 = vsel %vm1330_vm1, %v1326_v61, inf  ;;  %v1276_v61 = vshll.u32 %v1275_v26, 16 }
 0x256   :  { %1332 = vmin.xlane.f32.xlu0 %v1331_v42  ;;  %v1386_v53 = vcvt.s32.f32 %v1384_v30 }
 0x257   :  { %v4125_v24 = vpop.xlane.xlu1 %1348 }
 0x258   :  { %vm1350_vm2 = vcmp.eq.f32.partialorder %v4006_v41, %v4125_v24 }
 0x259   :  { %v1351_v54 = vsel %vm1350_vm2, %v1346_v49, inf }
 0x25a   :  { %1352 = vmin.xlane.f32.xlu1 %v1351_v54  ;;  %v1315_v54 = vcvt.f32.s32 %v4115_v20 }
 0x25b   :  { %v4130_v40 = vpop.xlane.xlu0 %1368 }
 0x25c   :  { %vm1370_vm3 = vcmp.eq.f32.partialorder %v4023_v29, %v4130_v40  ;;  %v1444_v29 = vand.u32 65535, %v4062_v22  ;;  %v1375_v12 = vcvt.f32.s32 %v4130_v40 }
 0x25d   :  { %v1371_v23 = vsel %vm1370_vm3, %v1366_v37, inf }
 0x25e   :  { %1372 = vmin.xlane.f32.xlu0 %v1371_v23  ;;  %v1446_v3 = vcvt.s32.f32 %v1444_v29  ;;  %v1316_v23 = vshll.u32 %v1315_v54, 16 }
 0x260   :  { %v4135_v18 = vpop.xlane.xlu1 %1388 }
 0x261   :  { %vm1390_vm4 = vcmp.eq.f32.partialorder %v4045_v27, %v4135_v18 }
 0x262   :  { %v1391_v41 = vsel %vm1390_vm4, %v1386_v53, inf  ;;  %v1335_v53 = vcvt.f32.s32 %v4120_v28 }
 0x263   :  { %1392 = vmin.xlane.f32.xlu1 %v1391_v41 }
 0x264   :  { %v4141_v31 = vpop.xlane.xlu0 %1408  ;;  %v1336_v50 = vshll.u32 %v1335_v53, 16 }
 0x265   :  { %vm1410_vm5 = vcmp.eq.f32.partialorder %v4059_v25, %v4141_v31 }
 0x266   :  { %v1411_v60 = vsel %vm1410_vm5, %v1406_v6, inf  ;;  %v1355_v6 = vcvt.f32.s32 %v4125_v24 }
 0x267   :  { %v4146_v34 = vpop.xlane.xlu1 %1428  ;;  %1412 = vmin.xlane.f32.xlu0 %v1411_v60 }
 0x268   :  { %vm1430_vm6 = vcmp.eq.f32.partialorder %v4066_v17, %v4146_v34  ;;  %v1175_v17 = vcvt.f32.s32 %v4080_v63  ;;  %v2746_v63 = vmov 1.0  }
 0x269   :  { %v1431_v27 = vsel %vm1430_vm6, %v1426_v13, inf  ;;  %v4151_v59 = vpop.xlane.xlu0 %1448  ;;  %v1356_v13 = vshll.u32 %v1355_v6, 16 }
 0x26a   :  { %1432 = vmin.xlane.f32.xlu1 %v1431_v27  ;;  %vm1450_vm7 = vcmp.eq.f32.partialorder %v4072_v48, %v4151_v59  ;;  %v1176_v19 = vshll.u32 %v1175_v17, 16  ;;  %v1215_v48 = vcvt.f32.s32 %v4090_v4  ;;  %v1395_v17 = vcvt.f32.s32 %v4135_v18 }
 0x26b   :  { %v1451_v22 = vsel %vm1450_vm7, %v1446_v3, inf  ;;  %v4155_v25 = vpop.xlane.xlu1 %1468 }
 0x26c   :  { %1452 = vmin.xlane.f32.xlu0 %v1451_v22  ;;  %vm1470_vm8 = vcmp.eq.f32.partialorder %v4076_v51, %v4155_v25  ;;  %v1216_v56 = vshll.u32 %v1215_v48, 16  ;;  %v1376_v22 = vshll.u32 %v1375_v12, 16  ;;  %v1396_v18 = vshll.u32 %v1395_v17, 16 }
 0x26d   :  { %v1471_v32 = vsel %vm1470_vm8, %v1466_v45, inf }
 0x26e   :  { %1472 = vmin.xlane.f32.xlu1 %v1471_v32 }
 0x2bb   :  { %v1173_v2 = vpop.xlane.xlu0 %1172 }
 0x2bc   :  { %v1174_v8 = vcvt.f32.s32 %v1173_v2 }
 0x2be   :  { %v1177_v15 = vadd.s32 %v1176_v19, %v1174_v8  ;;  %v1415_v19 = vcvt.f32.s32 %v4141_v31  ;;  %v1435_v31 = vcvt.f32.s32 %v4146_v34 }
 0x2c0   :  { %1977 = vst.msk [vmem:[%s4508_s4] sm:$0xff] %vm1976_vm9, %v1177_v15  ;;  %vm1479_vm10 = vcmp.eq.s32.totalorder %v3819_v14, %v1177_v15  ;;  %vm1481_vm11 = vcmp.eq.s32.totalorder %v3830_v52, %v1177_v15  ;;  %vm1478_vm12 = vcmp.eq.s32.totalorder %v3816_v57, %v1177_v15  ;;  %vm1480_vm13 = vcmp.eq.s32.totalorder %v3822_v44, %v1177_v15 }
 0x2c1   :  { %2351 = vmatprep.mubr.msk.f32.mxu0 %vm1479_vm10, %v2746_v63  ;;  %2383 = vmatprep.mubr.msk.f32.mxu1 %vm1481_vm11, %v2746_v63  ;;  %v1416_v48 = vshll.u32 %v1415_v19, 16 }
 0x2c2   :  { %v1193_v51 = vpop.xlane.xlu1 %1192  ;;  %2352 = vmatmul.mubr.msk.f32.vlgmr.msra.gmra.mxu0 %vm1478_vm12, %v2746_v63  ;;  %2384 = vmatmul.mubr.msk.f32.vlgmr.msra.gmra.mxu1 %vm1480_vm13, %v2746_v63 }
 0x2c3   :  { %v1194_v0 = vcvt.f32.s32 %v1193_v51 }
 0x2c5   :  { %v1197_v55 = vadd.s32 %v1196_v39, %v1194_v0  ;;  %v1455_v0 = vcvt.f32.s32 %v4151_v59 }
 0x2c7   :  { %v1213_v62 = vpop.xlane.xlu0 %1212  ;;  %1978 = vst.msk [vmem:[%s4508_s4 + $0x8] sm:$0xff] %vm1976_vm9, %v1197_v55  ;;  %vm1483_vm14 = vcmp.eq.s32.totalorder %v3819_v14, %v1197_v55  ;;  %vm1485_vm15 = vcmp.eq.s32.totalorder %v3830_v52, %v1197_v55  ;;  %vm1482_vm1 = vcmp.eq.s32.totalorder %v3816_v57, %v1197_v55  ;;  %vm1484_vm2 = vcmp.eq.s32.totalorder %v3822_v44, %v1197_v55 }
 0x2c8   :  { %v1214_v4 = vcvt.f32.s32 %v1213_v62  ;;  %2353 = vmatprep.mubr.msk.f32.mxu0 %vm1483_vm14, %v2746_v63  ;;  %2385 = vmatprep.mubr.msk.f32.mxu1 %vm1485_vm15, %v2746_v63  ;;  %v1436_v55 = vshll.u32 %v1435_v31, 16 }
 0x2c9   :  { %2354 = vmatmul.mubr.msk.f32.gmra.mxu0 %vm1482_vm1, %v2746_v63  ;;  %2386 = vmatmul.mubr.msk.f32.gmra.mxu1 %vm1484_vm2, %v2746_v63 }
 0x2ca   :  { %v1217_v43 = vadd.s32 %v1216_v56, %v1214_v4  ;;  %v1475_v56 = vcvt.f32.s32 %v4155_v25  ;;  %v1456_v25 = vshll.u32 %v1455_v0, 16 }
 0x2cb   :  { %v1233_v47 = vpop.xlane.xlu1 %1232 }
 0x2cc   :  { %1979 = vst.msk [vmem:[%s4508_s4 + $0x10] sm:$0xff] %vm1976_vm9, %v1217_v43  ;;  %v1234_v16 = vcvt.f32.s32 %v1233_v47  ;;  %vm1487_vm3 = vcmp.eq.s32.totalorder %v3819_v14, %v1217_v43  ;;  %vm1489_vm4 = vcmp.eq.s32.totalorder %v3830_v52, %v1217_v43  ;;  %vm1486_vm5 = vcmp.eq.s32.totalorder %v3816_v57, %v1217_v43 }
 0x2cd   :  { %2355 = vmatprep.mubr.msk.f32.mxu0 %vm1487_vm3, %v2746_v63  ;;  %2387 = vmatprep.mubr.msk.f32.mxu1 %vm1489_vm4, %v2746_v63  ;;  %vm1488_vm6 = vcmp.eq.s32.totalorder %v3822_v44, %v1217_v43  ;;  %v1476_v58 = vshll.u32 %v1475_v56, 16 }
 0x2ce   :  { %v1237_v11 = vadd.s32 %v1236_v5, %v1234_v16  ;;  %2356 = vmatmul.mubr.msk.f32.gmra.mxu0 %vm1486_vm5, %v2746_v63  ;;  %2388 = vmatmul.mubr.msk.f32.gmra.mxu1 %vm1488_vm6, %v2746_v63 }
 0x2cf   :  { %v1253_v21 = vpop.xlane.xlu0 %1252 }
 0x2d0   :  { %1980 = vst.msk [vmem:[%s4508_s4 + $0x18] sm:$0xff] %vm1976_vm9, %v1237_v11  ;;  %v1254_v7 = vcvt.f32.s32 %v1253_v21  ;;  %vm1491_vm7 = vcmp.eq.s32.totalorder %v3819_v14, %v1237_v11  ;;  %vm1493_vm8 = vcmp.eq.s32.totalorder %v3830_v52, %v1237_v11  ;;  %vm1490_vm10 = vcmp.eq.s32.totalorder %v3816_v57, %v1237_v11 }
 0x2d1   :  { %2357 = vmatprep.mubr.msk.f32.mxu0 %vm1491_vm7, %v2746_v63  ;;  %2389 = vmatprep.mubr.msk.f32.mxu1 %vm1493_vm8, %v2746_v63  ;;  %vm1492_vm11 = vcmp.eq.s32.totalorder %v3822_v44, %v1237_v11 }
 0x2d2   :  { %v1257_v35 = vadd.s32 %v1256_v46, %v1254_v7  ;;  %2358 = vmatmul.mubr.msk.f32.gmra.mxu0 %vm1490_vm10, %v2746_v63  ;;  %2390 = vmatmul.mubr.msk.f32.gmra.mxu1 %vm1492_vm11, %v2746_v63 }
 0x2d3   :  { %v1273_v42 = vpop.xlane.xlu1 %1272 }
 0x2d4   :  { %1981 = vst.msk [vmem:[%s4508_s4 + $0x20] sm:$0xff] %vm1976_vm9, %v1257_v35  ;;  %v1274_v49 = vcvt.f32.s32 %v1273_v42  ;;  %vm1495_vm12 = vcmp.eq.s32.totalorder %v3819_v14, %v1257_v35  ;;  %vm1497_vm13 = vcmp.eq.s32.totalorder %v3830_v52, %v1257_v35  ;;  %vm1494_vm14 = vcmp.eq.s32.totalorder %v3816_v57, %v1257_v35 }
 0x2d5   :  { %2359 = vmatprep.mubr.msk.f32.mxu0 %vm1495_vm12, %v2746_v63  ;;  %2391 = vmatprep.mubr.msk.f32.mxu1 %vm1497_vm13, %v2746_v63  ;;  %vm1496_vm15 = vcmp.eq.s32.totalorder %v3822_v44, %v1257_v35 }
 0x2d6   :  { %v1277_v1 = vadd.s32 %v1276_v61, %v1274_v49  ;;  %2360 = vmatmul.mubr.msk.f32.gmra.mxu0 %vm1494_vm14, %v2746_v63  ;;  %2392 = vmatmul.mubr.msk.f32.gmra.mxu1 %vm1496_vm15, %v2746_v63 }
 0x2d7   :  { %v1293_v37 = vpop.xlane.xlu0 %1292 }
 0x2d8   :  { %1982 = vst.msk [vmem:[%s4508_s4 + $0x28] sm:$0xff] %vm1976_vm9, %v1277_v1  ;;  %v1294_v30 = vcvt.f32.s32 %v1293_v37  ;;  %vm1499_vm1 = vcmp.eq.s32.totalorder %v3819_v14, %v1277_v1  ;;  %vm1501_vm2 = vcmp.eq.s32.totalorder %v3830_v52, %v1277_v1  ;;  %vm1498_vm3 = vcmp.eq.s32.totalorder %v3816_v57, %v1277_v1 }
 0x2d9   :  { %2361 = vmatprep.mubr.msk.f32.mxu0 %vm1499_vm1, %v2746_v63  ;;  %2393 = vmatprep.mubr.msk.f32.mxu1 %vm1501_vm2, %v2746_v63  ;;  %vm1500_vm4 = vcmp.eq.s32.totalorder %v3822_v44, %v1277_v1 }
 0x2da   :  { %v1297_v20 = vadd.s32 %v1296_v9, %v1294_v30  ;;  %2362 = vmatmul.mubr.msk.f32.gmra.mxu0 %vm1498_vm3, %v2746_v63  ;;  %2394 = vmatmul.mubr.msk.f32.gmra.mxu1 %vm1500_vm4, %v2746_v63 }
 0x2db   :  { %v1313_v38 = vpop.xlane.xlu1 %1312 }
 0x2dc   :  { %1983 = vst.msk [vmem:[%s4508_s4 + $0x30] sm:$0xff] %vm1976_vm9, %v1297_v20  ;;  %v1314_v41 = vcvt.f32.s32 %v1313_v38  ;;  %vm1503_vm5 = vcmp.eq.s32.totalorder %v3819_v14, %v1297_v20  ;;  %vm1505_vm6 = vcmp.eq.s32.totalorder %v3830_v52, %v1297_v20  ;;  %vm1502_vm7 = vcmp.eq.s32.totalorder %v3816_v57, %v1297_v20 }
 0x2dd   :  { %2363 = vmatprep.mubr.msk.f32.mxu0 %vm1503_vm5, %v2746_v63  ;;  %2395 = vmatprep.mubr.msk.f32.mxu1 %vm1505_vm6, %v2746_v63  ;;  %vm1504_vm8 = vcmp.eq.s32.totalorder %v3822_v44, %v1297_v20 }
 0x2de   :  { %v1317_v28 = vadd.s32 %v1316_v23, %v1314_v41  ;;  %2364 = vmatmul.mubr.msk.f32.gmra.mxu0 %vm1502_vm7, %v2746_v63  ;;  %2396 = vmatmul.mubr.msk.f32.gmra.mxu1 %vm1504_vm8, %v2746_v63 }
 0x2df   :  { %v1333_v29 = vpop.xlane.xlu0 %1332 }
 0x2e0   :  { %1984 = vst.msk [vmem:[%s4508_s4 + $0x38] sm:$0xff] %vm1976_vm9, %v1317_v28  ;;  %v1334_v60 = vcvt.f32.s32 %v1333_v29  ;;  %vm1507_vm10 = vcmp.eq.s32.totalorder %v3819_v14, %v1317_v28  ;;  %vm1509_vm11 = vcmp.eq.s32.totalorder %v3830_v52, %v1317_v28  ;;  %vm1506_vm12 = vcmp.eq.s32.totalorder %v3816_v57, %v1317_v28 }
 0x2e1   :  { %2365 = vmatprep.mubr.msk.f32.mxu0 %vm1507_vm10, %v2746_v63  ;;  %2397 = vmatprep.mubr.msk.f32.mxu1 %vm1509_vm11, %v2746_v63  ;;  %vm1508_vm13 = vcmp.eq.s32.totalorder %v3822_v44, %v1317_v28 }
 0x2e2   :  { %v1337_v24 = vadd.s32 %v1336_v50, %v1334_v60  ;;  %2366 = vmatmul.mubr.msk.f32.gmra.mxu0 %vm1506_vm12, %v2746_v63  ;;  %2398 = vmatmul.mubr.msk.f32.gmra.mxu1 %vm1508_vm13, %v2746_v63 }
 0x2e3   :  { %v1353_v27 = vpop.xlane.xlu1 %1352 }
 0x2e4   :  { %1985 = vst.msk [vmem:[%s4508_s4 + $0x40] sm:$0xff] %vm1976_vm9, %v1337_v24  ;;  %v1354_v3 = vcvt.f32.s32 %v1353_v27  ;;  %vm1511_vm14 = vcmp.eq.s32.totalorder %v3819_v14, %v1337_v24  ;;  %vm1513_vm15 = vcmp.eq.s32.totalorder %v3830_v52, %v1337_v24  ;;  %vm1510_vm1 = vcmp.eq.s32.totalorder %v3816_v57, %v1337_v24 }
 0x2e5   :  { %2367 = vmatprep.mubr.msk.f32.mxu0 %vm1511_vm14, %v2746_v63  ;;  %2399 = vmatprep.mubr.msk.f32.mxu1 %vm1513_vm15, %v2746_v63  ;;  %vm1512_vm2 = vcmp.eq.s32.totalorder %v3822_v44, %v1337_v24 }
 0x2e6   :  { %v1357_v40 = vadd.s32 %v1356_v13, %v1354_v3  ;;  %2368 = vmatmul.mubr.msk.f32.gmra.mxu0 %vm1510_vm1, %v2746_v63  ;;  %2400 = vmatmul.mubr.msk.f32.gmra.mxu1 %vm1512_vm2, %v2746_v63 }
 0x2e7   :  { %v1373_v45 = vpop.xlane.xlu0 %1372 }
 0x2e8   :  { %1986 = vst.msk [vmem:[%s4508_s4 + $0x48] sm:$0xff] %vm1976_vm9, %v1357_v40  ;;  %v1374_v32 = vcvt.f32.s32 %v1373_v45  ;;  %vm1515_vm3 = vcmp.eq.s32.totalorder %v3819_v14, %v1357_v40  ;;  %vm1517_vm4 = vcmp.eq.s32.totalorder %v3830_v52, %v1357_v40  ;;  %vm1514_vm5 = vcmp.eq.s32.totalorder %v3816_v57, %v1357_v40 }
 0x2e9   :  { %2369 = vmatprep.mubr.msk.f32.mxu0 %vm1515_vm3, %v2746_v63  ;;  %2401 = vmatprep.mubr.msk.f32.mxu1 %vm1517_vm4, %v2746_v63  ;;  %vm1516_vm6 = vcmp.eq.s32.totalorder %v3822_v44, %v1357_v40 }
 0x2ea   :  { %v1377_v2 = vadd.s32 %v1376_v22, %v1374_v32  ;;  %2370 = vmatmul.mubr.msk.f32.gmra.mxu0 %vm1514_vm5, %v2746_v63  ;;  %2402 = vmatmul.mubr.msk.f32.gmra.mxu1 %vm1516_vm6, %v2746_v63 }
 0x2ec   :  { %1987 = vst.msk [vmem:[%s4508_s4 + $0x50] sm:$0xff] %vm1976_vm9, %v1377_v2  ;;  %v1393_v8 = vpop.xlane.xlu1 %1392  ;;  %vm1519_vm7 = vcmp.eq.s32.totalorder %v3819_v14, %v1377_v2  ;;  %vm1521_vm8 = vcmp.eq.s32.totalorder %v3830_v52, %v1377_v2  ;;  %vm1518_vm10 = vcmp.eq.s32.totalorder %v3816_v57, %v1377_v2  ;;  %vm1520_vm11 = vcmp.eq.s32.totalorder %v3822_v44, %v1377_v2 }
 0x2ed   :  { %v1394_v33 = vcvt.f32.s32 %v1393_v8  ;;  %2371 = vmatprep.mubr.msk.f32.mxu0 %vm1519_vm7, %v2746_v63  ;;  %2403 = vmatprep.mubr.msk.f32.mxu1 %vm1521_vm8, %v2746_v63 }
 0x2ee   :  { %2372 = vmatmul.mubr.msk.f32.gmra.mxu0 %vm1518_vm10, %v2746_v63  ;;  %2404 = vmatmul.mubr.msk.f32.gmra.mxu1 %vm1520_vm11, %v2746_v63 }
 0x2ef   :  { %v1397_v15 = vadd.s32 %v1396_v18, %v1394_v33 }
 0x2f0   :  { %v1413_v51 = vpop.xlane.xlu0 %1412 }
 0x2f1   :  { %1988 = vst.msk [vmem:[%s4508_s4 + $0x58] sm:$0xff] %vm1976_vm9, %v1397_v15  ;;  %v1414_v39 = vcvt.f32.s32 %v1413_v51  ;;  %vm1523_vm12 = vcmp.eq.s32.totalorder %v3819_v14, %v1397_v15  ;;  %vm1525_vm13 = vcmp.eq.s32.totalorder %v3830_v52, %v1397_v15  ;;  %vm1522_vm14 = vcmp.eq.s32.totalorder %v3816_v57, %v1397_v15 }
 0x2f2   :  { %2373 = vmatprep.mubr.msk.f32.mxu0 %vm1523_vm12, %v2746_v63  ;;  %2405 = vmatprep.mubr.msk.f32.mxu1 %vm1525_vm13, %v2746_v63  ;;  %vm1524_vm15 = vcmp.eq.s32.totalorder %v3822_v44, %v1397_v15 }
 0x2f3   :  { %v1433_v34 = vpop.xlane.xlu1 %1432  ;;  %v1417_v36 = vadd.s32 %v1416_v48, %v1414_v39  ;;  %2374 = vmatmul.mubr.msk.f32.gmra.mxu0 %vm1522_vm14, %v2746_v63  ;;  %2406 = vmatmul.mubr.msk.f32.gmra.mxu1 %vm1524_vm15, %v2746_v63 }
 0x2f4   :  { %v1434_v62 = vcvt.f32.s32 %v1433_v34 }
 0x2f5   :  { %v1453_v4 = vpop.xlane.xlu0 %1452  ;;  %1989 = vst.msk [vmem:[%s4508_s4 + $0x60] sm:$0xff] %vm1976_vm9, %v1417_v36  ;;  %vm1527_vm1 = vcmp.eq.s32.totalorder %v3819_v14, %v1417_v36  ;;  %vm1529_vm2 = vcmp.eq.s32.totalorder %v3830_v52, %v1417_v36  ;;  %vm1526_vm3 = vcmp.eq.s32.totalorder %v3816_v57, %v1417_v36  ;;  %vm1528_vm4 = vcmp.eq.s32.totalorder %v3822_v44, %v1417_v36 }
 0x2f6   :  { %v1437_v59 = vadd.s32 %v1436_v55, %v1434_v62  ;;  %2375 = vmatprep.mubr.msk.f32.mxu0 %vm1527_vm1, %v2746_v63  ;;  %2407 = vmatprep.mubr.msk.f32.mxu1 %vm1529_vm2, %v2746_v63  ;;  %v1454_v43 = vcvt.f32.s32 %v1453_v4  ;;  %v2708_v4 = vld [vmem:[%s4504_s0 + $0x8] sm:$0xff]  ;;  %vm22_vm2 = vcmask 0  }
 0x2f7   :  { %v1473_v5 = vpop.xlane.xlu1 %1472  ;;  %2376 = vmatmul.mubr.msk.f32.gmra.mxu0 %vm1526_vm3, %v2746_v63  ;;  %2408 = vmatmul.mubr.msk.f32.gmra.mxu1 %vm1528_vm4, %v2746_v63 }
 0x2f8   :  { %1990 = vst.msk [vmem:[%s4508_s4 + $0x68] sm:$0xff] %vm1976_vm9, %v1437_v59  ;;  %vm1531_vm5 = vcmp.eq.s32.totalorder %v3819_v14, %v1437_v59  ;;  %vm1533_vm6 = vcmp.eq.s32.totalorder %v3830_v52, %v1437_v59  ;;  %v1474_v47 = vcvt.f32.s32 %v1473_v5  ;;  %v1457_v16 = vadd.s32 %v1456_v25, %v1454_v43 }
 0x2f9   :  { %2377 = vmatprep.mubr.msk.f32.mxu0 %vm1531_vm5, %v2746_v63  ;;  %2409 = vmatprep.mubr.msk.f32.mxu1 %vm1533_vm6, %v2746_v63  ;;  %vm1530_vm7 = vcmp.eq.s32.totalorder %v3816_v57, %v1437_v59  ;;  %vm1532_vm8 = vcmp.eq.s32.totalorder %v3822_v44, %v1437_v59 }
 0x2fa   :  { %v1477_v11 = vadd.s32 %v1476_v58, %v1474_v47  ;;  %1991 = vst.msk [vmem:[%s4508_s4 + $0x70] sm:$0xff] %vm1976_vm9, %v1457_v16  ;;  %vm1535_vm10 = vcmp.eq.s32.totalorder %v3819_v14, %v1457_v16  ;;  %vm1537_vm11 = vcmp.eq.s32.totalorder %v3830_v52, %v1457_v16  ;;  %vm1534_vm12 = vcmp.eq.s32.totalorder %v3816_v57, %v1457_v16  ;;  %v2709_v58 = vld [vmem:[%s4504_s0 + $0x10] sm:$0xff] }
 0x2fb   :  { %2378 = vmatmul.mubr.msk.f32.gmra.mxu0 %vm1530_vm7, %v2746_v63  ;;  %2410 = vmatmul.mubr.msk.f32.gmra.mxu1 %vm1532_vm8, %v2746_v63  ;;  %vm1536_vm13 = vcmp.eq.s32.totalorder %v3822_v44, %v1457_v16 }
 0x2fc   :  { %1992 = vst.msk [vmem:[%s4508_s4 + $0x78] sm:$0xff] %vm1976_vm9, %v1477_v11  ;;  %2379 = vmatprep.mubr.msk.f32.mxu0 %vm1535_vm10, %v2746_v63  ;;  %2411 = vmatprep.mubr.msk.f32.mxu1 %vm1537_vm11, %v2746_v63  ;;  %vm1539_vm14 = vcmp.eq.s32.totalorder %v3819_v14, %v1477_v11  ;;  %vm1541_vm15 = vcmp.eq.s32.totalorder %v3830_v52, %v1477_v11 }
 0x2fd   :  { %vm1538_vm9 = vcmp.eq.s32.totalorder %v3816_v57, %v1477_v11  ;;  %vm1540_vm1 = vcmp.eq.s32.totalorder %v3822_v44, %v1477_v11 }
 0x2ff   :  { %2380 = vmatmul.mubr.msk.f32.gmra.mxu0 %vm1534_vm12, %v2746_v63  ;;  %2412 = vmatmul.mubr.msk.f32.gmra.mxu1 %vm1536_vm13, %v2746_v63 }
 0x300   :  { %2381 = vmatprep.mubr.msk.f32.mxu0 %vm1539_vm14, %v2746_v63  ;;  %2413 = vmatprep.mubr.msk.f32.mxu1 %vm1541_vm15, %v2746_v63 }
 0x303   :  { %2382 = vmatmul.mubr.msk.f32.gmra.mxu0 %vm1538_vm9, %v2746_v63  ;;  %2414 = vmatmul.mubr.msk.f32.gmra.mxu1 %vm1540_vm1, %v2746_v63 }
 0x382   :  { %v2575_v46 = vpop.f32.mrf.mxu0  ;;  %v2655_v14 = vpop.f32.mrf.mxu1 }
 0x384   :  { %v2576_v26 = vpop.f32.mrf.mxu0  ;;  %v2656_v52 = vpop.f32.mrf.mxu1 }
 0x385   :  { %v2577_v21 = vadd.f32 %v2576_v26, %v2575_v46  ;;  %v2657_v7 = vadd.f32 %v2656_v52, %v2655_v14  ;;  %v2710_v52 = vld [vmem:[%s4504_s0 + $0x18] sm:$0xff] }
 0x387   :  { %v4367_v35 = vadd.f32 %v2657_v7, %v2577_v21 }
 0x389   :  { %v2578_v61 = vpop.f32.mrf.mxu0  ;;  %v2658_v10 = vpop.f32.mrf.mxu1  ;;  %1960 = vst.msk [vmem:[%s4507_s3] sm:$0xff] %vm120_vm0, %v4367_v35 }
 0x38b   :  { %v2579_v57 = vpop.f32.mrf.mxu0  ;;  %v2659_v44 = vpop.f32.mrf.mxu1 }
 0x38c   :  { %v2580_v42 = vadd.f32 %v2579_v57, %v2578_v61  ;;  %v2660_v63 = vadd.f32 %v2659_v44, %v2658_v10  ;;  %v2711_v10 = vld [vmem:[%s4504_s0 + $0x20] sm:$0xff] }
 0x38e   :  { %v2581_v49 = vpop.f32.mrf.mxu0  ;;  %v2661_v1 = vpop.f32.mrf.mxu1  ;;  %v1887_v9 = vadd.f32 %v2660_v63, %v2580_v42  ;;  %v2712_v42 = vld [vmem:[%s4504_s0] sm:$0xff] }
 0x38f   :  { %v2076_v63 = vsub.f32 %v4367_v35, %v2712_v42 }
 0x390   :  { %v2582_v54 = vpop.f32.mrf.mxu0  ;;  %v2662_v37 = vpop.f32.mrf.mxu1  ;;  %1961 = vst.msk [vmem:[%s4507_s3 + $0x8] sm:$0xff] %vm120_vm0, %v1887_v9  ;;  %v2077_v59 = vsub.f32 %v1887_v9, %v2708_v4 }
 0x391   :  { %v2583_v30 = vadd.f32 %v2582_v54, %v2581_v49  ;;  %v2663_v20 = vadd.f32 %v2662_v37, %v2661_v1  ;;  %v2713_v54 = vld [vmem:[%s4504_s0 + $0x28] sm:$0xff] }
 0x392   :  { %v2584_v23 = vpop.f32.mrf.mxu0  ;;  %v2664_v53 = vpop.f32.mrf.mxu1  ;;  %v2093_v26 = vmul.f32 0.0, %v2077_v59 }
 0x393   :  { %v1892_v38 = vadd.f32 %v2663_v20, %v2583_v30 }
 0x394   :  { %v2585_v41 = vpop.f32.mrf.mxu0  ;;  %v2665_v28 = vpop.f32.mrf.mxu1 }
 0x395   :  { %1962 = vst.msk [vmem:[%s4507_s3 + $0x10] sm:$0xff] %vm120_vm0, %v1892_v38  ;;  %v2586_v50 = vadd.f32 %v2585_v41, %v2584_v23  ;;  %v2666_v6 = vadd.f32 %v2665_v28, %v2664_v53  ;;  %v2078_v47 = vsub.f32 %v1892_v38, %v2709_v58  ;;  %v2110_v23 = vmul.f32 %v2093_v26, %v2093_v26 }
 0x396   :  { %v2587_v29 = vpop.f32.mrf.mxu0  ;;  %v2667_v60 = vpop.f32.mrf.mxu1 }
 0x397   :  { %v1897_v24 = vadd.f32 %v2666_v6, %v2586_v50  ;;  %v2094_v49 = vmul.f32 0.0, %v2078_v47  ;;  %v2109_v50 = vmul.f32 %v2076_v63, %v2076_v63 }
 0x398   :  { %v2588_v13 = vpop.f32.mrf.mxu0  ;;  %v2668_v12 = vpop.f32.mrf.mxu1 }
 0x399   :  { %1963 = vst.msk [vmem:[%s4507_s3 + $0x18] sm:$0xff] %vm120_vm0, %v1897_v24  ;;  %v2589_v27 = vadd.f32 %v2588_v13, %v2587_v29  ;;  %v2669_v3 = vadd.f32 %v2668_v12, %v2667_v60  ;;  %v2079_v21 = vsub.f32 %v1897_v24, %v2710_v52  ;;  %v2111_v6 = vmul.f32 %v2094_v49, %v2094_v49  ;;  %v2714_v29 = vld [vmem:[%s4504_s0 + $0x30] sm:$0xff] }
 0x39a   :  { %v2590_v40 = vpop.f32.mrf.mxu0  ;;  %v2670_v22 = vpop.f32.mrf.mxu1 }
 0x39b   :  { %v1902_v45 = vadd.f32 %v2669_v3, %v2589_v27  ;;  %v2095_v53 = vmul.f32 0.0, %v2079_v21  ;;  %v2715_v27 = vld [vmem:[%s4504_s0 + $0x38] sm:$0xff] }
 0x39c   :  { %v2591_v32 = vpop.f32.mrf.mxu0  ;;  %v2671_v17 = vpop.f32.mrf.mxu1 }
 0x39d   :  { %1964 = vst.msk [vmem:[%s4507_s3 + $0x20] sm:$0xff] %vm120_vm0, %v1902_v45  ;;  %v2592_v2 = vadd.f32 %v2591_v32, %v2590_v40  ;;  %v2672_v19 = vadd.f32 %v2671_v17, %v2670_v22  ;;  %v2080_v57 = vsub.f32 %v1902_v45, %v2711_v10  ;;  %v2126_v45 = vsel %vm120_vm0, %v2110_v23, 0.0 }
 0x39e   :  { %v2593_v8 = vpop.f32.mrf.mxu0  ;;  %v2673_v18 = vpop.f32.mrf.mxu1  ;;  %v2112_v32 = vmul.f32 %v2095_v53, %v2095_v53 }
 0x39f   :  { %v1907_v33 = vadd.f32 %v2672_v19, %v2592_v2  ;;  %v2096_v35 = vmul.f32 0.0, %v2080_v57  ;;  %v2719_v57 = vld [vmem:[%s4504_s0 + $0x58] sm:$0xff] }
 0x3a0   :  { %v2594_v31 = vpop.f32.mrf.mxu0  ;;  %v2674_v15 = vpop.f32.mrf.mxu1 }
 0x3a1   :  { %1965 = vst.msk [vmem:[%s4507_s3 + $0x28] sm:$0xff] %vm120_vm0, %v1907_v33  ;;  %v2595_v48 = vadd.f32 %v2594_v31, %v2593_v8  ;;  %v2675_v51 = vadd.f32 %v2674_v15, %v2673_v18  ;;  %v2081_v37 = vsub.f32 %v1907_v33, %v2713_v54  ;;  %v2113_v17 = vmul.f32 %v2096_v35, %v2096_v35  ;;  %v2716_v15 = vld [vmem:[%s4504_s0 + $0x40] sm:$0xff] }
 0x3a2   :  { %v2596_v39 = vpop.f32.mrf.mxu0  ;;  %v2676_v0 = vpop.f32.mrf.mxu1  ;;  %v2125_v18 = vsel %vm120_vm0, %v2109_v50, 0.0  ;;  %v2128_v33 = vsel %vm120_vm0, %v2111_v6, 0.0  ;;  %v2720_v50 = vld [vmem:[%s4504_s0 + $0x60] sm:$0xff] }
 0x3a3   :  { %v1912_v34 = vadd.f32 %v2675_v51, %v2595_v48  ;;  %v2097_v12 = vmul.f32 0.0, %v2081_v37  ;;  %v2127_v51 = vadd.f32 %v2126_v45, %v2125_v18 }
 0x3a4   :  { %v2597_v55 = vpop.f32.mrf.mxu0  ;;  %v2677_v56 = vpop.f32.mrf.mxu1 }
 0x3a5   :  { %1966 = vst.msk [vmem:[%s4507_s3 + $0x30] sm:$0xff] %vm120_vm0, %v1912_v34  ;;  %v2598_v36 = vadd.f32 %v2597_v55, %v2596_v39  ;;  %v2678_v62 = vadd.f32 %v2677_v56, %v2676_v0  ;;  %v2082_v60 = vsub.f32 %v1912_v34, %v2714_v29  ;;  %v2114_v39 = vmul.f32 %v2097_v12, %v2097_v12 }
 0x3a6   :  { %v2599_v25 = vpop.f32.mrf.mxu0  ;;  %v2679_v43 = vpop.f32.mrf.mxu1  ;;  %v2130_v56 = vsel %vm120_vm0, %v2112_v32, 0.0 }
 0x3a7   :  { %v1917_v5 = vadd.f32 %v2678_v62, %v2598_v36  ;;  %v2098_v31 = vmul.f32 0.0, %v2082_v60  ;;  %v2717_v36 = vld [vmem:[%s4504_s0 + $0x48] sm:$0xff]  ;;  %v2134_v52 = vsel %vm120_vm0, %v2114_v39, 0.0 }
 0x3a8   :  { %v2600_v16 = vpop.f32.mrf.mxu0  ;;  %v2680_v11 = vpop.f32.mrf.mxu1 }
 0x3a9   :  { %1967 = vst.msk [vmem:[%s4507_s3 + $0x38] sm:$0xff] %vm120_vm0, %v1917_v5  ;;  %v2601_v46 = vadd.f32 %v2600_v16, %v2599_v25  ;;  %v2681_v14 = vadd.f32 %v2680_v11, %v2679_v43  ;;  %v2083_v3 = vsub.f32 %v1917_v5, %v2715_v27  ;;  %v2129_v25 = vadd.f32 %v2128_v33, %v2127_v51  ;;  %v2718_v11 = vld [vmem:[%s4504_s0 + $0x50] sm:$0xff] }
 0x3aa   :  { %v2602_v7 = vpop.f32.mrf.mxu0  ;;  %v2682_v61 = vpop.f32.mrf.mxu1  ;;  %v2132_v43 = vsel %vm120_vm0, %v2113_v17, 0.0  ;;  %v2115_v47 = vmul.f32 %v2098_v31, %v2098_v31 }
 0x3ab   :  { %v1922_v44 = vadd.f32 %v2681_v14, %v2601_v46  ;;  %v2099_v0 = vmul.f32 0.0, %v2083_v3  ;;  %v2131_v26 = vadd.f32 %v2130_v56, %v2129_v25  ;;  %v2722_v25 = vld [vmem:[%s4504_s0 + $0x70] sm:$0xff] }
 0x3ac   :  { %v2603_v1 = vpop.f32.mrf.mxu0  ;;  %v2683_v9 = vpop.f32.mrf.mxu1  ;;  %v2136_v54 = vsel %vm120_vm0, %v2115_v47, 0.0 }
 0x3ad   :  { %1968 = vst.msk [vmem:[%s4507_s3 + $0x40] sm:$0xff] %vm120_vm0, %v1922_v44  ;;  %v2604_v30 = vadd.f32 %v2603_v1, %v2602_v7  ;;  %v2684_v20 = vadd.f32 %v2683_v9, %v2682_v61  ;;  %v2084_v48 = vsub.f32 %v1922_v44, %v2716_v15  ;;  %v2116_v21 = vmul.f32 %v2099_v0, %v2099_v0 }
 0x3ae   :  { %v2605_v38 = vpop.f32.mrf.mxu0  ;;  %v2685_v41 = vpop.f32.mrf.mxu1  ;;  %v2133_v49 = vadd.f32 %v2132_v43, %v2131_v26 }
 0x3af   :  { %v1927_v28 = vadd.f32 %v2684_v20, %v2604_v30  ;;  %v2100_v16 = vmul.f32 0.0, %v2084_v48  ;;  %v2138_v53 = vsel %vm120_vm0, %v2116_v21, 0.0 }
 0x3b0   :  { %v2606_v24 = vpop.f32.mrf.mxu0  ;;  %v2686_v13 = vpop.f32.mrf.mxu1  ;;  %v2135_v23 = vadd.f32 %v2134_v52, %v2133_v49  ;;  %v2723_v52 = vld [vmem:[%s4504_s0 + $0x78] sm:$0xff] }
 0x3b1   :  { %1969 = vst.msk [vmem:[%s4507_s3 + $0x48] sm:$0xff] %vm120_vm0, %v1927_v28  ;;  %v2607_v40 = vadd.f32 %v2606_v24, %v2605_v38  ;;  %v2687_v22 = vadd.f32 %v2686_v13, %v2685_v41  ;;  %v2085_v62 = vsub.f32 %v1927_v28, %v2717_v36  ;;  %v2117_v37 = vmul.f32 %v2100_v16, %v2100_v16 }
 0x3b2   :  { %v2137_v24 = vadd.f32 %v2136_v54, %v2135_v23 }
 0x3b3   :  { %v1932_v2 = vadd.f32 %v2687_v22, %v2607_v40  ;;  %v2608_v19 = vpop.f32.mrf.mxu0  ;;  %v2688_v8 = vpop.f32.mrf.mxu1  ;;  %v2101_v10 = vmul.f32 0.0, %v2085_v62  ;;  %v2140_v27 = vsel %vm120_vm0, %v2117_v37, 0.0 }
 0x3b4   :  { %v2139_v45 = vadd.f32 %v2138_v53, %v2137_v24 }
 0x3b5   :  { %1970 = vst.msk [vmem:[%s4507_s3 + $0x50] sm:$0xff] %vm120_vm0, %v1932_v2  ;;  %v2609_v34 = vpop.f32.mrf.mxu0  ;;  %v2689_v55 = vpop.f32.mrf.mxu1  ;;  %v2086_v46 = vsub.f32 %v1932_v2, %v2718_v11  ;;  %v2118_v28 = vmul.f32 %v2101_v10, %v2101_v10 }
 0x3b6   :  { %v2610_v4 = vadd.f32 %v2609_v34, %v2608_v19  ;;  %v2690_v59 = vadd.f32 %v2689_v55, %v2688_v8  ;;  %v2721_v8 = vld [vmem:[%s4504_s0 + $0x68] sm:$0xff]  ;;  %v2141_v15 = vadd.f32 %v2140_v27, %v2139_v45  ;;  %s2748_s0 = smov [#allocation2]  }
 0x3b7   :  { %v2611_v5 = vpop.f32.mrf.mxu0  ;;  %v2691_v58 = vpop.f32.mrf.mxu1  ;;  %v2102_v30 = vmul.f32 0.0, %v2086_v46  ;;  %v2142_v19 = vsel %vm120_vm0, %v2118_v28, 0.0 }
 0x3b8   :  { %v1937_v14 = vadd.f32 %v2690_v59, %v2610_v4  ;;  %v2143_v56 = vadd.f32 %v2142_v19, %v2141_v15 }
 0x3b9   :  { %v2612_v7 = vpop.f32.mrf.mxu0  ;;  %v2692_v61 = vpop.f32.mrf.mxu1  ;;  %v2119_v3 = vmul.f32 %v2102_v30, %v2102_v30 }
 0x3ba   :  { %1971 = vst.msk [vmem:[%s4507_s3 + $0x58] sm:$0xff] %vm120_vm0, %v1937_v14  ;;  %v2087_v44 = vsub.f32 %v1937_v14, %v2719_v57  ;;  %v2613_v42 = vadd.f32 %v2612_v7, %v2611_v5  ;;  %v2693_v63 = vadd.f32 %v2692_v61, %v2691_v58 }
 0x3bb   :  { %v2614_v1 = vpop.f32.mrf.mxu0  ;;  %v2694_v9 = vpop.f32.mrf.mxu1  ;;  %v2144_v39 = vsel %vm120_vm0, %v2119_v3, 0.0 }
 0x3bc   :  { %v1942_v20 = vadd.f32 %v2693_v63, %v2613_v42  ;;  %v2103_v38 = vmul.f32 0.0, %v2087_v44  ;;  %v2145_v47 = vadd.f32 %v2144_v39, %v2143_v56 }
 0x3bd   :  { %v2615_v41 = vpop.f32.mrf.mxu0  ;;  %v2695_v35 = vpop.f32.mrf.mxu1 }
 0x3be   :  { %1972 = vst.msk [vmem:[%s4507_s3 + $0x60] sm:$0xff] %vm120_vm0, %v1942_v20  ;;  %v2088_v6 = vsub.f32 %v1942_v20, %v2720_v50  ;;  %v2616_v29 = vadd.f32 %v2615_v41, %v2614_v1  ;;  %v2696_v60 = vadd.f32 %v2695_v35, %v2694_v9  ;;  %v2120_v32 = vmul.f32 %v2103_v38, %v2103_v38 }
 0x3bf   :  { %v2617_v13 = vpop.f32.mrf.mxu0  ;;  %v2697_v12 = vpop.f32.mrf.mxu1  ;;  %v2747_v9 = vmov 0.0  }
 0x3c0   :  { %v2104_v40 = vmul.f32 0.0, %v2088_v6  ;;  %v1947_v22 = vadd.f32 %v2696_v60, %v2616_v29  ;;  %v2146_v36 = vsel %vm120_vm0, %v2120_v32, 0.0  ;;  %23 = vst.msk [vmem:[#allocation2] sm:$0x1] %vm22_vm2, %v2747_v9 }
 0x3c1   :  { %v2618_v17 = vpop.f32.mrf.mxu0  ;;  %v2698_v2 = vpop.f32.mrf.mxu1  ;;  %v2147_v14 = vadd.f32 %v2146_v36, %v2145_v47 }
 0x3c2   :  { %1973 = vst.msk [vmem:[%s4507_s3 + $0x68] sm:$0xff] %vm120_vm0, %v1947_v22  ;;  %v2089_v18 = vsub.f32 %v1947_v22, %v2721_v8  ;;  %v2619_v33 = vadd.f32 %v2618_v17, %v2617_v13  ;;  %v2699_v31 = vadd.f32 %v2698_v2, %v2697_v12  ;;  %v2121_v0 = vmul.f32 %v2104_v40, %v2104_v40 }
 0x3c3   :  { %v2620_v48 = vpop.f32.mrf.mxu0  ;;  %v2700_v51 = vpop.f32.mrf.mxu1 }
 0x3c4   :  { %v2105_v34 = vmul.f32 0.0, %v2089_v18  ;;  %v1952_v55 = vadd.f32 %v2699_v31, %v2619_v33  ;;  %v2148_v16 = vsel %vm120_vm0, %v2121_v0, 0.0 }
 0x3c5   :  { %v2621_v62 = vpop.f32.mrf.mxu0  ;;  %v2701_v4 = vpop.f32.mrf.mxu1  ;;  %v2149_v61 = vadd.f32 %v2148_v16, %v2147_v14 }
 0x3c6   :  { %v2122_v59 = vmul.f32 %v2105_v34, %v2105_v34  ;;  %1974 = vst.msk [vmem:[%s4507_s3 + $0x70] sm:$0xff] %vm120_vm0, %v1952_v55  ;;  %v2090_v43 = vsub.f32 %v1952_v55, %v2722_v25  ;;  %v2622_v5 = vadd.f32 %v2621_v62, %v2620_v48  ;;  %v2702_v58 = vadd.f32 %v2701_v4, %v2700_v51 }
 0x3c7   :  { %v2108_v41 = vld [vmem:[#allocation2] sm:$0x1] }
 0x3c8   :  { %v2106_v11 = vmul.f32 0.0, %v2090_v43  ;;  %v1957_v46 = vadd.f32 %v2702_v58, %v2622_v5  ;;  %v2150_v7 = vsel %vm120_vm0, %v2122_v59, 0.0 }
 0x3c9   :  { %v2151_v44 = vadd.f32 %v2150_v7, %v2149_v61 }
 0x3ca   :  { %v2123_v26 = vmul.f32 %v2106_v11, %v2106_v11  ;;  %1975 = vst.msk [vmem:[%s4507_s3 + $0x78] sm:$0xff] %vm120_vm0, %v1957_v46  ;;  %v2091_v21 = vsub.f32 %v1957_v46, %v2723_v52  ;;  %s2179_s3 = sshll.u32 %s2748_s0, 4  ;;  %s2180_s3 = int_to_ptr.vmem [resolvable:$true] %s2179_s3 }
 0x3cb   :  { %s2724_s16 = scalar_lea.vmem %s2180_s3, 16  ;;  %s2728_s17 = scalar_lea.vmem %s2180_s3, 32 }
 0x3cc   :  { %v2107_v10 = vmul.f32 0.0, %v2091_v21  ;;  %v2152_v57 = vsel %vm120_vm0, %v2123_v26, 0.0  ;;  %p2725_p0 = scmp.ne.s32.totalorder %s2180_s3, %s2724_s16  ;;  %p2729_p1 = scmp.lt.s32.totalorder %s2180_s3, %s2180_s3 }
 0x3cd   :  { %v2153_v63 = vadd.f32 %v2152_v57, %v2151_v44  ;;  %p2730_p2 = scmp.lt.s32.totalorder %s2728_s17, %s2724_s16 }
 0x3ce   :  { %v2124_v42 = vmul.f32 %v2107_v10, %v2107_v10 }
 0x3cf   :  { %p2731_p3 = por %p2730_p2, %p2729_p1 }
 0x3d0   :  { %v2154_v49 = vsel %vm120_vm0, %v2124_v42, 0.0 }
 0x3d1   :  { %v2155_v1 = vadd.f32 %v2154_v49, %v2153_v63  ;;  %p2732_p4 = pnand %p2731_p3, %p2725_p0 }
 0x3d3   :  { %2156 = vadd.xlane.f32.xlu0 %v2155_v1 }
 0x45c   :  { %v2157_v54 = vpop.xlane.xlu0 %2156 }
 0x45d   :  { %v2158_v37 = vrot.slane %v2157_v54, 4 }
 0x45f   :  { %v2159_v30 = vadd.f32 %v2158_v37, %v2157_v54 }
 0x461   :  { %v2160_v20 = vrot.slane %v2159_v30, 2 }
 0x463   :  { %v2161_v23 = vadd.f32 %v2160_v20, %v2159_v30 }
 0x465   :  { %v2162_v53 = vrot.slane %v2161_v23, 1 }
 0x467   :  { %v2163_v38 = vadd.f32 %v2162_v53, %v2161_v23 }
 0x469   :  { %2703 = vpush %v2163_v38 }
 0x49a   :  { %s2704_s15 = spop %2703 }
 0x49b   :  { %v2165_v35 = vstv %s2704_s15 }
 0x49c   :  { %v2166_v28 = vadd.f32 %v2165_v35, %v2108_v41 }
 0x49e   :  { %2168 = vst.msk [vmem:[#allocation2] sm:$0x1] %vm22_vm2, %v2166_v28 }
 0x49f   :  { %2735 = shalt.err (!%p2732_p4)
}
 0x4a0   :  { %2182 = dma.vmem_to_hbm [thread:$0]  %s2180_s3, 16, %s4509_s5, [#allocation3]  }
 0x4a1   :  { %2744 = dma.done.wait [#allocation3], 16  }
 0x4a2   :  { %2745 = vsyncadd [#allocation3], 4294967280 }
 0x4a3   :  { %2190 = vsyncpa [#allocation3], 1 }

// kernel: _lambda_.15
= control target key start
LH: loop header
LB: loop body
LE: loop exit
PB: predicated region body
PF: predicated region fallthrough
CT: control target
= control target key end

     0   :  { %s1374_s12 = smov 0   ;;  %s1376_s13 = smov 0   ;;  %s1525_s0 = inlined_call_operand.vmem [shape: bf16[4,128,512], index: 0, kind: input, shape index: {}]   ;;  %s1526_s1 = inlined_call_operand.vmem [shape: bf16[4,512,128], index: 1, kind: input, shape index: {}]   ;;  %s1527_s2 = inlined_call_operand.vmem [shape: f32[1,128], index: 2, kind: input, shape index: {}]   ;;  %s1528_s3 = inlined_call_operand.vmem [shape: f32[4,128,128], index: 3, kind: output, shape index: {}]  }
   0x1   :  { %s1378_s14 = smov 0  }
   0x2 LB: > { %s25_s15 = sadd.s32 1, %s1348_s13  ;;  %p1021_p0 = scmp.ge.s32.totalorder %s1352_s14, 1  ;;  %s1352_s14 = sphi %s1378_s14, %s13_s14   ;;  %s1348_s13 = sphi %s1376_s13, %s1530_s13   ;;  %s1344_s12 = sphi %s1374_s12, %s1529_s12  }
   0x3   : > { %p27_p1 = scmp.ge.s32.totalorder %s25_s15, 4  ;;  %p169_p2 = scmp.lt.s32.totalorder %s1352_s14, 5 }
   0x5   : > { %s1532_s15 = smov (%p27_p1, %s25_s15), 0  ;;  %p170_p3 = pnand %p1021_p0, %p169_p2 }
   0x6   : > { %p208_p4 = scmp.lt.s32.totalorder (!%p170_p3), %s1344_s12, 3 }
   0x7   : > { %173 = sbr.rel (%p170_p3) target bundleno = 313 (0x139), region = 32 }
   0xc   : > { %s1534_s12 = smov (!%p208_p4, %s1344_s12), 3 }
   0xd   : > { %s1095_s16 = sshll.u32 %s1534_s12, 8  ;;  %s1097_s25 = sshll.u32 %s1534_s12, 7 }
   0xe   : > { %s1400_s19 = scalar_lea.vmem %s1526_s1, %s1095_s16  ;;  %s1437_s22 = scalar_lea.vmem %s1525_s0, %s1095_s16 }
   0xf   : > { %v1250_v0 = vld [vmem:[%s1400_s19 + $0x78] sm:$0xff]   ;;  %v1254_v4 = vld [vmem:[%s1400_s19 + $0x70] sm:$0xff]   ;;  %v1258_v8 = vld [vmem:[%s1400_s19 + $0x68] sm:$0xff]   ;;  %s1483_s28 = scalar_lea.vmem %s1528_s3, %s1097_s25 }
  0x10   : > { %v1251_v1 = vld [vmem:[%s1400_s19 + $0xf8] sm:$0xff]   ;;  %1098 = vmatprep.subr.bf16.mxu0 %v1250_v0  ;;  %v1255_v5 = vld [vmem:[%s1400_s19 + $0xf0] sm:$0xff]   ;;  %v1259_v9 = vld [vmem:[%s1400_s19 + $0xe8] sm:$0xff]  }
  0x11   : > { %v1252_v2 = vld [vmem:[%s1400_s19 + $0x38] sm:$0xff]   ;;  %1162 = vmatprep.subr.bf16.mxu1 %v1251_v1  ;;  %v1256_v6 = vld [vmem:[%s1400_s19 + $0x30] sm:$0xff]   ;;  %v1260_v10 = vld [vmem:[%s1400_s19 + $0x28] sm:$0xff]  }
  0x12   : > { %v1253_v3 = vld [vmem:[%s1400_s19 + $0xb8] sm:$0xff]   ;;  %1099 = vmatpush3.bf16.msra.mxu0 %v1252_v2  ;;  %v1257_v7 = vld [vmem:[%s1400_s19 + $0xb0] sm:$0xff]   ;;  %v1261_v11 = vld [vmem:[%s1400_s19 + $0xa8] sm:$0xff]  }
  0x13   : > { %1163 = vmatpush3.bf16.msra.mxu1 %v1253_v3  ;;  %1100 = vmatprep.subr.bf16.mxu0 %v1254_v4  ;;  %v1262_v12 = vld [vmem:[%s1400_s19 + $0x60] sm:$0xff]   ;;  %v1266_v16 = vld [vmem:[%s1400_s19 + $0x58] sm:$0xff]   ;;  %v1270_v20 = vld [vmem:[%s1400_s19 + $0x50] sm:$0xff]  }
  0x14   : > { %1164 = vmatprep.subr.bf16.mxu1 %v1255_v5  ;;  %v1263_v13 = vld [vmem:[%s1400_s19 + $0xe0] sm:$0xff]   ;;  %v1267_v17 = vld [vmem:[%s1400_s19 + $0xd8] sm:$0xff]   ;;  %v1271_v21 = vld [vmem:[%s1400_s19 + $0xd0] sm:$0xff]  }
  0x15   : > { %v1264_v14 = vld [vmem:[%s1400_s19 + $0x20] sm:$0xff]   ;;  %v1268_v18 = vld [vmem:[%s1400_s19 + $0x18] sm:$0xff]   ;;  %v1272_v22 = vld [vmem:[%s1400_s19 + $0x10] sm:$0xff]  }
  0x16   : > { %1101 = vmatpush3.bf16.msra.mxu0 %v1256_v6  ;;  %v1265_v15 = vld [vmem:[%s1400_s19 + $0xa0] sm:$0xff]   ;;  %v1269_v19 = vld [vmem:[%s1400_s19 + $0x98] sm:$0xff]   ;;  %v1273_v23 = vld [vmem:[%s1400_s19 + $0x90] sm:$0xff]  }
  0x17   : > { %1165 = vmatpush3.bf16.msra.mxu1 %v1257_v7  ;;  %1102 = vmatprep.subr.bf16.mxu0 %v1258_v8  ;;  %v1274_v24 = vld [vmem:[%s1400_s19 + $0x48] sm:$0xff]   ;;  %v1278_v28 = vld [vmem:[%s1400_s19 + $0x40] sm:$0xff]  }
  0x18   : > { %1166 = vmatprep.subr.bf16.mxu1 %v1259_v9  ;;  %v1275_v25 = vld [vmem:[%s1400_s19 + $0xc8] sm:$0xff]   ;;  %v1279_v29 = vld [vmem:[%s1400_s19 + $0xc0] sm:$0xff]  }
  0x19   : > { %v1276_v26 = vld [vmem:[%s1400_s19 + $0x8] sm:$0xff]   ;;  %v1280_v30 = vld [vmem:[%s1400_s19] sm:$0xff]  }
  0x1a   : > { %1103 = vmatpush3.bf16.msra.mxu0 %v1260_v10  ;;  %v1277_v27 = vld [vmem:[%s1400_s19 + $0x88] sm:$0xff]   ;;  %v1281_v31 = vld [vmem:[%s1400_s19 + $0x80] sm:$0xff]  }
  0x1b   : > { %1167 = vmatpush3.bf16.msra.mxu1 %v1261_v11  ;;  %1104 = vmatprep.subr.bf16.mxu0 %v1262_v12  ;;  %v1282_v32 = vld [vmem:[%s1437_s22] ss:$16 sps:$4 sm:$0xff]   ;;  %v1284_v33 = vld [vmem:[%s1437_s22 + $0x4] ss:$16 sps:$4 sm:$0xff]   ;;  %v1285_v34 = vld [vmem:[%s1437_s22 + $0x8] ss:$16 sps:$4 sm:$0xff]  }
  0x1c   : > { %1168 = vmatprep.subr.bf16.mxu1 %v1263_v13  ;;  %v1287_v35 = vld [vmem:[%s1437_s22 + $0xc] ss:$16 sps:$4 sm:$0xff]   ;;  %721 = vmatprep.mubr.bf16.mxu0 %v1284_v33  ;;  %v1288_v36 = vld [vmem:[%s1437_s22 + $0x24] ss:$16 sps:$4 sm:$0xff]   ;;  %v1292_v38 = vld [vmem:[%s1437_s22 + $0x20] ss:$16 sps:$4 sm:$0xff]  }
  0x1d   : > { %818 = vmatprep.mubr.bf16.mxu1 %v1287_v35  ;;  %v1290_v37 = vld [vmem:[%s1437_s22 + $0x2c] ss:$16 sps:$4 sm:$0xff]   ;;  %v1293_v39 = vld [vmem:[%s1437_s22 + $0x28] ss:$16 sps:$4 sm:$0xff]   ;;  %v1294_v40 = vld [vmem:[%s1437_s22 + $0x44] ss:$16 sps:$4 sm:$0xff]  }
  0x1e   : > { %1105 = vmatpush3.bf16.msra.mxu0 %v1264_v14  ;;  %v1296_v41 = vld [vmem:[%s1437_s22 + $0x4c] ss:$16 sps:$4 sm:$0xff]   ;;  %v1298_v42 = vld [vmem:[%s1437_s22 + $0x40] ss:$16 sps:$4 sm:$0xff]   ;;  %v1299_v43 = vld [vmem:[%s1437_s22 + $0x48] ss:$16 sps:$4 sm:$0xff]  }
  0x1f   : > { %1169 = vmatpush3.bf16.msra.mxu1 %v1265_v15  ;;  %1106 = vmatprep.subr.bf16.mxu0 %v1266_v16  ;;  %v1300_v44 = vld [vmem:[%s1437_s22 + $0x64] ss:$16 sps:$4 sm:$0xff]   ;;  %v1302_v45 = vld [vmem:[%s1437_s22 + $0x6c] ss:$16 sps:$4 sm:$0xff]   ;;  %v1304_v46 = vld [vmem:[%s1437_s22 + $0x60] ss:$16 sps:$4 sm:$0xff]  }
  0x20   : > { %1170 = vmatprep.subr.bf16.mxu1 %v1267_v17  ;;  %v1305_v47 = vld [vmem:[%s1437_s22 + $0x68] ss:$16 sps:$4 sm:$0xff]   ;;  %v1306_v48 = vld [vmem:[%s1437_s22 + $0x84] ss:$16 sps:$4 sm:$0xff]   ;;  %v1308_v49 = vld [vmem:[%s1437_s22 + $0x8c] ss:$16 sps:$4 sm:$0xff]  }
  0x21   : > { %v1310_v50 = vld [vmem:[%s1437_s22 + $0x80] ss:$16 sps:$4 sm:$0xff]   ;;  %v1311_v51 = vld [vmem:[%s1437_s22 + $0x88] ss:$16 sps:$4 sm:$0xff]   ;;  %v1312_v52 = vld [vmem:[%s1437_s22 + $0xa4] ss:$16 sps:$4 sm:$0xff]  }
  0x22   : > { %1107 = vmatpush3.bf16.msra.mxu0 %v1268_v18  ;;  %v1314_v53 = vld [vmem:[%s1437_s22 + $0xac] ss:$16 sps:$4 sm:$0xff]   ;;  %v1316_v54 = vld [vmem:[%s1437_s22 + $0xa0] ss:$16 sps:$4 sm:$0xff]   ;;  %v1317_v55 = vld [vmem:[%s1437_s22 + $0xa8] ss:$16 sps:$4 sm:$0xff]  }
  0x23   : > { %1171 = vmatpush3.bf16.msra.mxu1 %v1269_v19  ;;  %1108 = vmatprep.subr.bf16.mxu0 %v1270_v20  ;;  %v1318_v56 = vld [vmem:[%s1437_s22 + $0xc4] ss:$16 sps:$4 sm:$0xff]   ;;  %v1320_v57 = vld [vmem:[%s1437_s22 + $0xcc] ss:$16 sps:$4 sm:$0xff]   ;;  %v1322_v58 = vld [vmem:[%s1437_s22 + $0xc0] ss:$16 sps:$4 sm:$0xff]  }
  0x24   : > { %1172 = vmatprep.subr.bf16.mxu1 %v1271_v21  ;;  %v1323_v59 = vld [vmem:[%s1437_s22 + $0xc8] ss:$16 sps:$4 sm:$0xff]   ;;  %v1324_v60 = vld [vmem:[%s1437_s22 + $0xe4] ss:$16 sps:$4 sm:$0xff]   ;;  %v1326_v61 = vld [vmem:[%s1437_s22 + $0xec] ss:$16 sps:$4 sm:$0xff]  }
  0x25   : > { %v1328_v62 = vld [vmem:[%s1437_s22 + $0xe0] ss:$16 sps:$4 sm:$0xff]   ;;  %v1329_v63 = vld [vmem:[%s1437_s22 + $0xe8] ss:$16 sps:$4 sm:$0xff]  }
  0x26   : > { %1109 = vmatpush3.bf16.msra.mxu0 %v1272_v22  ;;  %v1476_v2 = vld [vmem:[%s1527_s2] ss:$0 sm:$0xff] }
  0x27   : > { %1173 = vmatpush3.bf16.msra.mxu1 %v1273_v23  ;;  %1110 = vmatprep.subr.bf16.mxu0 %v1274_v24 }
  0x28   : > { %1174 = vmatprep.subr.bf16.mxu1 %v1275_v25 }
  0x2a   : > { %1111 = vmatpush3.bf16.msra.mxu0 %v1276_v26 }
  0x2b   : > { %1175 = vmatpush3.bf16.msra.mxu1 %v1277_v27  ;;  %1112 = vmatprep.subr.bf16.mxu0 %v1278_v28 }
  0x2c   : > { %1176 = vmatprep.subr.bf16.mxu1 %v1279_v29 }
  0x2e   : > { %1113 = vmatpush3.bf16.msra.mxu0 %v1280_v30 }
  0x2f   : > { %1177 = vmatpush3.bf16.msra.mxu1 %v1281_v31 }
  0x31   : > { %722 = vmatmul.mubr.bf16.vlgmr.msra.gmra.mxu0 %v1282_v32 }
  0x32   : > { %819 = vmatmul.mubr.bf16.vlgmr.msra.gmra.mxu1 %v1285_v34  ;;  %729 = vmatprep.mubr.bf16.mxu0 %v1288_v36 }
  0x33   : > { %826 = vmatprep.mubr.bf16.mxu1 %v1290_v37 }
  0x39   : > { %730 = vmatmul.mubr.bf16.gmra.mxu0 %v1292_v38 }
  0x3a   : > { %827 = vmatmul.mubr.bf16.gmra.mxu1 %v1293_v39  ;;  %737 = vmatprep.mubr.bf16.mxu0 %v1294_v40 }
  0x3b   : > { %834 = vmatprep.mubr.bf16.mxu1 %v1296_v41 }
  0x41   : > { %738 = vmatmul.mubr.bf16.gmra.mxu0 %v1298_v42 }
  0x42   : > { %835 = vmatmul.mubr.bf16.gmra.mxu1 %v1299_v43  ;;  %745 = vmatprep.mubr.bf16.mxu0 %v1300_v44 }
  0x43   : > { %842 = vmatprep.mubr.bf16.mxu1 %v1302_v45 }
  0x49   : > { %746 = vmatmul.mubr.bf16.gmra.mxu0 %v1304_v46 }
  0x4a   : > { %843 = vmatmul.mubr.bf16.gmra.mxu1 %v1305_v47  ;;  %753 = vmatprep.mubr.bf16.mxu0 %v1306_v48 }
  0x4b   : > { %850 = vmatprep.mubr.bf16.mxu1 %v1308_v49 }
  0x51   : > { %754 = vmatmul.mubr.bf16.gmra.mxu0 %v1310_v50 }
  0x52   : > { %851 = vmatmul.mubr.bf16.gmra.mxu1 %v1311_v51  ;;  %761 = vmatprep.mubr.bf16.mxu0 %v1312_v52 }
  0x53   : > { %858 = vmatprep.mubr.bf16.mxu1 %v1314_v53 }
  0x59   : > { %762 = vmatmul.mubr.bf16.gmra.mxu0 %v1316_v54 }
  0x5a   : > { %859 = vmatmul.mubr.bf16.gmra.mxu1 %v1317_v55  ;;  %769 = vmatprep.mubr.bf16.mxu0 %v1318_v56 }
  0x5b   : > { %866 = vmatprep.mubr.bf16.mxu1 %v1320_v57 }
  0x61   : > { %770 = vmatmul.mubr.bf16.gmra.mxu0 %v1322_v58 }
  0x62   : > { %867 = vmatmul.mubr.bf16.gmra.mxu1 %v1323_v59  ;;  %777 = vmatprep.mubr.bf16.mxu0 %v1324_v60 }
  0x63   : > { %874 = vmatprep.mubr.bf16.mxu1 %v1326_v61 }
  0x69   : > { %778 = vmatmul.mubr.bf16.gmra.mxu0 %v1328_v62 }
  0x6a   : > { %875 = vmatmul.mubr.bf16.gmra.mxu1 %v1329_v63 }
  0xf1   : > { %v1114_v0 = vpop.f32.mrf.mxu0 }
  0xf2   : > { %v1178_v1 = vpop.f32.mrf.mxu1 }
  0xf3   : > { %v1115_v3 = vpop.f32.mrf.mxu0 }
  0xf4   : > { %v1116_v4 = vadd.f32 %v1115_v3, %v1114_v0  ;;  %v1179_v5 = vpop.f32.mrf.mxu1 }
  0xf5   : > { %v1117_v6 = vpop.f32.mrf.mxu0  ;;  %v1180_v8 = vadd.f32 %v1179_v5, %v1178_v1 }
  0xf6   : > { %v724_v7 = vadd.f32 %v1116_v4, %v1476_v2  ;;  %v1181_v9 = vpop.f32.mrf.mxu1 }
  0xf7   : > { %v1118_v10 = vpop.f32.mrf.mxu0 }
  0xf8   : > { %v821_v11 = vadd.f32 %v1180_v8, %v724_v7  ;;  %v1119_v12 = vadd.f32 %v1118_v10, %v1117_v6  ;;  %v1182_v13 = vpop.f32.mrf.mxu1 }
  0xf9   : > { %v1120_v14 = vpop.f32.mrf.mxu0  ;;  %v1183_v17 = vadd.f32 %v1182_v13, %v1181_v9 }
  0xfa   : > { %v883_v15 = vmax.f32 %v821_v11, 0.0  ;;  %v727_v16 = vadd.f32 %v1119_v12, %v1476_v2  ;;  %v1184_v18 = vpop.f32.mrf.mxu1 }
  0xfb   : > { %v1121_v19 = vpop.f32.mrf.mxu0 }
  0xfc   : > { %899 = vst [vmem:[%s1483_s28] sm:$0xff] %v883_v15  ;;  %v824_v20 = vadd.f32 %v1183_v17, %v727_v16  ;;  %v1122_v21 = vadd.f32 %v1121_v19, %v1120_v14  ;;  %v1185_v22 = vpop.f32.mrf.mxu1 }
  0xfd   : > { %v1123_v23 = vpop.f32.mrf.mxu0  ;;  %v1186_v26 = vadd.f32 %v1185_v22, %v1184_v18 }
  0xfe   : > { %v884_v24 = vmax.f32 %v824_v20, 0.0  ;;  %v732_v25 = vadd.f32 %v1122_v21, %v1476_v2  ;;  %v1187_v27 = vpop.f32.mrf.mxu1 }
  0xff   : > { %v1124_v28 = vpop.f32.mrf.mxu0 }
 0x100   : > { %900 = vst [vmem:[%s1483_s28 + $0x8] sm:$0xff] %v884_v24  ;;  %v829_v29 = vadd.f32 %v1186_v26, %v732_v25  ;;  %v1125_v30 = vadd.f32 %v1124_v28, %v1123_v23  ;;  %v1188_v31 = vpop.f32.mrf.mxu1 }
 0x101   : > { %v1126_v32 = vpop.f32.mrf.mxu0  ;;  %v1189_v35 = vadd.f32 %v1188_v31, %v1187_v27 }
 0x102   : > { %v885_v33 = vmax.f32 %v829_v29, 0.0  ;;  %v735_v34 = vadd.f32 %v1125_v30, %v1476_v2  ;;  %v1190_v36 = vpop.f32.mrf.mxu1 }
 0x103   : > { %v1127_v37 = vpop.f32.mrf.mxu0 }
 0x104   : > { %901 = vst [vmem:[%s1483_s28 + $0x10] sm:$0xff] %v885_v33  ;;  %v832_v38 = vadd.f32 %v1189_v35, %v735_v34  ;;  %v1128_v39 = vadd.f32 %v1127_v37, %v1126_v32  ;;  %v1191_v40 = vpop.f32.mrf.mxu1 }
 0x105   : > { %v1129_v41 = vpop.f32.mrf.mxu0  ;;  %v1192_v44 = vadd.f32 %v1191_v40, %v1190_v36 }
 0x106   : > { %v886_v42 = vmax.f32 %v832_v38, 0.0  ;;  %v740_v43 = vadd.f32 %v1128_v39, %v1476_v2  ;;  %v1193_v45 = vpop.f32.mrf.mxu1 }
 0x107   : > { %v1130_v46 = vpop.f32.mrf.mxu0 }
 0x108   : > { %902 = vst [vmem:[%s1483_s28 + $0x18] sm:$0xff] %v886_v42  ;;  %v837_v47 = vadd.f32 %v1192_v44, %v740_v43  ;;  %v1131_v48 = vadd.f32 %v1130_v46, %v1129_v41  ;;  %v1194_v49 = vpop.f32.mrf.mxu1 }
 0x109   : > { %v1132_v50 = vpop.f32.mrf.mxu0  ;;  %v1195_v53 = vadd.f32 %v1194_v49, %v1193_v45 }
 0x10a   : > { %v887_v51 = vmax.f32 %v837_v47, 0.0  ;;  %v743_v52 = vadd.f32 %v1131_v48, %v1476_v2  ;;  %v1196_v54 = vpop.f32.mrf.mxu1 }
 0x10b   : > { %v1133_v55 = vpop.f32.mrf.mxu0 }
 0x10c   : > { %903 = vst [vmem:[%s1483_s28 + $0x20] sm:$0xff] %v887_v51  ;;  %v840_v56 = vadd.f32 %v1195_v53, %v743_v52  ;;  %v1134_v57 = vadd.f32 %v1133_v55, %v1132_v50  ;;  %v1197_v58 = vpop.f32.mrf.mxu1 }
 0x10d   : > { %v1135_v59 = vpop.f32.mrf.mxu0  ;;  %v1198_v62 = vadd.f32 %v1197_v58, %v1196_v54 }
 0x10e   : > { %v888_v60 = vmax.f32 %v840_v56, 0.0  ;;  %v748_v61 = vadd.f32 %v1134_v57, %v1476_v2  ;;  %v1199_v63 = vpop.f32.mrf.mxu1 }
 0x10f   : > { %v1136_v0 = vpop.f32.mrf.mxu0 }
 0x110   : > { %904 = vst [vmem:[%s1483_s28 + $0x28] sm:$0xff] %v888_v60  ;;  %v845_v1 = vadd.f32 %v1198_v62, %v748_v61  ;;  %v1137_v3 = vadd.f32 %v1136_v0, %v1135_v59  ;;  %v1200_v4 = vpop.f32.mrf.mxu1 }
 0x111   : > { %v1138_v5 = vpop.f32.mrf.mxu0  ;;  %v1201_v8 = vadd.f32 %v1200_v4, %v1199_v63 }
 0x112   : > { %v889_v6 = vmax.f32 %v845_v1, 0.0  ;;  %v751_v7 = vadd.f32 %v1137_v3, %v1476_v2  ;;  %v1202_v9 = vpop.f32.mrf.mxu1 }
 0x113   : > { %v1139_v10 = vpop.f32.mrf.mxu0 }
 0x114   : > { %905 = vst [vmem:[%s1483_s28 + $0x30] sm:$0xff] %v889_v6  ;;  %v848_v11 = vadd.f32 %v1201_v8, %v751_v7  ;;  %v1140_v12 = vadd.f32 %v1139_v10, %v1138_v5  ;;  %v1203_v13 = vpop.f32.mrf.mxu1 }
 0x115   : > { %v1141_v14 = vpop.f32.mrf.mxu0  ;;  %v1204_v17 = vadd.f32 %v1203_v13, %v1202_v9 }
 0x116   : > { %v890_v15 = vmax.f32 %v848_v11, 0.0  ;;  %v756_v16 = vadd.f32 %v1140_v12, %v1476_v2  ;;  %v1205_v18 = vpop.f32.mrf.mxu1 }
 0x117   : > { %v1142_v19 = vpop.f32.mrf.mxu0 }
 0x118   : > { %906 = vst [vmem:[%s1483_s28 + $0x38] sm:$0xff] %v890_v15  ;;  %v853_v20 = vadd.f32 %v1204_v17, %v756_v16  ;;  %v1143_v21 = vadd.f32 %v1142_v19, %v1141_v14  ;;  %v1206_v22 = vpop.f32.mrf.mxu1 }
 0x119   : > { %v1144_v23 = vpop.f32.mrf.mxu0  ;;  %v1207_v26 = vadd.f32 %v1206_v22, %v1205_v18 }
 0x11a   : > { %v891_v24 = vmax.f32 %v853_v20, 0.0  ;;  %v759_v25 = vadd.f32 %v1143_v21, %v1476_v2  ;;  %v1208_v27 = vpop.f32.mrf.mxu1 }
 0x11b   : > { %v1145_v28 = vpop.f32.mrf.mxu0 }
 0x11c   : > { %907 = vst [vmem:[%s1483_s28 + $0x40] sm:$0xff] %v891_v24  ;;  %v856_v29 = vadd.f32 %v1207_v26, %v759_v25  ;;  %v1146_v30 = vadd.f32 %v1145_v28, %v1144_v23  ;;  %v1209_v31 = vpop.f32.mrf.mxu1 }
 0x11d   : > { %v1147_v32 = vpop.f32.mrf.mxu0  ;;  %v1210_v35 = vadd.f32 %v1209_v31, %v1208_v27 }
 0x11e   : > { %v892_v33 = vmax.f32 %v856_v29, 0.0  ;;  %v764_v34 = vadd.f32 %v1146_v30, %v1476_v2  ;;  %v1211_v36 = vpop.f32.mrf.mxu1 }
 0x11f   : > { %v1148_v37 = vpop.f32.mrf.mxu0 }
 0x120   : > { %908 = vst [vmem:[%s1483_s28 + $0x48] sm:$0xff] %v892_v33  ;;  %v861_v38 = vadd.f32 %v1210_v35, %v764_v34  ;;  %v1149_v39 = vadd.f32 %v1148_v37, %v1147_v32  ;;  %v1212_v40 = vpop.f32.mrf.mxu1 }
 0x121   : > { %v1150_v41 = vpop.f32.mrf.mxu0  ;;  %v1213_v44 = vadd.f32 %v1212_v40, %v1211_v36 }
 0x122   : > { %v893_v42 = vmax.f32 %v861_v38, 0.0  ;;  %v767_v43 = vadd.f32 %v1149_v39, %v1476_v2  ;;  %v1214_v45 = vpop.f32.mrf.mxu1 }
 0x123   : > { %v1151_v46 = vpop.f32.mrf.mxu0 }
 0x124   : > { %909 = vst [vmem:[%s1483_s28 + $0x50] sm:$0xff] %v893_v42  ;;  %v864_v47 = vadd.f32 %v1213_v44, %v767_v43  ;;  %v1152_v48 = vadd.f32 %v1151_v46, %v1150_v41  ;;  %v1215_v49 = vpop.f32.mrf.mxu1 }
 0x125   : > { %v1153_v50 = vpop.f32.mrf.mxu0  ;;  %v1216_v53 = vadd.f32 %v1215_v49, %v1214_v45 }
 0x126   : > { %v894_v51 = vmax.f32 %v864_v47, 0.0  ;;  %v772_v52 = vadd.f32 %v1152_v48, %v1476_v2  ;;  %v1217_v54 = vpop.f32.mrf.mxu1 }
 0x127   : > { %v1154_v55 = vpop.f32.mrf.mxu0 }
 0x128   : > { %910 = vst [vmem:[%s1483_s28 + $0x58] sm:$0xff] %v894_v51  ;;  %v869_v56 = vadd.f32 %v1216_v53, %v772_v52  ;;  %v1155_v57 = vadd.f32 %v1154_v55, %v1153_v50  ;;  %v1218_v58 = vpop.f32.mrf.mxu1 }
 0x129   : > { %v1156_v59 = vpop.f32.mrf.mxu0  ;;  %v1219_v62 = vadd.f32 %v1218_v58, %v1217_v54 }
 0x12a   : > { %v895_v60 = vmax.f32 %v869_v56, 0.0  ;;  %v775_v61 = vadd.f32 %v1155_v57, %v1476_v2  ;;  %v1220_v63 = vpop.f32.mrf.mxu1 }
 0x12b   : > { %v1157_v0 = vpop.f32.mrf.mxu0 }
 0x12c   : > { %911 = vst [vmem:[%s1483_s28 + $0x60] sm:$0xff] %v895_v60  ;;  %v872_v1 = vadd.f32 %v1219_v62, %v775_v61  ;;  %v1158_v3 = vadd.f32 %v1157_v0, %v1156_v59  ;;  %v1221_v4 = vpop.f32.mrf.mxu1 }
 0x12d   : > { %v1159_v5 = vpop.f32.mrf.mxu0  ;;  %v1222_v8 = vadd.f32 %v1221_v4, %v1220_v63 }
 0x12e   : > { %v896_v6 = vmax.f32 %v872_v1, 0.0  ;;  %v780_v7 = vadd.f32 %v1158_v3, %v1476_v2  ;;  %v1223_v9 = vpop.f32.mrf.mxu1 }
 0x12f   : > { %v1160_v10 = vpop.f32.mrf.mxu0 }
 0x130   : > { %912 = vst [vmem:[%s1483_s28 + $0x68] sm:$0xff] %v896_v6  ;;  %v877_v11 = vadd.f32 %v1222_v8, %v780_v7  ;;  %v1161_v12 = vadd.f32 %v1160_v10, %v1159_v5  ;;  %v1224_v13 = vpop.f32.mrf.mxu1 }
 0x131   : > { %v1225_v16 = vadd.f32 %v1224_v13, %v1223_v9 }
 0x132   : > { %v897_v14 = vmax.f32 %v877_v11, 0.0  ;;  %v783_v15 = vadd.f32 %v1161_v12, %v1476_v2 }
 0x134   : > { %913 = vst [vmem:[%s1483_s28 + $0x70] sm:$0xff] %v897_v14  ;;  %v880_v17 = vadd.f32 %v1225_v16, %v783_v15 }
 0x136   : > { %v898_v18 = vmax.f32 %v880_v17, 0.0 }
 0x138   : > { %914 = vst [vmem:[%s1483_s28 + $0x78] sm:$0xff] %v898_v18 }
 0x139 PF: > { %s13_s14 = sadd.s32 1, %s1352_s14   ;;  %s1529_s12 = smov %s1348_s13 }
 0x13a   : > { %p10_p5 = scmp.ge.s32.totalorder %s13_s14, 6   ;;  %s1530_s13 = smov %s1532_s15 }
 0x13c   :  { %12 = sbr.rel (!%p10_p5) target bundleno = 2 (0x2), region = 65 }

// kernel: _lambda_.12
= control target key start
LH: loop header
LB: loop body
LE: loop exit
PB: predicated region body
PF: predicated region fallthrough
CT: control target
= control target key end

     0   :  { %s4640_s1 = inlined_call_operand.vmem [shape: bf16[1,2048,128], index: 1, kind: input, shape index: {}]   ;;  %s4641_s0 = inlined_call_operand.vmem [shape: bf16[1,128,2048], index: 0, kind: input, shape index: {}]   ;;  %s4642_s2 = inlined_call_operand.vmem [shape: f32[1,128], index: 2, kind: input, shape index: {}]   ;;  %s4643_s3 = inlined_call_operand.vmem [shape: f32[1,128,128], index: 3, kind: output, shape index: {}]  }
   0x1   :  { %v3379_v0 = vld [vmem:[%s4640_s1 + $0x78] sm:$0xff]   ;;  %v3383_v4 = vld [vmem:[%s4640_s1 + $0x70] sm:$0xff]   ;;  %v3387_v8 = vld [vmem:[%s4640_s1 + $0x68] sm:$0xff]  }
   0x2   :  { %v3380_v1 = vld [vmem:[%s4640_s1 + $0xf8] sm:$0xff]   ;;  %2867 = vmatprep.subr.bf16.mxu0 %v3379_v0  ;;  %v3384_v5 = vld [vmem:[%s4640_s1 + $0xf0] sm:$0xff]   ;;  %v3388_v9 = vld [vmem:[%s4640_s1 + $0xe8] sm:$0xff]  }
   0x3   :  { %v3381_v2 = vld [vmem:[%s4640_s1 + $0x38] sm:$0xff]   ;;  %2931 = vmatprep.subr.bf16.mxu1 %v3380_v1  ;;  %v3385_v6 = vld [vmem:[%s4640_s1 + $0x30] sm:$0xff]   ;;  %v3389_v10 = vld [vmem:[%s4640_s1 + $0x28] sm:$0xff]  }
   0x4   :  { %v3382_v3 = vld [vmem:[%s4640_s1 + $0xb8] sm:$0xff]   ;;  %2868 = vmatpush3.bf16.msra.mxu0 %v3381_v2  ;;  %v3386_v7 = vld [vmem:[%s4640_s1 + $0xb0] sm:$0xff]   ;;  %v3390_v11 = vld [vmem:[%s4640_s1 + $0xa8] sm:$0xff]  }
   0x5   :  { %2932 = vmatpush3.bf16.msra.mxu1 %v3382_v3  ;;  %2869 = vmatprep.subr.bf16.mxu0 %v3383_v4  ;;  %v3391_v12 = vld [vmem:[%s4640_s1 + $0x60] sm:$0xff]   ;;  %v3395_v16 = vld [vmem:[%s4640_s1 + $0x58] sm:$0xff]   ;;  %v3399_v20 = vld [vmem:[%s4640_s1 + $0x50] sm:$0xff]  }
   0x6   :  { %2933 = vmatprep.subr.bf16.mxu1 %v3384_v5  ;;  %v3392_v13 = vld [vmem:[%s4640_s1 + $0xe0] sm:$0xff]   ;;  %v3396_v17 = vld [vmem:[%s4640_s1 + $0xd8] sm:$0xff]   ;;  %v3400_v21 = vld [vmem:[%s4640_s1 + $0xd0] sm:$0xff]  }
   0x7   :  { %v3393_v14 = vld [vmem:[%s4640_s1 + $0x20] sm:$0xff]   ;;  %v3397_v18 = vld [vmem:[%s4640_s1 + $0x18] sm:$0xff]   ;;  %v3401_v22 = vld [vmem:[%s4640_s1 + $0x10] sm:$0xff]  }
   0x8   :  { %2870 = vmatpush3.bf16.msra.mxu0 %v3385_v6  ;;  %v3394_v15 = vld [vmem:[%s4640_s1 + $0xa0] sm:$0xff]   ;;  %v3398_v19 = vld [vmem:[%s4640_s1 + $0x98] sm:$0xff]   ;;  %v3402_v23 = vld [vmem:[%s4640_s1 + $0x90] sm:$0xff]  }
   0x9   :  { %2934 = vmatpush3.bf16.msra.mxu1 %v3386_v7  ;;  %2871 = vmatprep.subr.bf16.mxu0 %v3387_v8  ;;  %v3403_v24 = vld [vmem:[%s4640_s1 + $0x48] sm:$0xff]   ;;  %v3407_v28 = vld [vmem:[%s4640_s1 + $0x40] sm:$0xff]   ;;  %v3411_v40 = vld [vmem:[%s4640_s1 + $0x178] sm:$0xff]  }
   0xa   :  { %2935 = vmatprep.subr.bf16.mxu1 %v3388_v9  ;;  %v3404_v25 = vld [vmem:[%s4640_s1 + $0xc8] sm:$0xff]   ;;  %v3408_v29 = vld [vmem:[%s4640_s1 + $0xc0] sm:$0xff]   ;;  %v3412_v41 = vld [vmem:[%s4640_s1 + $0x138] sm:$0xff]  }
   0xb   :  { %v3405_v26 = vld [vmem:[%s4640_s1 + $0x8] sm:$0xff]   ;;  %v3409_v30 = vld [vmem:[%s4640_s1] sm:$0xff]   ;;  %v3413_v42 = vld [vmem:[%s4640_s1 + $0x1f8] sm:$0xff]  }
   0xc   :  { %2872 = vmatpush3.bf16.msra.mxu0 %v3389_v10  ;;  %v3406_v27 = vld [vmem:[%s4640_s1 + $0x88] sm:$0xff]   ;;  %v3410_v31 = vld [vmem:[%s4640_s1 + $0x80] sm:$0xff]   ;;  %v3414_v43 = vld [vmem:[%s4640_s1 + $0x1b8] sm:$0xff]  }
   0xd   :  { %2936 = vmatpush3.bf16.msra.mxu1 %v3390_v11  ;;  %2873 = vmatprep.subr.bf16.mxu0 %v3391_v12  ;;  %v15_v32 = vld [vmem:[%s4641_s0] sm:$0xff]  ;;  %v16_v34 = vld [vmem:[%s4641_s0 + $0x8] sm:$0xff]  ;;  %v3415_v50 = vld [vmem:[%s4640_s1 + $0x170] sm:$0xff]  }
   0xe   :  { %2937 = vmatprep.subr.bf16.mxu1 %v3392_v13  ;;  %v23_v33 = vld [vmem:[%s4641_s0 + $0x40] sm:$0xff]  ;;  %v24_v37 = vld [vmem:[%s4641_s0 + $0x48] sm:$0xff]  ;;  %v3416_v52 = vld [vmem:[%s4640_s1 + $0x130] sm:$0xff]  }
   0xf   :  { %v2611_v35 = vcombine.low %v15_v32, %v23_v33  ;;  %v2612_v36 = vcombine.high %v15_v32, %v23_v33  ;;  %v2613_v38 = vcombine.low %v16_v34, %v24_v37  ;;  %v2614_v39 = vcombine.high %v16_v34, %v24_v37  ;;  %v31_v44 = vld [vmem:[%s4641_s0 + $0x80] sm:$0xff]  ;;  %v32_v47 = vld [vmem:[%s4641_s0 + $0x88] sm:$0xff]  ;;  %v3417_v54 = vld [vmem:[%s4640_s1 + $0x1f0] sm:$0xff]  }
  0x10   :  { %2874 = vmatpush3.bf16.msra.mxu0 %v3393_v14  ;;  %v39_v45 = vld [vmem:[%s4641_s0 + $0xc0] sm:$0xff]  ;;  %v40_v48 = vld [vmem:[%s4641_s0 + $0xc8] sm:$0xff]  ;;  %v3418_v55 = vld [vmem:[%s4640_s1 + $0x1b0] sm:$0xff]  }
  0x11   :  { %2938 = vmatpush3.bf16.msra.mxu1 %v3394_v15  ;;  %2875 = vmatprep.subr.bf16.mxu0 %v3395_v16  ;;  %v2628_v46 = vcombine.high %v31_v44, %v39_v45  ;;  %v2630_v49 = vcombine.high %v32_v47, %v40_v48  ;;  %v2627_v51 = vcombine.low %v31_v44, %v39_v45  ;;  %v47_v56 = vld [vmem:[%s4641_s0 + $0x100] sm:$0xff]  ;;  %v48_v58 = vld [vmem:[%s4641_s0 + $0x108] sm:$0xff]  ;;  %v3433_v32 = vld [vmem:[%s4640_s1 + $0x1d0] sm:$0xff]  }
  0x12   :  { %2939 = vmatprep.subr.bf16.mxu1 %v3396_v17  ;;  %1846 = vmatprep.mubr.bf16.mxu0 %v2612_v36  ;;  %v2629_v53 = vcombine.low %v32_v47, %v40_v48  ;;  %v55_v57 = vld [vmem:[%s4641_s0 + $0x140] sm:$0xff]  ;;  %v56_v59 = vld [vmem:[%s4641_s0 + $0x148] sm:$0xff]  ;;  %v3434_v33 = vld [vmem:[%s4640_s1 + $0x190] sm:$0xff]  }
  0x13   :  { %1943 = vmatprep.mubr.bf16.mxu1 %v2614_v39  ;;  %v2644_v60 = vcombine.high %v47_v56, %v55_v57  ;;  %v2646_v61 = vcombine.high %v48_v58, %v56_v59  ;;  %v3419_v62 = vld [vmem:[%s4640_s1 + $0x168] sm:$0xff]   ;;  %v2643_v2 = vcombine.low %v47_v56, %v55_v57  ;;  %v63_v3 = vld [vmem:[%s4641_s0 + $0x180] sm:$0xff]  ;;  %v2645_v6 = vcombine.low %v48_v58, %v56_v59  ;;  %v3443_v56 = vld [vmem:[%s4640_s1 + $0x278] sm:$0xff]  }
  0x14   :  { %2876 = vmatpush3.bf16.msra.mxu0 %v3397_v18  ;;  %v3420_v63 = vld [vmem:[%s4640_s1 + $0x128] sm:$0xff]   ;;  %v71_v4 = vld [vmem:[%s4641_s0 + $0x1c0] sm:$0xff]  ;;  %v3427_v18 = vld [vmem:[%s4640_s1 + $0x158] sm:$0xff]  }
  0x15   :  { %2940 = vmatpush3.bf16.msra.mxu1 %v3398_v19  ;;  %2877 = vmatprep.subr.bf16.mxu0 %v3399_v20  ;;  %v3421_v0 = vld [vmem:[%s4640_s1 + $0x1e8] sm:$0xff]   ;;  %v2660_v7 = vcombine.high %v63_v3, %v71_v4  ;;  %v3423_v10 = vld [vmem:[%s4640_s1 + $0x160] sm:$0xff]   ;;  %v2659_v19 = vcombine.low %v63_v3, %v71_v4  ;;  %v3428_v20 = vld [vmem:[%s4640_s1 + $0x118] sm:$0xff]  }
  0x16   :  { %2941 = vmatprep.subr.bf16.mxu1 %v3400_v21  ;;  %v3422_v1 = vld [vmem:[%s4640_s1 + $0x1a8] sm:$0xff]   ;;  %v3424_v11 = vld [vmem:[%s4640_s1 + $0x120] sm:$0xff]   ;;  %v3445_v58 = vld [vmem:[%s4640_s1 + $0x2f8] sm:$0xff]  }
  0x17   :  { %v64_v5 = vld [vmem:[%s4641_s0 + $0x188] sm:$0xff]  ;;  %v3425_v12 = vld [vmem:[%s4640_s1 + $0x1e0] sm:$0xff]   ;;  %v26_v3 = vld [vmem:[%s4641_s0 + $0x58] sm:$0xff] }
  0x18   :  { %2878 = vmatpush3.bf16.msra.mxu0 %v3401_v22  ;;  %v72_v8 = vld [vmem:[%s4641_s0 + $0x1c8] sm:$0xff]  ;;  %v3426_v13 = vld [vmem:[%s4640_s1 + $0x1a0] sm:$0xff]  }
  0x19   :  { %2942 = vmatpush3.bf16.msra.mxu1 %v3402_v23  ;;  %2879 = vmatprep.subr.bf16.mxu0 %v3403_v24  ;;  %v2662_v9 = vcombine.high %v64_v5, %v72_v8  ;;  %v79_v14 = vld [vmem:[%s4641_s0 + $0x200] sm:$0xff]  ;;  %v80_v16 = vld [vmem:[%s4641_s0 + $0x208] sm:$0xff]  ;;  %v2661_v21 = vcombine.low %v64_v5, %v72_v8  ;;  %v3429_v23 = vld [vmem:[%s4640_s1 + $0x1d8] sm:$0xff]  }
  0x1a   :  { %2943 = vmatprep.subr.bf16.mxu1 %v3404_v25  ;;  %v87_v15 = vld [vmem:[%s4641_s0 + $0x240] sm:$0xff]  ;;  %v88_v17 = vld [vmem:[%s4641_s0 + $0x248] sm:$0xff]  ;;  %v3430_v25 = vld [vmem:[%s4640_s1 + $0x198] sm:$0xff]  }
  0x1b   :  { %v2676_v22 = vcombine.high %v79_v14, %v87_v15  ;;  %v2678_v24 = vcombine.high %v80_v16, %v88_v17  ;;  %v2675_v34 = vcombine.low %v79_v14, %v87_v15  ;;  %v3436_v39 = vld [vmem:[%s4640_s1 + $0x108] sm:$0xff]   ;;  %v3440_v48 = vld [vmem:[%s4640_s1 + $0x100] sm:$0xff]   ;;  %v33_v8 = vld [vmem:[%s4641_s0 + $0x90] sm:$0xff] }
  0x1c   :  { %2880 = vmatpush3.bf16.msra.mxu0 %v3405_v26  ;;  %v95_v26 = vld [vmem:[%s4641_s0 + $0x280] sm:$0xff]  ;;  %v112_v44 = vld [vmem:[%s4641_s0 + $0x308] sm:$0xff]  ;;  %v3446_v15 = vld [vmem:[%s4640_s1 + $0x2b8] sm:$0xff]  }
  0x1d   :  { %2944 = vmatpush3.bf16.msra.mxu1 %v3406_v27  ;;  %2881 = vmatprep.subr.bf16.mxu0 %v3407_v28  ;;  %v103_v27 = vld [vmem:[%s4641_s0 + $0x2c0] sm:$0xff]  ;;  %v3431_v28 = vld [vmem:[%s4640_s1 + $0x150] sm:$0xff]   ;;  %v120_v45 = vld [vmem:[%s4641_s0 + $0x348] sm:$0xff] }
  0x1e   :  { %2945 = vmatprep.subr.bf16.mxu1 %v3408_v29  ;;  %v96_v29 = vld [vmem:[%s4641_s0 + $0x288] sm:$0xff]  ;;  %v2692_v36 = vcombine.high %v95_v26, %v103_v27  ;;  %v2691_v47 = vcombine.low %v95_v26, %v103_v27 }
  0x1f   :  { %v128_v57 = vld [vmem:[%s4641_s0 + $0x388] sm:$0xff] }
  0x20   :  { %2882 = vmatpush3.bf16.msra.mxu0 %v3409_v30  ;;  %v104_v30 = vld [vmem:[%s4641_s0 + $0x2c8] sm:$0xff] }
  0x21   :  { %2946 = vmatpush3.bf16.msra.mxu1 %v3410_v31  ;;  %2995 = vmatprep.subr.bf16.mxu0 %v3411_v40  ;;  %v3432_v31 = vld [vmem:[%s4640_s1 + $0x110] sm:$0xff]   ;;  %v2694_v37 = vcombine.high %v96_v29, %v104_v30  ;;  %v3437_v40 = vld [vmem:[%s4640_s1 + $0x1c8] sm:$0xff]  }
  0x22   :  { %3059 = vmatprep.subr.bf16.mxu1 %v3413_v42  ;;  %v119_v42 = vld [vmem:[%s4641_s0 + $0x340] sm:$0xff]  ;;  %v136_v59 = vld [vmem:[%s4641_s0 + $0x3c8] sm:$0xff] }
  0x23   :  { %1847 = vmatmul.mubr.bf16.vlgmr.msra.gmra.mxu0 %v2611_v35  ;;  %v2677_v35 = vcombine.low %v80_v16, %v88_v17  ;;  %v2725_v5 = vcombine.low %v128_v57, %v136_v59  ;;  %v3447_v17 = vld [vmem:[%s4640_s1 + $0x270] sm:$0xff]   ;;  %v3451_v26 = vld [vmem:[%s4640_s1 + $0x268] sm:$0xff]  }
  0x24   :  { %1944 = vmatmul.mubr.bf16.vlgmr.msra.gmra.mxu1 %v2613_v38  ;;  %2996 = vmatpush3.bf16.msra.mxu0 %v3412_v41  ;;  %v3435_v38 = vld [vmem:[%s4640_s1 + $0x148] sm:$0xff]   ;;  %v111_v41 = vld [vmem:[%s4641_s0 + $0x300] sm:$0xff] }
  0x25   :  { %3060 = vmatpush3.bf16.msra.mxu1 %v3414_v43  ;;  %1854 = vmatprep.mubr.bf16.mxu0 %v2628_v46  ;;  %v3438_v43 = vld [vmem:[%s4640_s1 + $0x188] sm:$0xff]   ;;  %v3439_v46 = vld [vmem:[%s4640_s1 + $0x140] sm:$0xff]  }
  0x26   :  { %1951 = vmatprep.mubr.bf16.mxu1 %v2630_v49  ;;  %2997 = vmatprep.subr.bf16.mxu0 %v3415_v50  ;;  %v2693_v49 = vcombine.low %v96_v29, %v104_v30  ;;  %v2708_v50 = vcombine.high %v111_v41, %v119_v42  ;;  %v3453_v27 = vld [vmem:[%s4640_s1 + $0x2e8] sm:$0xff]  }
  0x27   :  { %3061 = vmatprep.subr.bf16.mxu1 %v3417_v54  ;;  %v127_v54 = vld [vmem:[%s4641_s0 + $0x380] sm:$0xff] }
  0x28   :  { %2998 = vmatpush3.bf16.msra.mxu0 %v3416_v52  ;;  %v2710_v52 = vcombine.high %v112_v44, %v120_v45 }
  0x29   :  { %3062 = vmatpush3.bf16.msra.mxu1 %v3418_v55  ;;  %2999 = vmatprep.subr.bf16.mxu0 %v3419_v62  ;;  %v135_v55 = vld [vmem:[%s4641_s0 + $0x3c0] sm:$0xff] }
  0x2a   :  { %3063 = vmatprep.subr.bf16.mxu1 %v3421_v0  ;;  %v2724_v62 = vcombine.high %v127_v54, %v135_v55  ;;  %v17_v0 = vld [vmem:[%s4641_s0 + $0x10] sm:$0xff]  ;;  %v2723_v4 = vcombine.low %v127_v54, %v135_v55  ;;  %v82_v54 = vld [vmem:[%s4641_s0 + $0x218] sm:$0xff] }
  0x2b   :  { %1855 = vmatmul.mubr.bf16.gmra.mxu0 %v2627_v51  ;;  %v3441_v51 = vld [vmem:[%s4640_s1 + $0x1c0] sm:$0xff]   ;;  %v90_v55 = vld [vmem:[%s4641_s0 + $0x258] sm:$0xff] }
  0x2c   :  { %1952 = vmatmul.mubr.bf16.gmra.mxu1 %v2629_v53  ;;  %1862 = vmatprep.mubr.bf16.mxu0 %v2644_v60  ;;  %v3442_v53 = vld [vmem:[%s4640_s1 + $0x180] sm:$0xff]   ;;  %v2707_v60 = vcombine.low %v111_v41, %v119_v42  ;;  %v3459_v42 = vld [vmem:[%s4640_s1 + $0x258] sm:$0xff]  }
  0x2d   :  { %1959 = vmatprep.mubr.bf16.mxu1 %v2646_v61  ;;  %3000 = vmatpush3.bf16.msra.mxu0 %v3420_v63  ;;  %v2709_v61 = vcombine.low %v112_v44, %v120_v45  ;;  %v2726_v63 = vcombine.high %v128_v57, %v136_v59  ;;  %v3458_v41 = vld [vmem:[%s4640_s1 + $0x2a0] sm:$0xff]   ;;  %v3461_v44 = vld [vmem:[%s4640_s1 + $0x2d8] sm:$0xff]   ;;  %v3466_v57 = vld [vmem:[%s4640_s1 + $0x290] sm:$0xff]  }
  0x2e   :  { %3064 = vmatpush3.bf16.msra.mxu1 %v3422_v1  ;;  %3001 = vmatprep.subr.bf16.mxu0 %v3423_v10  ;;  %v25_v1 = vld [vmem:[%s4641_s0 + $0x50] sm:$0xff] }
  0x2f   :  { %3065 = vmatprep.subr.bf16.mxu1 %v3425_v12  ;;  %v2615_v10 = vcombine.low %v17_v0, %v25_v1  ;;  %v34_v12 = vld [vmem:[%s4641_s0 + $0x98] sm:$0xff] }
  0x31   :  { %3002 = vmatpush3.bf16.msra.mxu0 %v3424_v11  ;;  %v3444_v11 = vld [vmem:[%s4640_s1 + $0x238] sm:$0xff]  }
  0x32   :  { %3066 = vmatpush3.bf16.msra.mxu1 %v3426_v13  ;;  %3003 = vmatprep.subr.bf16.mxu0 %v3427_v18  ;;  %v42_v13 = vld [vmem:[%s4641_s0 + $0xd8] sm:$0xff] }
  0x33   :  { %1863 = vmatmul.mubr.bf16.gmra.mxu0 %v2643_v2  ;;  %3067 = vmatprep.subr.bf16.mxu1 %v3429_v23  ;;  %v18_v2 = vld [vmem:[%s4641_s0 + $0x18] sm:$0xff]  ;;  %v2634_v18 = vcombine.high %v34_v12, %v42_v13  ;;  %v57_v23 = vld [vmem:[%s4641_s0 + $0x150] sm:$0xff]  ;;  %v2633_v29 = vcombine.low %v34_v12, %v42_v13  ;;  %v2681_v13 = vcombine.low %v82_v54, %v90_v55 }
  0x34   :  { %1960 = vmatmul.mubr.bf16.gmra.mxu1 %v2645_v6  ;;  %1870 = vmatprep.mubr.bf16.mxu0 %v2660_v7  ;;  %v2616_v6 = vcombine.high %v17_v0, %v25_v1  ;;  %v2618_v7 = vcombine.high %v18_v2, %v26_v3  ;;  %v2617_v14 = vcombine.low %v18_v2, %v26_v3  ;;  %v3468_v0 = vld [vmem:[%s4640_s1 + $0x208] sm:$0xff]   ;;  %v3471_v2 = vld [vmem:[%s4640_s1 + $0x240] sm:$0xff]   ;;  %v97_v3 = vld [vmem:[%s4641_s0 + $0x290] sm:$0xff] }
  0x35   :  { %1967 = vmatprep.mubr.bf16.mxu1 %v2662_v9  ;;  %3004 = vmatpush3.bf16.msra.mxu0 %v3428_v20  ;;  %v41_v9 = vld [vmem:[%s4641_s0 + $0xd0] sm:$0xff]  ;;  %v3470_v1 = vld [vmem:[%s4640_s1 + $0x288] sm:$0xff]   ;;  %v3477_v12 = vld [vmem:[%s4640_s1 + $0x3f8] sm:$0xff]  }
  0x36   :  { %3068 = vmatpush3.bf16.msra.mxu1 %v3430_v25  ;;  %3005 = vmatprep.subr.bf16.mxu0 %v3431_v28  ;;  %v2632_v16 = vcombine.high %v33_v8, %v41_v9  ;;  %v3449_v20 = vld [vmem:[%s4640_s1 + $0x2f0] sm:$0xff]   ;;  %v58_v25 = vld [vmem:[%s4641_s0 + $0x158] sm:$0xff]  ;;  %v2631_v28 = vcombine.low %v33_v8, %v41_v9  ;;  %v3472_v8 = vld [vmem:[%s4640_s1 + $0x200] sm:$0xff]  }
  0x37   :  { %3069 = vmatprep.subr.bf16.mxu1 %v3433_v32  ;;  %v3452_v32 = vld [vmem:[%s4640_s1 + $0x228] sm:$0xff]   ;;  %v3474_v9 = vld [vmem:[%s4640_s1 + $0x280] sm:$0xff]  }
  0x39   :  { %3006 = vmatpush3.bf16.msra.mxu0 %v3432_v31 }
  0x3a   :  { %3070 = vmatpush3.bf16.msra.mxu1 %v3434_v33  ;;  %3007 = vmatprep.subr.bf16.mxu0 %v3435_v38  ;;  %v3454_v33 = vld [vmem:[%s4640_s1 + $0x2a8] sm:$0xff]   ;;  %v66_v38 = vld [vmem:[%s4641_s0 + $0x198] sm:$0xff] }
  0x3b   :  { %1871 = vmatmul.mubr.bf16.gmra.mxu0 %v2659_v19  ;;  %3071 = vmatprep.subr.bf16.mxu1 %v3437_v40  ;;  %v3448_v19 = vld [vmem:[%s4640_s1 + $0x230] sm:$0xff]   ;;  %v3456_v40 = vld [vmem:[%s4640_s1 + $0x220] sm:$0xff]  }
  0x3c   :  { %1968 = vmatmul.mubr.bf16.gmra.mxu1 %v2661_v21  ;;  %1878 = vmatprep.mubr.bf16.mxu0 %v2676_v22  ;;  %v3450_v21 = vld [vmem:[%s4640_s1 + $0x2b0] sm:$0xff]  }
  0x3d   :  { %1975 = vmatprep.mubr.bf16.mxu1 %v2678_v24  ;;  %3008 = vmatpush3.bf16.msra.mxu0 %v3436_v39  ;;  %v49_v22 = vld [vmem:[%s4641_s0 + $0x110] sm:$0xff]  ;;  %v50_v24 = vld [vmem:[%s4641_s0 + $0x118] sm:$0xff] }
  0x3e   :  { %3072 = vmatpush3.bf16.msra.mxu1 %v3438_v43  ;;  %3009 = vmatprep.subr.bf16.mxu0 %v3439_v46  ;;  %v2648_v30 = vcombine.high %v49_v22, %v57_v23  ;;  %v2650_v31 = vcombine.high %v50_v24, %v58_v25  ;;  %v74_v39 = vld [vmem:[%s4641_s0 + $0x1d8] sm:$0xff]  ;;  %v2647_v43 = vcombine.low %v49_v22, %v57_v23 }
  0x3f   :  { %3073 = vmatprep.subr.bf16.mxu1 %v3441_v51  ;;  %v2649_v45 = vcombine.low %v50_v24, %v58_v25  ;;  %v81_v51 = vld [vmem:[%s4641_s0 + $0x210] sm:$0xff] }
  0x40   :  { %v129_v24 = vld [vmem:[%s4641_s0 + $0x390] sm:$0xff] }
  0x41   :  { %3010 = vmatpush3.bf16.msra.mxu0 %v3440_v48  ;;  %v2666_v48 = vcombine.high %v66_v38, %v74_v39  ;;  %v137_v25 = vld [vmem:[%s4641_s0 + $0x3d0] sm:$0xff] }
  0x42   :  { %3074 = vmatpush3.bf16.msra.mxu1 %v3442_v53  ;;  %3123 = vmatprep.subr.bf16.mxu0 %v3443_v56  ;;  %v89_v53 = vld [vmem:[%s4641_s0 + $0x250] sm:$0xff] }
  0x43   :  { %1879 = vmatmul.mubr.bf16.gmra.mxu0 %v2675_v34  ;;  %3187 = vmatprep.subr.bf16.mxu1 %v3445_v58  ;;  %v3455_v34 = vld [vmem:[%s4640_s1 + $0x260] sm:$0xff]   ;;  %v3464_v56 = vld [vmem:[%s4640_s1 + $0x210] sm:$0xff]   ;;  %v3467_v58 = vld [vmem:[%s4640_s1 + $0x248] sm:$0xff]  }
  0x44   :  { %1976 = vmatmul.mubr.bf16.gmra.mxu1 %v2677_v35  ;;  %1886 = vmatprep.mubr.bf16.mxu0 %v2692_v36  ;;  %v65_v35 = vld [vmem:[%s4641_s0 + $0x190] sm:$0xff] }
  0x45   :  { %1983 = vmatprep.mubr.bf16.mxu1 %v2694_v37  ;;  %v73_v36 = vld [vmem:[%s4641_s0 + $0x1d0] sm:$0xff]  ;;  %v3457_v37 = vld [vmem:[%s4640_s1 + $0x2e0] sm:$0xff]  }
  0x46   :  { %v2664_v46 = vcombine.high %v65_v35, %v73_v36  ;;  %v2663_v59 = vcombine.low %v65_v35, %v73_v36  ;;  %v28_v35 = vld [vmem:[%s4641_s0 + $0x68] sm:$0xff]  ;;  %v2727_v36 = vcombine.low %v129_v24, %v137_v25 }
  0x4b   :  { %1887 = vmatmul.mubr.bf16.gmra.mxu0 %v2691_v47  ;;  %v3460_v47 = vld [vmem:[%s4640_s1 + $0x218] sm:$0xff]  }
  0x4c   :  { %1984 = vmatmul.mubr.bf16.gmra.mxu1 %v2693_v49  ;;  %1894 = vmatprep.mubr.bf16.mxu0 %v2708_v50  ;;  %v3462_v49 = vld [vmem:[%s4640_s1 + $0x298] sm:$0xff]   ;;  %v3463_v50 = vld [vmem:[%s4640_s1 + $0x250] sm:$0xff]  }
  0x4d   :  { %1991 = vmatprep.mubr.bf16.mxu1 %v2710_v52  ;;  %v3465_v52 = vld [vmem:[%s4640_s1 + $0x2d0] sm:$0xff]  }
  0x53   :  { %1895 = vmatmul.mubr.bf16.gmra.mxu0 %v2707_v60  ;;  %v3469_v60 = vld [vmem:[%s4640_s1 + $0x2c8] sm:$0xff]  }
  0x54   :  { %1992 = vmatmul.mubr.bf16.gmra.mxu1 %v2709_v61  ;;  %1902 = vmatprep.mubr.bf16.mxu0 %v2724_v62  ;;  %v2665_v61 = vcombine.low %v66_v38, %v74_v39  ;;  %v2680_v62 = vcombine.high %v81_v51, %v89_v53 }
  0x55   :  { %1999 = vmatprep.mubr.bf16.mxu1 %v2726_v63  ;;  %v2682_v63 = vcombine.high %v82_v54, %v90_v55  ;;  %v51_v54 = vld [vmem:[%s4641_s0 + $0x120] sm:$0xff] }
  0x56   :  { %v59_v55 = vld [vmem:[%s4641_s0 + $0x160] sm:$0xff] }
  0x5b   :  { %1903 = vmatmul.mubr.bf16.gmra.mxu0 %v2723_v4  ;;  %v105_v4 = vld [vmem:[%s4641_s0 + $0x2d0] sm:$0xff] }
  0x5c   :  { %2000 = vmatmul.mubr.bf16.gmra.mxu1 %v2725_v5  ;;  %2040 = vmatprep.mubr.bf16.mxu0 %v2616_v6  ;;  %v3473_v5 = vld [vmem:[%s4640_s1 + $0x2c0] sm:$0xff]   ;;  %v98_v6 = vld [vmem:[%s4641_s0 + $0x298] sm:$0xff] }
  0x5d   :  { %2137 = vmatprep.mubr.bf16.mxu1 %v2618_v7  ;;  %v106_v7 = vld [vmem:[%s4641_s0 + $0x2d8] sm:$0xff] }
  0x63   :  { %2041 = vmatmul.mubr.bf16.vlgmr.msra.gmra.mxu0 %v2615_v10  ;;  %v3475_v10 = vld [vmem:[%s4640_s1 + $0x378] sm:$0xff]  }
  0x64   :  { %2138 = vmatmul.mubr.bf16.vlgmr.msra.gmra.mxu1 %v2617_v14  ;;  %3124 = vmatpush3.bf16.msra.mxu0 %v3444_v11  ;;  %v2679_v11 = vcombine.low %v81_v51, %v89_v53  ;;  %v2696_v14 = vcombine.high %v97_v3, %v105_v4  ;;  %v3481_v51 = vld [vmem:[%s4640_s1 + $0x3f0] sm:$0xff]  }
  0x65   :  { %3188 = vmatpush3.bf16.msra.mxu1 %v3446_v15  ;;  %2048 = vmatprep.mubr.bf16.mxu0 %v2632_v16  ;;  %v2698_v15 = vcombine.high %v98_v6, %v106_v7  ;;  %v113_v16 = vld [vmem:[%s4641_s0 + $0x310] sm:$0xff] }
  0x66   :  { %2145 = vmatprep.mubr.bf16.mxu1 %v2634_v18  ;;  %3125 = vmatprep.subr.bf16.mxu0 %v3447_v17  ;;  %v121_v17 = vld [vmem:[%s4641_s0 + $0x350] sm:$0xff]  ;;  %v114_v18 = vld [vmem:[%s4641_s0 + $0x318] sm:$0xff] }
  0x67   :  { %3189 = vmatprep.subr.bf16.mxu1 %v3449_v20  ;;  %v2695_v20 = vcombine.low %v97_v3, %v105_v4  ;;  %v2712_v22 = vcombine.high %v113_v16, %v121_v17  ;;  %v3482_v53 = vld [vmem:[%s4640_s1 + $0x3b0] sm:$0xff]   ;;  %v3489_v3 = vld [vmem:[%s4640_s1 + $0x3e0] sm:$0xff]  }
  0x68   :  { %3126 = vmatpush3.bf16.msra.mxu0 %v3448_v19  ;;  %v122_v19 = vld [vmem:[%s4641_s0 + $0x358] sm:$0xff]  ;;  %v67_v4 = vld [vmem:[%s4641_s0 + $0x1a0] sm:$0xff] }
  0x69   :  { %3190 = vmatpush3.bf16.msra.mxu1 %v3450_v21  ;;  %3127 = vmatprep.subr.bf16.mxu0 %v3451_v26  ;;  %v2697_v21 = vcombine.low %v98_v6, %v106_v7  ;;  %v2714_v23 = vcombine.high %v114_v18, %v122_v19  ;;  %v130_v26 = vld [vmem:[%s4641_s0 + $0x398] sm:$0xff]  ;;  %v68_v6 = vld [vmem:[%s4641_s0 + $0x1a8] sm:$0xff]  ;;  %v3488_v7 = vld [vmem:[%s4640_s1 + $0x320] sm:$0xff]  }
  0x6a   :  { %3191 = vmatprep.subr.bf16.mxu1 %v3453_v27  ;;  %v138_v27 = vld [vmem:[%s4641_s0 + $0x3d8] sm:$0xff] }
  0x6b   :  { %2049 = vmatmul.mubr.bf16.gmra.mxu0 %v2631_v28  ;;  %v2711_v28 = vcombine.low %v113_v16, %v121_v17  ;;  %v3492_v16 = vld [vmem:[%s4640_s1 + $0x318] sm:$0xff]  }
  0x6c   :  { %2146 = vmatmul.mubr.bf16.gmra.mxu1 %v2633_v29  ;;  %2056 = vmatprep.mubr.bf16.mxu0 %v2648_v30  ;;  %v2713_v29 = vcombine.low %v114_v18, %v122_v19  ;;  %v2728_v30 = vcombine.high %v129_v24, %v137_v25  ;;  %v3494_v17 = vld [vmem:[%s4640_s1 + $0x398] sm:$0xff]   ;;  %v3495_v18 = vld [vmem:[%s4640_s1 + $0x350] sm:$0xff]   ;;  %v92_v24 = vld [vmem:[%s4641_s0 + $0x268] sm:$0xff] }
  0x6d   :  { %2153 = vmatprep.mubr.bf16.mxu1 %v2650_v31  ;;  %3128 = vmatpush3.bf16.msra.mxu0 %v3452_v32  ;;  %v2730_v31 = vcombine.high %v130_v26, %v138_v27  ;;  %v19_v32 = vld [vmem:[%s4641_s0 + $0x20] sm:$0xff]  ;;  %v3497_v19 = vld [vmem:[%s4640_s1 + $0x3d0] sm:$0xff]  }
  0x6e   :  { %3192 = vmatpush3.bf16.msra.mxu1 %v3454_v33  ;;  %3129 = vmatprep.subr.bf16.mxu0 %v3455_v34  ;;  %v27_v33 = vld [vmem:[%s4641_s0 + $0x60] sm:$0xff]  ;;  %v20_v34 = vld [vmem:[%s4641_s0 + $0x28] sm:$0xff]  ;;  %v3498_v25 = vld [vmem:[%s4640_s1 + $0x390] sm:$0xff]  }
  0x6f   :  { %3193 = vmatprep.subr.bf16.mxu1 %v3457_v37  ;;  %v2729_v37 = vcombine.low %v130_v26, %v138_v27  ;;  %v2620_v38 = vcombine.high %v19_v32, %v27_v33  ;;  %v2622_v39 = vcombine.high %v20_v34, %v28_v35  ;;  %v3499_v26 = vld [vmem:[%s4640_s1 + $0x348] sm:$0xff]  }
  0x71   :  { %3130 = vmatpush3.bf16.msra.mxu0 %v3456_v40  ;;  %v35_v40 = vld [vmem:[%s4641_s0 + $0xa0] sm:$0xff] }
  0x72   :  { %3194 = vmatpush3.bf16.msra.mxu1 %v3458_v41  ;;  %3131 = vmatprep.subr.bf16.mxu0 %v3459_v42  ;;  %v43_v41 = vld [vmem:[%s4641_s0 + $0xe0] sm:$0xff]  ;;  %v2619_v42 = vcombine.low %v19_v32, %v27_v33  ;;  %v3500_v32 = vld [vmem:[%s4640_s1 + $0x308] sm:$0xff]  }
  0x73   :  { %2057 = vmatmul.mubr.bf16.gmra.mxu0 %v2647_v43  ;;  %3195 = vmatprep.subr.bf16.mxu1 %v3461_v44  ;;  %v36_v43 = vld [vmem:[%s4641_s0 + $0xa8] sm:$0xff] }
  0x74   :  { %2154 = vmatmul.mubr.bf16.gmra.mxu1 %v2649_v45  ;;  %2064 = vmatprep.mubr.bf16.mxu0 %v2664_v46  ;;  %v44_v44 = vld [vmem:[%s4641_s0 + $0xe8] sm:$0xff]  ;;  %v2621_v45 = vcombine.low %v20_v34, %v28_v35  ;;  %v3476_v46 = vld [vmem:[%s4640_s1 + $0x338] sm:$0xff]   ;;  %v3503_v34 = vld [vmem:[%s4640_s1 + $0x340] sm:$0xff]  }
  0x75   :  { %2161 = vmatprep.mubr.bf16.mxu1 %v2666_v48  ;;  %3132 = vmatpush3.bf16.msra.mxu0 %v3460_v47  ;;  %v3478_v47 = vld [vmem:[%s4640_s1 + $0x3b8] sm:$0xff]   ;;  %v2636_v48 = vcombine.high %v35_v40, %v43_v41  ;;  %v3502_v33 = vld [vmem:[%s4640_s1 + $0x388] sm:$0xff]   ;;  %v3505_v35 = vld [vmem:[%s4640_s1 + $0x3c0] sm:$0xff]  }
  0x76   :  { %3196 = vmatpush3.bf16.msra.mxu1 %v3462_v49  ;;  %3133 = vmatprep.subr.bf16.mxu0 %v3463_v50  ;;  %v2638_v49 = vcombine.high %v36_v43, %v44_v44  ;;  %v3479_v50 = vld [vmem:[%s4640_s1 + $0x370] sm:$0xff]  }
  0x77   :  { %3197 = vmatprep.subr.bf16.mxu1 %v3465_v52  ;;  %v3480_v52 = vld [vmem:[%s4640_s1 + $0x330] sm:$0xff]  }
  0x79   :  { %3134 = vmatpush3.bf16.msra.mxu0 %v3464_v56  ;;  %v3483_v56 = vld [vmem:[%s4640_s1 + $0x368] sm:$0xff]  }
  0x7a   :  { %3198 = vmatpush3.bf16.msra.mxu1 %v3466_v57  ;;  %3135 = vmatprep.subr.bf16.mxu0 %v3467_v58  ;;  %v52_v57 = vld [vmem:[%s4641_s0 + $0x128] sm:$0xff] }
  0x7b   :  { %2065 = vmatmul.mubr.bf16.gmra.mxu0 %v2663_v59  ;;  %3199 = vmatprep.subr.bf16.mxu1 %v3469_v60  ;;  %v60_v58 = vld [vmem:[%s4641_s0 + $0x168] sm:$0xff]  ;;  %v2635_v60 = vcombine.low %v35_v40, %v43_v41  ;;  %v3506_v41 = vld [vmem:[%s4640_s1 + $0x380] sm:$0xff]  }
  0x7c   :  { %2162 = vmatmul.mubr.bf16.gmra.mxu1 %v2665_v61  ;;  %2072 = vmatprep.mubr.bf16.mxu0 %v2680_v62  ;;  %v3485_v59 = vld [vmem:[%s4640_s1 + $0x3e8] sm:$0xff]   ;;  %v2637_v61 = vcombine.low %v36_v43, %v44_v44  ;;  %v2652_v62 = vcombine.high %v51_v54, %v59_v55 }
  0x7d   :  { %2169 = vmatprep.mubr.bf16.mxu1 %v2682_v63  ;;  %3136 = vmatpush3.bf16.msra.mxu0 %v3468_v0  ;;  %v2654_v63 = vcombine.high %v52_v57, %v60_v58  ;;  %v3484_v0 = vld [vmem:[%s4640_s1 + $0x328] sm:$0xff]  }
  0x7e   :  { %3200 = vmatpush3.bf16.msra.mxu1 %v3470_v1  ;;  %3137 = vmatprep.subr.bf16.mxu0 %v3471_v2  ;;  %v3486_v1 = vld [vmem:[%s4640_s1 + $0x3a8] sm:$0xff]   ;;  %v3487_v2 = vld [vmem:[%s4640_s1 + $0x360] sm:$0xff]  }
  0x7f   :  { %3201 = vmatprep.subr.bf16.mxu1 %v3473_v5  ;;  %v75_v5 = vld [vmem:[%s4641_s0 + $0x1e0] sm:$0xff]  ;;  %v108_v40 = vld [vmem:[%s4641_s0 + $0x2e8] sm:$0xff] }
  0x80   :  { %v2667_v27 = vcombine.low %v67_v4, %v75_v5 }
  0x81   :  { %3138 = vmatpush3.bf16.msra.mxu0 %v3472_v8  ;;  %v76_v8 = vld [vmem:[%s4641_s0 + $0x1e8] sm:$0xff] }
  0x82   :  { %3202 = vmatpush3.bf16.msra.mxu1 %v3474_v9  ;;  %3251 = vmatprep.subr.bf16.mxu0 %v3475_v10  ;;  %v3490_v9 = vld [vmem:[%s4640_s1 + $0x3a0] sm:$0xff]   ;;  %v3491_v10 = vld [vmem:[%s4640_s1 + $0x358] sm:$0xff]  }
  0x83   :  { %2073 = vmatmul.mubr.bf16.gmra.mxu0 %v2679_v11  ;;  %3315 = vmatprep.subr.bf16.mxu1 %v3477_v12  ;;  %v2651_v11 = vcombine.low %v51_v54, %v59_v55  ;;  %v3493_v12 = vld [vmem:[%s4640_s1 + $0x3d8] sm:$0xff]   ;;  %v131_v54 = vld [vmem:[%s4641_s0 + $0x3a0] sm:$0xff] }
  0x84   :  { %2170 = vmatmul.mubr.bf16.gmra.mxu1 %v2681_v13  ;;  %2080 = vmatprep.mubr.bf16.mxu0 %v2696_v14  ;;  %v2653_v13 = vcombine.low %v52_v57, %v60_v58  ;;  %v2668_v14 = vcombine.high %v67_v4, %v75_v5  ;;  %v139_v55 = vld [vmem:[%s4641_s0 + $0x3e0] sm:$0xff]  ;;  %v140_v57 = vld [vmem:[%s4641_s0 + $0x3e8] sm:$0xff] }
  0x85   :  { %2177 = vmatprep.mubr.bf16.mxu1 %v2698_v15  ;;  %v2670_v15 = vcombine.high %v68_v6, %v76_v8 }
  0x8b   :  { %2081 = vmatmul.mubr.bf16.gmra.mxu0 %v2695_v20  ;;  %v83_v20 = vld [vmem:[%s4641_s0 + $0x220] sm:$0xff] }
  0x8c   :  { %2178 = vmatmul.mubr.bf16.gmra.mxu1 %v2697_v21  ;;  %2088 = vmatprep.mubr.bf16.mxu0 %v2712_v22  ;;  %v91_v21 = vld [vmem:[%s4641_s0 + $0x260] sm:$0xff]  ;;  %v84_v22 = vld [vmem:[%s4641_s0 + $0x228] sm:$0xff] }
  0x8d   :  { %2185 = vmatprep.mubr.bf16.mxu1 %v2714_v23  ;;  %v3496_v23 = vld [vmem:[%s4640_s1 + $0x310] sm:$0xff]   ;;  %v2685_v43 = vcombine.low %v84_v22, %v92_v24 }
  0x93   :  { %2089 = vmatmul.mubr.bf16.gmra.mxu0 %v2711_v28  ;;  %v3501_v28 = vld [vmem:[%s4640_s1 + $0x3c8] sm:$0xff]  }
  0x94   :  { %2186 = vmatmul.mubr.bf16.gmra.mxu1 %v2713_v29  ;;  %2096 = vmatprep.mubr.bf16.mxu0 %v2728_v30  ;;  %v2669_v29 = vcombine.low %v68_v6, %v76_v8  ;;  %v2684_v30 = vcombine.high %v83_v20, %v91_v21  ;;  %v37_v6 = vld [vmem:[%s4641_s0 + $0xb0] sm:$0xff]  ;;  %v38_v8 = vld [vmem:[%s4641_s0 + $0xb8] sm:$0xff] }
  0x95   :  { %2193 = vmatprep.mubr.bf16.mxu1 %v2730_v31  ;;  %v2686_v31 = vcombine.high %v84_v22, %v92_v24  ;;  %v54_v22 = vld [vmem:[%s4641_s0 + $0x138] sm:$0xff] }
  0x9b   :  { %2097 = vmatmul.mubr.bf16.gmra.mxu0 %v2727_v36  ;;  %v99_v36 = vld [vmem:[%s4641_s0 + $0x2a0] sm:$0xff] }
  0x9c   :  { %2194 = vmatmul.mubr.bf16.gmra.mxu1 %v2729_v37  ;;  %2234 = vmatprep.mubr.bf16.mxu0 %v2620_v38  ;;  %v107_v37 = vld [vmem:[%s4641_s0 + $0x2e0] sm:$0xff] }
  0x9d   :  { %2331 = vmatprep.mubr.bf16.mxu1 %v2622_v39  ;;  %v3504_v38 = vld [vmem:[%s4640_s1 + $0x300] sm:$0xff]   ;;  %v100_v39 = vld [vmem:[%s4641_s0 + $0x2a8] sm:$0xff]  ;;  %v2700_v44 = vcombine.high %v99_v36, %v107_v37 }
  0xa3   :  { %2235 = vmatmul.mubr.bf16.vlgmr.msra.gmra.mxu0 %v2619_v42  ;;  %v2683_v42 = vcombine.low %v83_v20, %v91_v21 }
  0xa4   :  { %2332 = vmatmul.mubr.bf16.vlgmr.msra.gmra.mxu1 %v2621_v45  ;;  %3252 = vmatpush3.bf16.msra.mxu0 %v3476_v46  ;;  %v2702_v45 = vcombine.high %v100_v39, %v108_v40  ;;  %v115_v46 = vld [vmem:[%s4641_s0 + $0x320] sm:$0xff] }
  0xa5   :  { %3316 = vmatpush3.bf16.msra.mxu1 %v3478_v47  ;;  %2242 = vmatprep.mubr.bf16.mxu0 %v2636_v48  ;;  %v123_v47 = vld [vmem:[%s4641_s0 + $0x360] sm:$0xff]  ;;  %v116_v48 = vld [vmem:[%s4641_s0 + $0x328] sm:$0xff] }
  0xa6   :  { %2339 = vmatprep.mubr.bf16.mxu1 %v2638_v49  ;;  %3253 = vmatprep.subr.bf16.mxu0 %v3479_v50  ;;  %v124_v49 = vld [vmem:[%s4641_s0 + $0x368] sm:$0xff]  ;;  %v2699_v50 = vcombine.low %v99_v36, %v107_v37  ;;  %v2715_v58 = vcombine.low %v115_v46, %v123_v47 }
  0xa7   :  { %3317 = vmatprep.subr.bf16.mxu1 %v3481_v51  ;;  %v2701_v51 = vcombine.low %v100_v39, %v108_v40 }
  0xa8   :  { %3254 = vmatpush3.bf16.msra.mxu0 %v3480_v52  ;;  %v2716_v52 = vcombine.high %v115_v46, %v123_v47  ;;  %v70_v46 = vld [vmem:[%s4641_s0 + $0x1b8] sm:$0xff] }
  0xa9   :  { %3318 = vmatpush3.bf16.msra.mxu1 %v3482_v53  ;;  %3255 = vmatprep.subr.bf16.mxu0 %v3483_v56  ;;  %v2718_v53 = vcombine.high %v116_v48, %v124_v49  ;;  %v132_v56 = vld [vmem:[%s4641_s0 + $0x3a8] sm:$0xff]  ;;  %v78_v47 = vld [vmem:[%s4641_s0 + $0x1f8] sm:$0xff] }
  0xaa   :  { %3319 = vmatprep.subr.bf16.mxu1 %v3485_v59  ;;  %v2717_v59 = vcombine.low %v116_v48, %v124_v49 }
  0xab   :  { %2243 = vmatmul.mubr.bf16.gmra.mxu0 %v2635_v60  ;;  %v2732_v60 = vcombine.high %v131_v54, %v139_v55 }
  0xac   :  { %2340 = vmatmul.mubr.bf16.gmra.mxu1 %v2637_v61  ;;  %2250 = vmatprep.mubr.bf16.mxu0 %v2652_v62  ;;  %v2734_v61 = vcombine.high %v132_v56, %v140_v57  ;;  %v21_v62 = vld [vmem:[%s4641_s0 + $0x30] sm:$0xff] }
  0xad   :  { %2347 = vmatprep.mubr.bf16.mxu1 %v2654_v63  ;;  %3256 = vmatpush3.bf16.msra.mxu0 %v3484_v0  ;;  %v29_v63 = vld [vmem:[%s4641_s0 + $0x70] sm:$0xff]  ;;  %v22_v0 = vld [vmem:[%s4641_s0 + $0x38] sm:$0xff] }
  0xae   :  { %3320 = vmatpush3.bf16.msra.mxu1 %v3486_v1  ;;  %3257 = vmatprep.subr.bf16.mxu0 %v3487_v2  ;;  %v30_v1 = vld [vmem:[%s4641_s0 + $0x78] sm:$0xff]  ;;  %v2731_v2 = vcombine.low %v131_v54, %v139_v55  ;;  %v2624_v4 = vcombine.high %v21_v62, %v29_v63 }
  0xaf   :  { %3321 = vmatprep.subr.bf16.mxu1 %v3489_v3  ;;  %v2733_v3 = vcombine.low %v132_v56, %v140_v57  ;;  %v2626_v5 = vcombine.high %v22_v0, %v30_v1  ;;  %v2674_v56 = vcombine.high %v70_v46, %v78_v47 }
  0xb1   :  { %3258 = vmatpush3.bf16.msra.mxu0 %v3488_v7  ;;  %v45_v7 = vld [vmem:[%s4641_s0 + $0xf0] sm:$0xff] }
  0xb2   :  { %3322 = vmatpush3.bf16.msra.mxu1 %v3490_v9  ;;  %3259 = vmatprep.subr.bf16.mxu0 %v3491_v10  ;;  %v46_v9 = vld [vmem:[%s4641_s0 + $0xf8] sm:$0xff]  ;;  %v2623_v10 = vcombine.low %v21_v62, %v29_v63 }
  0xb3   :  { %2251 = vmatmul.mubr.bf16.gmra.mxu0 %v2651_v11  ;;  %3323 = vmatprep.subr.bf16.mxu1 %v3493_v12  ;;  %v2625_v11 = vcombine.low %v22_v0, %v30_v1  ;;  %v2640_v12 = vcombine.high %v37_v6, %v45_v7  ;;  %v85_v1 = vld [vmem:[%s4641_s0 + $0x230] sm:$0xff] }
  0xb4   :  { %2348 = vmatmul.mubr.bf16.gmra.mxu1 %v2653_v13  ;;  %2258 = vmatprep.mubr.bf16.mxu0 %v2668_v14  ;;  %v2642_v13 = vcombine.high %v38_v8, %v46_v9 }
  0xb5   :  { %2355 = vmatprep.mubr.bf16.mxu1 %v2670_v15  ;;  %3260 = vmatpush3.bf16.msra.mxu0 %v3492_v16  ;;  %v4226_v16 = vld [vmem:[%s4642_s2] ss:$0 sm:$0xff] }
  0xb6   :  { %3324 = vmatpush3.bf16.msra.mxu1 %v3494_v17  ;;  %3261 = vmatprep.subr.bf16.mxu0 %v3495_v18  ;;  %v53_v18 = vld [vmem:[%s4641_s0 + $0x130] sm:$0xff] }
  0xb7   :  { %3325 = vmatprep.subr.bf16.mxu1 %v3497_v19  ;;  %v61_v19 = vld [vmem:[%s4641_s0 + $0x170] sm:$0xff] }
  0xb9   :  { %3262 = vmatpush3.bf16.msra.mxu0 %v3496_v23  ;;  %v62_v23 = vld [vmem:[%s4641_s0 + $0x178] sm:$0xff] }
  0xba   :  { %3326 = vmatpush3.bf16.msra.mxu1 %v3498_v25  ;;  %3263 = vmatprep.subr.bf16.mxu0 %v3499_v26  ;;  %v2639_v26 = vcombine.low %v37_v6, %v45_v7  ;;  %v86_v6 = vld [vmem:[%s4641_s0 + $0x238] sm:$0xff] }
  0xbb   :  { %2259 = vmatmul.mubr.bf16.gmra.mxu0 %v2667_v27  ;;  %3327 = vmatprep.subr.bf16.mxu1 %v3501_v28  ;;  %v94_v7 = vld [vmem:[%s4641_s0 + $0x278] sm:$0xff] }
  0xbc   :  { %2356 = vmatmul.mubr.bf16.gmra.mxu1 %v2669_v29  ;;  %2266 = vmatprep.mubr.bf16.mxu0 %v2684_v30  ;;  %v2641_v29 = vcombine.low %v38_v8, %v46_v9  ;;  %v2656_v30 = vcombine.high %v53_v18, %v61_v19 }
  0xbd   :  { %2363 = vmatprep.mubr.bf16.mxu1 %v2686_v31  ;;  %3264 = vmatpush3.bf16.msra.mxu0 %v3500_v32  ;;  %v2658_v32 = vcombine.high %v54_v22, %v62_v23 }
  0xbe   :  { %3328 = vmatpush3.bf16.msra.mxu1 %v3502_v33  ;;  %3265 = vmatprep.subr.bf16.mxu0 %v3503_v34 }
  0xbf   :  { %3329 = vmatprep.subr.bf16.mxu1 %v3505_v35 }
  0xc1   :  { %3266 = vmatpush3.bf16.msra.mxu0 %v3504_v38 }
  0xc2   :  { %3330 = vmatpush3.bf16.msra.mxu1 %v3506_v41  ;;  %v69_v41 = vld [vmem:[%s4641_s0 + $0x1b0] sm:$0xff] }
  0xc3   :  { %2267 = vmatmul.mubr.bf16.gmra.mxu0 %v2683_v42  ;;  %v77_v42 = vld [vmem:[%s4641_s0 + $0x1f0] sm:$0xff] }
  0xc4   :  { %2364 = vmatmul.mubr.bf16.gmra.mxu1 %v2685_v43  ;;  %2274 = vmatprep.mubr.bf16.mxu0 %v2700_v44  ;;  %v2672_v54 = vcombine.high %v69_v41, %v77_v42 }
  0xc5   :  { %2371 = vmatprep.mubr.bf16.mxu1 %v2702_v45 }
  0xcb   :  { %2275 = vmatmul.mubr.bf16.gmra.mxu0 %v2699_v50  ;;  %v2655_v50 = vcombine.low %v53_v18, %v61_v19 }
  0xcc   :  { %2372 = vmatmul.mubr.bf16.gmra.mxu1 %v2701_v51  ;;  %2282 = vmatprep.mubr.bf16.mxu0 %v2716_v52 }
  0xcd   :  { %2379 = vmatprep.mubr.bf16.mxu1 %v2718_v53  ;;  %v2657_v53 = vcombine.low %v54_v22, %v62_v23 }
  0xd3   :  { %2283 = vmatmul.mubr.bf16.gmra.mxu0 %v2715_v58 }
  0xd4   :  { %2380 = vmatmul.mubr.bf16.gmra.mxu1 %v2717_v59  ;;  %2290 = vmatprep.mubr.bf16.mxu0 %v2732_v60 }
  0xd5   :  { %2387 = vmatprep.mubr.bf16.mxu1 %v2734_v61 }
  0xdb   :  { %2291 = vmatmul.mubr.bf16.gmra.mxu0 %v2731_v2  ;;  %v93_v2 = vld [vmem:[%s4641_s0 + $0x270] sm:$0xff] }
  0xdc   :  { %2388 = vmatmul.mubr.bf16.gmra.mxu1 %v2733_v3  ;;  %2428 = vmatprep.mubr.bf16.mxu0 %v2624_v4 }
  0xdd   :  { %2525 = vmatprep.mubr.bf16.mxu1 %v2626_v5 }
  0xe3   :  { %v2883_v14 = vpop.f32.mrf.mxu0  ;;  %2429 = vmatmul.mubr.bf16.vlgmr.msra.gmra.mxu0 %v2623_v10  ;;  %v2671_v10 = vcombine.low %v69_v41, %v77_v42 }
  0xe4   :  { %v2947_v15 = vpop.f32.mrf.mxu1  ;;  %2526 = vmatmul.mubr.bf16.vlgmr.msra.gmra.mxu1 %v2625_v11  ;;  %2436 = vmatprep.mubr.bf16.mxu0 %v2640_v12 }
  0xe5   :  { %v2884_v17 = vpop.f32.mrf.mxu0  ;;  %2533 = vmatprep.mubr.bf16.mxu1 %v2642_v13  ;;  %v2673_v13 = vcombine.low %v70_v46, %v78_v47 }
  0xe6   :  { %v2885_v20 = vadd.f32 %v2884_v17, %v2883_v14  ;;  %v2948_v21 = vpop.f32.mrf.mxu1  ;;  %v2688_v14 = vcombine.high %v85_v1, %v93_v2  ;;  %v2690_v17 = vcombine.high %v86_v6, %v94_v7 }
  0xe7   :  { %v2949_v24 = vadd.f32 %v2948_v21, %v2947_v15  ;;  %v2886_v25 = vpop.f32.mrf.mxu0 }
  0xe8   :  { %v1849_v27 = vadd.f32 %v2885_v20, %v4226_v16  ;;  %v2950_v28 = vpop.f32.mrf.mxu1 }
  0xe9   :  { %v2887_v31 = vpop.f32.mrf.mxu0 }
  0xea   :  { %v4241_v33 = vadd.f32 %v2949_v24, %v1849_v27  ;;  %v2888_v34 = vadd.f32 %v2887_v31, %v2886_v25  ;;  %v2951_v35 = vpop.f32.mrf.mxu1  ;;  %v109_v27 = vld [vmem:[%s4641_s0 + $0x2f0] sm:$0xff]  ;;  %v102_v31 = vld [vmem:[%s4641_s0 + $0x2b8] sm:$0xff] }
  0xeb   :  { %v2952_v36 = vadd.f32 %v2951_v35, %v2950_v28  ;;  %v2889_v37 = vpop.f32.mrf.mxu0  ;;  %2437 = vmatmul.mubr.bf16.gmra.mxu0 %v2639_v26  ;;  %v101_v26 = vld [vmem:[%s4641_s0 + $0x2b0] sm:$0xff] }
  0xec   :  { %v1852_v38 = vadd.f32 %v2888_v34, %v4226_v16  ;;  %v2953_v39 = vpop.f32.mrf.mxu1  ;;  %2534 = vmatmul.mubr.bf16.gmra.mxu1 %v2641_v29  ;;  %2444 = vmatprep.mubr.bf16.mxu0 %v2656_v30 }
  0xed   :  { %v2890_v40 = vpop.f32.mrf.mxu0  ;;  %2541 = vmatprep.mubr.bf16.mxu1 %v2658_v32  ;;  %v110_v32 = vld [vmem:[%s4641_s0 + $0x2f8] sm:$0xff] }
  0xee   :  { %v4250_v43 = vadd.f32 %v2952_v36, %v1852_v38  ;;  %v2891_v44 = vadd.f32 %v2890_v40, %v2889_v37  ;;  %v2954_v45 = vpop.f32.mrf.mxu1  ;;  %v2687_v36 = vcombine.low %v85_v1, %v93_v2  ;;  %v2704_v40 = vcombine.high %v101_v26, %v109_v27 }
  0xef   :  { %v2955_v48 = vadd.f32 %v2954_v45, %v2953_v39  ;;  %v2892_v49 = vpop.f32.mrf.mxu0  ;;  %v2689_v39 = vcombine.low %v86_v6, %v94_v7  ;;  %v2706_v42 = vcombine.high %v102_v31, %v110_v32  ;;  %v2705_v1 = vcombine.low %v102_v31, %v110_v32 }
  0xf0   :  { %v1857_v51 = vadd.f32 %v2891_v44, %v4226_v16  ;;  %v2956_v52 = vpop.f32.mrf.mxu1 }
  0xf1   :  { %v2893_v55 = vpop.f32.mrf.mxu0 }
  0xf2   :  { %v4259_v57 = vadd.f32 %v2955_v48, %v1857_v51  ;;  %v2894_v58 = vadd.f32 %v2893_v55, %v2892_v49  ;;  %v2957_v59 = vpop.f32.mrf.mxu1 }
  0xf3   :  { %v2958_v60 = vadd.f32 %v2957_v59, %v2956_v52  ;;  %v2895_v61 = vpop.f32.mrf.mxu0  ;;  %2445 = vmatmul.mubr.bf16.gmra.mxu0 %v2655_v50  ;;  %v117_v52 = vld [vmem:[%s4641_s0 + $0x330] sm:$0xff]  ;;  %v126_v59 = vld [vmem:[%s4641_s0 + $0x378] sm:$0xff] }
  0xf4   :  { %v1860_v62 = vadd.f32 %v2894_v58, %v4226_v16  ;;  %v2959_v63 = vpop.f32.mrf.mxu1  ;;  %2542 = vmatmul.mubr.bf16.gmra.mxu1 %v2657_v53  ;;  %2452 = vmatprep.mubr.bf16.mxu0 %v2672_v54  ;;  %v125_v53 = vld [vmem:[%s4641_s0 + $0x370] sm:$0xff]  ;;  %v118_v58 = vld [vmem:[%s4641_s0 + $0x338] sm:$0xff] }
  0xf5   :  { %v2896_v0 = vpop.f32.mrf.mxu0  ;;  %2549 = vmatprep.mubr.bf16.mxu1 %v2674_v56  ;;  %v2720_v2 = vcombine.high %v117_v52, %v125_v53 }
  0xf6   :  { %v4268_v3 = vadd.f32 %v2958_v60, %v1860_v62  ;;  %v2897_v4 = vadd.f32 %v2896_v0, %v2895_v61  ;;  %v2960_v5 = vpop.f32.mrf.mxu1  ;;  %v2703_v62 = vcombine.low %v101_v26, %v109_v27 }
  0xf7   :  { %v2961_v8 = vadd.f32 %v2960_v5, %v2959_v63  ;;  %v2898_v9 = vpop.f32.mrf.mxu0  ;;  %v2722_v5 = vcombine.high %v118_v58, %v126_v59 }
  0xf8   :  { %v1865_v11 = vadd.f32 %v2897_v4, %v4226_v16  ;;  %v2962_v12 = vpop.f32.mrf.mxu1 }
  0xf9   :  { %v2899_v15 = vpop.f32.mrf.mxu0 }
  0xfa   :  { %v4277_v18 = vadd.f32 %v2961_v8, %v1865_v11  ;;  %v2900_v19 = vadd.f32 %v2899_v15, %v2898_v9  ;;  %v2963_v20 = vpop.f32.mrf.mxu1  ;;  %v141_v15 = vld [vmem:[%s4641_s0 + $0x3f0] sm:$0xff] }
  0xfb   :  { %v2964_v21 = vadd.f32 %v2963_v20, %v2962_v12  ;;  %v2901_v22 = vpop.f32.mrf.mxu0  ;;  %2453 = vmatmul.mubr.bf16.gmra.mxu0 %v2671_v10 }
  0xfc   :  { %v1868_v23 = vadd.f32 %v2900_v19, %v4226_v16  ;;  %v2965_v24 = vpop.f32.mrf.mxu1  ;;  %2550 = vmatmul.mubr.bf16.gmra.mxu1 %v2673_v13  ;;  %2460 = vmatprep.mubr.bf16.mxu0 %v2688_v14  ;;  %v133_v14 = vld [vmem:[%s4641_s0 + $0x3b0] sm:$0xff] }
  0xfd   :  { %v2902_v25 = vpop.f32.mrf.mxu0  ;;  %2557 = vmatprep.mubr.bf16.mxu1 %v2690_v17 }
  0xfe   :  { %v4286_v28 = vadd.f32 %v2964_v21, %v1868_v23  ;;  %v2903_v29 = vadd.f32 %v2902_v25, %v2901_v22  ;;  %v2966_v30 = vpop.f32.mrf.mxu1  ;;  %v134_v21 = vld [vmem:[%s4641_s0 + $0x3b8] sm:$0xff]  ;;  %v2719_v25 = vcombine.low %v117_v52, %v125_v53 }
  0xff   :  { %v2967_v34 = vadd.f32 %v2966_v30, %v2965_v24  ;;  %v2904_v35 = vpop.f32.mrf.mxu0  ;;  %v142_v22 = vld [vmem:[%s4641_s0 + $0x3f8] sm:$0xff]  ;;  %v2736_v30 = vcombine.high %v133_v14, %v141_v15 }
 0x100   :  { %v1873_v37 = vadd.f32 %v2903_v29, %v4226_v16  ;;  %v2968_v38 = vpop.f32.mrf.mxu1  ;;  %v2721_v29 = vcombine.low %v118_v58, %v126_v59  ;;  %v2738_v32 = vcombine.high %v134_v21, %v142_v22  ;;  %v2737_v52 = vcombine.low %v134_v21, %v142_v22 }
 0x101   :  { %v2905_v41 = vpop.f32.mrf.mxu0 }
 0x102   :  { %v4295_v44 = vadd.f32 %v2967_v34, %v1873_v37  ;;  %v2906_v45 = vadd.f32 %v2905_v41, %v2904_v35  ;;  %v2969_v46 = vpop.f32.mrf.mxu1 }
 0x103   :  { %v2970_v47 = vadd.f32 %v2969_v46, %v2968_v38  ;;  %v2907_v48 = vpop.f32.mrf.mxu0  ;;  %2461 = vmatmul.mubr.bf16.gmra.mxu0 %v2687_v36 }
 0x104   :  { %v1876_v49 = vadd.f32 %v2906_v45, %v4226_v16  ;;  %v2971_v50 = vpop.f32.mrf.mxu1  ;;  %2558 = vmatmul.mubr.bf16.gmra.mxu1 %v2689_v39  ;;  %2468 = vmatprep.mubr.bf16.mxu0 %v2704_v40 }
 0x105   :  { %v2908_v51 = vpop.f32.mrf.mxu0  ;;  %2565 = vmatprep.mubr.bf16.mxu1 %v2706_v42 }
 0x106   :  { %v4304_v54 = vadd.f32 %v2970_v47, %v1876_v49  ;;  %v2909_v55 = vadd.f32 %v2908_v51, %v2907_v48  ;;  %v2972_v56 = vpop.f32.mrf.mxu1  ;;  %v2735_v49 = vcombine.low %v133_v14, %v141_v15 }
 0x107   :  { %v2973_v60 = vadd.f32 %v2972_v56, %v2971_v50  ;;  %v2910_v61 = vpop.f32.mrf.mxu0 }
 0x108   :  { %v1881_v63 = vadd.f32 %v2909_v55, %v4226_v16  ;;  %v2974_v0 = vpop.f32.mrf.mxu1 }
 0x109   :  { %v2911_v4 = vpop.f32.mrf.mxu0 }
 0x10a   :  { %v4313_v6 = vadd.f32 %v2973_v60, %v1881_v63  ;;  %v2912_v7 = vadd.f32 %v2911_v4, %v2910_v61  ;;  %v2975_v8 = vpop.f32.mrf.mxu1 }
 0x10b   :  { %v2976_v9 = vadd.f32 %v2975_v8, %v2974_v0  ;;  %v2913_v10 = vpop.f32.mrf.mxu0  ;;  %2469 = vmatmul.mubr.bf16.gmra.mxu0 %v2703_v62 }
 0x10c   :  { %v1884_v11 = vadd.f32 %v2912_v7, %v4226_v16  ;;  %v2977_v12 = vpop.f32.mrf.mxu1  ;;  %2566 = vmatmul.mubr.bf16.gmra.mxu1 %v2705_v1  ;;  %2476 = vmatprep.mubr.bf16.mxu0 %v2720_v2 }
 0x10d   :  { %v2914_v13 = vpop.f32.mrf.mxu0  ;;  %2573 = vmatprep.mubr.bf16.mxu1 %v2722_v5 }
 0x10e   :  { %v4322_v17 = vadd.f32 %v2976_v9, %v1884_v11  ;;  %v2915_v19 = vadd.f32 %v2914_v13, %v2913_v10  ;;  %v2978_v20 = vpop.f32.mrf.mxu1 }
 0x10f   :  { %v2979_v23 = vadd.f32 %v2978_v20, %v2977_v12  ;;  %v2916_v24 = vpop.f32.mrf.mxu0 }
 0x110   :  { %v1889_v26 = vadd.f32 %v2915_v19, %v4226_v16  ;;  %v2980_v27 = vpop.f32.mrf.mxu1 }
 0x111   :  { %v2917_v31 = vpop.f32.mrf.mxu0 }
 0x112   :  { %v4331_v34 = vadd.f32 %v2979_v23, %v1889_v26  ;;  %v2918_v35 = vadd.f32 %v2917_v31, %v2916_v24  ;;  %v2981_v36 = vpop.f32.mrf.mxu1 }
 0x113   :  { %v2982_v37 = vadd.f32 %v2981_v36, %v2980_v27  ;;  %v2919_v38 = vpop.f32.mrf.mxu0  ;;  %2477 = vmatmul.mubr.bf16.gmra.mxu0 %v2719_v25 }
 0x114   :  { %v1892_v39 = vadd.f32 %v2918_v35, %v4226_v16  ;;  %v2983_v40 = vpop.f32.mrf.mxu1  ;;  %2574 = vmatmul.mubr.bf16.gmra.mxu1 %v2721_v29  ;;  %2484 = vmatprep.mubr.bf16.mxu0 %v2736_v30 }
 0x115   :  { %v2920_v41 = vpop.f32.mrf.mxu0  ;;  %2581 = vmatprep.mubr.bf16.mxu1 %v2738_v32 }
 0x116   :  { %v4334_v42 = vadd.f32 %v2982_v37, %v1892_v39  ;;  %v2921_v45 = vadd.f32 %v2920_v41, %v2919_v38  ;;  %v2984_v46 = vpop.f32.mrf.mxu1 }
 0x117   :  { %v2985_v47 = vadd.f32 %v2984_v46, %v2983_v40  ;;  %v2922_v48 = vpop.f32.mrf.mxu0 }
 0x118   :  { %v1897_v50 = vadd.f32 %v2921_v45, %v4226_v16  ;;  %v2986_v51 = vpop.f32.mrf.mxu1 }
 0x119   :  { %v2923_v53 = vpop.f32.mrf.mxu0 }
 0x11a   :  { %v4337_v55 = vadd.f32 %v2985_v47, %v1897_v50  ;;  %v2924_v56 = vadd.f32 %v2923_v53, %v2922_v48  ;;  %v2987_v58 = vpop.f32.mrf.mxu1 }
 0x11b   :  { %v2988_v59 = vadd.f32 %v2987_v58, %v2986_v51  ;;  %v2925_v60 = vpop.f32.mrf.mxu0  ;;  %2485 = vmatmul.mubr.bf16.gmra.mxu0 %v2735_v49 }
 0x11c   :  { %v1900_v61 = vadd.f32 %v2924_v56, %v4226_v16  ;;  %v2989_v62 = vpop.f32.mrf.mxu1  ;;  %2582 = vmatmul.mubr.bf16.gmra.mxu1 %v2737_v52 }
 0x11d   :  { %v2926_v63 = vpop.f32.mrf.mxu0 }
 0x11e   :  { %v4340_v0 = vadd.f32 %v2988_v59, %v1900_v61  ;;  %v2927_v1 = vadd.f32 %v2926_v63, %v2925_v60  ;;  %v2990_v2 = vpop.f32.mrf.mxu1 }
 0x11f   :  { %v2991_v4 = vadd.f32 %v2990_v2, %v2989_v62  ;;  %v2928_v5 = vpop.f32.mrf.mxu0 }
 0x120   :  { %v1905_v7 = vadd.f32 %v2927_v1, %v4226_v16  ;;  %v2992_v8 = vpop.f32.mrf.mxu1 }
 0x121   :  { %v2929_v9 = vpop.f32.mrf.mxu0 }
 0x122   :  { %v4343_v10 = vadd.f32 %v2991_v4, %v1905_v7  ;;  %v2930_v11 = vadd.f32 %v2929_v9, %v2928_v5  ;;  %v2993_v12 = vpop.f32.mrf.mxu1 }
 0x123   :  { %v2994_v13 = vadd.f32 %v2993_v12, %v2992_v8  ;;  %v3011_v14 = vpop.f32.mrf.mxu0 }
 0x124   :  { %v1908_v15 = vadd.f32 %v2930_v11, %v4226_v16  ;;  %v3075_v19 = vpop.f32.mrf.mxu1 }
 0x125   :  { %v3012_v20 = vpop.f32.mrf.mxu0 }
 0x126   :  { %v4346_v21 = vadd.f32 %v2994_v13, %v1908_v15  ;;  %v3013_v22 = vadd.f32 %v3012_v20, %v3011_v14  ;;  %v3076_v23 = vpop.f32.mrf.mxu1 }
 0x127   :  { %v3077_v24 = vadd.f32 %v3076_v23, %v3075_v19  ;;  %v3014_v25 = vpop.f32.mrf.mxu0 }
 0x128   :  { %v2043_v26 = vadd.f32 %v3013_v22, %v4241_v33  ;;  %v3078_v27 = vpop.f32.mrf.mxu1 }
 0x129   :  { %v3015_v29 = vpop.f32.mrf.mxu0 }
 0x12a   :  { %v4349_v30 = vadd.f32 %v3077_v24, %v2043_v26  ;;  %v3016_v31 = vadd.f32 %v3015_v29, %v3014_v25  ;;  %v3079_v32 = vpop.f32.mrf.mxu1 }
 0x12b   :  { %v3080_v35 = vadd.f32 %v3079_v32, %v3078_v27  ;;  %v3017_v36 = vpop.f32.mrf.mxu0 }
 0x12c   :  { %v2046_v16 = vadd.f32 %v3016_v31, %v4250_v43  ;;  %v3081_v37 = vpop.f32.mrf.mxu1 }
 0x12d   :  { %v3018_v38 = vpop.f32.mrf.mxu0 }
 0x12e   :  { %v4352_v39 = vadd.f32 %v3080_v35, %v2046_v16  ;;  %v3019_v40 = vadd.f32 %v3018_v38, %v3017_v36  ;;  %v3082_v41 = vpop.f32.mrf.mxu1 }
 0x12f   :  { %v3083_v45 = vadd.f32 %v3082_v41, %v3081_v37  ;;  %v3020_v46 = vpop.f32.mrf.mxu0 }
 0x130   :  { %v2051_v33 = vadd.f32 %v3019_v40, %v4259_v57  ;;  %v3084_v47 = vpop.f32.mrf.mxu1 }
 0x131   :  { %v3021_v48 = vpop.f32.mrf.mxu0 }
 0x132   :  { %v4355_v49 = vadd.f32 %v3083_v45, %v2051_v33  ;;  %v3022_v50 = vadd.f32 %v3021_v48, %v3020_v46  ;;  %v3085_v51 = vpop.f32.mrf.mxu1 }
 0x133   :  { %v3086_v52 = vadd.f32 %v3085_v51, %v3084_v47  ;;  %v3023_v53 = vpop.f32.mrf.mxu0 }
 0x134   :  { %v2054_v43 = vadd.f32 %v3022_v50, %v4268_v3  ;;  %v3087_v56 = vpop.f32.mrf.mxu1 }
 0x135   :  { %v3024_v58 = vpop.f32.mrf.mxu0 }
 0x136   :  { %v4358_v59 = vadd.f32 %v3086_v52, %v2054_v43  ;;  %v3025_v60 = vadd.f32 %v3024_v58, %v3023_v53  ;;  %v3088_v61 = vpop.f32.mrf.mxu1 }
 0x137   :  { %v3089_v62 = vadd.f32 %v3088_v61, %v3087_v56  ;;  %v3026_v63 = vpop.f32.mrf.mxu0 }
 0x138   :  { %v2059_v57 = vadd.f32 %v3025_v60, %v4277_v18  ;;  %v3090_v1 = vpop.f32.mrf.mxu1 }
 0x139   :  { %v3027_v2 = vpop.f32.mrf.mxu0 }
 0x13a   :  { %v4361_v4 = vadd.f32 %v3089_v62, %v2059_v57  ;;  %v3028_v5 = vadd.f32 %v3027_v2, %v3026_v63  ;;  %v3091_v7 = vpop.f32.mrf.mxu1 }
 0x13b   :  { %v3092_v8 = vadd.f32 %v3091_v7, %v3090_v1  ;;  %v3029_v9 = vpop.f32.mrf.mxu0 }
 0x13c   :  { %v2062_v3 = vadd.f32 %v3028_v5, %v4286_v28  ;;  %v3093_v11 = vpop.f32.mrf.mxu1 }
 0x13d   :  { %v3030_v12 = vpop.f32.mrf.mxu0 }
 0x13e   :  { %v4364_v13 = vadd.f32 %v3092_v8, %v2062_v3  ;;  %v3031_v14 = vadd.f32 %v3030_v12, %v3029_v9  ;;  %v3094_v15 = vpop.f32.mrf.mxu1 }
 0x13f   :  { %v3095_v19 = vadd.f32 %v3094_v15, %v3093_v11  ;;  %v3032_v20 = vpop.f32.mrf.mxu0 }
 0x140   :  { %v2067_v18 = vadd.f32 %v3031_v14, %v4295_v44  ;;  %v3096_v22 = vpop.f32.mrf.mxu1 }
 0x141   :  { %v3033_v23 = vpop.f32.mrf.mxu0 }
 0x142   :  { %v4367_v24 = vadd.f32 %v3095_v19, %v2067_v18  ;;  %v3034_v25 = vadd.f32 %v3033_v23, %v3032_v20  ;;  %v3097_v26 = vpop.f32.mrf.mxu1 }
 0x143   :  { %v3098_v27 = vadd.f32 %v3097_v26, %v3096_v22  ;;  %v3035_v29 = vpop.f32.mrf.mxu0 }
 0x144   :  { %v2070_v28 = vadd.f32 %v3034_v25, %v4304_v54  ;;  %v3099_v31 = vpop.f32.mrf.mxu1 }
 0x145   :  { %v3036_v32 = vpop.f32.mrf.mxu0 }
 0x146   :  { %v4370_v35 = vadd.f32 %v3098_v27, %v2070_v28  ;;  %v3037_v36 = vadd.f32 %v3036_v32, %v3035_v29  ;;  %v3100_v16 = vpop.f32.mrf.mxu1 }
 0x147   :  { %v3101_v37 = vadd.f32 %v3100_v16, %v3099_v31  ;;  %v3038_v38 = vpop.f32.mrf.mxu0 }
 0x148   :  { %v2075_v44 = vadd.f32 %v3037_v36, %v4313_v6  ;;  %v3102_v40 = vpop.f32.mrf.mxu1 }
 0x149   :  { %v3039_v41 = vpop.f32.mrf.mxu0 }
 0x14a   :  { %v4373_v45 = vadd.f32 %v3101_v37, %v2075_v44  ;;  %v3040_v46 = vadd.f32 %v3039_v41, %v3038_v38  ;;  %v3103_v33 = vpop.f32.mrf.mxu1 }
 0x14b   :  { %v3104_v47 = vadd.f32 %v3103_v33, %v3102_v40  ;;  %v3041_v48 = vpop.f32.mrf.mxu0 }
 0x14c   :  { %v2078_v54 = vadd.f32 %v3040_v46, %v4322_v17  ;;  %v3105_v50 = vpop.f32.mrf.mxu1 }
 0x14d   :  { %v3042_v51 = vpop.f32.mrf.mxu0 }
 0x14e   :  { %v4376_v52 = vadd.f32 %v3104_v47, %v2078_v54  ;;  %v3043_v53 = vadd.f32 %v3042_v51, %v3041_v48  ;;  %v3106_v43 = vpop.f32.mrf.mxu1 }
 0x14f   :  { %v3107_v56 = vadd.f32 %v3106_v43, %v3105_v50  ;;  %v3044_v58 = vpop.f32.mrf.mxu0 }
 0x150   :  { %v2083_v6 = vadd.f32 %v3043_v53, %v4331_v34  ;;  %v3108_v60 = vpop.f32.mrf.mxu1 }
 0x151   :  { %v3045_v61 = vpop.f32.mrf.mxu0 }
 0x152   :  { %v4379_v62 = vadd.f32 %v3107_v56, %v2083_v6  ;;  %v3046_v63 = vadd.f32 %v3045_v61, %v3044_v58  ;;  %v3109_v57 = vpop.f32.mrf.mxu1 }
 0x153   :  { %v3110_v1 = vadd.f32 %v3109_v57, %v3108_v60  ;;  %v3047_v2 = vpop.f32.mrf.mxu0 }
 0x154   :  { %4644 = vst [vmem:[#allocation2_spill] sm:$0xff] %v4379_v62  ;;  %v2086_v17 = vadd.f32 %v3046_v63, %v4334_v42  ;;  %v3111_v5 = vpop.f32.mrf.mxu1 }
 0x155   :  { %v3048_v7 = vpop.f32.mrf.mxu0 }
 0x156   :  { %v4382_v8 = vadd.f32 %v3110_v1, %v2086_v17  ;;  %v3049_v9 = vadd.f32 %v3048_v7, %v3047_v2  ;;  %v3112_v3 = vpop.f32.mrf.mxu1 }
 0x157   :  { %v3113_v11 = vadd.f32 %v3112_v3, %v3111_v5  ;;  %v3050_v12 = vpop.f32.mrf.mxu0 }
 0x158   :  { %4645 = vst [vmem:[#allocation3_spill] sm:$0xff] %v4382_v8  ;;  %v2091_v34 = vadd.f32 %v3049_v9, %v4337_v55  ;;  %v3114_v14 = vpop.f32.mrf.mxu1 }
 0x159   :  { %v3051_v15 = vpop.f32.mrf.mxu0 }
 0x15a   :  { %v4385_v19 = vadd.f32 %v3113_v11, %v2091_v34  ;;  %v3052_v20 = vadd.f32 %v3051_v15, %v3050_v12  ;;  %v3115_v18 = vpop.f32.mrf.mxu1 }
 0x15b   :  { %v3116_v22 = vadd.f32 %v3115_v18, %v3114_v14  ;;  %v3053_v23 = vpop.f32.mrf.mxu0 }
 0x15c   :  { %4646 = vst [vmem:[#allocation4_spill] sm:$0xff] %v4385_v19  ;;  %v2094_v42 = vadd.f32 %v3052_v20, %v4340_v0  ;;  %v3117_v25 = vpop.f32.mrf.mxu1 }
 0x15d   :  { %v3054_v26 = vpop.f32.mrf.mxu0 }
 0x15e   :  { %v4388_v27 = vadd.f32 %v3116_v22, %v2094_v42  ;;  %v3055_v29 = vadd.f32 %v3054_v26, %v3053_v23  ;;  %v3118_v28 = vpop.f32.mrf.mxu1 }
 0x15f   :  { %v3119_v31 = vadd.f32 %v3118_v28, %v3117_v25  ;;  %v3056_v32 = vpop.f32.mrf.mxu0 }
 0x160   :  { %4647 = vst [vmem:[#allocation5_spill] sm:$0xff] %v4388_v27  ;;  %v2099_v55 = vadd.f32 %v3055_v29, %v4343_v10  ;;  %v3120_v36 = vpop.f32.mrf.mxu1 }
 0x161   :  { %v3057_v16 = vpop.f32.mrf.mxu0 }
 0x162   :  { %v4391_v37 = vadd.f32 %v3119_v31, %v2099_v55  ;;  %v3058_v38 = vadd.f32 %v3057_v16, %v3056_v32  ;;  %v3121_v44 = vpop.f32.mrf.mxu1 }
 0x163   :  { %v3122_v40 = vadd.f32 %v3121_v44, %v3120_v36  ;;  %v3139_v41 = vpop.f32.mrf.mxu0 }
 0x164   :  { %4648 = vst [vmem:[#allocation6_spill] sm:$0xff] %v4391_v37  ;;  %v2102_v0 = vadd.f32 %v3058_v38, %v4346_v21  ;;  %v4394_v46 = vpop.f32.mrf.mxu1 }
 0x165   :  { %v3140_v33 = vpop.f32.mrf.mxu0 }
 0x166   :  { %v4396_v47 = vadd.f32 %v3122_v40, %v2102_v0  ;;  %v4398_v48 = vpop.f32.mrf.mxu1 }
 0x167   :  { %v3142_v54 = vpop.f32.mrf.mxu0 }
 0x168   :  { %4649 = vst [vmem:[#allocation7_spill] sm:$0xff] %v4396_v47  ;;  %v4400_v50 = vpop.f32.mrf.mxu1 }
 0x169   :  { %v3143_v10 = vpop.f32.mrf.mxu0 }
 0x16a   :  { %v4402_v51 = vpop.f32.mrf.mxu1 }
 0x16b   :  { %v4404_v53 = vpop.f32.mrf.mxu0 }
 0x16c   :  { %v4406_v43 = vpop.f32.mrf.mxu1 }
 0x16d   :  { %v4408_v56 = vpop.f32.mrf.mxu0 }
 0x16e   :  { %v4410_v21 = vpop.f32.mrf.mxu1 }
 0x16f   :  { %v4412_v58 = vpop.f32.mrf.mxu0 }
 0x170   :  { %v4414_v6 = vpop.f32.mrf.mxu1 }
 0x171   :  { %v4416_v60 = vpop.f32.mrf.mxu0 }
 0x172   :  { %v4418_v61 = vpop.f32.mrf.mxu1 }
 0x173   :  { %v4420_v63 = vpop.f32.mrf.mxu0 }
 0x174   :  { %v4422_v57 = vpop.f32.mrf.mxu1 }
 0x175   :  { %v4424_v1 = vpop.f32.mrf.mxu0 }
 0x176   :  { %v4426_v2 = vpop.f32.mrf.mxu1 }
 0x177   :  { %v4428_v17 = vpop.f32.mrf.mxu0 }
 0x178   :  { %v4430_v5 = vpop.f32.mrf.mxu1 }
 0x179   :  { %v4432_v7 = vpop.f32.mrf.mxu0 }
 0x17a   :  { %v4434_v9 = vpop.f32.mrf.mxu1 }
 0x17b   :  { %v4436_v3 = vpop.f32.mrf.mxu0 }
 0x17c   :  { %v4438_v11 = vpop.f32.mrf.mxu1 }
 0x17d   :  { %v4440_v12 = vpop.f32.mrf.mxu0 }
 0x17e   :  { %v4442_v34 = vpop.f32.mrf.mxu1 }
 0x17f   :  { %v4444_v14 = vpop.f32.mrf.mxu0 }
 0x180   :  { %v4446_v15 = vpop.f32.mrf.mxu1 }
 0x181   :  { %v4448_v20 = vpop.f32.mrf.mxu0 }
 0x182   :  { %v4450_v18 = vpop.f32.mrf.mxu1 }
 0x183   :  { %v4452_v22 = vpop.f32.mrf.mxu0 }
 0x184   :  { %v4454_v23 = vpop.f32.mrf.mxu1 }
 0x185   :  { %v4456_v42 = vpop.f32.mrf.mxu0 }
 0x186   :  { %v4458_v25 = vpop.f32.mrf.mxu1 }
 0x187   :  { %v4460_v26 = vpop.f32.mrf.mxu0 }
 0x188   :  { %v4462_v29 = vpop.f32.mrf.mxu1 }
 0x189   :  { %v4464_v28 = vpop.f32.mrf.mxu0 }
 0x18a   :  { %v4466_v31 = vpop.f32.mrf.mxu1 }
 0x18b   :  { %4650 = vst [vmem:[#allocation8_spill] sm:$0xff] %v4466_v31  ;;  %v4468_v32 = vpop.f32.mrf.mxu0 }
 0x18c   :  { %v4470_v55 = vpop.f32.mrf.mxu1 }
 0x18d   :  { %4651 = vst [vmem:[#allocation9_spill] sm:$0xff] %v4470_v55  ;;  %v4472_v36 = vpop.f32.mrf.mxu0 }
 0x18e   :  { %v4474_v16 = vpop.f32.mrf.mxu1 }
 0x18f   :  { %4652 = vst [vmem:[#allocation10_spill] sm:$0xff] %v4474_v16  ;;  %v4476_v38 = vpop.f32.mrf.mxu0 }
 0x190   :  { %4653 = vst [vmem:[#allocation11_spill] sm:$0xff] %v4476_v38  ;;  %v4478_v44 = vpop.f32.mrf.mxu1 }
 0x191   :  { %4654 = vst [vmem:[#allocation12_spill] sm:$0xff] %v4478_v44  ;;  %v4480_v40 = vpop.f32.mrf.mxu0 }
 0x192   :  { %4655 = vst [vmem:[#allocation13_spill] sm:$0xff] %v4480_v40  ;;  %v4482_v0 = vpop.f32.mrf.mxu1 }
 0x193   :  { %4656 = vst [vmem:[#allocation14_spill] sm:$0xff] %v4482_v0  ;;  %v4484_v47 = vpop.f32.mrf.mxu0 }
 0x194   :  { %4657 = vst [vmem:[#allocation15_spill] sm:$0xff] %v4484_v47  ;;  %v4486_v37 = vpop.f32.mrf.mxu1  ;;  %v3141_v47 = vadd.f32 %v3140_v33, %v3139_v41 }
 0x195   :  { %4658 = vst [vmem:[#allocation16_spill] sm:$0xff] %v4486_v37  ;;  %v4488_v27 = vpop.f32.mrf.mxu0 }
 0x196   :  { %4659 = vst [vmem:[#allocation17_spill] sm:$0xff] %v4488_v27  ;;  %v4490_v19 = vpop.f32.mrf.mxu1 }
 0x197   :  { %4660 = vst [vmem:[#allocation18_spill] sm:$0xff] %v4490_v19  ;;  %v4492_v8 = vpop.f32.mrf.mxu0 }
 0x198   :  { %4661 = vst [vmem:[#allocation19_spill] sm:$0xff] %v4492_v8  ;;  %v4494_v55 = vpop.f32.mrf.mxu1  ;;  %v3144_v8 = vadd.f32 %v3143_v10, %v3142_v54  ;;  %v3208_v10 = vadd.f32 %v4402_v51, %v4400_v50 }
 0x199   :  { %4662 = vst [vmem:[#allocation20_spill] sm:$0xff] %v4494_v55  ;;  %v4496_v16 = vpop.f32.mrf.mxu0  ;;  %v2237_v55 = vadd.f32 %v3141_v47, %v4349_v30 }
 0x19a   :  { %4663 = vst [vmem:[#allocation21_spill] sm:$0xff] %v4496_v16  ;;  %v4498_v38 = vpop.f32.mrf.mxu1  ;;  %v2240_v41 = vadd.f32 %v3144_v8, %v4352_v39  ;;  %v3150_v39 = vadd.f32 %v4416_v60, %v4412_v58 }
 0x19b   :  { %4664 = vst [vmem:[#allocation22_spill] sm:$0xff] %v4498_v38  ;;  %v4500_v44 = vpop.f32.mrf.mxu0 }
 0x19c   :  { %4665 = vst [vmem:[#allocation23_spill] sm:$0xff] %v4500_v44  ;;  %v4502_v40 = vpop.f32.mrf.mxu1  ;;  %v2248_v58 = vadd.f32 %v3150_v39, %v4358_v59  ;;  %v3156_v59 = vadd.f32 %v4432_v7, %v4428_v17  ;;  %v3159_v17 = vadd.f32 %v4440_v12, %v4436_v3 }
 0x19d   :  { %4666 = vst [vmem:[#allocation24_spill] sm:$0xff] %v4502_v40  ;;  %v4504_v0 = vpop.f32.mrf.mxu0  ;;  %v3205_v40 = vadd.f32 %v4398_v48, %v4394_v46 }
 0x19e   :  { %4667 = vst [vmem:[#allocation25_spill] sm:$0xff] %v4504_v0  ;;  %v4506_v37 = vpop.f32.mrf.mxu1  ;;  %v2337_v0 = vadd.f32 %v3208_v10, %v2240_v41  ;;  %v2261_v3 = vadd.f32 %v3159_v17, %v4367_v24  ;;  %v3165_v24 = vadd.f32 %v4456_v42, %v4452_v22  ;;  %v3168_v22 = vadd.f32 %v4464_v28, %v4460_v26  ;;  %v4675_v17 = vld [vmem:[#allocation11_spill] sm:$0xff] }
 0x19f   :  { %4668 = vst [vmem:[#allocation26_spill] sm:$0xff] %v4506_v37  ;;  %v4508_v27 = vpop.f32.mrf.mxu0  ;;  %v2334_v37 = vadd.f32 %v3205_v40, %v2237_v55 }
 0x1a0   :  { %4669 = vst [vmem:[#allocation27_spill] sm:$0xff] %v4508_v27  ;;  %v4510_v19 = vpop.f32.mrf.mxu1  ;;  %v3147_v27 = vadd.f32 %v4408_v56, %v4404_v53  ;;  %v3211_v56 = vadd.f32 %v4410_v21, %v4406_v43  ;;  %v3214_v43 = vadd.f32 %v4418_v61, %v4414_v6  ;;  %v3217_v6 = vadd.f32 %v4426_v2, %v4422_v57 }
 0x1a1   :  { %4670 = vst [vmem:[#allocation28_spill] sm:$0xff] %v4510_v19  ;;  %v4512_v62 = vpop.f32.mrf.mxu0  ;;  %v3220_v57 = vadd.f32 %v4434_v9, %v4430_v5  ;;  %v3223_v5 = vadd.f32 %v4442_v34, %v4438_v11  ;;  %v3226_v11 = vadd.f32 %v4450_v18, %v4446_v15  ;;  %v3229_v15 = vadd.f32 %v4458_v25, %v4454_v23  ;;  %v4673_v23 = vld [vmem:[#allocation8_spill] sm:$0xff] }
 0x1a2   :  { %4671 = vst [vmem:[#allocation29_spill] sm:$0xff] %v4512_v62  ;;  %v4515_v16 = vpop.f32.mrf.mxu1  ;;  %v2245_v46 = vadd.f32 %v3147_v27, %v4355_v49  ;;  %v3153_v49 = vadd.f32 %v4424_v1, %v4420_v63  ;;  %v2345_v40 = vadd.f32 %v3214_v43, %v2248_v58  ;;  %v2272_v26 = vadd.f32 %v3168_v22, %v4376_v52  ;;  %v4676_v52 = vld [vmem:[#allocation13_spill] sm:$0xff] }
 0x1a3   :  { %4672 = vst [vmem:[#allocation30_spill] sm:$0xff] %v4515_v16  ;;  %v3267_v38 = vpop.f32.mrf.mxu0  ;;  %v2358_v58 = vadd.f32 %v3223_v5, %v2261_v3  ;;  %v3232_v25 = vadd.f32 %v4673_v23, %v4462_v29 }
 0x1a4   :  { %v3331_v44 = vpop.f32.mrf.mxu1  ;;  %v2342_v51 = vadd.f32 %v3211_v56, %v2245_v46  ;;  %v2253_v63 = vadd.f32 %v3153_v49, %v4361_v4  ;;  %v2256_v46 = vadd.f32 %v3156_v59, %v4364_v13  ;;  %v3162_v13 = vadd.f32 %v4448_v20, %v4444_v14 }
 0x1a5   :  { %v3268_v33 = vpop.f32.mrf.mxu0 }
 0x1a6   :  { %v3269_v19 = vadd.f32 %v3268_v33, %v3267_v38  ;;  %v3332_v54 = vpop.f32.mrf.mxu1  ;;  %v2350_v4 = vadd.f32 %v3217_v6, %v2253_v63  ;;  %v2264_v14 = vadd.f32 %v3162_v13, %v4370_v35 }
 0x1a7   :  { %v3270_v30 = vpop.f32.mrf.mxu0  ;;  %v3333_v16 = vadd.f32 %v3332_v54, %v3331_v44 }
 0x1a8   :  { %v2431_v47 = vadd.f32 %v3269_v19, %v2334_v37  ;;  %v3334_v62 = vpop.f32.mrf.mxu1  ;;  %v2361_v35 = vadd.f32 %v3226_v11, %v2264_v14  ;;  %v4684_v11 = vld [vmem:[#allocation19_spill] sm:$0xff] }
 0x1a9   :  { %v3271_v31 = vpop.f32.mrf.mxu0 }
 0x1aa   :  { %v2528_v8 = vadd.f32 %v3333_v16, %v2431_v47  ;;  %v3272_v48 = vadd.f32 %v3271_v31, %v3270_v30  ;;  %v3335_v55 = vpop.f32.mrf.mxu1 }
 0x1ab   :  { %v3273_v53 = vpop.f32.mrf.mxu0  ;;  %v3336_v37 = vadd.f32 %v3335_v55, %v3334_v62 }
 0x1ac   :  { %2590 = vst [vmem:[%s4643_s3] sm:$0xff] %v2528_v8  ;;  %v2434_v19 = vadd.f32 %v3272_v48, %v2337_v0  ;;  %v3337_v50 = vpop.f32.mrf.mxu1 }
 0x1ad   :  { %v3274_v27 = vpop.f32.mrf.mxu0 }
 0x1ae   :  { %v2531_v60 = vadd.f32 %v3336_v37, %v2434_v19  ;;  %v3275_v31 = vadd.f32 %v3274_v27, %v3273_v53  ;;  %v3338_v16 = vpop.f32.mrf.mxu1  ;;  %v2353_v19 = vadd.f32 %v3220_v57, %v2256_v46  ;;  %v2369_v46 = vadd.f32 %v3232_v25, %v2272_v26  ;;  %v4677_v57 = vld [vmem:[#allocation9_spill] sm:$0xff] }
 0x1af   :  { %v3276_v38 = vpop.f32.mrf.mxu0  ;;  %v3339_v21 = vadd.f32 %v3338_v16, %v3337_v50 }
 0x1b0   :  { %2591 = vst [vmem:[%s4643_s3 + $0x8] sm:$0xff] %v2531_v60  ;;  %v2439_v62 = vadd.f32 %v3275_v31, %v2342_v51  ;;  %v3340_v44 = vpop.f32.mrf.mxu1 }
 0x1b1   :  { %v3277_v1 = vpop.f32.mrf.mxu0 }
 0x1b2   :  { %v2536_v0 = vadd.f32 %v3339_v21, %v2439_v62  ;;  %v3278_v41 = vadd.f32 %v3277_v1, %v3276_v38  ;;  %v3341_v33 = vpop.f32.mrf.mxu1 }
 0x1b3   :  { %v3279_v61 = vpop.f32.mrf.mxu0  ;;  %v3342_v10 = vadd.f32 %v3341_v33, %v3340_v44  ;;  %v2269_v44 = vadd.f32 %v3165_v24, %v4373_v45  ;;  %v3171_v45 = vadd.f32 %v4472_v36, %v4468_v32 }
 0x1b4   :  { %2592 = vst [vmem:[%s4643_s3 + $0x10] sm:$0xff] %v2536_v0  ;;  %v2442_v54 = vadd.f32 %v3278_v41, %v2345_v40  ;;  %v3343_v30 = vpop.f32.mrf.mxu1 }
 0x1b5   :  { %v3280_v47 = vpop.f32.mrf.mxu0  ;;  %v2366_v33 = vadd.f32 %v3229_v15, %v2269_v44 }
 0x1b6   :  { %v2539_v7 = vadd.f32 %v3342_v10, %v2442_v54  ;;  %v3281_v39 = vadd.f32 %v3280_v47, %v3279_v61  ;;  %v3344_v8 = vpop.f32.mrf.mxu1  ;;  %v4674_v47 = vld [vmem:[#allocation2_spill] sm:$0xff] }
 0x1b7   :  { %v3282_v48 = vpop.f32.mrf.mxu0  ;;  %v3345_v55 = vadd.f32 %v3344_v8, %v3343_v30  ;;  %v2277_v32 = vadd.f32 %v3171_v45, %v4674_v47  ;;  %v4689_v45 = vld [vmem:[#allocation5_spill] sm:$0xff] }
 0x1b8   :  { %2593 = vst [vmem:[%s4643_s3 + $0x18] sm:$0xff] %v2539_v7  ;;  %v2447_v2 = vadd.f32 %v3281_v39, %v2350_v4  ;;  %v3346_v53 = vpop.f32.mrf.mxu1  ;;  %v3174_v7 = vadd.f32 %v4676_v52, %v4675_v17 }
 0x1b9   :  { %v3283_v56 = vpop.f32.mrf.mxu0 }
 0x1ba   :  { %v2544_v12 = vadd.f32 %v3345_v55, %v2447_v2  ;;  %v3284_v37 = vadd.f32 %v3283_v56, %v3282_v48  ;;  %v3347_v50 = vpop.f32.mrf.mxu1  ;;  %v4678_v2 = vld [vmem:[#allocation10_spill] sm:$0xff] }
 0x1bb   :  { %v3285_v49 = vpop.f32.mrf.mxu0  ;;  %v3348_v27 = vadd.f32 %v3347_v50, %v3346_v53  ;;  %v3235_v29 = vadd.f32 %v4678_v2, %v4677_v57  ;;  %v4680_v50 = vld [vmem:[#allocation15_spill] sm:$0xff] }
 0x1bc   :  { %2594 = vst [vmem:[%s4643_s3 + $0x20] sm:$0xff] %v2544_v12  ;;  %v2450_v9 = vadd.f32 %v3284_v37, %v2353_v19  ;;  %v3349_v51 = vpop.f32.mrf.mxu1  ;;  %v4679_v12 = vld [vmem:[#allocation3_spill] sm:$0xff] }
 0x1bd   :  { %v3286_v20 = vpop.f32.mrf.mxu0  ;;  %v2374_v19 = vadd.f32 %v3235_v29, %v2277_v32  ;;  %v2280_v37 = vadd.f32 %v3174_v7, %v4679_v12  ;;  %v4694_v7 = vld [vmem:[#allocation6_spill] sm:$0xff] }
 0x1be   :  { %v2547_v60 = vadd.f32 %v3348_v27, %v2450_v9  ;;  %v3287_v31 = vadd.f32 %v3286_v20, %v3285_v49  ;;  %v3350_v16 = vpop.f32.mrf.mxu1  ;;  %v4681_v49 = vld [vmem:[#allocation17_spill] sm:$0xff]  ;;  %v4682_v20 = vld [vmem:[#allocation12_spill] sm:$0xff] }
 0x1bf   :  { %v3288_v34 = vpop.f32.mrf.mxu0  ;;  %v3351_v43 = vadd.f32 %v3350_v16, %v3349_v51  ;;  %v3177_v5 = vadd.f32 %v4681_v49, %v4680_v50 }
 0x1c0   :  { %2595 = vst [vmem:[%s4643_s3 + $0x28] sm:$0xff] %v2547_v60  ;;  %v2455_v38 = vadd.f32 %v3287_v31, %v2358_v58  ;;  %v3352_v62 = vpop.f32.mrf.mxu1  ;;  %v4683_v58 = vld [vmem:[#allocation14_spill] sm:$0xff] }
 0x1c1   :  { %v3289_v21 = vpop.f32.mrf.mxu0  ;;  %v3238_v24 = vadd.f32 %v4683_v58, %v4682_v20  ;;  %v4700_v58 = vld [vmem:[#allocation28_spill] sm:$0xff] }
 0x1c2   :  { %v2552_v42 = vadd.f32 %v3351_v43, %v2455_v38  ;;  %v3290_v63 = vadd.f32 %v3289_v21, %v3288_v34  ;;  %v3353_v1 = vpop.f32.mrf.mxu1  ;;  %v4685_v34 = vld [vmem:[#allocation21_spill] sm:$0xff] }
 0x1c3   :  { %v3291_v40 = vpop.f32.mrf.mxu0  ;;  %v3354_v59 = vadd.f32 %v3353_v1, %v3352_v62  ;;  %v3180_v38 = vadd.f32 %v4685_v34, %v4684_v11  ;;  %v2377_v62 = vadd.f32 %v3238_v24, %v2280_v37  ;;  %v4687_v1 = vld [vmem:[#allocation16_spill] sm:$0xff]  ;;  %v4701_v24 = vld [vmem:[#allocation30_spill] sm:$0xff] }
 0x1c4   :  { %2596 = vst [vmem:[%s4643_s3 + $0x30] sm:$0xff] %v2552_v42  ;;  %v2458_v18 = vadd.f32 %v3290_v63, %v2361_v35  ;;  %v3355_v0 = vpop.f32.mrf.mxu1  ;;  %v4686_v35 = vld [vmem:[#allocation4_spill] sm:$0xff] }
 0x1c5   :  { %v3292_v41 = vpop.f32.mrf.mxu0  ;;  %v2285_v21 = vadd.f32 %v3177_v5, %v4686_v35  ;;  %v4699_v5 = vld [vmem:[#allocation7_spill] sm:$0xff] }
 0x1c6   :  { %v2555_v28 = vadd.f32 %v3354_v59, %v2458_v18  ;;  %v3293_v6 = vadd.f32 %v3292_v41, %v3291_v40  ;;  %v3356_v61 = vpop.f32.mrf.mxu1  ;;  %v4688_v40 = vld [vmem:[#allocation18_spill] sm:$0xff]  ;;  %v2288_v41 = vadd.f32 %v3180_v38, %v4689_v45 }
 0x1c7   :  { %v3294_v54 = vpop.f32.mrf.mxu0  ;;  %v3357_v30 = vadd.f32 %v3356_v61, %v3355_v0  ;;  %v3241_v15 = vadd.f32 %v4688_v40, %v4687_v1 }
 0x1c8   :  { %2597 = vst [vmem:[%s4643_s3 + $0x38] sm:$0xff] %v2555_v28  ;;  %v2463_v10 = vadd.f32 %v3293_v6, %v2366_v33  ;;  %v3358_v4 = vpop.f32.mrf.mxu1  ;;  %v4690_v28 = vld [vmem:[#allocation23_spill] sm:$0xff]  ;;  %v4691_v6 = vld [vmem:[#allocation25_spill] sm:$0xff] }
 0x1c9   :  { %v3295_v36 = vpop.f32.mrf.mxu0  ;;  %v2382_v26 = vadd.f32 %v3241_v15, %v2285_v21  ;;  %v3183_v61 = vadd.f32 %v4691_v6, %v4690_v28 }
 0x1ca   :  { %v2560_v39 = vadd.f32 %v3357_v30, %v2463_v10  ;;  %v3296_v8 = vadd.f32 %v3295_v36, %v3294_v54  ;;  %v3359_v48 = vpop.f32.mrf.mxu1  ;;  %v4692_v10 = vld [vmem:[#allocation20_spill] sm:$0xff]  ;;  %v4693_v30 = vld [vmem:[#allocation22_spill] sm:$0xff] }
 0x1cb   :  { %v3297_v55 = vpop.f32.mrf.mxu0  ;;  %v3360_v13 = vadd.f32 %v3359_v48, %v3358_v4  ;;  %v3244_v4 = vadd.f32 %v4693_v30, %v4692_v10  ;;  %v4696_v48 = vld [vmem:[#allocation29_spill] sm:$0xff] }
 0x1cc   :  { %2598 = vst [vmem:[%s4643_s3 + $0x40] sm:$0xff] %v2560_v39  ;;  %v2466_v53 = vadd.f32 %v3296_v8, %v2369_v46  ;;  %v3361_v56 = vpop.f32.mrf.mxu1  ;;  %v2293_v39 = vadd.f32 %v3183_v61, %v4694_v7  ;;  %v4695_v8 = vld [vmem:[#allocation27_spill] sm:$0xff] }
 0x1cd   :  { %v3298_v3 = vpop.f32.mrf.mxu0  ;;  %v2385_v17 = vadd.f32 %v3244_v4, %v2288_v41  ;;  %v3186_v57 = vadd.f32 %v4696_v48, %v4695_v8 }
 0x1ce   :  { %v2563_v9 = vadd.f32 %v3360_v13, %v2466_v53  ;;  %v3299_v27 = vadd.f32 %v3298_v3, %v3297_v55  ;;  %v3362_v51 = vpop.f32.mrf.mxu1  ;;  %v4697_v13 = vld [vmem:[#allocation24_spill] sm:$0xff] }
 0x1cf   :  { %v3300_v14 = vpop.f32.mrf.mxu0  ;;  %v3363_v31 = vadd.f32 %v3362_v51, %v3361_v56  ;;  %v4698_v56 = vld [vmem:[#allocation26_spill] sm:$0xff] }
 0x1d0   :  { %2599 = vst [vmem:[%s4643_s3 + $0x48] sm:$0xff] %v2563_v9  ;;  %v2471_v60 = vadd.f32 %v3299_v27, %v2374_v19  ;;  %v3364_v16 = vpop.f32.mrf.mxu1  ;;  %v3247_v19 = vadd.f32 %v4698_v56, %v4697_v13  ;;  %v2296_v9 = vadd.f32 %v3186_v57, %v4699_v5 }
 0x1d1   :  { %v3301_v43 = vpop.f32.mrf.mxu0 }
 0x1d2   :  { %v2568_v44 = vadd.f32 %v3363_v31, %v2471_v60  ;;  %v3302_v22 = vadd.f32 %v3301_v43, %v3300_v14  ;;  %v3365_v42 = vpop.f32.mrf.mxu1  ;;  %v2390_v49 = vadd.f32 %v3247_v19, %v2293_v39  ;;  %v3250_v60 = vadd.f32 %v4701_v24, %v4700_v58 }
 0x1d3   :  { %v3303_v63 = vpop.f32.mrf.mxu0  ;;  %v3366_v59 = vadd.f32 %v3365_v42, %v3364_v16 }
 0x1d4   :  { %2600 = vst [vmem:[%s4643_s3 + $0x50] sm:$0xff] %v2568_v44  ;;  %v2474_v18 = vadd.f32 %v3302_v22, %v2377_v62  ;;  %v3367_v0 = vpop.f32.mrf.mxu1  ;;  %v2393_v38 = vadd.f32 %v3250_v60, %v2296_v9 }
 0x1d5   :  { %v3304_v33 = vpop.f32.mrf.mxu0 }
 0x1d6   :  { %v2571_v54 = vadd.f32 %v3366_v59, %v2474_v18  ;;  %v3305_v23 = vadd.f32 %v3304_v33, %v3303_v63  ;;  %v3368_v25 = vpop.f32.mrf.mxu1 }
 0x1d7   :  { %v3306_v47 = vpop.f32.mrf.mxu0  ;;  %v3369_v36 = vadd.f32 %v3368_v25, %v3367_v0 }
 0x1d8   :  { %2601 = vst [vmem:[%s4643_s3 + $0x58] sm:$0xff] %v2571_v54  ;;  %v2479_v32 = vadd.f32 %v3305_v23, %v2382_v26  ;;  %v3370_v46 = vpop.f32.mrf.mxu1 }
 0x1d9   :  { %v3307_v52 = vpop.f32.mrf.mxu0 }
 0x1da   :  { %v2576_v2 = vadd.f32 %v3369_v36, %v2479_v32  ;;  %v3308_v29 = vadd.f32 %v3307_v52, %v3306_v47  ;;  %v3371_v55 = vpop.f32.mrf.mxu1 }
 0x1db   :  { %v3309_v53 = vpop.f32.mrf.mxu0  ;;  %v3372_v12 = vadd.f32 %v3371_v55, %v3370_v46 }
 0x1dc   :  { %2602 = vst [vmem:[%s4643_s3 + $0x60] sm:$0xff] %v2576_v2  ;;  %v2482_v3 = vadd.f32 %v3308_v29, %v2385_v17  ;;  %v3373_v37 = vpop.f32.mrf.mxu1 }
 0x1dd   :  { %v3310_v50 = vpop.f32.mrf.mxu0 }
 0x1de   :  { %v2579_v27 = vadd.f32 %v3372_v12, %v2482_v3  ;;  %v3311_v51 = vadd.f32 %v3310_v50, %v3309_v53  ;;  %v3374_v14 = vpop.f32.mrf.mxu1 }
 0x1df   :  { %v3312_v20 = vpop.f32.mrf.mxu0  ;;  %v3375_v16 = vadd.f32 %v3374_v14, %v3373_v37 }
 0x1e0   :  { %2603 = vst [vmem:[%s4643_s3 + $0x68] sm:$0xff] %v2579_v27  ;;  %v2487_v31 = vadd.f32 %v3311_v51, %v2390_v49  ;;  %v3376_v11 = vpop.f32.mrf.mxu1 }
 0x1e1   :  { %v3313_v34 = vpop.f32.mrf.mxu0 }
 0x1e2   :  { %v2584_v43 = vadd.f32 %v3375_v16, %v2487_v31  ;;  %v3314_v62 = vadd.f32 %v3313_v34, %v3312_v20  ;;  %v3377_v35 = vpop.f32.mrf.mxu1 }
 0x1e3   :  { %v3378_v44 = vadd.f32 %v3377_v35, %v3376_v11 }
 0x1e4   :  { %2604 = vst [vmem:[%s4643_s3 + $0x70] sm:$0xff] %v2584_v43  ;;  %v2490_v21 = vadd.f32 %v3314_v62, %v2393_v38 }
 0x1e6   :  { %v2587_v22 = vadd.f32 %v3378_v44, %v2490_v21 }
 0x1e8   :  { %2605 = vst [vmem:[%s4643_s3 + $0x78] sm:$0xff] %v2587_v22 }

// kernel: _lambda_.16
= control target key start
LH: loop header
LB: loop body
LE: loop exit
PB: predicated region body
PF: predicated region fallthrough
CT: control target
= control target key end

     0   :  { %s933_s12 = smov 0   ;;  %s935_s13 = smov 0   ;;  %s1049_s0 = inlined_call_operand.vmem [shape: bf16[4,128,256], index: 0, kind: input, shape index: {}]   ;;  %s1050_s1 = inlined_call_operand.vmem [shape: bf16[4,256,128], index: 1, kind: input, shape index: {}]   ;;  %s1051_s2 = inlined_call_operand.vmem [shape: f32[1,128], index: 2, kind: input, shape index: {}]   ;;  %s1052_s3 = inlined_call_operand.vmem [shape: f32[4,128,128], index: 3, kind: output, shape index: {}]  }
   0x1   :  { %s937_s14 = smov 0  }
   0x2 LB: > { %s25_s15 = sadd.s32 1, %s907_s13  ;;  %p700_p0 = scmp.ge.s32.totalorder %s911_s14, 1  ;;  %s911_s14 = sphi %s937_s14, %s13_s14   ;;  %s907_s13 = sphi %s935_s13, %s1054_s13   ;;  %s903_s12 = sphi %s933_s12, %s1053_s12  }
   0x3   : > { %p27_p1 = scmp.ge.s32.totalorder %s25_s15, 4  ;;  %p169_p2 = scmp.lt.s32.totalorder %s911_s14, 5 }
   0x5   : > { %s1056_s15 = smov (%p27_p1, %s25_s15), 0  ;;  %p170_p3 = pnand %p700_p0, %p169_p2 }
   0x6   : > { %p208_p4 = scmp.lt.s32.totalorder (!%p170_p3), %s903_s12, 3 }
   0x7   : > { %173 = sbr.rel (%p170_p3) target bundleno = 278 (0x116), region = 32 }
   0xc   : > { %s1058_s12 = smov (!%p208_p4, %s903_s12), 3  ;;  %v1000_v34 = vld [vmem:[%s1051_s2] ss:$0 sm:$0xff] }
   0xd   : > { %s951_s16 = sshll.u32 %s1058_s12, 7 }
   0xe   : > { %s957_s19 = scalar_lea.vmem %s1050_s1, %s951_s16  ;;  %s972_s22 = scalar_lea.vmem %s1049_s0, %s951_s16 }
   0xf   : > { %v849_v0 = vld [vmem:[%s957_s19 + $0x78] sm:$0xff]   ;;  %v851_v2 = vld [vmem:[%s957_s19 + $0x70] sm:$0xff]   ;;  %v853_v4 = vld [vmem:[%s957_s19 + $0x68] sm:$0xff]   ;;  %s1008_s27 = scalar_lea.vmem %s1052_s3, %s951_s16 }
  0x10   : > { %v850_v1 = vld [vmem:[%s957_s19 + $0x38] sm:$0xff]   ;;  %745 = vmatprep.subr.bf16.mxu0 %v849_v0  ;;  %809 = vmatprep.subr.bf16.mxu1 %v849_v0  ;;  %v852_v3 = vld [vmem:[%s957_s19 + $0x30] sm:$0xff]   ;;  %v854_v5 = vld [vmem:[%s957_s19 + $0x28] sm:$0xff]  }
  0x11   : > { %746 = vmatpush3.bf16.msra.mxu0 %v850_v1  ;;  %817 = vmatpush3.bf16.msra.mxu1 %v850_v1  ;;  %v855_v6 = vld [vmem:[%s957_s19 + $0x60] sm:$0xff]   ;;  %v857_v8 = vld [vmem:[%s957_s19 + $0x58] sm:$0xff]   ;;  %v859_v10 = vld [vmem:[%s957_s19 + $0x50] sm:$0xff]  }
  0x12   : > { %747 = vmatprep.subr.bf16.mxu0 %v851_v2  ;;  %810 = vmatprep.subr.bf16.mxu1 %v851_v2  ;;  %v856_v7 = vld [vmem:[%s957_s19 + $0x20] sm:$0xff]   ;;  %v858_v9 = vld [vmem:[%s957_s19 + $0x18] sm:$0xff]   ;;  %v860_v13 = vld [vmem:[%s957_s19 + $0x10] sm:$0xff]  }
  0x13   : > { %v867_v11 = vld [vmem:[%s972_s22 + $0x4] ss:$8 sps:$4 sm:$0xff]   ;;  %v865_v18 = vld [vmem:[%s972_s22] ss:$8 sps:$4 sm:$0xff]   ;;  %v871_v20 = vld [vmem:[%s972_s22 + $0x14] ss:$8 sps:$4 sm:$0xff]  }
  0x14   : > { %v870_v12 = vld [vmem:[%s972_s22 + $0x44] ss:$8 sps:$4 sm:$0xff]   ;;  %497 = vmatprep.mubr.bf16.mxu0 %v867_v11  ;;  %v868_v19 = vld [vmem:[%s972_s22 + $0x40] ss:$8 sps:$4 sm:$0xff]   ;;  %v873_v21 = vld [vmem:[%s972_s22 + $0x54] ss:$8 sps:$4 sm:$0xff]  }
  0x15   : > { %748 = vmatpush3.bf16.msra.mxu0 %v852_v3  ;;  %818 = vmatpush3.bf16.msra.mxu1 %v852_v3  ;;  %v861_v14 = vld [vmem:[%s957_s19 + $0x48] sm:$0xff]   ;;  %v863_v16 = vld [vmem:[%s957_s19 + $0x40] sm:$0xff]   ;;  %v875_v22 = vld [vmem:[%s972_s22 + $0x10] ss:$8 sps:$4 sm:$0xff]  }
  0x16   : > { %749 = vmatprep.subr.bf16.mxu0 %v853_v4  ;;  %811 = vmatprep.subr.bf16.mxu1 %v853_v4  ;;  %v862_v15 = vld [vmem:[%s957_s19 + $0x8] sm:$0xff]   ;;  %v864_v17 = vld [vmem:[%s957_s19] sm:$0xff]   ;;  %v876_v23 = vld [vmem:[%s972_s22 + $0x50] ss:$8 sps:$4 sm:$0xff]  }
  0x17   : > { %529 = vmatprep.mubr.bf16.mxu1 %v870_v12  ;;  %v877_v24 = vld [vmem:[%s972_s22 + $0x24] ss:$8 sps:$4 sm:$0xff]   ;;  %v881_v26 = vld [vmem:[%s972_s22 + $0x20] ss:$8 sps:$4 sm:$0xff]   ;;  %v883_v28 = vld [vmem:[%s972_s22 + $0x34] ss:$8 sps:$4 sm:$0xff]  }
  0x18   : > { %v879_v25 = vld [vmem:[%s972_s22 + $0x64] ss:$8 sps:$4 sm:$0xff]   ;;  %v882_v27 = vld [vmem:[%s972_s22 + $0x60] ss:$8 sps:$4 sm:$0xff]   ;;  %v885_v29 = vld [vmem:[%s972_s22 + $0x74] ss:$8 sps:$4 sm:$0xff]  }
  0x19   : > { %750 = vmatpush3.bf16.msra.mxu0 %v854_v5  ;;  %819 = vmatpush3.bf16.msra.mxu1 %v854_v5  ;;  %v887_v30 = vld [vmem:[%s972_s22 + $0x30] ss:$8 sps:$4 sm:$0xff]  }
  0x1a   : > { %751 = vmatprep.subr.bf16.mxu0 %v855_v6  ;;  %812 = vmatprep.subr.bf16.mxu1 %v855_v6  ;;  %v888_v31 = vld [vmem:[%s972_s22 + $0x70] ss:$8 sps:$4 sm:$0xff]  }
  0x1d   : > { %752 = vmatpush3.bf16.msra.mxu0 %v856_v7  ;;  %820 = vmatpush3.bf16.msra.mxu1 %v856_v7 }
  0x1e   : > { %753 = vmatprep.subr.bf16.mxu0 %v857_v8  ;;  %813 = vmatprep.subr.bf16.mxu1 %v857_v8 }
  0x21   : > { %754 = vmatpush3.bf16.msra.mxu0 %v858_v9  ;;  %821 = vmatpush3.bf16.msra.mxu1 %v858_v9 }
  0x22   : > { %755 = vmatprep.subr.bf16.mxu0 %v859_v10  ;;  %814 = vmatprep.subr.bf16.mxu1 %v859_v10 }
  0x25   : > { %756 = vmatpush3.bf16.msra.mxu0 %v860_v13  ;;  %822 = vmatpush3.bf16.msra.mxu1 %v860_v13 }
  0x26   : > { %757 = vmatprep.subr.bf16.mxu0 %v861_v14  ;;  %815 = vmatprep.subr.bf16.mxu1 %v861_v14 }
  0x29   : > { %758 = vmatpush3.bf16.msra.mxu0 %v862_v15  ;;  %823 = vmatpush3.bf16.msra.mxu1 %v862_v15 }
  0x2a   : > { %759 = vmatprep.subr.bf16.mxu0 %v863_v16  ;;  %816 = vmatprep.subr.bf16.mxu1 %v863_v16 }
  0x2d   : > { %760 = vmatpush3.bf16.msra.mxu0 %v864_v17  ;;  %824 = vmatpush3.bf16.msra.mxu1 %v864_v17 }
  0x30   : > { %498 = vmatmul.mubr.bf16.vlgmr.msra.gmra.mxu0 %v865_v18  ;;  %530 = vmatmul.mubr.bf16.vlgmr.msra.gmra.mxu1 %v868_v19 }
  0x31   : > { %505 = vmatprep.mubr.bf16.mxu0 %v871_v20  ;;  %537 = vmatprep.mubr.bf16.mxu1 %v873_v21 }
  0x38   : > { %506 = vmatmul.mubr.bf16.gmra.mxu0 %v875_v22  ;;  %538 = vmatmul.mubr.bf16.gmra.mxu1 %v876_v23 }
  0x39   : > { %513 = vmatprep.mubr.bf16.mxu0 %v877_v24  ;;  %545 = vmatprep.mubr.bf16.mxu1 %v879_v25 }
  0x40   : > { %514 = vmatmul.mubr.bf16.gmra.mxu0 %v881_v26  ;;  %546 = vmatmul.mubr.bf16.gmra.mxu1 %v882_v27 }
  0x41   : > { %521 = vmatprep.mubr.bf16.mxu0 %v883_v28  ;;  %553 = vmatprep.mubr.bf16.mxu1 %v885_v29 }
  0x48   : > { %522 = vmatmul.mubr.bf16.gmra.mxu0 %v887_v30  ;;  %554 = vmatmul.mubr.bf16.gmra.mxu1 %v888_v31 }
  0xf0   : > { %v761_v32 = vpop.f32.mrf.mxu0  ;;  %v785_v33 = vpop.f32.mrf.mxu1 }
  0xf2   : > { %v762_v35 = vpop.f32.mrf.mxu0  ;;  %v786_v36 = vpop.f32.mrf.mxu1 }
  0xf3   : > { %v763_v37 = vadd.f32 %v762_v35, %v761_v32  ;;  %v787_v38 = vadd.f32 %v786_v36, %v785_v33 }
  0xf4   : > { %v764_v39 = vpop.f32.mrf.mxu0  ;;  %v788_v40 = vpop.f32.mrf.mxu1 }
  0xf5   : > { %v500_v41 = vadd.f32 %v763_v37, %v1000_v34  ;;  %v532_v42 = vadd.f32 %v787_v38, %v1000_v34 }
  0xf6   : > { %v765_v43 = vpop.f32.mrf.mxu0  ;;  %v789_v44 = vpop.f32.mrf.mxu1 }
  0xf7   : > { %v562_v45 = vmax.f32 %v500_v41, 0.0  ;;  %v570_v46 = vmax.f32 %v532_v42, 0.0  ;;  %v766_v47 = vadd.f32 %v765_v43, %v764_v39  ;;  %v790_v48 = vadd.f32 %v789_v44, %v788_v40 }
  0xf8   : > { %v767_v49 = vpop.f32.mrf.mxu0  ;;  %v791_v50 = vpop.f32.mrf.mxu1 }
  0xf9   : > { %578 = vst [vmem:[%s1008_s27] sm:$0xff] %v562_v45  ;;  %586 = vst [vmem:[%s1008_s27 + $0x40] sm:$0xff] %v570_v46  ;;  %v503_v51 = vadd.f32 %v766_v47, %v1000_v34  ;;  %v535_v52 = vadd.f32 %v790_v48, %v1000_v34 }
  0xfa   : > { %v768_v53 = vpop.f32.mrf.mxu0  ;;  %v792_v54 = vpop.f32.mrf.mxu1 }
  0xfb   : > { %v563_v55 = vmax.f32 %v503_v51, 0.0  ;;  %v571_v56 = vmax.f32 %v535_v52, 0.0  ;;  %v769_v57 = vadd.f32 %v768_v53, %v767_v49  ;;  %v793_v58 = vadd.f32 %v792_v54, %v791_v50 }
  0xfc   : > { %v770_v59 = vpop.f32.mrf.mxu0  ;;  %v794_v60 = vpop.f32.mrf.mxu1 }
  0xfd   : > { %579 = vst [vmem:[%s1008_s27 + $0x8] sm:$0xff] %v563_v55  ;;  %587 = vst [vmem:[%s1008_s27 + $0x48] sm:$0xff] %v571_v56  ;;  %v508_v61 = vadd.f32 %v769_v57, %v1000_v34  ;;  %v540_v62 = vadd.f32 %v793_v58, %v1000_v34 }
  0xfe   : > { %v771_v63 = vpop.f32.mrf.mxu0  ;;  %v795_v0 = vpop.f32.mrf.mxu1 }
  0xff   : > { %v564_v1 = vmax.f32 %v508_v61, 0.0  ;;  %v572_v2 = vmax.f32 %v540_v62, 0.0  ;;  %v772_v3 = vadd.f32 %v771_v63, %v770_v59  ;;  %v796_v4 = vadd.f32 %v795_v0, %v794_v60 }
 0x100   : > { %v773_v5 = vpop.f32.mrf.mxu0  ;;  %v797_v6 = vpop.f32.mrf.mxu1 }
 0x101   : > { %580 = vst [vmem:[%s1008_s27 + $0x10] sm:$0xff] %v564_v1  ;;  %588 = vst [vmem:[%s1008_s27 + $0x50] sm:$0xff] %v572_v2  ;;  %v511_v7 = vadd.f32 %v772_v3, %v1000_v34  ;;  %v543_v8 = vadd.f32 %v796_v4, %v1000_v34 }
 0x102   : > { %v774_v9 = vpop.f32.mrf.mxu0  ;;  %v798_v10 = vpop.f32.mrf.mxu1 }
 0x103   : > { %v565_v11 = vmax.f32 %v511_v7, 0.0  ;;  %v573_v12 = vmax.f32 %v543_v8, 0.0  ;;  %v775_v13 = vadd.f32 %v774_v9, %v773_v5  ;;  %v799_v14 = vadd.f32 %v798_v10, %v797_v6 }
 0x104   : > { %v776_v15 = vpop.f32.mrf.mxu0  ;;  %v800_v16 = vpop.f32.mrf.mxu1 }
 0x105   : > { %581 = vst [vmem:[%s1008_s27 + $0x18] sm:$0xff] %v565_v11  ;;  %589 = vst [vmem:[%s1008_s27 + $0x58] sm:$0xff] %v573_v12  ;;  %v516_v17 = vadd.f32 %v775_v13, %v1000_v34  ;;  %v548_v18 = vadd.f32 %v799_v14, %v1000_v34 }
 0x106   : > { %v777_v19 = vpop.f32.mrf.mxu0  ;;  %v801_v20 = vpop.f32.mrf.mxu1 }
 0x107   : > { %v566_v21 = vmax.f32 %v516_v17, 0.0  ;;  %v574_v22 = vmax.f32 %v548_v18, 0.0  ;;  %v778_v23 = vadd.f32 %v777_v19, %v776_v15  ;;  %v802_v24 = vadd.f32 %v801_v20, %v800_v16 }
 0x108   : > { %v779_v25 = vpop.f32.mrf.mxu0  ;;  %v803_v26 = vpop.f32.mrf.mxu1 }
 0x109   : > { %582 = vst [vmem:[%s1008_s27 + $0x20] sm:$0xff] %v566_v21  ;;  %590 = vst [vmem:[%s1008_s27 + $0x60] sm:$0xff] %v574_v22  ;;  %v519_v27 = vadd.f32 %v778_v23, %v1000_v34  ;;  %v551_v28 = vadd.f32 %v802_v24, %v1000_v34 }
 0x10a   : > { %v780_v29 = vpop.f32.mrf.mxu0  ;;  %v804_v30 = vpop.f32.mrf.mxu1 }
 0x10b   : > { %v567_v31 = vmax.f32 %v519_v27, 0.0  ;;  %v575_v32 = vmax.f32 %v551_v28, 0.0  ;;  %v781_v33 = vadd.f32 %v780_v29, %v779_v25  ;;  %v805_v35 = vadd.f32 %v804_v30, %v803_v26 }
 0x10c   : > { %v782_v36 = vpop.f32.mrf.mxu0  ;;  %v806_v37 = vpop.f32.mrf.mxu1 }
 0x10d   : > { %583 = vst [vmem:[%s1008_s27 + $0x28] sm:$0xff] %v567_v31  ;;  %591 = vst [vmem:[%s1008_s27 + $0x68] sm:$0xff] %v575_v32  ;;  %v524_v38 = vadd.f32 %v781_v33, %v1000_v34  ;;  %v556_v39 = vadd.f32 %v805_v35, %v1000_v34 }
 0x10e   : > { %v783_v40 = vpop.f32.mrf.mxu0  ;;  %v807_v41 = vpop.f32.mrf.mxu1 }
 0x10f   : > { %v568_v42 = vmax.f32 %v524_v38, 0.0  ;;  %v576_v43 = vmax.f32 %v556_v39, 0.0  ;;  %v784_v44 = vadd.f32 %v783_v40, %v782_v36  ;;  %v808_v45 = vadd.f32 %v807_v41, %v806_v37 }
 0x111   : > { %584 = vst [vmem:[%s1008_s27 + $0x30] sm:$0xff] %v568_v42  ;;  %592 = vst [vmem:[%s1008_s27 + $0x70] sm:$0xff] %v576_v43  ;;  %v527_v46 = vadd.f32 %v784_v44, %v1000_v34  ;;  %v559_v47 = vadd.f32 %v808_v45, %v1000_v34 }
 0x113   : > { %v569_v48 = vmax.f32 %v527_v46, 0.0  ;;  %v577_v49 = vmax.f32 %v559_v47, 0.0 }
 0x115   : > { %585 = vst [vmem:[%s1008_s27 + $0x38] sm:$0xff] %v569_v48  ;;  %593 = vst [vmem:[%s1008_s27 + $0x78] sm:$0xff] %v577_v49 }
 0x116 PF: > { %s13_s14 = sadd.s32 1, %s911_s14   ;;  %s1053_s12 = smov %s907_s13 }
 0x117   : > { %p10_p5 = scmp.ge.s32.totalorder %s13_s14, 6   ;;  %s1054_s13 = smov %s1056_s15 }
 0x119   :  { %12 = sbr.rel (!%p10_p5) target bundleno = 2 (0x2), region = 65 }

// kernel: _lambda_.17
= control target key start
LH: loop header
LB: loop body
LE: loop exit
PB: predicated region body
PF: predicated region fallthrough
CT: control target
= control target key end

     0   :  { %s1503_s12 = smov 0   ;;  %s1505_s13 = smov 0   ;;  %s1723_s0 = inlined_call_operand.vmem [shape: bf16[4,512,128], index: 0, kind: input, shape index: {}]   ;;  %s1724_s1 = inlined_call_operand.vmem [shape: bf16[4,128,128], index: 1, kind: input, shape index: {}]   ;;  %s1725_s2 = inlined_call_operand.vmem [shape: f32[1,128], index: 2, kind: input, shape index: {}]   ;;  %s1726_s3 = inlined_call_operand.vmem [shape: f32[4,512,128], index: 3, kind: output, shape index: {}]  }
   0x1   :  { %s1507_s14 = smov 0  }
   0x2 LB: > { %s25_s15 = sadd.s32 1, %s1477_s13  ;;  %p1078_p0 = scmp.ge.s32.totalorder %s1481_s14, 1  ;;  %s1481_s14 = sphi %s1507_s14, %s13_s14   ;;  %s1477_s13 = sphi %s1505_s13, %s1728_s13   ;;  %s1473_s12 = sphi %s1503_s12, %s1727_s12  }
   0x3   : > { %p27_p1 = scmp.ge.s32.totalorder %s25_s15, 4  ;;  %p168_p2 = scmp.lt.s32.totalorder %s1481_s14, 5 }
   0x5   : > { %s1730_s15 = smov (%p27_p1, %s25_s15), 0  ;;  %p169_p3 = pnand %p1078_p0, %p168_p2 }
   0x6   : > { %p206_p4 = scmp.lt.s32.totalorder (!%p169_p3), %s1473_s12, 3 }
   0x7   : > { %172 = sbr.rel (%p169_p3) target bundleno = 321 (0x141), region = 32 }
   0xc   : > { %s1732_s12 = smov (!%p206_p4, %s1473_s12), 3  ;;  %v1578_v40 = vld [vmem:[%s1725_s2] ss:$0 sm:$0xff] }
   0xd   : > { %s1129_s16 = sshll.u32 %s1732_s12, 6  ;;  %s1128_s20 = sshll.u32 %s1732_s12, 8 }
   0xe   : > { %s1527_s19 = scalar_lea.vmem %s1724_s1, %s1129_s16  ;;  %s1536_s23 = scalar_lea.vmem %s1723_s0, %s1128_s20 }
   0xf   : > { %v1291_v0 = vld [vmem:[%s1527_s19 + $0x38] sm:$0xff]   ;;  %v1292_v1 = vld [vmem:[%s1527_s19 + $0x30] sm:$0xff]   ;;  %v1293_v2 = vld [vmem:[%s1527_s19 + $0x28] sm:$0xff]   ;;  %s1130_s26 = sshll.u32 %s1732_s12, 9 }
  0x10   : > { %1171 = vmatprep.subr.bf16.mxu0 %v1291_v0  ;;  %1251 = vmatprep.subr.bf16.mxu1 %v1291_v0  ;;  %v1294_v3 = vld [vmem:[%s1527_s19 + $0x20] sm:$0xff]   ;;  %v1295_v6 = vld [vmem:[%s1527_s19 + $0x18] sm:$0xff]   ;;  %v1296_v7 = vld [vmem:[%s1527_s19 + $0x10] sm:$0xff]   ;;  %s1598_s29 = scalar_lea.vmem %s1726_s3, %s1130_s26 }
  0x11   : > { %1172 = vmatpush3.bf16.msra.mxu0 %v1291_v0  ;;  %1259 = vmatpush3.bf16.msra.mxu1 %v1291_v0  ;;  %v1299_v4 = vld [vmem:[%s1536_s23] sm:$0xff]   ;;  %v1297_v8 = vld [vmem:[%s1527_s19 + $0x8] sm:$0xff]   ;;  %v1303_v12 = vld [vmem:[%s1536_s23 + $0x10] sm:$0xff]  }
  0x12   : > { %1173 = vmatprep.subr.bf16.mxu0 %v1292_v1  ;;  %1252 = vmatprep.subr.bf16.mxu1 %v1292_v1  ;;  %v1300_v5 = vld [vmem:[%s1536_s23 + $0x80] sm:$0xff]   ;;  %v1301_v10 = vld [vmem:[%s1536_s23 + $0x8] sm:$0xff]   ;;  %v1304_v13 = vld [vmem:[%s1536_s23 + $0x90] sm:$0xff]  }
  0x13   : > { %1187 = vmatprep.mubr.bf16.mxu0 %v1299_v4  ;;  %1219 = vmatprep.mubr.bf16.mxu1 %v1300_v5  ;;  %v1298_v9 = vld [vmem:[%s1527_s19] sm:$0xff]   ;;  %v1302_v11 = vld [vmem:[%s1536_s23 + $0x88] sm:$0xff]   ;;  %v1305_v14 = vld [vmem:[%s1536_s23 + $0x18] sm:$0xff]  }
  0x14   : > { %v1306_v15 = vld [vmem:[%s1536_s23 + $0x98] sm:$0xff]   ;;  %v1307_v16 = vld [vmem:[%s1536_s23 + $0x20] sm:$0xff]   ;;  %v1309_v18 = vld [vmem:[%s1536_s23 + $0x28] sm:$0xff]  }
  0x15   : > { %1174 = vmatpush3.bf16.msra.mxu0 %v1292_v1  ;;  %1260 = vmatpush3.bf16.msra.mxu1 %v1292_v1  ;;  %v1308_v17 = vld [vmem:[%s1536_s23 + $0xa0] sm:$0xff]   ;;  %v1310_v19 = vld [vmem:[%s1536_s23 + $0xa8] sm:$0xff]   ;;  %v1311_v20 = vld [vmem:[%s1536_s23 + $0x30] sm:$0xff]  }
  0x16   : > { %1175 = vmatprep.subr.bf16.mxu0 %v1293_v2  ;;  %1253 = vmatprep.subr.bf16.mxu1 %v1293_v2  ;;  %v1312_v21 = vld [vmem:[%s1536_s23 + $0xb0] sm:$0xff]   ;;  %v1313_v22 = vld [vmem:[%s1536_s23 + $0x38] sm:$0xff]   ;;  %v1315_v24 = vld [vmem:[%s1536_s23 + $0x40] sm:$0xff]  }
  0x17   : > { %v1314_v23 = vld [vmem:[%s1536_s23 + $0xb8] sm:$0xff]   ;;  %v1316_v25 = vld [vmem:[%s1536_s23 + $0xc0] sm:$0xff]   ;;  %v1317_v26 = vld [vmem:[%s1536_s23 + $0x48] sm:$0xff]  }
  0x18   : > { %v1318_v27 = vld [vmem:[%s1536_s23 + $0xc8] sm:$0xff]   ;;  %v1319_v28 = vld [vmem:[%s1536_s23 + $0x50] sm:$0xff]   ;;  %v1321_v30 = vld [vmem:[%s1536_s23 + $0x58] sm:$0xff]  }
  0x19   : > { %1176 = vmatpush3.bf16.msra.mxu0 %v1293_v2  ;;  %1261 = vmatpush3.bf16.msra.mxu1 %v1293_v2  ;;  %v1320_v29 = vld [vmem:[%s1536_s23 + $0xd0] sm:$0xff]   ;;  %v1322_v31 = vld [vmem:[%s1536_s23 + $0xd8] sm:$0xff]   ;;  %v1323_v32 = vld [vmem:[%s1536_s23 + $0x60] sm:$0xff]  }
  0x1a   : > { %1177 = vmatprep.subr.bf16.mxu0 %v1294_v3  ;;  %1254 = vmatprep.subr.bf16.mxu1 %v1294_v3  ;;  %v1324_v33 = vld [vmem:[%s1536_s23 + $0xe0] sm:$0xff]   ;;  %v1325_v34 = vld [vmem:[%s1536_s23 + $0x68] sm:$0xff]   ;;  %v1327_v36 = vld [vmem:[%s1536_s23 + $0x70] sm:$0xff]  }
  0x1b   : > { %v1326_v35 = vld [vmem:[%s1536_s23 + $0xe8] sm:$0xff]   ;;  %v1328_v37 = vld [vmem:[%s1536_s23 + $0xf0] sm:$0xff]   ;;  %v1329_v38 = vld [vmem:[%s1536_s23 + $0x78] sm:$0xff]  }
  0x1c   : > { %v1330_v39 = vld [vmem:[%s1536_s23 + $0xf8] sm:$0xff]  }
  0x1d   : > { %1178 = vmatpush3.bf16.msra.mxu0 %v1294_v3  ;;  %1262 = vmatpush3.bf16.msra.mxu1 %v1294_v3 }
  0x1e   : > { %1179 = vmatprep.subr.bf16.mxu0 %v1295_v6  ;;  %1255 = vmatprep.subr.bf16.mxu1 %v1295_v6 }
  0x21   : > { %1180 = vmatpush3.bf16.msra.mxu0 %v1295_v6  ;;  %1263 = vmatpush3.bf16.msra.mxu1 %v1295_v6 }
  0x22   : > { %1181 = vmatprep.subr.bf16.mxu0 %v1296_v7  ;;  %1256 = vmatprep.subr.bf16.mxu1 %v1296_v7 }
  0x25   : > { %1182 = vmatpush3.bf16.msra.mxu0 %v1296_v7  ;;  %1264 = vmatpush3.bf16.msra.mxu1 %v1296_v7 }
  0x26   : > { %1183 = vmatprep.subr.bf16.mxu0 %v1297_v8  ;;  %1257 = vmatprep.subr.bf16.mxu1 %v1297_v8 }
  0x29   : > { %1184 = vmatpush3.bf16.msra.mxu0 %v1297_v8  ;;  %1265 = vmatpush3.bf16.msra.mxu1 %v1297_v8 }
  0x2a   : > { %1185 = vmatprep.subr.bf16.mxu0 %v1298_v9  ;;  %1258 = vmatprep.subr.bf16.mxu1 %v1298_v9 }
  0x2d   : > { %1186 = vmatpush3.bf16.msra.mxu0 %v1298_v9  ;;  %1266 = vmatpush3.bf16.msra.mxu1 %v1298_v9 }
  0x30   : > { %1188 = vmatmul.mubr.bf16.vlgmr.msra.gmra.mxu0 %v1301_v10  ;;  %1220 = vmatmul.mubr.bf16.vlgmr.msra.gmra.mxu1 %v1302_v11 }
  0x31   : > { %1191 = vmatprep.mubr.bf16.mxu0 %v1303_v12  ;;  %1223 = vmatprep.mubr.bf16.mxu1 %v1304_v13 }
  0x38   : > { %1192 = vmatmul.mubr.bf16.gmra.mxu0 %v1305_v14  ;;  %1224 = vmatmul.mubr.bf16.gmra.mxu1 %v1306_v15 }
  0x39   : > { %1195 = vmatprep.mubr.bf16.mxu0 %v1307_v16  ;;  %1227 = vmatprep.mubr.bf16.mxu1 %v1308_v17 }
  0x40   : > { %1196 = vmatmul.mubr.bf16.gmra.mxu0 %v1309_v18  ;;  %1228 = vmatmul.mubr.bf16.gmra.mxu1 %v1310_v19 }
  0x41   : > { %1199 = vmatprep.mubr.bf16.mxu0 %v1311_v20  ;;  %1231 = vmatprep.mubr.bf16.mxu1 %v1312_v21 }
  0x48   : > { %1200 = vmatmul.mubr.bf16.gmra.mxu0 %v1313_v22  ;;  %1232 = vmatmul.mubr.bf16.gmra.mxu1 %v1314_v23 }
  0x49   : > { %1203 = vmatprep.mubr.bf16.mxu0 %v1315_v24  ;;  %1235 = vmatprep.mubr.bf16.mxu1 %v1316_v25 }
  0x50   : > { %1204 = vmatmul.mubr.bf16.gmra.mxu0 %v1317_v26  ;;  %1236 = vmatmul.mubr.bf16.gmra.mxu1 %v1318_v27 }
  0x51   : > { %1207 = vmatprep.mubr.bf16.mxu0 %v1319_v28  ;;  %1239 = vmatprep.mubr.bf16.mxu1 %v1320_v29 }
  0x58   : > { %1208 = vmatmul.mubr.bf16.gmra.mxu0 %v1321_v30  ;;  %1240 = vmatmul.mubr.bf16.gmra.mxu1 %v1322_v31 }
  0x59   : > { %1211 = vmatprep.mubr.bf16.mxu0 %v1323_v32  ;;  %1243 = vmatprep.mubr.bf16.mxu1 %v1324_v33 }
  0x60   : > { %1212 = vmatmul.mubr.bf16.gmra.mxu0 %v1325_v34  ;;  %1244 = vmatmul.mubr.bf16.gmra.mxu1 %v1326_v35 }
  0x61   : > { %1215 = vmatprep.mubr.bf16.mxu0 %v1327_v36  ;;  %1247 = vmatprep.mubr.bf16.mxu1 %v1328_v37 }
  0x68   : > { %1216 = vmatmul.mubr.bf16.gmra.mxu0 %v1329_v38  ;;  %1248 = vmatmul.mubr.bf16.gmra.mxu1 %v1330_v39 }
  0xf0   : > { %v1189_v41 = vpop.f32.mrf.mxu0  ;;  %v1221_v42 = vpop.f32.mrf.mxu1 }
  0xf1   : > { %v601_v43 = vadd.f32 %v1189_v41, %v1578_v40  ;;  %v729_v44 = vadd.f32 %v1221_v42, %v1578_v40 }
  0xf2   : > { %v592_v45 = vpop.f32.mrf.mxu0  ;;  %v720_v46 = vpop.f32.mrf.mxu1 }
  0xf3   : > { %1331 = vtanh.f32 %v601_v43  ;;  %v593_v47 = vadd.f32 %v1578_v40, %v592_v45  ;;  %v721_v48 = vadd.f32 %v1578_v40, %v720_v46 }
  0xf4   : > { %1333 = vtanh.f32 %v729_v44  ;;  %v1190_v49 = vpop.f32.mrf.mxu0  ;;  %v1222_v50 = vpop.f32.mrf.mxu1 }
  0xf5   : > { %1335 = vtanh.f32 %v593_v47  ;;  %v604_v51 = vadd.f32 %v1190_v49, %v1578_v40  ;;  %v732_v52 = vadd.f32 %v1222_v50, %v1578_v40 }
  0xf6   : > { %1337 = vtanh.f32 %v721_v48  ;;  %v595_v53 = vpop.f32.mrf.mxu0  ;;  %v723_v54 = vpop.f32.mrf.mxu1 }
  0xf7   : > { %1339 = vtanh.f32 %v604_v51  ;;  %v596_v55 = vadd.f32 %v1578_v40, %v595_v53  ;;  %v724_v56 = vadd.f32 %v1578_v40, %v723_v54 }
  0xf8   : > { %1341 = vtanh.f32 %v732_v52  ;;  %v1193_v57 = vpop.f32.mrf.mxu0  ;;  %v1225_v58 = vpop.f32.mrf.mxu1 }
  0xf9   : > { %1343 = vtanh.f32 %v596_v55  ;;  %v617_v59 = vadd.f32 %v1193_v57, %v1578_v40  ;;  %v745_v60 = vadd.f32 %v1225_v58, %v1578_v40 }
  0xfa   : > { %1345 = vtanh.f32 %v724_v56  ;;  %v608_v61 = vpop.f32.mrf.mxu0  ;;  %v736_v62 = vpop.f32.mrf.mxu1 }
  0xfb   : > { %1347 = vtanh.f32 %v617_v59  ;;  %v609_v63 = vadd.f32 %v1578_v40, %v608_v61  ;;  %v737_v0 = vadd.f32 %v1578_v40, %v736_v62 }
  0xfc   : > { %1349 = vtanh.f32 %v745_v60  ;;  %v1194_v1 = vpop.f32.mrf.mxu0  ;;  %v1226_v2 = vpop.f32.mrf.mxu1 }
  0xfd   : > { %1351 = vtanh.f32 %v609_v63  ;;  %v620_v3 = vadd.f32 %v1194_v1, %v1578_v40  ;;  %v748_v4 = vadd.f32 %v1226_v2, %v1578_v40 }
  0xfe   : > { %1353 = vtanh.f32 %v737_v0  ;;  %v611_v5 = vpop.f32.mrf.mxu0  ;;  %v739_v6 = vpop.f32.mrf.mxu1 }
  0xff   : > { %1355 = vtanh.f32 %v620_v3  ;;  %v612_v7 = vadd.f32 %v1578_v40, %v611_v5  ;;  %v740_v8 = vadd.f32 %v1578_v40, %v739_v6 }
 0x100   : > { %v1332_v9 = vpop.eup %1331  ;;  %1357 = vtanh.f32 %v748_v4  ;;  %v1197_v10 = vpop.f32.mrf.mxu0 }
 0x101   : > { %v1229_v11 = vpop.f32.mrf.mxu1  ;;  %v1334_v12 = vpop.eup %1333  ;;  %913 = vst [vmem:[%s1598_s29 + $0x10] sm:$0xff] %v1332_v9  ;;  %1359 = vtanh.f32 %v612_v7  ;;  %v633_v13 = vadd.f32 %v1197_v10, %v1578_v40 }
 0x102   : > { %v761_v14 = vadd.f32 %v1229_v11, %v1578_v40  ;;  %v1336_v15 = vpop.eup %1335  ;;  %945 = vst [vmem:[%s1598_s29 + $0x110] sm:$0xff] %v1334_v12  ;;  %1361 = vtanh.f32 %v740_v8  ;;  %v624_v16 = vpop.f32.mrf.mxu0 }
 0x103   : > { %v752_v17 = vpop.f32.mrf.mxu1  ;;  %v1338_v18 = vpop.eup %1337  ;;  %911 = vst [vmem:[%s1598_s29] sm:$0xff] %v1336_v15  ;;  %1363 = vtanh.f32 %v633_v13  ;;  %v625_v19 = vadd.f32 %v1578_v40, %v624_v16 }
 0x104   : > { %v753_v20 = vadd.f32 %v1578_v40, %v752_v17  ;;  %v1340_v21 = vpop.eup %1339  ;;  %943 = vst [vmem:[%s1598_s29 + $0x100] sm:$0xff] %v1338_v18  ;;  %1365 = vtanh.f32 %v761_v14  ;;  %v1198_v22 = vpop.f32.mrf.mxu0 }
 0x105   : > { %v1230_v23 = vpop.f32.mrf.mxu1  ;;  %v1342_v24 = vpop.eup %1341  ;;  %914 = vst [vmem:[%s1598_s29 + $0x18] sm:$0xff] %v1340_v21  ;;  %1367 = vtanh.f32 %v625_v19  ;;  %v636_v25 = vadd.f32 %v1198_v22, %v1578_v40 }
 0x106   : > { %v764_v26 = vadd.f32 %v1230_v23, %v1578_v40  ;;  %v1344_v27 = vpop.eup %1343  ;;  %946 = vst [vmem:[%s1598_s29 + $0x118] sm:$0xff] %v1342_v24  ;;  %1369 = vtanh.f32 %v753_v20  ;;  %v627_v28 = vpop.f32.mrf.mxu0 }
 0x107   : > { %v755_v29 = vpop.f32.mrf.mxu1  ;;  %v1346_v30 = vpop.eup %1345  ;;  %912 = vst [vmem:[%s1598_s29 + $0x8] sm:$0xff] %v1344_v27  ;;  %1371 = vtanh.f32 %v636_v25  ;;  %v628_v31 = vadd.f32 %v1578_v40, %v627_v28 }
 0x108   : > { %v756_v32 = vadd.f32 %v1578_v40, %v755_v29  ;;  %v1348_v33 = vpop.eup %1347  ;;  %944 = vst [vmem:[%s1598_s29 + $0x108] sm:$0xff] %v1346_v30  ;;  %1373 = vtanh.f32 %v764_v26  ;;  %v1201_v34 = vpop.f32.mrf.mxu0 }
 0x109   : > { %v1233_v35 = vpop.f32.mrf.mxu1  ;;  %v1350_v36 = vpop.eup %1349  ;;  %917 = vst [vmem:[%s1598_s29 + $0x30] sm:$0xff] %v1348_v33  ;;  %1375 = vtanh.f32 %v628_v31  ;;  %v649_v37 = vadd.f32 %v1201_v34, %v1578_v40 }
 0x10a   : > { %v777_v38 = vadd.f32 %v1233_v35, %v1578_v40  ;;  %v1352_v39 = vpop.eup %1351  ;;  %949 = vst [vmem:[%s1598_s29 + $0x130] sm:$0xff] %v1350_v36  ;;  %1377 = vtanh.f32 %v756_v32  ;;  %v640_v41 = vpop.f32.mrf.mxu0 }
 0x10b   : > { %v768_v42 = vpop.f32.mrf.mxu1  ;;  %v1354_v43 = vpop.eup %1353  ;;  %915 = vst [vmem:[%s1598_s29 + $0x20] sm:$0xff] %v1352_v39  ;;  %1379 = vtanh.f32 %v649_v37  ;;  %v641_v44 = vadd.f32 %v1578_v40, %v640_v41 }
 0x10c   : > { %v769_v45 = vadd.f32 %v1578_v40, %v768_v42  ;;  %v1356_v46 = vpop.eup %1355  ;;  %947 = vst [vmem:[%s1598_s29 + $0x120] sm:$0xff] %v1354_v43  ;;  %1381 = vtanh.f32 %v777_v38  ;;  %v1202_v47 = vpop.f32.mrf.mxu0 }
 0x10d   : > { %v1234_v48 = vpop.f32.mrf.mxu1  ;;  %v1358_v49 = vpop.eup %1357  ;;  %918 = vst [vmem:[%s1598_s29 + $0x38] sm:$0xff] %v1356_v46  ;;  %1383 = vtanh.f32 %v641_v44  ;;  %v652_v50 = vadd.f32 %v1202_v47, %v1578_v40 }
 0x10e   : > { %v780_v51 = vadd.f32 %v1234_v48, %v1578_v40  ;;  %v1360_v52 = vpop.eup %1359  ;;  %950 = vst [vmem:[%s1598_s29 + $0x138] sm:$0xff] %v1358_v49  ;;  %1385 = vtanh.f32 %v769_v45  ;;  %v643_v53 = vpop.f32.mrf.mxu0 }
 0x10f   : > { %v771_v54 = vpop.f32.mrf.mxu1  ;;  %v1362_v55 = vpop.eup %1361  ;;  %916 = vst [vmem:[%s1598_s29 + $0x28] sm:$0xff] %v1360_v52  ;;  %1387 = vtanh.f32 %v652_v50  ;;  %v644_v56 = vadd.f32 %v1578_v40, %v643_v53 }
 0x110   : > { %v772_v57 = vadd.f32 %v1578_v40, %v771_v54  ;;  %v1364_v58 = vpop.eup %1363  ;;  %948 = vst [vmem:[%s1598_s29 + $0x128] sm:$0xff] %v1362_v55  ;;  %1389 = vtanh.f32 %v780_v51  ;;  %v1205_v59 = vpop.f32.mrf.mxu0 }
 0x111   : > { %v1237_v60 = vpop.f32.mrf.mxu1  ;;  %v1366_v61 = vpop.eup %1365  ;;  %921 = vst [vmem:[%s1598_s29 + $0x50] sm:$0xff] %v1364_v58  ;;  %1391 = vtanh.f32 %v644_v56  ;;  %v665_v62 = vadd.f32 %v1205_v59, %v1578_v40 }
 0x112   : > { %v793_v63 = vadd.f32 %v1237_v60, %v1578_v40  ;;  %v1368_v0 = vpop.eup %1367  ;;  %953 = vst [vmem:[%s1598_s29 + $0x150] sm:$0xff] %v1366_v61  ;;  %1393 = vtanh.f32 %v772_v57  ;;  %v656_v1 = vpop.f32.mrf.mxu0 }
 0x113   : > { %v784_v2 = vpop.f32.mrf.mxu1  ;;  %v1370_v3 = vpop.eup %1369  ;;  %919 = vst [vmem:[%s1598_s29 + $0x40] sm:$0xff] %v1368_v0  ;;  %1395 = vtanh.f32 %v665_v62  ;;  %v657_v4 = vadd.f32 %v1578_v40, %v656_v1 }
 0x114   : > { %v785_v5 = vadd.f32 %v1578_v40, %v784_v2  ;;  %v1372_v6 = vpop.eup %1371  ;;  %951 = vst [vmem:[%s1598_s29 + $0x140] sm:$0xff] %v1370_v3  ;;  %1397 = vtanh.f32 %v793_v63  ;;  %v1206_v7 = vpop.f32.mrf.mxu0 }
 0x115   : > { %v1238_v8 = vpop.f32.mrf.mxu1  ;;  %v1374_v9 = vpop.eup %1373  ;;  %922 = vst [vmem:[%s1598_s29 + $0x58] sm:$0xff] %v1372_v6  ;;  %1399 = vtanh.f32 %v657_v4  ;;  %v668_v10 = vadd.f32 %v1206_v7, %v1578_v40 }
 0x116   : > { %v796_v11 = vadd.f32 %v1238_v8, %v1578_v40  ;;  %v1376_v12 = vpop.eup %1375  ;;  %954 = vst [vmem:[%s1598_s29 + $0x158] sm:$0xff] %v1374_v9  ;;  %1401 = vtanh.f32 %v785_v5  ;;  %v659_v13 = vpop.f32.mrf.mxu0 }
 0x117   : > { %v787_v14 = vpop.f32.mrf.mxu1  ;;  %v1378_v15 = vpop.eup %1377  ;;  %920 = vst [vmem:[%s1598_s29 + $0x48] sm:$0xff] %v1376_v12  ;;  %1403 = vtanh.f32 %v668_v10  ;;  %v660_v16 = vadd.f32 %v1578_v40, %v659_v13 }
 0x118   : > { %v788_v17 = vadd.f32 %v1578_v40, %v787_v14  ;;  %v1380_v18 = vpop.eup %1379  ;;  %952 = vst [vmem:[%s1598_s29 + $0x148] sm:$0xff] %v1378_v15  ;;  %1405 = vtanh.f32 %v796_v11  ;;  %v1209_v19 = vpop.f32.mrf.mxu0 }
 0x119   : > { %v1241_v20 = vpop.f32.mrf.mxu1  ;;  %v1382_v21 = vpop.eup %1381  ;;  %925 = vst [vmem:[%s1598_s29 + $0x70] sm:$0xff] %v1380_v18  ;;  %1407 = vtanh.f32 %v660_v16  ;;  %v681_v22 = vadd.f32 %v1209_v19, %v1578_v40 }
 0x11a   : > { %v809_v23 = vadd.f32 %v1241_v20, %v1578_v40  ;;  %v1384_v24 = vpop.eup %1383  ;;  %957 = vst [vmem:[%s1598_s29 + $0x170] sm:$0xff] %v1382_v21  ;;  %1409 = vtanh.f32 %v788_v17  ;;  %v672_v25 = vpop.f32.mrf.mxu0 }
 0x11b   : > { %v800_v26 = vpop.f32.mrf.mxu1  ;;  %v1386_v27 = vpop.eup %1385  ;;  %923 = vst [vmem:[%s1598_s29 + $0x60] sm:$0xff] %v1384_v24  ;;  %1411 = vtanh.f32 %v681_v22  ;;  %v673_v28 = vadd.f32 %v1578_v40, %v672_v25 }
 0x11c   : > { %v801_v29 = vadd.f32 %v1578_v40, %v800_v26  ;;  %v1388_v30 = vpop.eup %1387  ;;  %955 = vst [vmem:[%s1598_s29 + $0x160] sm:$0xff] %v1386_v27  ;;  %1413 = vtanh.f32 %v809_v23  ;;  %v1210_v31 = vpop.f32.mrf.mxu0 }
 0x11d   : > { %v1242_v32 = vpop.f32.mrf.mxu1  ;;  %v1390_v33 = vpop.eup %1389  ;;  %926 = vst [vmem:[%s1598_s29 + $0x78] sm:$0xff] %v1388_v30  ;;  %1415 = vtanh.f32 %v673_v28  ;;  %v684_v34 = vadd.f32 %v1210_v31, %v1578_v40 }
 0x11e   : > { %v812_v35 = vadd.f32 %v1242_v32, %v1578_v40  ;;  %v1392_v36 = vpop.eup %1391  ;;  %958 = vst [vmem:[%s1598_s29 + $0x178] sm:$0xff] %v1390_v33  ;;  %1417 = vtanh.f32 %v801_v29  ;;  %v675_v37 = vpop.f32.mrf.mxu0 }
 0x11f   : > { %v803_v38 = vpop.f32.mrf.mxu1  ;;  %v1394_v39 = vpop.eup %1393  ;;  %924 = vst [vmem:[%s1598_s29 + $0x68] sm:$0xff] %v1392_v36  ;;  %1419 = vtanh.f32 %v684_v34  ;;  %v676_v41 = vadd.f32 %v1578_v40, %v675_v37 }
 0x120   : > { %v804_v42 = vadd.f32 %v1578_v40, %v803_v38  ;;  %v1396_v43 = vpop.eup %1395  ;;  %956 = vst [vmem:[%s1598_s29 + $0x168] sm:$0xff] %v1394_v39  ;;  %1421 = vtanh.f32 %v812_v35  ;;  %v1213_v44 = vpop.f32.mrf.mxu0 }
 0x121   : > { %v1245_v45 = vpop.f32.mrf.mxu1  ;;  %v1398_v46 = vpop.eup %1397  ;;  %929 = vst [vmem:[%s1598_s29 + $0x90] sm:$0xff] %v1396_v43  ;;  %1423 = vtanh.f32 %v676_v41  ;;  %v697_v47 = vadd.f32 %v1213_v44, %v1578_v40 }
 0x122   : > { %v825_v48 = vadd.f32 %v1245_v45, %v1578_v40  ;;  %v1400_v49 = vpop.eup %1399  ;;  %961 = vst [vmem:[%s1598_s29 + $0x190] sm:$0xff] %v1398_v46  ;;  %1425 = vtanh.f32 %v804_v42  ;;  %v688_v50 = vpop.f32.mrf.mxu0 }
 0x123   : > { %v816_v51 = vpop.f32.mrf.mxu1  ;;  %v1402_v52 = vpop.eup %1401  ;;  %927 = vst [vmem:[%s1598_s29 + $0x80] sm:$0xff] %v1400_v49  ;;  %1427 = vtanh.f32 %v697_v47  ;;  %v689_v53 = vadd.f32 %v1578_v40, %v688_v50 }
 0x124   : > { %v817_v54 = vadd.f32 %v1578_v40, %v816_v51  ;;  %v1404_v55 = vpop.eup %1403  ;;  %959 = vst [vmem:[%s1598_s29 + $0x180] sm:$0xff] %v1402_v52  ;;  %1429 = vtanh.f32 %v825_v48  ;;  %v1214_v56 = vpop.f32.mrf.mxu0 }
 0x125   : > { %v1246_v57 = vpop.f32.mrf.mxu1  ;;  %v1406_v58 = vpop.eup %1405  ;;  %930 = vst [vmem:[%s1598_s29 + $0x98] sm:$0xff] %v1404_v55  ;;  %1431 = vtanh.f32 %v689_v53  ;;  %v700_v59 = vadd.f32 %v1214_v56, %v1578_v40 }
 0x126   : > { %v828_v60 = vadd.f32 %v1246_v57, %v1578_v40  ;;  %v1408_v61 = vpop.eup %1407  ;;  %962 = vst [vmem:[%s1598_s29 + $0x198] sm:$0xff] %v1406_v58  ;;  %1433 = vtanh.f32 %v817_v54  ;;  %v691_v62 = vpop.f32.mrf.mxu0 }
 0x127   : > { %v819_v63 = vpop.f32.mrf.mxu1  ;;  %v1410_v0 = vpop.eup %1409  ;;  %928 = vst [vmem:[%s1598_s29 + $0x88] sm:$0xff] %v1408_v61  ;;  %1435 = vtanh.f32 %v700_v59  ;;  %v692_v1 = vadd.f32 %v1578_v40, %v691_v62 }
 0x128   : > { %v820_v2 = vadd.f32 %v1578_v40, %v819_v63  ;;  %v1412_v3 = vpop.eup %1411  ;;  %960 = vst [vmem:[%s1598_s29 + $0x188] sm:$0xff] %v1410_v0  ;;  %1437 = vtanh.f32 %v828_v60  ;;  %v1217_v4 = vpop.f32.mrf.mxu0 }
 0x129   : > { %v1249_v5 = vpop.f32.mrf.mxu1  ;;  %v1414_v6 = vpop.eup %1413  ;;  %933 = vst [vmem:[%s1598_s29 + $0xb0] sm:$0xff] %v1412_v3  ;;  %1439 = vtanh.f32 %v692_v1  ;;  %v713_v7 = vadd.f32 %v1217_v4, %v1578_v40 }
 0x12a   : > { %v841_v8 = vadd.f32 %v1249_v5, %v1578_v40  ;;  %v1416_v9 = vpop.eup %1415  ;;  %965 = vst [vmem:[%s1598_s29 + $0x1b0] sm:$0xff] %v1414_v6  ;;  %1441 = vtanh.f32 %v820_v2  ;;  %v704_v10 = vpop.f32.mrf.mxu0 }
 0x12b   : > { %v832_v11 = vpop.f32.mrf.mxu1  ;;  %v1418_v12 = vpop.eup %1417  ;;  %931 = vst [vmem:[%s1598_s29 + $0xa0] sm:$0xff] %v1416_v9  ;;  %1443 = vtanh.f32 %v713_v7  ;;  %v705_v13 = vadd.f32 %v1578_v40, %v704_v10 }
 0x12c   : > { %v833_v14 = vadd.f32 %v1578_v40, %v832_v11  ;;  %v1420_v15 = vpop.eup %1419  ;;  %963 = vst [vmem:[%s1598_s29 + $0x1a0] sm:$0xff] %v1418_v12  ;;  %1445 = vtanh.f32 %v841_v8  ;;  %v1218_v16 = vpop.f32.mrf.mxu0 }
 0x12d   : > { %v1250_v17 = vpop.f32.mrf.mxu1  ;;  %v1422_v18 = vpop.eup %1421  ;;  %934 = vst [vmem:[%s1598_s29 + $0xb8] sm:$0xff] %v1420_v15  ;;  %1447 = vtanh.f32 %v705_v13  ;;  %v716_v19 = vadd.f32 %v1218_v16, %v1578_v40 }
 0x12e   : > { %v844_v20 = vadd.f32 %v1250_v17, %v1578_v40  ;;  %v1424_v21 = vpop.eup %1423  ;;  %966 = vst [vmem:[%s1598_s29 + $0x1b8] sm:$0xff] %v1422_v18  ;;  %1449 = vtanh.f32 %v833_v14  ;;  %v707_v22 = vpop.f32.mrf.mxu0 }
 0x12f   : > { %v835_v23 = vpop.f32.mrf.mxu1  ;;  %v1426_v24 = vpop.eup %1425  ;;  %932 = vst [vmem:[%s1598_s29 + $0xa8] sm:$0xff] %v1424_v21  ;;  %1451 = vtanh.f32 %v716_v19  ;;  %v708_v25 = vadd.f32 %v1578_v40, %v707_v22 }
 0x130   : > { %v836_v26 = vadd.f32 %v1578_v40, %v835_v23  ;;  %v1428_v27 = vpop.eup %1427  ;;  %964 = vst [vmem:[%s1598_s29 + $0x1a8] sm:$0xff] %v1426_v24  ;;  %1453 = vtanh.f32 %v844_v20 }
 0x131   : > { %v1430_v28 = vpop.eup %1429  ;;  %937 = vst [vmem:[%s1598_s29 + $0xd0] sm:$0xff] %v1428_v27  ;;  %1455 = vtanh.f32 %v708_v25 }
 0x132   : > { %v1432_v29 = vpop.eup %1431  ;;  %969 = vst [vmem:[%s1598_s29 + $0x1d0] sm:$0xff] %v1430_v28  ;;  %1457 = vtanh.f32 %v836_v26 }
 0x133   : > { %v1434_v30 = vpop.eup %1433  ;;  %935 = vst [vmem:[%s1598_s29 + $0xc0] sm:$0xff] %v1432_v29 }
 0x134   : > { %v1436_v31 = vpop.eup %1435  ;;  %967 = vst [vmem:[%s1598_s29 + $0x1c0] sm:$0xff] %v1434_v30 }
 0x135   : > { %v1438_v40 = vpop.eup %1437  ;;  %938 = vst [vmem:[%s1598_s29 + $0xd8] sm:$0xff] %v1436_v31 }
 0x136   : > { %v1440_v32 = vpop.eup %1439  ;;  %970 = vst [vmem:[%s1598_s29 + $0x1d8] sm:$0xff] %v1438_v40 }
 0x137   : > { %v1442_v33 = vpop.eup %1441  ;;  %936 = vst [vmem:[%s1598_s29 + $0xc8] sm:$0xff] %v1440_v32 }
 0x138   : > { %v1444_v34 = vpop.eup %1443  ;;  %968 = vst [vmem:[%s1598_s29 + $0x1c8] sm:$0xff] %v1442_v33 }
 0x139   : > { %v1446_v35 = vpop.eup %1445  ;;  %941 = vst [vmem:[%s1598_s29 + $0xf0] sm:$0xff] %v1444_v34 }
 0x13a   : > { %v1448_v36 = vpop.eup %1447  ;;  %973 = vst [vmem:[%s1598_s29 + $0x1f0] sm:$0xff] %v1446_v35 }
 0x13b   : > { %v1450_v37 = vpop.eup %1449  ;;  %939 = vst [vmem:[%s1598_s29 + $0xe0] sm:$0xff] %v1448_v36 }
 0x13c   : > { %v1452_v38 = vpop.eup %1451  ;;  %971 = vst [vmem:[%s1598_s29 + $0x1e0] sm:$0xff] %v1450_v37 }
 0x13d   : > { %v1454_v39 = vpop.eup %1453  ;;  %942 = vst [vmem:[%s1598_s29 + $0xf8] sm:$0xff] %v1452_v38 }
 0x13e   : > { %v1456_v41 = vpop.eup %1455  ;;  %974 = vst [vmem:[%s1598_s29 + $0x1f8] sm:$0xff] %v1454_v39 }
 0x13f   : > { %v1458_v42 = vpop.eup %1457  ;;  %940 = vst [vmem:[%s1598_s29 + $0xe8] sm:$0xff] %v1456_v41 }
 0x140   : > { %972 = vst [vmem:[%s1598_s29 + $0x1e8] sm:$0xff] %v1458_v42 }
 0x141 PF: > { %s13_s14 = sadd.s32 1, %s1481_s14   ;;  %s1727_s12 = smov %s1477_s13 }
 0x142   : > { %p10_p5 = scmp.ge.s32.totalorder %s13_s14, 6   ;;  %s1728_s13 = smov %s1730_s15 }
 0x144   :  { %12 = sbr.rel (!%p10_p5) target bundleno = 2 (0x2), region = 65 }

</bundles_post_ra>
